<compile_context>
chip_gen: v6e
topology: v6e:2x2x1
jax: 0.10.0
libtpu: 0.0.40
codegen_flags: <defaults>
</compile_context>

<pallas_src>
import functools

import jax
import jax.numpy as jnp
from jax.experimental import pallas as pl
from jax.experimental.pallas import tpu as pltpu


# ---------------------------------------------------------------------------
# Fused Pallas kernel: grouped tiled matmul + bias + activation + BN partials
# ---------------------------------------------------------------------------
def _activate(x, act):
    if act == "leaky":
        return jnp.where(x >= 0, x, 0.2 * x)
    if act == "relu":
        return jnp.maximum(x, 0.0)
    if act == "tanh":
        return jnp.tanh(x)
    return x


def _fused_mm_kernel(x_ref, w_ref, b_ref, y_ref, st_ref, acc_ref, *, out_act):
    k = pl.program_id(2)

    @pl.when(k == 0)
    def _():
        acc_ref[...] = jnp.zeros_like(acc_ref)

    acc_ref[...] += jnp.dot(x_ref[0], w_ref[0],
                            preferred_element_type=jnp.float32)

    @pl.when(k == pl.num_programs(2) - 1)
    def _():
        y = acc_ref[...] + b_ref[...]                     # (TM, OC) + (1, OC)
        # One-pass per-channel partial sums for BatchNorm (reduced in glue).
        s1 = jnp.sum(y, axis=0, keepdims=True)            # (1, OC)
        s2 = jnp.sum(y * y, axis=0, keepdims=True)        # (1, OC)
        st_ref[...] = jnp.concatenate([s1, s2], axis=0)[None, None]
        y_ref[...] = _activate(y, out_act).astype(y_ref.dtype)[None]


def _pick_tile(dim, candidates):
    for c in candidates:
        if dim % c == 0:
            return c
    return dim


def fused_matmul(x, w, b, *, out_act, out_dtype):
    """x: (G, M, K) bf16, w: (G, K, OC) bf16, b: (OC,) f32.

    Returns:
      y:     (G, M, OC) out_dtype  = act(x @ w + b)
      stats: (G, n_m_tiles, 2, OC) f32 per-tile [sum, sum_sq] of (x @ w + b)
    """
    G, M, K = x.shape
    OC = w.shape[2]
    TM = _pick_tile(M, (512, 256, 128, 64, 32, 16, 8))
    TK = _pick_tile(K, (2048, 1024, 512, 256, 128))
    nm, nk = M // TM, K // TK
    b2 = b.reshape(1, OC).astype(jnp.float32)

    kern = functools.partial(_fused_mm_kernel, out_act=out_act)
    y, stats = pl.pallas_call(
        kern,
        grid=(G, nm, nk),
        in_specs=[
            pl.BlockSpec((1, TM, TK), lambda g, i, k: (g, i, k)),
            pl.BlockSpec((1, TK, OC), lambda g, i, k: (g, k, 0)),
            pl.BlockSpec((1, OC), lambda g, i, k: (0, 0)),
        ],
        out_specs=[
            pl.BlockSpec((1, TM, OC), lambda g, i, k: (g, i, 0)),
            pl.BlockSpec((1, 1, 2, OC), lambda g, i, k: (g, i, 0, 0)),
        ],
        out_shape=[
            jax.ShapeDtypeStruct((G, M, OC), out_dtype),
            jax.ShapeDtypeStruct((G, nm, 2, OC), jnp.float32),
        ],
        scratch_shapes=[pltpu.VMEM((TM, OC), jnp.float32)],
        compiler_params=pltpu.CompilerParams(
            dimension_semantics=("parallel", "parallel", "arbitrary")),
    )(x, w, b2)
    return y, stats


# ---------------------------------------------------------------------------
# Lazy-affine activation carrier: value = raw * scale + shift (per channel)
# ---------------------------------------------------------------------------
def lazy(raw):
    C = raw.shape[-1]
    return (raw, jnp.ones((C,), jnp.float32), jnp.zeros((C,), jnp.float32))


def lazy_concat(a, b):
    return (jnp.concatenate([a[0], b[0]], axis=-1),
            jnp.concatenate([a[1], b[1]], axis=0),
            jnp.concatenate([a[2], b[2]], axis=0))


def resolve(act_t, act_fn):
    """Apply the pending BN affine + pre-conv activation; cast to bf16.
    XLA fuses this into the patch-gather copy that follows (no extra HBM pass)."""
    raw, scale, shift = act_t
    v = raw.astype(jnp.float32) * scale + shift
    return _activate(v, act_fn).astype(jnp.bfloat16)


def bn_scale_shift(stats, count, gamma, beta, eps=1e-5):
    """Training-mode BatchNorm2d affine from the kernel's partial sums."""
    s = jnp.sum(stats, axis=(0, 1))                      # (2, OC)
    mean = s[0] / count
    var = jnp.maximum(s[1] / count - mean * mean, 0.0)
    scale = gamma * jax.lax.rsqrt(var + eps)
    shift = beta - mean * scale
    return scale, shift


# ---------------------------------------------------------------------------
# Conv layers (JAX glue -> fused Pallas matmul kernel)
# ---------------------------------------------------------------------------
def conv4x4_s2(act_in, in_act, w_oihw, b):
    """nn.Conv2d(k=4, s=2, p=1).  PyTorch weight layout (OutC, InC, 4, 4)."""
    x = resolve(act_in, in_act)                          # (N, H, W, C) bf16
    N, H, W, C = x.shape
    OC = w_oihw.shape[0]
    OH, OW = H // 2, W // 2
    xp = jnp.pad(x, ((0, 0), (1, 1), (1, 1), (0, 0)))
    taps = [xp[:, ky:ky + 2 * OH:2, kx:kx + 2 * OW:2, :]
            for ky in range(4) for kx in range(4)]
    # TODO(synk): the (M, 16C) tap matrix is still materialized (in bf16) by XLA;
    # moving the tap gather into the kernel (shifted-window index_maps) would
    # remove this last im2col round trip.
    pat = jnp.stack(taps, axis=3).reshape(1, N * OH * OW, 16 * C)
    wmat = jnp.transpose(w_oihw, (2, 3, 1, 0)).reshape(1, 16 * C, OC)
    y, stats = fused_matmul(pat, wmat.astype(jnp.bfloat16), b,
                            out_act="none", out_dtype=jnp.bfloat16)
    return y.reshape(N, OH, OW, OC), stats


def convT4x4_s2(act_in, in_act, w_iohw, b, out_act, out_dtype):
    """nn.ConvTranspose2d(k=4, s=2, p=1), phase-decomposed: each of the 4 output
    pixel phases is a 2x2-tap stride-1 conv on the (un-dilated) input."""
    x = resolve(act_in, in_act)                          # (N, H, W, C) bf16
    N, H, W, C = x.shape
    OC = w_iohw.shape[1]
    xp = jnp.pad(x, ((0, 0), (1, 1), (1, 1), (0, 0)))
    pats, wms = [], []
    for py in range(2):
        for px in range(2):
            taps = [xp[:, py + dy:py + dy + H, px + dx:px + dx + W, :]
                    for dy in range(2) for dx in range(2)]
            pats.append(jnp.stack(taps, axis=3).reshape(N * H * W, 4 * C))
            wtap = [w_iohw[:, :, 3 - py - 2 * dy, 3 - px - 2 * dx]
                    for dy in range(2) for dx in range(2)]
            wms.append(jnp.stack(wtap, axis=0).reshape(4 * C, OC))
    pat = jnp.stack(pats, axis=0)                        # (4, M, 4C)
    wmat = jnp.stack(wms, axis=0).astype(jnp.bfloat16)   # (4, 4C, OC)
    y, stats = fused_matmul(pat, wmat, b, out_act=out_act, out_dtype=out_dtype)
    # Interleave phases: (py, px, N, H, W, OC) -> (N, 2H, 2W, OC)
    y = y.reshape(2, 2, N, H, W, OC).transpose(2, 3, 0, 4, 1, 5)
    return y.reshape(N, 2 * H, 2 * W, OC), stats


# ---------------------------------------------------------------------------
# U-Net construction (mirrors UnetGenerator.__init__) and forward
# ---------------------------------------------------------------------------
def init_block_params(key, outer_nc, inner_nc, kind):
    ks = jax.random.split(key, 8)
    p = {}
    p["down_w"] = 0.05 * jax.random.normal(ks[0], (inner_nc, outer_nc, 4, 4), jnp.float32)
    p["down_b"] = 0.01 * jax.random.normal(ks[1], (inner_nc,), jnp.float32)
    up_in = inner_nc if kind == "innermost" else inner_nc * 2
    p["up_w"] = 0.05 * jax.random.normal(ks[2], (up_in, outer_nc, 4, 4), jnp.float32)
    p["up_b"] = 0.01 * jax.random.normal(ks[3], (outer_nc,), jnp.float32)
    if kind == "middle":
        p["dn_gamma"] = 1.0 + 0.01 * jax.random.normal(ks[4], (inner_nc,), jnp.float32)
        p["dn_beta"] = 0.01 * jax.random.normal(ks[5], (inner_nc,), jnp.float32)
    if kind != "outermost":
        p["up_gamma"] = 1.0 + 0.01 * jax.random.normal(ks[6], (outer_nc,), jnp.float32)
        p["up_beta"] = 0.01 * jax.random.normal(ks[7], (outer_nc,), jnp.float32)
    return p


def build_unet_params(key, input_nc, output_nc, num_downs, ngf):
    assert input_nc == output_nc
    # blocks listed innermost -> outermost, exactly as in UnetGenerator.__init__
    specs = [(ngf * 8, ngf * 8, "innermost")]
    for _ in range(num_downs - 5):
        specs.append((ngf * 8, ngf * 8, "middle"))       # use_dropout=False (default)
    specs.append((ngf * 4, ngf * 8, "middle"))
    specs.append((ngf * 2, ngf * 4, "middle"))
    specs.append((ngf, ngf * 2, "middle"))
    specs.append((output_nc, ngf, "outermost"))
    keys = jax.random.split(key, len(specs))
    kinds = tuple(k for (_, _, k) in specs)
    params = [init_block_params(kk, o, i, k) for (o, i, k), kk in zip(specs, keys)]
    return kinds, params


@functools.partial(jax.jit, static_argnums=(0,))
def unet_forward(kinds, params, x_nchw):
    x_nhwc = jnp.transpose(x_nchw, (0, 2, 3, 1))

    def n_elems(raw):
        return float(raw.shape[0] * raw.shape[1] * raw.shape[2])

    def run_block(idx, act_in):
        kind, p = kinds[idx], params[idx]
        if kind == "outermost":
            # down = [downconv]; up = [relu, upconv, tanh]; no skip concat
            raw_d, _ = conv4x4_s2(act_in, "none", p["down_w"], p["down_b"])
            sub = run_block(idx - 1, lazy(raw_d))
            y, _ = convT4x4_s2(sub, "relu", p["up_w"], p["up_b"],
                               out_act="tanh", out_dtype=jnp.float32)
            return y
        if kind == "innermost":
            # down = [leaky, downconv]; up = [relu, upconv, norm]; concat skip
            raw_d, _ = conv4x4_s2(act_in, "leaky", p["down_w"], p["down_b"])
            raw_u, st = convT4x4_s2(lazy(raw_d), "relu", p["up_w"], p["up_b"],
                                    out_act="none", out_dtype=jnp.bfloat16)
            sc, sh = bn_scale_shift(st, n_elems(raw_u), p["up_gamma"], p["up_beta"])
            return lazy_concat((raw_u, sc, sh), act_in)
        # middle: down = [leaky, downconv, norm]; up = [relu, upconv, norm]; concat
        raw_d, st_d = conv4x4_s2(act_in, "leaky", p["down_w"], p["down_b"])
        sc_d, sh_d = bn_scale_shift(st_d, n_elems(raw_d), p["dn_gamma"], p["dn_beta"])
        sub = run_block(idx - 1, (raw_d, sc_d, sh_d))
        raw_u, st_u = convT4x4_s2(sub, "relu", p["up_w"], p["up_b"],
                                  out_act="none", out_dtype=jnp.bfloat16)
        sc_u, sh_u = bn_scale_shift(st_u, n_elems(raw_u), p["up_gamma"], p["up_beta"])
        return lazy_concat((raw_u, sc_u, sh_u), act_in)

    out_nhwc = run_block(len(kinds) - 1, lazy(x_nhwc.astype(jnp.bfloat16)))
    return jnp.transpose(out_nhwc, (0, 3, 1, 2))


# ---------------------------------------------------------------------------
if __name__ == "__main__":
    # small config: num_downs=5 => spatial must be divisible by 2^5 = 32
    input_nc = output_nc = 4
    num_downs = 5
    ngf = 8
    N, H, W = 2, 32, 32

    key = jax.random.PRNGKey(0)
    kx, kp = jax.random.split(key)
    x_nchw = jax.random.normal(kx, (N, input_nc, H, W), jnp.float32)  # PyTorch NCHW input
    kinds, params = build_unet_params(kp, input_nc, output_nc, num_downs, ngf)

    out_nchw = unet_forward(kinds, params, x_nchw)
    out_nchw = jax.block_until_ready(out_nchw)

    assert out_nchw.shape == (N, output_nc, H, W), out_nchw.shape
    assert bool(jnp.all(jnp.isfinite(out_nchw)))
    # TODO(synk): BatchNorm running-stat updates (eval-mode inference) and the
    # use_dropout=True path are training-side behaviors not modeled here
    # (training-mode batch statistics are used, as in the original port).
    print("KERNEL_OK")
</pallas_src>

<mosaic_0001>
module attributes {stable_mosaic.version = 11 : i64} {
  func.func @_fused_mm_kernel(%arg0: i32, %arg1: i32, %arg2: i32, %arg3: memref<1x512x64xbf16, #tpu.memory_space<vmem>>, %arg4: memref<1x64x8xbf16, #tpu.memory_space<vmem>>, %arg5: memref<1x8xf32, #tpu.memory_space<vmem>>, %arg6: memref<1x512x8xbf16, #tpu.memory_space<vmem>>, %arg7: memref<1x1x2x8xf32, #tpu.memory_space<vmem>>, %arg8: memref<512x8xf32, #tpu.memory_space<vmem>>) attributes {dimension_semantics = [#tpu.dimension_semantics<parallel>, #tpu.dimension_semantics<parallel>, #tpu.dimension_semantics<arbitrary>], iteration_bounds = array<i64: 1, 1, 1>, scalar_prefetch = 0 : i64, scratch_operands = 1 : i64, tpu.core_type = #tpu.core_type<tc>, window_params = [{transform_indices = @transform_0, window_bounds = array<i64: 1, 512, 64>}, {transform_indices = @transform_1, window_bounds = array<i64: 1, 64, 8>}, {pipeline_mode = #tpu.pipeline_mode<synchronous>, transform_indices = @transform_2, window_bounds = array<i64: 1, 8>}, {transform_indices = @transform_3, window_bounds = array<i64: 1, 512, 8>}, {transform_indices = @transform_4, window_bounds = array<i64: 1, 1, 2, 8>}]} {
    %c0_i32 = arith.constant 0 : i32
    %0 = arith.cmpi eq, %arg2, %c0_i32 : i32
    %1 = arith.extui %0 : i1 to i32
    %c0_i32_0 = arith.constant 0 : i32
    %2 = arith.cmpi ne, %1, %c0_i32_0 : i32
    scf.if %2 {
      %cst_12 = arith.constant 0.000000e+00 : f32
      %14 = vector.broadcast %cst_12 : f32 to vector<512x8xf32>
      %c0_13 = arith.constant 0 : index
      %c0_14 = arith.constant 0 : index
      %15 = vector.load %arg8[%c0_13, %c0_14] : memref<512x8xf32, #tpu.memory_space<vmem>>, vector<512x8xf32>
      tpu.vector_store %arg8[%c0_13, %c0_14], %14 {strides = array<i32>} : memref<512x8xf32, #tpu.memory_space<vmem>>, vector<512x8xf32>,
    } else {
    }
    %c0 = arith.constant 0 : index
    %c0_1 = arith.constant 0 : index
    %3 = vector.load %arg8[%c0, %c0_1] : memref<512x8xf32, #tpu.memory_space<vmem>>, vector<512x8xf32>
    %c0_2 = arith.constant 0 : index
    %c0_3 = arith.constant 0 : index
    %c0_4 = arith.constant 0 : index
    %4 = vector.load %arg3[%c0_2, %c0_3, %c0_4] : memref<1x512x64xbf16, #tpu.memory_space<vmem>>, vector<1x512x64xbf16>
    %5 = vector.shape_cast %4 : vector<1x512x64xbf16> to vector<512x64xbf16>
    %c0_5 = arith.constant 0 : index
    %c0_6 = arith.constant 0 : index
    %c0_7 = arith.constant 0 : index
    %6 = vector.load %arg4[%c0_5, %c0_6, %c0_7] : memref<1x64x8xbf16, #tpu.memory_space<vmem>>, vector<1x64x8xbf16>
    %7 = vector.shape_cast %6 : vector<1x64x8xbf16> to vector<64x8xbf16>
    %cst = arith.constant dense<0.000000e+00> : vector<512x8xf32>
    %8 = tpu.matmul %5, %7, %cst {dimension_numbers = #tpu.dot_dimension_numbers<[1], [0], [0], [1], [0, 0, 1, 1], [], []>} : vector<512x64xbf16>, vector<64x8xbf16>, vector<512x8xf32> -> vector<512x8xf32>
    %9 = arith.addf %3, %8 : vector<512x8xf32>
    %c0_8 = arith.constant 0 : index
    %c0_9 = arith.constant 0 : index
    %10 = vector.load %arg8[%c0_8, %c0_9] : memref<512x8xf32, #tpu.memory_space<vmem>>, vector<512x8xf32>
    tpu.vector_store %arg8[%c0_8, %c0_9], %9 {strides = array<i32>} : memref<512x8xf32, #tpu.memory_space<vmem>>, vector<512x8xf32>,
    %c0_i32_10 = arith.constant 0 : i32
    %11 = arith.cmpi eq, %arg2, %c0_i32_10 : i32
    %12 = arith.extui %11 : i1 to i32
    %c0_i32_11 = arith.constant 0 : i32
    %13 = arith.cmpi ne, %12, %c0_i32_11 : i32
    scf.if %13 {
      %c0_12 = arith.constant 0 : index
      %c0_13 = arith.constant 0 : index
      %14 = vector.load %arg8[%c0_12, %c0_13] : memref<512x8xf32, #tpu.memory_space<vmem>>, vector<512x8xf32>
      %c0_14 = arith.constant 0 : index
      %c0_15 = arith.constant 0 : index
      %15 = vector.load %arg5[%c0_14, %c0_15] : memref<1x8xf32, #tpu.memory_space<vmem>>, vector<1x8xf32>
      %16 = vector.broadcast %15 : vector<1x8xf32> to vector<512x8xf32>
      %17 = arith.addf %14, %16 : vector<512x8xf32>
      %cst_16 = arith.constant dense<0.000000e+00> : vector<8xf32>
      %18 = vector.multi_reduction <add>, %17, %cst_16 [0] : vector<512x8xf32> to vector<8xf32>
      %19 = vector.shape_cast %18 : vector<8xf32> to vector<1x8xf32>
      %20 = arith.mulf %17, %17 : vector<512x8xf32>
      %cst_17 = arith.constant dense<0.000000e+00> : vector<8xf32>
      %21 = vector.multi_reduction <add>, %20, %cst_17 [0] : vector<512x8xf32> to vector<8xf32>
      %22 = vector.shape_cast %21 : vector<8xf32> to vector<1x8xf32>
      %23 = tpu.concatenate %19, %22 in 0 : vector<1x8xf32>, vector<1x8xf32> -> vector<2x8xf32>
      %24 = vector.shape_cast %23 : vector<2x8xf32> to vector<1x1x2x8xf32>
      %c0_18 = arith.constant 0 : index
      %c0_19 = arith.constant 0 : index
      %c0_20 = arith.constant 0 : index
      %c0_21 = arith.constant 0 : index
      %25 = vector.load %arg7[%c0_18, %c0_19, %c0_20, %c0_21] : memref<1x1x2x8xf32, #tpu.memory_space<vmem>>, vector<1x1x2x8xf32>
      tpu.vector_store %arg7[%c0_18, %c0_19, %c0_20, %c0_21], %24 {strides = array<i32>} : memref<1x1x2x8xf32, #tpu.memory_space<vmem>>, vector<1x1x2x8xf32>,
      %26 = arith.truncf %17 : vector<512x8xf32> to vector<512x8xbf16>
      %27 = vector.shape_cast %26 : vector<512x8xbf16> to vector<1x512x8xbf16>
      %c0_22 = arith.constant 0 : index
      %c0_23 = arith.constant 0 : index
      %c0_24 = arith.constant 0 : index
      %28 = vector.load %arg6[%c0_22, %c0_23, %c0_24] : memref<1x512x8xbf16, #tpu.memory_space<vmem>>, vector<1x512x8xbf16>
      tpu.vector_store %arg6[%c0_22, %c0_23, %c0_24], %27 {strides = array<i32>} : memref<1x512x8xbf16, #tpu.memory_space<vmem>>, vector<1x512x8xbf16>,
    } else {
    }
    return
  }
  func.func @transform_0(%arg0: i32, %arg1: i32, %arg2: i32) -> (i32, i32, i32) {
    %c0_i32 = arith.constant 0 : i32
    return %arg0, %arg1, %arg2 : i32, i32, i32
  }
  func.func @transform_1(%arg0: i32, %arg1: i32, %arg2: i32) -> (i32, i32, i32) {
    %c0_i32 = arith.constant 0 : i32
    %c0_i32_0 = arith.constant 0 : i32
    return %arg0, %arg2, %c0_i32 : i32, i32, i32
  }
  func.func @transform_2(%arg0: i32, %arg1: i32, %arg2: i32) -> (i32, i32) {
    %c0_i32 = arith.constant 0 : i32
    %c0_i32_0 = arith.constant 0 : i32
    %c0_i32_1 = arith.constant 0 : i32
    return %c0_i32, %c0_i32_0 : i32, i32
  }
  func.func @transform_3(%arg0: i32, %arg1: i32, %arg2: i32) -> (i32, i32, i32) {
    %c0_i32 = arith.constant 0 : i32
    %c0_i32_0 = arith.constant 0 : i32
    return %arg0, %arg1, %c0_i32 : i32, i32, i32
  }
  func.func @transform_4(%arg0: i32, %arg1: i32, %arg2: i32) -> (i32, i32, i32, i32) {
    %c0_i32 = arith.constant 0 : i32
    %c0_i32_0 = arith.constant 0 : i32
    %c0_i32_1 = arith.constant 0 : i32
    return %arg0, %arg1, %c0_i32, %c0_i32_0 : i32, i32, i32, i32
  }
}

module attributes {stable_mosaic.version = 11 : i64} {
  func.func @_fused_mm_kernel(%arg0: i32, %arg1: i32, %arg2: i32, %arg3: memref<1x128x128xbf16, #tpu.memory_space<vmem>>, %arg4: memref<1x128x16xbf16, #tpu.memory_space<vmem>>, %arg5: memref<1x16xf32, #tpu.memory_space<vmem>>, %arg6: memref<1x128x16xbf16, #tpu.memory_space<vmem>>, %arg7: memref<1x1x2x16xf32, #tpu.memory_space<vmem>>, %arg8: memref<128x16xf32, #tpu.memory_space<vmem>>) attributes {dimension_semantics = [#tpu.dimension_semantics<parallel>, #tpu.dimension_semantics<parallel>, #tpu.dimension_semantics<arbitrary>], iteration_bounds = array<i64: 1, 1, 1>, scalar_prefetch = 0 : i64, scratch_operands = 1 : i64, tpu.core_type = #tpu.core_type<tc>, window_params = [{transform_indices = @transform_0, window_bounds = array<i64: 1, 128, 128>}, {transform_indices = @transform_1, window_bounds = array<i64: 1, 128, 16>}, {pipeline_mode = #tpu.pipeline_mode<synchronous>, transform_indices = @transform_2, window_bounds = array<i64: 1, 16>}, {transform_indices = @transform_3, window_bounds = array<i64: 1, 128, 16>}, {transform_indices = @transform_4, window_bounds = array<i64: 1, 1, 2, 16>}]} {
    %c0_i32 = arith.constant 0 : i32
    %0 = arith.cmpi eq, %arg2, %c0_i32 : i32
    %1 = arith.extui %0 : i1 to i32
    %c0_i32_0 = arith.constant 0 : i32
    %2 = arith.cmpi ne, %1, %c0_i32_0 : i32
    scf.if %2 {
      %cst_12 = arith.constant 0.000000e+00 : f32
      %14 = vector.broadcast %cst_12 : f32 to vector<128x16xf32>
      %c0_13 = arith.constant 0 : index
      %c0_14 = arith.constant 0 : index
      %15 = vector.load %arg8[%c0_13, %c0_14] : memref<128x16xf32, #tpu.memory_space<vmem>>, vector<128x16xf32>
      tpu.vector_store %arg8[%c0_13, %c0_14], %14 {strides = array<i32>} : memref<128x16xf32, #tpu.memory_space<vmem>>, vector<128x16xf32>,
    } else {
    }
    %c0 = arith.constant 0 : index
    %c0_1 = arith.constant 0 : index
    %3 = vector.load %arg8[%c0, %c0_1] : memref<128x16xf32, #tpu.memory_space<vmem>>, vector<128x16xf32>
    %c0_2 = arith.constant 0 : index
    %c0_3 = arith.constant 0 : index
    %c0_4 = arith.constant 0 : index
    %4 = vector.load %arg3[%c0_2, %c0_3, %c0_4] : memref<1x128x128xbf16, #tpu.memory_space<vmem>>, vector<1x128x128xbf16>
    %5 = vector.shape_cast %4 : vector<1x128x128xbf16> to vector<128x128xbf16>
    %c0_5 = arith.constant 0 : index
    %c0_6 = arith.constant 0 : index
    %c0_7 = arith.constant 0 : index
    %6 = vector.load %arg4[%c0_5, %c0_6, %c0_7] : memref<1x128x16xbf16, #tpu.memory_space<vmem>>, vector<1x128x16xbf16>
    %7 = vector.shape_cast %6 : vector<1x128x16xbf16> to vector<128x16xbf16>
    %cst = arith.constant dense<0.000000e+00> : vector<128x16xf32>
    %8 = tpu.matmul %5, %7, %cst {dimension_numbers = #tpu.dot_dimension_numbers<[1], [0], [0], [1], [0, 0, 1, 1], [], []>} : vector<128x128xbf16>, vector<128x16xbf16>, vector<128x16xf32> -> vector<128x16xf32>
    %9 = arith.addf %3, %8 : vector<128x16xf32>
    %c0_8 = arith.constant 0 : index
    %c0_9 = arith.constant 0 : index
    %10 = vector.load %arg8[%c0_8, %c0_9] : memref<128x16xf32, #tpu.memory_space<vmem>>, vector<128x16xf32>
    tpu.vector_store %arg8[%c0_8, %c0_9], %9 {strides = array<i32>} : memref<128x16xf32, #tpu.memory_space<vmem>>, vector<128x16xf32>,
    %c0_i32_10 = arith.constant 0 : i32
    %11 = arith.cmpi eq, %arg2, %c0_i32_10 : i32
    %12 = arith.extui %11 : i1 to i32
    %c0_i32_11 = arith.constant 0 : i32
    %13 = arith.cmpi ne, %12, %c0_i32_11 : i32
    scf.if %13 {
      %c0_12 = arith.constant 0 : index
      %c0_13 = arith.constant 0 : index
      %14 = vector.load %arg8[%c0_12, %c0_13] : memref<128x16xf32, #tpu.memory_space<vmem>>, vector<128x16xf32>
      %c0_14 = arith.constant 0 : index
      %c0_15 = arith.constant 0 : index
      %15 = vector.load %arg5[%c0_14, %c0_15] : memref<1x16xf32, #tpu.memory_space<vmem>>, vector<1x16xf32>
      %16 = vector.broadcast %15 : vector<1x16xf32> to vector<128x16xf32>
      %17 = arith.addf %14, %16 : vector<128x16xf32>
      %cst_16 = arith.constant dense<0.000000e+00> : vector<16xf32>
      %18 = vector.multi_reduction <add>, %17, %cst_16 [0] : vector<128x16xf32> to vector<16xf32>
      %19 = vector.shape_cast %18 : vector<16xf32> to vector<1x16xf32>
      %20 = arith.mulf %17, %17 : vector<128x16xf32>
      %cst_17 = arith.constant dense<0.000000e+00> : vector<16xf32>
      %21 = vector.multi_reduction <add>, %20, %cst_17 [0] : vector<128x16xf32> to vector<16xf32>
      %22 = vector.shape_cast %21 : vector<16xf32> to vector<1x16xf32>
      %23 = tpu.concatenate %19, %22 in 0 : vector<1x16xf32>, vector<1x16xf32> -> vector<2x16xf32>
      %24 = vector.shape_cast %23 : vector<2x16xf32> to vector<1x1x2x16xf32>
      %c0_18 = arith.constant 0 : index
      %c0_19 = arith.constant 0 : index
      %c0_20 = arith.constant 0 : index
      %c0_21 = arith.constant 0 : index
      %25 = vector.load %arg7[%c0_18, %c0_19, %c0_20, %c0_21] : memref<1x1x2x16xf32, #tpu.memory_space<vmem>>, vector<1x1x2x16xf32>
      tpu.vector_store %arg7[%c0_18, %c0_19, %c0_20, %c0_21], %24 {strides = array<i32>} : memref<1x1x2x16xf32, #tpu.memory_space<vmem>>, vector<1x1x2x16xf32>,
      %26 = arith.truncf %17 : vector<128x16xf32> to vector<128x16xbf16>
      %27 = vector.shape_cast %26 : vector<128x16xbf16> to vector<1x128x16xbf16>
      %c0_22 = arith.constant 0 : index
      %c0_23 = arith.constant 0 : index
      %c0_24 = arith.constant 0 : index
      %28 = vector.load %arg6[%c0_22, %c0_23, %c0_24] : memref<1x128x16xbf16, #tpu.memory_space<vmem>>, vector<1x128x16xbf16>
      tpu.vector_store %arg6[%c0_22, %c0_23, %c0_24], %27 {strides = array<i32>} : memref<1x128x16xbf16, #tpu.memory_space<vmem>>, vector<1x128x16xbf16>,
    } else {
    }
    return
  }
  func.func @transform_0(%arg0: i32, %arg1: i32, %arg2: i32) -> (i32, i32, i32) {
    %c0_i32 = arith.constant 0 : i32
    return %arg0, %arg1, %arg2 : i32, i32, i32
  }
  func.func @transform_1(%arg0: i32, %arg1: i32, %arg2: i32) -> (i32, i32, i32) {
    %c0_i32 = arith.constant 0 : i32
    %c0_i32_0 = arith.constant 0 : i32
    return %arg0, %arg2, %c0_i32 : i32, i32, i32
  }
  func.func @transform_2(%arg0: i32, %arg1: i32, %arg2: i32) -> (i32, i32) {
    %c0_i32 = arith.constant 0 : i32
    %c0_i32_0 = arith.constant 0 : i32
    %c0_i32_1 = arith.constant 0 : i32
    return %c0_i32, %c0_i32_0 : i32, i32
  }
  func.func @transform_3(%arg0: i32, %arg1: i32, %arg2: i32) -> (i32, i32, i32) {
    %c0_i32 = arith.constant 0 : i32
    %c0_i32_0 = arith.constant 0 : i32
    return %arg0, %arg1, %c0_i32 : i32, i32, i32
  }
  func.func @transform_4(%arg0: i32, %arg1: i32, %arg2: i32) -> (i32, i32, i32, i32) {
    %c0_i32 = arith.constant 0 : i32
    %c0_i32_0 = arith.constant 0 : i32
    %c0_i32_1 = arith.constant 0 : i32
    return %arg0, %arg1, %c0_i32, %c0_i32_0 : i32, i32, i32, i32
  }
}

module attributes {stable_mosaic.version = 11 : i64} {
  func.func @_fused_mm_kernel(%arg0: i32, %arg1: i32, %arg2: i32, %arg3: memref<1x32x256xbf16, #tpu.memory_space<vmem>>, %arg4: memref<1x256x32xbf16, #tpu.memory_space<vmem>>, %arg5: memref<1x32xf32, #tpu.memory_space<vmem>>, %arg6: memref<1x32x32xbf16, #tpu.memory_space<vmem>>, %arg7: memref<1x1x2x32xf32, #tpu.memory_space<vmem>>, %arg8: memref<32x32xf32, #tpu.memory_space<vmem>>) attributes {dimension_semantics = [#tpu.dimension_semantics<parallel>, #tpu.dimension_semantics<parallel>, #tpu.dimension_semantics<arbitrary>], iteration_bounds = array<i64: 1, 1, 1>, scalar_prefetch = 0 : i64, scratch_operands = 1 : i64, tpu.core_type = #tpu.core_type<tc>, window_params = [{transform_indices = @transform_0, window_bounds = array<i64: 1, 32, 256>}, {transform_indices = @transform_1, window_bounds = array<i64: 1, 256, 32>}, {pipeline_mode = #tpu.pipeline_mode<synchronous>, transform_indices = @transform_2, window_bounds = array<i64: 1, 32>}, {transform_indices = @transform_3, window_bounds = array<i64: 1, 32, 32>}, {transform_indices = @transform_4, window_bounds = array<i64: 1, 1, 2, 32>}]} {
    %c0_i32 = arith.constant 0 : i32
    %0 = arith.cmpi eq, %arg2, %c0_i32 : i32
    %1 = arith.extui %0 : i1 to i32
    %c0_i32_0 = arith.constant 0 : i32
    %2 = arith.cmpi ne, %1, %c0_i32_0 : i32
    scf.if %2 {
      %cst_12 = arith.constant 0.000000e+00 : f32
      %14 = vector.broadcast %cst_12 : f32 to vector<32x32xf32>
      %c0_13 = arith.constant 0 : index
      %c0_14 = arith.constant 0 : index
      %15 = vector.load %arg8[%c0_13, %c0_14] : memref<32x32xf32, #tpu.memory_space<vmem>>, vector<32x32xf32>
      tpu.vector_store %arg8[%c0_13, %c0_14], %14 {strides = array<i32>} : memref<32x32xf32, #tpu.memory_space<vmem>>, vector<32x32xf32>,
    } else {
    }
    %c0 = arith.constant 0 : index
    %c0_1 = arith.constant 0 : index
    %3 = vector.load %arg8[%c0, %c0_1] : memref<32x32xf32, #tpu.memory_space<vmem>>, vector<32x32xf32>
    %c0_2 = arith.constant 0 : index
    %c0_3 = arith.constant 0 : index
    %c0_4 = arith.constant 0 : index
    %4 = vector.load %arg3[%c0_2, %c0_3, %c0_4] : memref<1x32x256xbf16, #tpu.memory_space<vmem>>, vector<1x32x256xbf16>
    %5 = vector.shape_cast %4 : vector<1x32x256xbf16> to vector<32x256xbf16>
    %c0_5 = arith.constant 0 : index
    %c0_6 = arith.constant 0 : index
    %c0_7 = arith.constant 0 : index
    %6 = vector.load %arg4[%c0_5, %c0_6, %c0_7] : memref<1x256x32xbf16, #tpu.memory_space<vmem>>, vector<1x256x32xbf16>
    %7 = vector.shape_cast %6 : vector<1x256x32xbf16> to vector<256x32xbf16>
    %cst = arith.constant dense<0.000000e+00> : vector<32x32xf32>
    %8 = tpu.matmul %5, %7, %cst {dimension_numbers = #tpu.dot_dimension_numbers<[1], [0], [0], [1], [0, 0, 1, 1], [], []>} : vector<32x256xbf16>, vector<256x32xbf16>, vector<32x32xf32> -> vector<32x32xf32>
    %9 = arith.addf %3, %8 : vector<32x32xf32>
    %c0_8 = arith.constant 0 : index
    %c0_9 = arith.constant 0 : index
    %10 = vector.load %arg8[%c0_8, %c0_9] : memref<32x32xf32, #tpu.memory_space<vmem>>, vector<32x32xf32>
    tpu.vector_store %arg8[%c0_8, %c0_9], %9 {strides = array<i32>} : memref<32x32xf32, #tpu.memory_space<vmem>>, vector<32x32xf32>,
    %c0_i32_10 = arith.constant 0 : i32
    %11 = arith.cmpi eq, %arg2, %c0_i32_10 : i32
    %12 = arith.extui %11 : i1 to i32
    %c0_i32_11 = arith.constant 0 : i32
    %13 = arith.cmpi ne, %12, %c0_i32_11 : i32
    scf.if %13 {
      %c0_12 = arith.constant 0 : index
      %c0_13 = arith.constant 0 : index
      %14 = vector.load %arg8[%c0_12, %c0_13] : memref<32x32xf32, #tpu.memory_space<vmem>>, vector<32x32xf32>
      %c0_14 = arith.constant 0 : index
      %c0_15 = arith.constant 0 : index
      %15 = vector.load %arg5[%c0_14, %c0_15] : memref<1x32xf32, #tpu.memory_space<vmem>>, vector<1x32xf32>
      %16 = vector.broadcast %15 : vector<1x32xf32> to vector<32x32xf32>
      %17 = arith.addf %14, %16 : vector<32x32xf32>
      %cst_16 = arith.constant dense<0.000000e+00> : vector<32xf32>
      %18 = vector.multi_reduction <add>, %17, %cst_16 [0] : vector<32x32xf32> to vector<32xf32>
      %19 = vector.shape_cast %18 : vector<32xf32> to vector<1x32xf32>
      %20 = arith.mulf %17, %17 : vector<32x32xf32>
      %cst_17 = arith.constant dense<0.000000e+00> : vector<32xf32>
      %21 = vector.multi_reduction <add>, %20, %cst_17 [0] : vector<32x32xf32> to vector<32xf32>
      %22 = vector.shape_cast %21 : vector<32xf32> to vector<1x32xf32>
      %23 = tpu.concatenate %19, %22 in 0 : vector<1x32xf32>, vector<1x32xf32> -> vector<2x32xf32>
      %24 = vector.shape_cast %23 : vector<2x32xf32> to vector<1x1x2x32xf32>
      %c0_18 = arith.constant 0 : index
      %c0_19 = arith.constant 0 : index
      %c0_20 = arith.constant 0 : index
      %c0_21 = arith.constant 0 : index
      %25 = vector.load %arg7[%c0_18, %c0_19, %c0_20, %c0_21] : memref<1x1x2x32xf32, #tpu.memory_space<vmem>>, vector<1x1x2x32xf32>
      tpu.vector_store %arg7[%c0_18, %c0_19, %c0_20, %c0_21], %24 {strides = array<i32>} : memref<1x1x2x32xf32, #tpu.memory_space<vmem>>, vector<1x1x2x32xf32>,
      %26 = arith.truncf %17 : vector<32x32xf32> to vector<32x32xbf16>
      %27 = vector.shape_cast %26 : vector<32x32xbf16> to vector<1x32x32xbf16>
      %c0_22 = arith.constant 0 : index
      %c0_23 = arith.constant 0 : index
      %c0_24 = arith.constant 0 : index
      %28 = vector.load %arg6[%c0_22, %c0_23, %c0_24] : memref<1x32x32xbf16, #tpu.memory_space<vmem>>, vector<1x32x32xbf16>
      tpu.vector_store %arg6[%c0_22, %c0_23, %c0_24], %27 {strides = array<i32>} : memref<1x32x32xbf16, #tpu.memory_space<vmem>>, vector<1x32x32xbf16>,
    } else {
    }
    return
  }
  func.func @transform_0(%arg0: i32, %arg1: i32, %arg2: i32) -> (i32, i32, i32) {
    %c0_i32 = arith.constant 0 : i32
    return %arg0, %arg1, %arg2 : i32, i32, i32
  }
  func.func @transform_1(%arg0: i32, %arg1: i32, %arg2: i32) -> (i32, i32, i32) {
    %c0_i32 = arith.constant 0 : i32
    %c0_i32_0 = arith.constant 0 : i32
    return %arg0, %arg2, %c0_i32 : i32, i32, i32
  }
  func.func @transform_2(%arg0: i32, %arg1: i32, %arg2: i32) -> (i32, i32) {
    %c0_i32 = arith.constant 0 : i32
    %c0_i32_0 = arith.constant 0 : i32
    %c0_i32_1 = arith.constant 0 : i32
    return %c0_i32, %c0_i32_0 : i32, i32
  }
  func.func @transform_3(%arg0: i32, %arg1: i32, %arg2: i32) -> (i32, i32, i32) {
    %c0_i32 = arith.constant 0 : i32
    %c0_i32_0 = arith.constant 0 : i32
    return %arg0, %arg1, %c0_i32 : i32, i32, i32
  }
  func.func @transform_4(%arg0: i32, %arg1: i32, %arg2: i32) -> (i32, i32, i32, i32) {
    %c0_i32 = arith.constant 0 : i32
    %c0_i32_0 = arith.constant 0 : i32
    %c0_i32_1 = arith.constant 0 : i32
    return %arg0, %arg1, %c0_i32, %c0_i32_0 : i32, i32, i32, i32
  }
}

module attributes {stable_mosaic.version = 11 : i64} {
  func.func @_fused_mm_kernel(%arg0: i32, %arg1: i32, %arg2: i32, %arg3: memref<1x8x512xbf16, #tpu.memory_space<vmem>>, %arg4: memref<1x512x64xbf16, #tpu.memory_space<vmem>>, %arg5: memref<1x64xf32, #tpu.memory_space<vmem>>, %arg6: memref<1x8x64xbf16, #tpu.memory_space<vmem>>, %arg7: memref<1x1x2x64xf32, #tpu.memory_space<vmem>>, %arg8: memref<8x64xf32, #tpu.memory_space<vmem>>) attributes {dimension_semantics = [#tpu.dimension_semantics<parallel>, #tpu.dimension_semantics<parallel>, #tpu.dimension_semantics<arbitrary>], iteration_bounds = array<i64: 1, 1, 1>, scalar_prefetch = 0 : i64, scratch_operands = 1 : i64, tpu.core_type = #tpu.core_type<tc>, window_params = [{transform_indices = @transform_0, window_bounds = array<i64: 1, 8, 512>}, {transform_indices = @transform_1, window_bounds = array<i64: 1, 512, 64>}, {pipeline_mode = #tpu.pipeline_mode<synchronous>, transform_indices = @transform_2, window_bounds = array<i64: 1, 64>}, {transform_indices = @transform_3, window_bounds = array<i64: 1, 8, 64>}, {transform_indices = @transform_4, window_bounds = array<i64: 1, 1, 2, 64>}]} {
    %c0_i32 = arith.constant 0 : i32
    %0 = arith.cmpi eq, %arg2, %c0_i32 : i32
    %1 = arith.extui %0 : i1 to i32
    %c0_i32_0 = arith.constant 0 : i32
    %2 = arith.cmpi ne, %1, %c0_i32_0 : i32
    scf.if %2 {
      %cst_12 = arith.constant 0.000000e+00 : f32
      %14 = vector.broadcast %cst_12 : f32 to vector<8x64xf32>
      %c0_13 = arith.constant 0 : index
      %c0_14 = arith.constant 0 : index
      %15 = vector.load %arg8[%c0_13, %c0_14] : memref<8x64xf32, #tpu.memory_space<vmem>>, vector<8x64xf32>
      tpu.vector_store %arg8[%c0_13, %c0_14], %14 {strides = array<i32>} : memref<8x64xf32, #tpu.memory_space<vmem>>, vector<8x64xf32>,
    } else {
    }
    %c0 = arith.constant 0 : index
    %c0_1 = arith.constant 0 : index
    %3 = vector.load %arg8[%c0, %c0_1] : memref<8x64xf32, #tpu.memory_space<vmem>>, vector<8x64xf32>
    %c0_2 = arith.constant 0 : index
    %c0_3 = arith.constant 0 : index
    %c0_4 = arith.constant 0 : index
    %4 = vector.load %arg3[%c0_2, %c0_3, %c0_4] : memref<1x8x512xbf16, #tpu.memory_space<vmem>>, vector<1x8x512xbf16>
    %5 = vector.shape_cast %4 : vector<1x8x512xbf16> to vector<8x512xbf16>
    %c0_5 = arith.constant 0 : index
    %c0_6 = arith.constant 0 : index
    %c0_7 = arith.constant 0 : index
    %6 = vector.load %arg4[%c0_5, %c0_6, %c0_7] : memref<1x512x64xbf16, #tpu.memory_space<vmem>>, vector<1x512x64xbf16>
    %7 = vector.shape_cast %6 : vector<1x512x64xbf16> to vector<512x64xbf16>
    %cst = arith.constant dense<0.000000e+00> : vector<8x64xf32>
    %8 = tpu.matmul %5, %7, %cst {dimension_numbers = #tpu.dot_dimension_numbers<[1], [0], [0], [1], [0, 0, 1, 1], [], []>} : vector<8x512xbf16>, vector<512x64xbf16>, vector<8x64xf32> -> vector<8x64xf32>
    %9 = arith.addf %3, %8 : vector<8x64xf32>
    %c0_8 = arith.constant 0 : index
    %c0_9 = arith.constant 0 : index
    %10 = vector.load %arg8[%c0_8, %c0_9] : memref<8x64xf32, #tpu.memory_space<vmem>>, vector<8x64xf32>
    tpu.vector_store %arg8[%c0_8, %c0_9], %9 {strides = array<i32>} : memref<8x64xf32, #tpu.memory_space<vmem>>, vector<8x64xf32>,
    %c0_i32_10 = arith.constant 0 : i32
    %11 = arith.cmpi eq, %arg2, %c0_i32_10 : i32
    %12 = arith.extui %11 : i1 to i32
    %c0_i32_11 = arith.constant 0 : i32
    %13 = arith.cmpi ne, %12, %c0_i32_11 : i32
    scf.if %13 {
      %c0_12 = arith.constant 0 : index
      %c0_13 = arith.constant 0 : index
      %14 = vector.load %arg8[%c0_12, %c0_13] : memref<8x64xf32, #tpu.memory_space<vmem>>, vector<8x64xf32>
      %c0_14 = arith.constant 0 : index
      %c0_15 = arith.constant 0 : index
      %15 = vector.load %arg5[%c0_14, %c0_15] : memref<1x64xf32, #tpu.memory_space<vmem>>, vector<1x64xf32>
      %16 = vector.broadcast %15 : vector<1x64xf32> to vector<8x64xf32>
      %17 = arith.addf %14, %16 : vector<8x64xf32>
      %cst_16 = arith.constant dense<0.000000e+00> : vector<64xf32>
      %18 = vector.multi_reduction <add>, %17, %cst_16 [0] : vector<8x64xf32> to vector<64xf32>
      %19 = vector.shape_cast %18 : vector<64xf32> to vector<1x64xf32>
      %20 = arith.mulf %17, %17 : vector<8x64xf32>
      %cst_17 = arith.constant dense<0.000000e+00> : vector<64xf32>
      %21 = vector.multi_reduction <add>, %20, %cst_17 [0] : vector<8x64xf32> to vector<64xf32>
      %22 = vector.shape_cast %21 : vector<64xf32> to vector<1x64xf32>
      %23 = tpu.concatenate %19, %22 in 0 : vector<1x64xf32>, vector<1x64xf32> -> vector<2x64xf32>
      %24 = vector.shape_cast %23 : vector<2x64xf32> to vector<1x1x2x64xf32>
      %c0_18 = arith.constant 0 : index
      %c0_19 = arith.constant 0 : index
      %c0_20 = arith.constant 0 : index
      %c0_21 = arith.constant 0 : index
      %25 = vector.load %arg7[%c0_18, %c0_19, %c0_20, %c0_21] : memref<1x1x2x64xf32, #tpu.memory_space<vmem>>, vector<1x1x2x64xf32>
      tpu.vector_store %arg7[%c0_18, %c0_19, %c0_20, %c0_21], %24 {strides = array<i32>} : memref<1x1x2x64xf32, #tpu.memory_space<vmem>>, vector<1x1x2x64xf32>,
      %26 = arith.truncf %17 : vector<8x64xf32> to vector<8x64xbf16>
      %27 = vector.shape_cast %26 : vector<8x64xbf16> to vector<1x8x64xbf16>
      %c0_22 = arith.constant 0 : index
      %c0_23 = arith.constant 0 : index
      %c0_24 = arith.constant 0 : index
      %28 = vector.load %arg6[%c0_22, %c0_23, %c0_24] : memref<1x8x64xbf16, #tpu.memory_space<vmem>>, vector<1x8x64xbf16>
      tpu.vector_store %arg6[%c0_22, %c0_23, %c0_24], %27 {strides = array<i32>} : memref<1x8x64xbf16, #tpu.memory_space<vmem>>, vector<1x8x64xbf16>,
    } else {
    }
    return
  }
  func.func @transform_0(%arg0: i32, %arg1: i32, %arg2: i32) -> (i32, i32, i32) {
    %c0_i32 = arith.constant 0 : i32
    return %arg0, %arg1, %arg2 : i32, i32, i32
  }
  func.func @transform_1(%arg0: i32, %arg1: i32, %arg2: i32) -> (i32, i32, i32) {
    %c0_i32 = arith.constant 0 : i32
    %c0_i32_0 = arith.constant 0 : i32
    return %arg0, %arg2, %c0_i32 : i32, i32, i32
  }
  func.func @transform_2(%arg0: i32, %arg1: i32, %arg2: i32) -> (i32, i32) {
    %c0_i32 = arith.constant 0 : i32
    %c0_i32_0 = arith.constant 0 : i32
    %c0_i32_1 = arith.constant 0 : i32
    return %c0_i32, %c0_i32_0 : i32, i32
  }
  func.func @transform_3(%arg0: i32, %arg1: i32, %arg2: i32) -> (i32, i32, i32) {
    %c0_i32 = arith.constant 0 : i32
    %c0_i32_0 = arith.constant 0 : i32
    return %arg0, %arg1, %c0_i32 : i32, i32, i32
  }
  func.func @transform_4(%arg0: i32, %arg1: i32, %arg2: i32) -> (i32, i32, i32, i32) {
    %c0_i32 = arith.constant 0 : i32
    %c0_i32_0 = arith.constant 0 : i32
    %c0_i32_1 = arith.constant 0 : i32
    return %arg0, %arg1, %c0_i32, %c0_i32_0 : i32, i32, i32, i32
  }
}

module attributes {stable_mosaic.version = 11 : i64} {
  func.func @_fused_mm_kernel(%arg0: i32, %arg1: i32, %arg2: i32, %arg3: memref<1x2x1024xbf16, #tpu.memory_space<vmem>>, %arg4: memref<1x1024x64xbf16, #tpu.memory_space<vmem>>, %arg5: memref<1x64xf32, #tpu.memory_space<vmem>>, %arg6: memref<1x2x64xbf16, #tpu.memory_space<vmem>>, %arg7: memref<1x1x2x64xf32, #tpu.memory_space<vmem>>, %arg8: memref<2x64xf32, #tpu.memory_space<vmem>>) attributes {dimension_semantics = [#tpu.dimension_semantics<parallel>, #tpu.dimension_semantics<parallel>, #tpu.dimension_semantics<arbitrary>], iteration_bounds = array<i64: 1, 1, 1>, scalar_prefetch = 0 : i64, scratch_operands = 1 : i64, tpu.core_type = #tpu.core_type<tc>, window_params = [{transform_indices = @transform_0, window_bounds = array<i64: 1, 2, 1024>}, {transform_indices = @transform_1, window_bounds = array<i64: 1, 1024, 64>}, {pipeline_mode = #tpu.pipeline_mode<synchronous>, transform_indices = @transform_2, window_bounds = array<i64: 1, 64>}, {transform_indices = @transform_3, window_bounds = array<i64: 1, 2, 64>}, {transform_indices = @transform_4, window_bounds = array<i64: 1, 1, 2, 64>}]} {
    %c0_i32 = arith.constant 0 : i32
    %0 = arith.cmpi eq, %arg2, %c0_i32 : i32
    %1 = arith.extui %0 : i1 to i32
    %c0_i32_0 = arith.constant 0 : i32
    %2 = arith.cmpi ne, %1, %c0_i32_0 : i32
    scf.if %2 {
      %cst_12 = arith.constant 0.000000e+00 : f32
      %14 = vector.broadcast %cst_12 : f32 to vector<2x64xf32>
      %c0_13 = arith.constant 0 : index
      %c0_14 = arith.constant 0 : index
      %15 = vector.load %arg8[%c0_13, %c0_14] : memref<2x64xf32, #tpu.memory_space<vmem>>, vector<2x64xf32>
      tpu.vector_store %arg8[%c0_13, %c0_14], %14 {strides = array<i32>} : memref<2x64xf32, #tpu.memory_space<vmem>>, vector<2x64xf32>,
    } else {
    }
    %c0 = arith.constant 0 : index
    %c0_1 = arith.constant 0 : index
    %3 = vector.load %arg8[%c0, %c0_1] : memref<2x64xf32, #tpu.memory_space<vmem>>, vector<2x64xf32>
    %c0_2 = arith.constant 0 : index
    %c0_3 = arith.constant 0 : index
    %c0_4 = arith.constant 0 : index
    %4 = vector.load %arg3[%c0_2, %c0_3, %c0_4] : memref<1x2x1024xbf16, #tpu.memory_space<vmem>>, vector<1x2x1024xbf16>
    %5 = vector.shape_cast %4 : vector<1x2x1024xbf16> to vector<2x1024xbf16>
    %c0_5 = arith.constant 0 : index
    %c0_6 = arith.constant 0 : index
    %c0_7 = arith.constant 0 : index
    %6 = vector.load %arg4[%c0_5, %c0_6, %c0_7] : memref<1x1024x64xbf16, #tpu.memory_space<vmem>>, vector<1x1024x64xbf16>
    %7 = vector.shape_cast %6 : vector<1x1024x64xbf16> to vector<1024x64xbf16>
    %cst = arith.constant dense<0.000000e+00> : vector<2x64xf32>
    %8 = tpu.matmul %5, %7, %cst {dimension_numbers = #tpu.dot_dimension_numbers<[1], [0], [0], [1], [0, 0, 1, 1], [], []>} : vector<2x1024xbf16>, vector<1024x64xbf16>, vector<2x64xf32> -> vector<2x64xf32>
    %9 = arith.addf %3, %8 : vector<2x64xf32>
    %c0_8 = arith.constant 0 : index
    %c0_9 = arith.constant 0 : index
    %10 = vector.load %arg8[%c0_8, %c0_9] : memref<2x64xf32, #tpu.memory_space<vmem>>, vector<2x64xf32>
    tpu.vector_store %arg8[%c0_8, %c0_9], %9 {strides = array<i32>} : memref<2x64xf32, #tpu.memory_space<vmem>>, vector<2x64xf32>,
    %c0_i32_10 = arith.constant 0 : i32
    %11 = arith.cmpi eq, %arg2, %c0_i32_10 : i32
    %12 = arith.extui %11 : i1 to i32
    %c0_i32_11 = arith.constant 0 : i32
    %13 = arith.cmpi ne, %12, %c0_i32_11 : i32
    scf.if %13 {
      %c0_12 = arith.constant 0 : index
      %c0_13 = arith.constant 0 : index
      %14 = vector.load %arg8[%c0_12, %c0_13] : memref<2x64xf32, #tpu.memory_space<vmem>>, vector<2x64xf32>
      %c0_14 = arith.constant 0 : index
      %c0_15 = arith.constant 0 : index
      %15 = vector.load %arg5[%c0_14, %c0_15] : memref<1x64xf32, #tpu.memory_space<vmem>>, vector<1x64xf32>
      %16 = vector.broadcast %15 : vector<1x64xf32> to vector<2x64xf32>
      %17 = arith.addf %14, %16 : vector<2x64xf32>
      %cst_16 = arith.constant dense<0.000000e+00> : vector<64xf32>
      %18 = vector.multi_reduction <add>, %17, %cst_16 [0] : vector<2x64xf32> to vector<64xf32>
      %19 = vector.shape_cast %18 : vector<64xf32> to vector<1x64xf32>
      %20 = arith.mulf %17, %17 : vector<2x64xf32>
      %cst_17 = arith.constant dense<0.000000e+00> : vector<64xf32>
      %21 = vector.multi_reduction <add>, %20, %cst_17 [0] : vector<2x64xf32> to vector<64xf32>
      %22 = vector.shape_cast %21 : vector<64xf32> to vector<1x64xf32>
      %23 = tpu.concatenate %19, %22 in 0 : vector<1x64xf32>, vector<1x64xf32> -> vector<2x64xf32>
      %24 = vector.shape_cast %23 : vector<2x64xf32> to vector<1x1x2x64xf32>
      %c0_18 = arith.constant 0 : index
      %c0_19 = arith.constant 0 : index
      %c0_20 = arith.constant 0 : index
      %c0_21 = arith.constant 0 : index
      %25 = vector.load %arg7[%c0_18, %c0_19, %c0_20, %c0_21] : memref<1x1x2x64xf32, #tpu.memory_space<vmem>>, vector<1x1x2x64xf32>
      tpu.vector_store %arg7[%c0_18, %c0_19, %c0_20, %c0_21], %24 {strides = array<i32>} : memref<1x1x2x64xf32, #tpu.memory_space<vmem>>, vector<1x1x2x64xf32>,
      %26 = arith.truncf %17 : vector<2x64xf32> to vector<2x64xbf16>
      %27 = vector.shape_cast %26 : vector<2x64xbf16> to vector<1x2x64xbf16>
      %c0_22 = arith.constant 0 : index
      %c0_23 = arith.constant 0 : index
      %c0_24 = arith.constant 0 : index
      %28 = vector.load %arg6[%c0_22, %c0_23, %c0_24] : memref<1x2x64xbf16, #tpu.memory_space<vmem>>, vector<1x2x64xbf16>
      tpu.vector_store %arg6[%c0_22, %c0_23, %c0_24], %27 {strides = array<i32>} : memref<1x2x64xbf16, #tpu.memory_space<vmem>>, vector<1x2x64xbf16>,
    } else {
    }
    return
  }
  func.func @transform_0(%arg0: i32, %arg1: i32, %arg2: i32) -> (i32, i32, i32) {
    %c0_i32 = arith.constant 0 : i32
    return %arg0, %arg1, %arg2 : i32, i32, i32
  }
  func.func @transform_1(%arg0: i32, %arg1: i32, %arg2: i32) -> (i32, i32, i32) {
    %c0_i32 = arith.constant 0 : i32
    %c0_i32_0 = arith.constant 0 : i32
    return %arg0, %arg2, %c0_i32 : i32, i32, i32
  }
  func.func @transform_2(%arg0: i32, %arg1: i32, %arg2: i32) -> (i32, i32) {
    %c0_i32 = arith.constant 0 : i32
    %c0_i32_0 = arith.constant 0 : i32
    %c0_i32_1 = arith.constant 0 : i32
    return %c0_i32, %c0_i32_0 : i32, i32
  }
  func.func @transform_3(%arg0: i32, %arg1: i32, %arg2: i32) -> (i32, i32, i32) {
    %c0_i32 = arith.constant 0 : i32
    %c0_i32_0 = arith.constant 0 : i32
    return %arg0, %arg1, %c0_i32 : i32, i32, i32
  }
  func.func @transform_4(%arg0: i32, %arg1: i32, %arg2: i32) -> (i32, i32, i32, i32) {
    %c0_i32 = arith.constant 0 : i32
    %c0_i32_0 = arith.constant 0 : i32
    %c0_i32_1 = arith.constant 0 : i32
    return %arg0, %arg1, %c0_i32, %c0_i32_0 : i32, i32, i32, i32
  }
}

module attributes {stable_mosaic.version = 11 : i64} {
  func.func @_fused_mm_kernel(%arg0: i32, %arg1: i32, %arg2: i32, %arg3: memref<1x2x256xbf16, #tpu.memory_space<vmem>>, %arg4: memref<1x256x64xbf16, #tpu.memory_space<vmem>>, %arg5: memref<1x64xf32, #tpu.memory_space<vmem>>, %arg6: memref<1x2x64xbf16, #tpu.memory_space<vmem>>, %arg7: memref<1x1x2x64xf32, #tpu.memory_space<vmem>>, %arg8: memref<2x64xf32, #tpu.memory_space<vmem>>) attributes {dimension_semantics = [#tpu.dimension_semantics<parallel>, #tpu.dimension_semantics<parallel>, #tpu.dimension_semantics<arbitrary>], iteration_bounds = array<i64: 4, 1, 1>, scalar_prefetch = 0 : i64, scratch_operands = 1 : i64, tpu.core_type = #tpu.core_type<tc>, window_params = [{transform_indices = @transform_0, window_bounds = array<i64: 1, 2, 256>}, {transform_indices = @transform_1, window_bounds = array<i64: 1, 256, 64>}, {pipeline_mode = #tpu.pipeline_mode<synchronous>, transform_indices = @transform_2, window_bounds = array<i64: 1, 64>}, {transform_indices = @transform_3, window_bounds = array<i64: 1, 2, 64>}, {transform_indices = @transform_4, window_bounds = array<i64: 1, 1, 2, 64>}]} {
    %c0_i32 = arith.constant 0 : i32
    %0 = arith.cmpi eq, %arg2, %c0_i32 : i32
    %1 = arith.extui %0 : i1 to i32
    %c0_i32_0 = arith.constant 0 : i32
    %2 = arith.cmpi ne, %1, %c0_i32_0 : i32
    scf.if %2 {
      %cst_12 = arith.constant 0.000000e+00 : f32
      %14 = vector.broadcast %cst_12 : f32 to vector<2x64xf32>
      %c0_13 = arith.constant 0 : index
      %c0_14 = arith.constant 0 : index
      %15 = vector.load %arg8[%c0_13, %c0_14] : memref<2x64xf32, #tpu.memory_space<vmem>>, vector<2x64xf32>
      tpu.vector_store %arg8[%c0_13, %c0_14], %14 {strides = array<i32>} : memref<2x64xf32, #tpu.memory_space<vmem>>, vector<2x64xf32>,
    } else {
    }
    %c0 = arith.constant 0 : index
    %c0_1 = arith.constant 0 : index
    %3 = vector.load %arg8[%c0, %c0_1] : memref<2x64xf32, #tpu.memory_space<vmem>>, vector<2x64xf32>
    %c0_2 = arith.constant 0 : index
    %c0_3 = arith.constant 0 : index
    %c0_4 = arith.constant 0 : index
    %4 = vector.load %arg3[%c0_2, %c0_3, %c0_4] : memref<1x2x256xbf16, #tpu.memory_space<vmem>>, vector<1x2x256xbf16>
    %5 = vector.shape_cast %4 : vector<1x2x256xbf16> to vector<2x256xbf16>
    %c0_5 = arith.constant 0 : index
    %c0_6 = arith.constant 0 : index
    %c0_7 = arith.constant 0 : index
    %6 = vector.load %arg4[%c0_5, %c0_6, %c0_7] : memref<1x256x64xbf16, #tpu.memory_space<vmem>>, vector<1x256x64xbf16>
    %7 = vector.shape_cast %6 : vector<1x256x64xbf16> to vector<256x64xbf16>
    %cst = arith.constant dense<0.000000e+00> : vector<2x64xf32>
    %8 = tpu.matmul %5, %7, %cst {dimension_numbers = #tpu.dot_dimension_numbers<[1], [0], [0], [1], [0, 0, 1, 1], [], []>} : vector<2x256xbf16>, vector<256x64xbf16>, vector<2x64xf32> -> vector<2x64xf32>
    %9 = arith.addf %3, %8 : vector<2x64xf32>
    %c0_8 = arith.constant 0 : index
    %c0_9 = arith.constant 0 : index
    %10 = vector.load %arg8[%c0_8, %c0_9] : memref<2x64xf32, #tpu.memory_space<vmem>>, vector<2x64xf32>
    tpu.vector_store %arg8[%c0_8, %c0_9], %9 {strides = array<i32>} : memref<2x64xf32, #tpu.memory_space<vmem>>, vector<2x64xf32>,
    %c0_i32_10 = arith.constant 0 : i32
    %11 = arith.cmpi eq, %arg2, %c0_i32_10 : i32
    %12 = arith.extui %11 : i1 to i32
    %c0_i32_11 = arith.constant 0 : i32
    %13 = arith.cmpi ne, %12, %c0_i32_11 : i32
    scf.if %13 {
      %c0_12 = arith.constant 0 : index
      %c0_13 = arith.constant 0 : index
      %14 = vector.load %arg8[%c0_12, %c0_13] : memref<2x64xf32, #tpu.memory_space<vmem>>, vector<2x64xf32>
      %c0_14 = arith.constant 0 : index
      %c0_15 = arith.constant 0 : index
      %15 = vector.load %arg5[%c0_14, %c0_15] : memref<1x64xf32, #tpu.memory_space<vmem>>, vector<1x64xf32>
      %16 = vector.broadcast %15 : vector<1x64xf32> to vector<2x64xf32>
      %17 = arith.addf %14, %16 : vector<2x64xf32>
      %cst_16 = arith.constant dense<0.000000e+00> : vector<64xf32>
      %18 = vector.multi_reduction <add>, %17, %cst_16 [0] : vector<2x64xf32> to vector<64xf32>
      %19 = vector.shape_cast %18 : vector<64xf32> to vector<1x64xf32>
      %20 = arith.mulf %17, %17 : vector<2x64xf32>
      %cst_17 = arith.constant dense<0.000000e+00> : vector<64xf32>
      %21 = vector.multi_reduction <add>, %20, %cst_17 [0] : vector<2x64xf32> to vector<64xf32>
      %22 = vector.shape_cast %21 : vector<64xf32> to vector<1x64xf32>
      %23 = tpu.concatenate %19, %22 in 0 : vector<1x64xf32>, vector<1x64xf32> -> vector<2x64xf32>
      %24 = vector.shape_cast %23 : vector<2x64xf32> to vector<1x1x2x64xf32>
      %c0_18 = arith.constant 0 : index
      %c0_19 = arith.constant 0 : index
      %c0_20 = arith.constant 0 : index
      %c0_21 = arith.constant 0 : index
      %25 = vector.load %arg7[%c0_18, %c0_19, %c0_20, %c0_21] : memref<1x1x2x64xf32, #tpu.memory_space<vmem>>, vector<1x1x2x64xf32>
      tpu.vector_store %arg7[%c0_18, %c0_19, %c0_20, %c0_21], %24 {strides = array<i32>} : memref<1x1x2x64xf32, #tpu.memory_space<vmem>>, vector<1x1x2x64xf32>,
      %26 = arith.truncf %17 : vector<2x64xf32> to vector<2x64xbf16>
      %27 = vector.shape_cast %26 : vector<2x64xbf16> to vector<1x2x64xbf16>
      %c0_22 = arith.constant 0 : index
      %c0_23 = arith.constant 0 : index
      %c0_24 = arith.constant 0 : index
      %28 = vector.load %arg6[%c0_22, %c0_23, %c0_24] : memref<1x2x64xbf16, #tpu.memory_space<vmem>>, vector<1x2x64xbf16>
      tpu.vector_store %arg6[%c0_22, %c0_23, %c0_24], %27 {strides = array<i32>} : memref<1x2x64xbf16, #tpu.memory_space<vmem>>, vector<1x2x64xbf16>,
    } else {
    }
    return
  }
  func.func @transform_0(%arg0: i32, %arg1: i32, %arg2: i32) -> (i32, i32, i32) {
    %c0_i32 = arith.constant 0 : i32
    return %arg0, %arg1, %arg2 : i32, i32, i32
  }
  func.func @transform_1(%arg0: i32, %arg1: i32, %arg2: i32) -> (i32, i32, i32) {
    %c0_i32 = arith.constant 0 : i32
    %c0_i32_0 = arith.constant 0 : i32
    return %arg0, %arg2, %c0_i32 : i32, i32, i32
  }
  func.func @transform_2(%arg0: i32, %arg1: i32, %arg2: i32) -> (i32, i32) {
    %c0_i32 = arith.constant 0 : i32
    %c0_i32_0 = arith.constant 0 : i32
    %c0_i32_1 = arith.constant 0 : i32
    return %c0_i32, %c0_i32_0 : i32, i32
  }
  func.func @transform_3(%arg0: i32, %arg1: i32, %arg2: i32) -> (i32, i32, i32) {
    %c0_i32 = arith.constant 0 : i32
    %c0_i32_0 = arith.constant 0 : i32
    return %arg0, %arg1, %c0_i32 : i32, i32, i32
  }
  func.func @transform_4(%arg0: i32, %arg1: i32, %arg2: i32) -> (i32, i32, i32, i32) {
    %c0_i32 = arith.constant 0 : i32
    %c0_i32_0 = arith.constant 0 : i32
    %c0_i32_1 = arith.constant 0 : i32
    return %arg0, %arg1, %c0_i32, %c0_i32_0 : i32, i32, i32, i32
  }
}

module attributes {stable_mosaic.version = 11 : i64} {
  func.func @_fused_mm_kernel(%arg0: i32, %arg1: i32, %arg2: i32, %arg3: memref<1x8x512xbf16, #tpu.memory_space<vmem>>, %arg4: memref<1x512x32xbf16, #tpu.memory_space<vmem>>, %arg5: memref<1x32xf32, #tpu.memory_space<vmem>>, %arg6: memref<1x8x32xbf16, #tpu.memory_space<vmem>>, %arg7: memref<1x1x2x32xf32, #tpu.memory_space<vmem>>, %arg8: memref<8x32xf32, #tpu.memory_space<vmem>>) attributes {dimension_semantics = [#tpu.dimension_semantics<parallel>, #tpu.dimension_semantics<parallel>, #tpu.dimension_semantics<arbitrary>], iteration_bounds = array<i64: 4, 1, 1>, scalar_prefetch = 0 : i64, scratch_operands = 1 : i64, tpu.core_type = #tpu.core_type<tc>, window_params = [{transform_indices = @transform_0, window_bounds = array<i64: 1, 8, 512>}, {transform_indices = @transform_1, window_bounds = array<i64: 1, 512, 32>}, {pipeline_mode = #tpu.pipeline_mode<synchronous>, transform_indices = @transform_2, window_bounds = array<i64: 1, 32>}, {transform_indices = @transform_3, window_bounds = array<i64: 1, 8, 32>}, {transform_indices = @transform_4, window_bounds = array<i64: 1, 1, 2, 32>}]} {
    %c0_i32 = arith.constant 0 : i32
    %0 = arith.cmpi eq, %arg2, %c0_i32 : i32
    %1 = arith.extui %0 : i1 to i32
    %c0_i32_0 = arith.constant 0 : i32
    %2 = arith.cmpi ne, %1, %c0_i32_0 : i32
    scf.if %2 {
      %cst_12 = arith.constant 0.000000e+00 : f32
      %14 = vector.broadcast %cst_12 : f32 to vector<8x32xf32>
      %c0_13 = arith.constant 0 : index
      %c0_14 = arith.constant 0 : index
      %15 = vector.load %arg8[%c0_13, %c0_14] : memref<8x32xf32, #tpu.memory_space<vmem>>, vector<8x32xf32>
      tpu.vector_store %arg8[%c0_13, %c0_14], %14 {strides = array<i32>} : memref<8x32xf32, #tpu.memory_space<vmem>>, vector<8x32xf32>,
    } else {
    }
    %c0 = arith.constant 0 : index
    %c0_1 = arith.constant 0 : index
    %3 = vector.load %arg8[%c0, %c0_1] : memref<8x32xf32, #tpu.memory_space<vmem>>, vector<8x32xf32>
    %c0_2 = arith.constant 0 : index
    %c0_3 = arith.constant 0 : index
    %c0_4 = arith.constant 0 : index
    %4 = vector.load %arg3[%c0_2, %c0_3, %c0_4] : memref<1x8x512xbf16, #tpu.memory_space<vmem>>, vector<1x8x512xbf16>
    %5 = vector.shape_cast %4 : vector<1x8x512xbf16> to vector<8x512xbf16>
    %c0_5 = arith.constant 0 : index
    %c0_6 = arith.constant 0 : index
    %c0_7 = arith.constant 0 : index
    %6 = vector.load %arg4[%c0_5, %c0_6, %c0_7] : memref<1x512x32xbf16, #tpu.memory_space<vmem>>, vector<1x512x32xbf16>
    %7 = vector.shape_cast %6 : vector<1x512x32xbf16> to vector<512x32xbf16>
    %cst = arith.constant dense<0.000000e+00> : vector<8x32xf32>
    %8 = tpu.matmul %5, %7, %cst {dimension_numbers = #tpu.dot_dimension_numbers<[1], [0], [0], [1], [0, 0, 1, 1], [], []>} : vector<8x512xbf16>, vector<512x32xbf16>, vector<8x32xf32> -> vector<8x32xf32>
    %9 = arith.addf %3, %8 : vector<8x32xf32>
    %c0_8 = arith.constant 0 : index
    %c0_9 = arith.constant 0 : index
    %10 = vector.load %arg8[%c0_8, %c0_9] : memref<8x32xf32, #tpu.memory_space<vmem>>, vector<8x32xf32>
    tpu.vector_store %arg8[%c0_8, %c0_9], %9 {strides = array<i32>} : memref<8x32xf32, #tpu.memory_space<vmem>>, vector<8x32xf32>,
    %c0_i32_10 = arith.constant 0 : i32
    %11 = arith.cmpi eq, %arg2, %c0_i32_10 : i32
    %12 = arith.extui %11 : i1 to i32
    %c0_i32_11 = arith.constant 0 : i32
    %13 = arith.cmpi ne, %12, %c0_i32_11 : i32
    scf.if %13 {
      %c0_12 = arith.constant 0 : index
      %c0_13 = arith.constant 0 : index
      %14 = vector.load %arg8[%c0_12, %c0_13] : memref<8x32xf32, #tpu.memory_space<vmem>>, vector<8x32xf32>
      %c0_14 = arith.constant 0 : index
      %c0_15 = arith.constant 0 : index
      %15 = vector.load %arg5[%c0_14, %c0_15] : memref<1x32xf32, #tpu.memory_space<vmem>>, vector<1x32xf32>
      %16 = vector.broadcast %15 : vector<1x32xf32> to vector<8x32xf32>
      %17 = arith.addf %14, %16 : vector<8x32xf32>
      %cst_16 = arith.constant dense<0.000000e+00> : vector<32xf32>
      %18 = vector.multi_reduction <add>, %17, %cst_16 [0] : vector<8x32xf32> to vector<32xf32>
      %19 = vector.shape_cast %18 : vector<32xf32> to vector<1x32xf32>
      %20 = arith.mulf %17, %17 : vector<8x32xf32>
      %cst_17 = arith.constant dense<0.000000e+00> : vector<32xf32>
      %21 = vector.multi_reduction <add>, %20, %cst_17 [0] : vector<8x32xf32> to vector<32xf32>
      %22 = vector.shape_cast %21 : vector<32xf32> to vector<1x32xf32>
      %23 = tpu.concatenate %19, %22 in 0 : vector<1x32xf32>, vector<1x32xf32> -> vector<2x32xf32>
      %24 = vector.shape_cast %23 : vector<2x32xf32> to vector<1x1x2x32xf32>
      %c0_18 = arith.constant 0 : index
      %c0_19 = arith.constant 0 : index
      %c0_20 = arith.constant 0 : index
      %c0_21 = arith.constant 0 : index
      %25 = vector.load %arg7[%c0_18, %c0_19, %c0_20, %c0_21] : memref<1x1x2x32xf32, #tpu.memory_space<vmem>>, vector<1x1x2x32xf32>
      tpu.vector_store %arg7[%c0_18, %c0_19, %c0_20, %c0_21], %24 {strides = array<i32>} : memref<1x1x2x32xf32, #tpu.memory_space<vmem>>, vector<1x1x2x32xf32>,
      %26 = arith.truncf %17 : vector<8x32xf32> to vector<8x32xbf16>
      %27 = vector.shape_cast %26 : vector<8x32xbf16> to vector<1x8x32xbf16>
      %c0_22 = arith.constant 0 : index
      %c0_23 = arith.constant 0 : index
      %c0_24 = arith.constant 0 : index
      %28 = vector.load %arg6[%c0_22, %c0_23, %c0_24] : memref<1x8x32xbf16, #tpu.memory_space<vmem>>, vector<1x8x32xbf16>
      tpu.vector_store %arg6[%c0_22, %c0_23, %c0_24], %27 {strides = array<i32>} : memref<1x8x32xbf16, #tpu.memory_space<vmem>>, vector<1x8x32xbf16>,
    } else {
    }
    return
  }
  func.func @transform_0(%arg0: i32, %arg1: i32, %arg2: i32) -> (i32, i32, i32) {
    %c0_i32 = arith.constant 0 : i32
    return %arg0, %arg1, %arg2 : i32, i32, i32
  }
  func.func @transform_1(%arg0: i32, %arg1: i32, %arg2: i32) -> (i32, i32, i32) {
    %c0_i32 = arith.constant 0 : i32
    %c0_i32_0 = arith.constant 0 : i32
    return %arg0, %arg2, %c0_i32 : i32, i32, i32
  }
  func.func @transform_2(%arg0: i32, %arg1: i32, %arg2: i32) -> (i32, i32) {
    %c0_i32 = arith.constant 0 : i32
    %c0_i32_0 = arith.constant 0 : i32
    %c0_i32_1 = arith.constant 0 : i32
    return %c0_i32, %c0_i32_0 : i32, i32
  }
  func.func @transform_3(%arg0: i32, %arg1: i32, %arg2: i32) -> (i32, i32, i32) {
    %c0_i32 = arith.constant 0 : i32
    %c0_i32_0 = arith.constant 0 : i32
    return %arg0, %arg1, %c0_i32 : i32, i32, i32
  }
  func.func @transform_4(%arg0: i32, %arg1: i32, %arg2: i32) -> (i32, i32, i32, i32) {
    %c0_i32 = arith.constant 0 : i32
    %c0_i32_0 = arith.constant 0 : i32
    %c0_i32_1 = arith.constant 0 : i32
    return %arg0, %arg1, %c0_i32, %c0_i32_0 : i32, i32, i32, i32
  }
}

module attributes {stable_mosaic.version = 11 : i64} {
  func.func @_fused_mm_kernel(%arg0: i32, %arg1: i32, %arg2: i32, %arg3: memref<1x32x256xbf16, #tpu.memory_space<vmem>>, %arg4: memref<1x256x16xbf16, #tpu.memory_space<vmem>>, %arg5: memref<1x16xf32, #tpu.memory_space<vmem>>, %arg6: memref<1x32x16xbf16, #tpu.memory_space<vmem>>, %arg7: memref<1x1x2x16xf32, #tpu.memory_space<vmem>>, %arg8: memref<32x16xf32, #tpu.memory_space<vmem>>) attributes {dimension_semantics = [#tpu.dimension_semantics<parallel>, #tpu.dimension_semantics<parallel>, #tpu.dimension_semantics<arbitrary>], iteration_bounds = array<i64: 4, 1, 1>, scalar_prefetch = 0 : i64, scratch_operands = 1 : i64, tpu.core_type = #tpu.core_type<tc>, window_params = [{transform_indices = @transform_0, window_bounds = array<i64: 1, 32, 256>}, {transform_indices = @transform_1, window_bounds = array<i64: 1, 256, 16>}, {pipeline_mode = #tpu.pipeline_mode<synchronous>, transform_indices = @transform_2, window_bounds = array<i64: 1, 16>}, {transform_indices = @transform_3, window_bounds = array<i64: 1, 32, 16>}, {transform_indices = @transform_4, window_bounds = array<i64: 1, 1, 2, 16>}]} {
    %c0_i32 = arith.constant 0 : i32
    %0 = arith.cmpi eq, %arg2, %c0_i32 : i32
    %1 = arith.extui %0 : i1 to i32
    %c0_i32_0 = arith.constant 0 : i32
    %2 = arith.cmpi ne, %1, %c0_i32_0 : i32
    scf.if %2 {
      %cst_12 = arith.constant 0.000000e+00 : f32
      %14 = vector.broadcast %cst_12 : f32 to vector<32x16xf32>
      %c0_13 = arith.constant 0 : index
      %c0_14 = arith.constant 0 : index
      %15 = vector.load %arg8[%c0_13, %c0_14] : memref<32x16xf32, #tpu.memory_space<vmem>>, vector<32x16xf32>
      tpu.vector_store %arg8[%c0_13, %c0_14], %14 {strides = array<i32>} : memref<32x16xf32, #tpu.memory_space<vmem>>, vector<32x16xf32>,
    } else {
    }
    %c0 = arith.constant 0 : index
    %c0_1 = arith.constant 0 : index
    %3 = vector.load %arg8[%c0, %c0_1] : memref<32x16xf32, #tpu.memory_space<vmem>>, vector<32x16xf32>
    %c0_2 = arith.constant 0 : index
    %c0_3 = arith.constant 0 : index
    %c0_4 = arith.constant 0 : index
    %4 = vector.load %arg3[%c0_2, %c0_3, %c0_4] : memref<1x32x256xbf16, #tpu.memory_space<vmem>>, vector<1x32x256xbf16>
    %5 = vector.shape_cast %4 : vector<1x32x256xbf16> to vector<32x256xbf16>
    %c0_5 = arith.constant 0 : index
    %c0_6 = arith.constant 0 : index
    %c0_7 = arith.constant 0 : index
    %6 = vector.load %arg4[%c0_5, %c0_6, %c0_7] : memref<1x256x16xbf16, #tpu.memory_space<vmem>>, vector<1x256x16xbf16>
    %7 = vector.shape_cast %6 : vector<1x256x16xbf16> to vector<256x16xbf16>
    %cst = arith.constant dense<0.000000e+00> : vector<32x16xf32>
    %8 = tpu.matmul %5, %7, %cst {dimension_numbers = #tpu.dot_dimension_numbers<[1], [0], [0], [1], [0, 0, 1, 1], [], []>} : vector<32x256xbf16>, vector<256x16xbf16>, vector<32x16xf32> -> vector<32x16xf32>
    %9 = arith.addf %3, %8 : vector<32x16xf32>
    %c0_8 = arith.constant 0 : index
    %c0_9 = arith.constant 0 : index
    %10 = vector.load %arg8[%c0_8, %c0_9] : memref<32x16xf32, #tpu.memory_space<vmem>>, vector<32x16xf32>
    tpu.vector_store %arg8[%c0_8, %c0_9], %9 {strides = array<i32>} : memref<32x16xf32, #tpu.memory_space<vmem>>, vector<32x16xf32>,
    %c0_i32_10 = arith.constant 0 : i32
    %11 = arith.cmpi eq, %arg2, %c0_i32_10 : i32
    %12 = arith.extui %11 : i1 to i32
    %c0_i32_11 = arith.constant 0 : i32
    %13 = arith.cmpi ne, %12, %c0_i32_11 : i32
    scf.if %13 {
      %c0_12 = arith.constant 0 : index
      %c0_13 = arith.constant 0 : index
      %14 = vector.load %arg8[%c0_12, %c0_13] : memref<32x16xf32, #tpu.memory_space<vmem>>, vector<32x16xf32>
      %c0_14 = arith.constant 0 : index
      %c0_15 = arith.constant 0 : index
      %15 = vector.load %arg5[%c0_14, %c0_15] : memref<1x16xf32, #tpu.memory_space<vmem>>, vector<1x16xf32>
      %16 = vector.broadcast %15 : vector<1x16xf32> to vector<32x16xf32>
      %17 = arith.addf %14, %16 : vector<32x16xf32>
      %cst_16 = arith.constant dense<0.000000e+00> : vector<16xf32>
      %18 = vector.multi_reduction <add>, %17, %cst_16 [0] : vector<32x16xf32> to vector<16xf32>
      %19 = vector.shape_cast %18 : vector<16xf32> to vector<1x16xf32>
      %20 = arith.mulf %17, %17 : vector<32x16xf32>
      %cst_17 = arith.constant dense<0.000000e+00> : vector<16xf32>
      %21 = vector.multi_reduction <add>, %20, %cst_17 [0] : vector<32x16xf32> to vector<16xf32>
      %22 = vector.shape_cast %21 : vector<16xf32> to vector<1x16xf32>
      %23 = tpu.concatenate %19, %22 in 0 : vector<1x16xf32>, vector<1x16xf32> -> vector<2x16xf32>
      %24 = vector.shape_cast %23 : vector<2x16xf32> to vector<1x1x2x16xf32>
      %c0_18 = arith.constant 0 : index
      %c0_19 = arith.constant 0 : index
      %c0_20 = arith.constant 0 : index
      %c0_21 = arith.constant 0 : index
      %25 = vector.load %arg7[%c0_18, %c0_19, %c0_20, %c0_21] : memref<1x1x2x16xf32, #tpu.memory_space<vmem>>, vector<1x1x2x16xf32>
      tpu.vector_store %arg7[%c0_18, %c0_19, %c0_20, %c0_21], %24 {strides = array<i32>} : memref<1x1x2x16xf32, #tpu.memory_space<vmem>>, vector<1x1x2x16xf32>,
      %26 = arith.truncf %17 : vector<32x16xf32> to vector<32x16xbf16>
      %27 = vector.shape_cast %26 : vector<32x16xbf16> to vector<1x32x16xbf16>
      %c0_22 = arith.constant 0 : index
      %c0_23 = arith.constant 0 : index
      %c0_24 = arith.constant 0 : index
      %28 = vector.load %arg6[%c0_22, %c0_23, %c0_24] : memref<1x32x16xbf16, #tpu.memory_space<vmem>>, vector<1x32x16xbf16>
      tpu.vector_store %arg6[%c0_22, %c0_23, %c0_24], %27 {strides = array<i32>} : memref<1x32x16xbf16, #tpu.memory_space<vmem>>, vector<1x32x16xbf16>,
    } else {
    }
    return
  }
  func.func @transform_0(%arg0: i32, %arg1: i32, %arg2: i32) -> (i32, i32, i32) {
    %c0_i32 = arith.constant 0 : i32
    return %arg0, %arg1, %arg2 : i32, i32, i32
  }
  func.func @transform_1(%arg0: i32, %arg1: i32, %arg2: i32) -> (i32, i32, i32) {
    %c0_i32 = arith.constant 0 : i32
    %c0_i32_0 = arith.constant 0 : i32
    return %arg0, %arg2, %c0_i32 : i32, i32, i32
  }
  func.func @transform_2(%arg0: i32, %arg1: i32, %arg2: i32) -> (i32, i32) {
    %c0_i32 = arith.constant 0 : i32
    %c0_i32_0 = arith.constant 0 : i32
    %c0_i32_1 = arith.constant 0 : i32
    return %c0_i32, %c0_i32_0 : i32, i32
  }
  func.func @transform_3(%arg0: i32, %arg1: i32, %arg2: i32) -> (i32, i32, i32) {
    %c0_i32 = arith.constant 0 : i32
    %c0_i32_0 = arith.constant 0 : i32
    return %arg0, %arg1, %c0_i32 : i32, i32, i32
  }
  func.func @transform_4(%arg0: i32, %arg1: i32, %arg2: i32) -> (i32, i32, i32, i32) {
    %c0_i32 = arith.constant 0 : i32
    %c0_i32_0 = arith.constant 0 : i32
    %c0_i32_1 = arith.constant 0 : i32
    return %arg0, %arg1, %c0_i32, %c0_i32_0 : i32, i32, i32, i32
  }
}

module attributes {stable_mosaic.version = 11 : i64} {
  func.func @_fused_mm_kernel(%arg0: i32, %arg1: i32, %arg2: i32, %arg3: memref<1x128x128xbf16, #tpu.memory_space<vmem>>, %arg4: memref<1x128x8xbf16, #tpu.memory_space<vmem>>, %arg5: memref<1x8xf32, #tpu.memory_space<vmem>>, %arg6: memref<1x128x8xbf16, #tpu.memory_space<vmem>>, %arg7: memref<1x1x2x8xf32, #tpu.memory_space<vmem>>, %arg8: memref<128x8xf32, #tpu.memory_space<vmem>>) attributes {dimension_semantics = [#tpu.dimension_semantics<parallel>, #tpu.dimension_semantics<parallel>, #tpu.dimension_semantics<arbitrary>], iteration_bounds = array<i64: 4, 1, 1>, scalar_prefetch = 0 : i64, scratch_operands = 1 : i64, tpu.core_type = #tpu.core_type<tc>, window_params = [{transform_indices = @transform_0, window_bounds = array<i64: 1, 128, 128>}, {transform_indices = @transform_1, window_bounds = array<i64: 1, 128, 8>}, {pipeline_mode = #tpu.pipeline_mode<synchronous>, transform_indices = @transform_2, window_bounds = array<i64: 1, 8>}, {transform_indices = @transform_3, window_bounds = array<i64: 1, 128, 8>}, {transform_indices = @transform_4, window_bounds = array<i64: 1, 1, 2, 8>}]} {
    %c0_i32 = arith.constant 0 : i32
    %0 = arith.cmpi eq, %arg2, %c0_i32 : i32
    %1 = arith.extui %0 : i1 to i32
    %c0_i32_0 = arith.constant 0 : i32
    %2 = arith.cmpi ne, %1, %c0_i32_0 : i32
    scf.if %2 {
      %cst_12 = arith.constant 0.000000e+00 : f32
      %14 = vector.broadcast %cst_12 : f32 to vector<128x8xf32>
      %c0_13 = arith.constant 0 : index
      %c0_14 = arith.constant 0 : index
      %15 = vector.load %arg8[%c0_13, %c0_14] : memref<128x8xf32, #tpu.memory_space<vmem>>, vector<128x8xf32>
      tpu.vector_store %arg8[%c0_13, %c0_14], %14 {strides = array<i32>} : memref<128x8xf32, #tpu.memory_space<vmem>>, vector<128x8xf32>,
    } else {
    }
    %c0 = arith.constant 0 : index
    %c0_1 = arith.constant 0 : index
    %3 = vector.load %arg8[%c0, %c0_1] : memref<128x8xf32, #tpu.memory_space<vmem>>, vector<128x8xf32>
    %c0_2 = arith.constant 0 : index
    %c0_3 = arith.constant 0 : index
    %c0_4 = arith.constant 0 : index
    %4 = vector.load %arg3[%c0_2, %c0_3, %c0_4] : memref<1x128x128xbf16, #tpu.memory_space<vmem>>, vector<1x128x128xbf16>
    %5 = vector.shape_cast %4 : vector<1x128x128xbf16> to vector<128x128xbf16>
    %c0_5 = arith.constant 0 : index
    %c0_6 = arith.constant 0 : index
    %c0_7 = arith.constant 0 : index
    %6 = vector.load %arg4[%c0_5, %c0_6, %c0_7] : memref<1x128x8xbf16, #tpu.memory_space<vmem>>, vector<1x128x8xbf16>
    %7 = vector.shape_cast %6 : vector<1x128x8xbf16> to vector<128x8xbf16>
    %cst = arith.constant dense<0.000000e+00> : vector<128x8xf32>
    %8 = tpu.matmul %5, %7, %cst {dimension_numbers = #tpu.dot_dimension_numbers<[1], [0], [0], [1], [0, 0, 1, 1], [], []>} : vector<128x128xbf16>, vector<128x8xbf16>, vector<128x8xf32> -> vector<128x8xf32>
    %9 = arith.addf %3, %8 : vector<128x8xf32>
    %c0_8 = arith.constant 0 : index
    %c0_9 = arith.constant 0 : index
    %10 = vector.load %arg8[%c0_8, %c0_9] : memref<128x8xf32, #tpu.memory_space<vmem>>, vector<128x8xf32>
    tpu.vector_store %arg8[%c0_8, %c0_9], %9 {strides = array<i32>} : memref<128x8xf32, #tpu.memory_space<vmem>>, vector<128x8xf32>,
    %c0_i32_10 = arith.constant 0 : i32
    %11 = arith.cmpi eq, %arg2, %c0_i32_10 : i32
    %12 = arith.extui %11 : i1 to i32
    %c0_i32_11 = arith.constant 0 : i32
    %13 = arith.cmpi ne, %12, %c0_i32_11 : i32
    scf.if %13 {
      %c0_12 = arith.constant 0 : index
      %c0_13 = arith.constant 0 : index
      %14 = vector.load %arg8[%c0_12, %c0_13] : memref<128x8xf32, #tpu.memory_space<vmem>>, vector<128x8xf32>
      %c0_14 = arith.constant 0 : index
      %c0_15 = arith.constant 0 : index
      %15 = vector.load %arg5[%c0_14, %c0_15] : memref<1x8xf32, #tpu.memory_space<vmem>>, vector<1x8xf32>
      %16 = vector.broadcast %15 : vector<1x8xf32> to vector<128x8xf32>
      %17 = arith.addf %14, %16 : vector<128x8xf32>
      %cst_16 = arith.constant dense<0.000000e+00> : vector<8xf32>
      %18 = vector.multi_reduction <add>, %17, %cst_16 [0] : vector<128x8xf32> to vector<8xf32>
      %19 = vector.shape_cast %18 : vector<8xf32> to vector<1x8xf32>
      %20 = arith.mulf %17, %17 : vector<128x8xf32>
      %cst_17 = arith.constant dense<0.000000e+00> : vector<8xf32>
      %21 = vector.multi_reduction <add>, %20, %cst_17 [0] : vector<128x8xf32> to vector<8xf32>
      %22 = vector.shape_cast %21 : vector<8xf32> to vector<1x8xf32>
      %23 = tpu.concatenate %19, %22 in 0 : vector<1x8xf32>, vector<1x8xf32> -> vector<2x8xf32>
      %24 = vector.shape_cast %23 : vector<2x8xf32> to vector<1x1x2x8xf32>
      %c0_18 = arith.constant 0 : index
      %c0_19 = arith.constant 0 : index
      %c0_20 = arith.constant 0 : index
      %c0_21 = arith.constant 0 : index
      %25 = vector.load %arg7[%c0_18, %c0_19, %c0_20, %c0_21] : memref<1x1x2x8xf32, #tpu.memory_space<vmem>>, vector<1x1x2x8xf32>
      tpu.vector_store %arg7[%c0_18, %c0_19, %c0_20, %c0_21], %24 {strides = array<i32>} : memref<1x1x2x8xf32, #tpu.memory_space<vmem>>, vector<1x1x2x8xf32>,
      %26 = arith.truncf %17 : vector<128x8xf32> to vector<128x8xbf16>
      %27 = vector.shape_cast %26 : vector<128x8xbf16> to vector<1x128x8xbf16>
      %c0_22 = arith.constant 0 : index
      %c0_23 = arith.constant 0 : index
      %c0_24 = arith.constant 0 : index
      %28 = vector.load %arg6[%c0_22, %c0_23, %c0_24] : memref<1x128x8xbf16, #tpu.memory_space<vmem>>, vector<1x128x8xbf16>
      tpu.vector_store %arg6[%c0_22, %c0_23, %c0_24], %27 {strides = array<i32>} : memref<1x128x8xbf16, #tpu.memory_space<vmem>>, vector<1x128x8xbf16>,
    } else {
    }
    return
  }
  func.func @transform_0(%arg0: i32, %arg1: i32, %arg2: i32) -> (i32, i32, i32) {
    %c0_i32 = arith.constant 0 : i32
    return %arg0, %arg1, %arg2 : i32, i32, i32
  }
  func.func @transform_1(%arg0: i32, %arg1: i32, %arg2: i32) -> (i32, i32, i32) {
    %c0_i32 = arith.constant 0 : i32
    %c0_i32_0 = arith.constant 0 : i32
    return %arg0, %arg2, %c0_i32 : i32, i32, i32
  }
  func.func @transform_2(%arg0: i32, %arg1: i32, %arg2: i32) -> (i32, i32) {
    %c0_i32 = arith.constant 0 : i32
    %c0_i32_0 = arith.constant 0 : i32
    %c0_i32_1 = arith.constant 0 : i32
    return %c0_i32, %c0_i32_0 : i32, i32
  }
  func.func @transform_3(%arg0: i32, %arg1: i32, %arg2: i32) -> (i32, i32, i32) {
    %c0_i32 = arith.constant 0 : i32
    %c0_i32_0 = arith.constant 0 : i32
    return %arg0, %arg1, %c0_i32 : i32, i32, i32
  }
  func.func @transform_4(%arg0: i32, %arg1: i32, %arg2: i32) -> (i32, i32, i32, i32) {
    %c0_i32 = arith.constant 0 : i32
    %c0_i32_0 = arith.constant 0 : i32
    %c0_i32_1 = arith.constant 0 : i32
    return %arg0, %arg1, %c0_i32, %c0_i32_0 : i32, i32, i32, i32
  }
}

module attributes {stable_mosaic.version = 11 : i64} {
  func.func @_fused_mm_kernel(%arg0: i32, %arg1: i32, %arg2: i32, %arg3: memref<1x512x64xbf16, #tpu.memory_space<vmem>>, %arg4: memref<1x64x4xbf16, #tpu.memory_space<vmem>>, %arg5: memref<1x4xf32, #tpu.memory_space<vmem>>, %arg6: memref<1x512x4xf32, #tpu.memory_space<vmem>>, %arg7: memref<1x1x2x4xf32, #tpu.memory_space<vmem>>, %arg8: memref<512x4xf32, #tpu.memory_space<vmem>>) attributes {dimension_semantics = [#tpu.dimension_semantics<parallel>, #tpu.dimension_semantics<parallel>, #tpu.dimension_semantics<arbitrary>], iteration_bounds = array<i64: 4, 1, 1>, scalar_prefetch = 0 : i64, scratch_operands = 1 : i64, tpu.core_type = #tpu.core_type<tc>, window_params = [{transform_indices = @transform_0, window_bounds = array<i64: 1, 512, 64>}, {transform_indices = @transform_1, window_bounds = array<i64: 1, 64, 4>}, {pipeline_mode = #tpu.pipeline_mode<synchronous>, transform_indices = @transform_2, window_bounds = array<i64: 1, 4>}, {transform_indices = @transform_3, window_bounds = array<i64: 1, 512, 4>}, {transform_indices = @transform_4, window_bounds = array<i64: 1, 1, 2, 4>}]} {
    %c0_i32 = arith.constant 0 : i32
    %0 = arith.cmpi eq, %arg2, %c0_i32 : i32
    %1 = arith.extui %0 : i1 to i32
    %c0_i32_0 = arith.constant 0 : i32
    %2 = arith.cmpi ne, %1, %c0_i32_0 : i32
    scf.if %2 {
      %cst_12 = arith.constant 0.000000e+00 : f32
      %14 = vector.broadcast %cst_12 : f32 to vector<512x4xf32>
      %c0_13 = arith.constant 0 : index
      %c0_14 = arith.constant 0 : index
      %15 = vector.load %arg8[%c0_13, %c0_14] : memref<512x4xf32, #tpu.memory_space<vmem>>, vector<512x4xf32>
      tpu.vector_store %arg8[%c0_13, %c0_14], %14 {strides = array<i32>} : memref<512x4xf32, #tpu.memory_space<vmem>>, vector<512x4xf32>,
    } else {
    }
    %c0 = arith.constant 0 : index
    %c0_1 = arith.constant 0 : index
    %3 = vector.load %arg8[%c0, %c0_1] : memref<512x4xf32, #tpu.memory_space<vmem>>, vector<512x4xf32>
    %c0_2 = arith.constant 0 : index
    %c0_3 = arith.constant 0 : index
    %c0_4 = arith.constant 0 : index
    %4 = vector.load %arg3[%c0_2, %c0_3, %c0_4] : memref<1x512x64xbf16, #tpu.memory_space<vmem>>, vector<1x512x64xbf16>
    %5 = vector.shape_cast %4 : vector<1x512x64xbf16> to vector<512x64xbf16>
    %c0_5 = arith.constant 0 : index
    %c0_6 = arith.constant 0 : index
    %c0_7 = arith.constant 0 : index
    %6 = vector.load %arg4[%c0_5, %c0_6, %c0_7] : memref<1x64x4xbf16, #tpu.memory_space<vmem>>, vector<1x64x4xbf16>
    %7 = vector.shape_cast %6 : vector<1x64x4xbf16> to vector<64x4xbf16>
    %cst = arith.constant dense<0.000000e+00> : vector<512x4xf32>
    %8 = tpu.matmul %5, %7, %cst {dimension_numbers = #tpu.dot_dimension_numbers<[1], [0], [0], [1], [0, 0, 1, 1], [], []>} : vector<512x64xbf16>, vector<64x4xbf16>, vector<512x4xf32> -> vector<512x4xf32>
    %9 = arith.addf %3, %8 : vector<512x4xf32>
    %c0_8 = arith.constant 0 : index
    %c0_9 = arith.constant 0 : index
    %10 = vector.load %arg8[%c0_8, %c0_9] : memref<512x4xf32, #tpu.memory_space<vmem>>, vector<512x4xf32>
    tpu.vector_store %arg8[%c0_8, %c0_9], %9 {strides = array<i32>} : memref<512x4xf32, #tpu.memory_space<vmem>>, vector<512x4xf32>,
    %c0_i32_10 = arith.constant 0 : i32
    %11 = arith.cmpi eq, %arg2, %c0_i32_10 : i32
    %12 = arith.extui %11 : i1 to i32
    %c0_i32_11 = arith.constant 0 : i32
    %13 = arith.cmpi ne, %12, %c0_i32_11 : i32
    scf.if %13 {
      %c0_12 = arith.constant 0 : index
      %c0_13 = arith.constant 0 : index
      %14 = vector.load %arg8[%c0_12, %c0_13] : memref<512x4xf32, #tpu.memory_space<vmem>>, vector<512x4xf32>
      %c0_14 = arith.constant 0 : index
      %c0_15 = arith.constant 0 : index
      %15 = vector.load %arg5[%c0_14, %c0_15] : memref<1x4xf32, #tpu.memory_space<vmem>>, vector<1x4xf32>
      %16 = vector.broadcast %15 : vector<1x4xf32> to vector<512x4xf32>
      %17 = arith.addf %14, %16 : vector<512x4xf32>
      %cst_16 = arith.constant dense<0.000000e+00> : vector<4xf32>
      %18 = vector.multi_reduction <add>, %17, %cst_16 [0] : vector<512x4xf32> to vector<4xf32>
      %19 = vector.shape_cast %18 : vector<4xf32> to vector<1x4xf32>
      %20 = arith.mulf %17, %17 : vector<512x4xf32>
      %cst_17 = arith.constant dense<0.000000e+00> : vector<4xf32>
      %21 = vector.multi_reduction <add>, %20, %cst_17 [0] : vector<512x4xf32> to vector<4xf32>
      %22 = vector.shape_cast %21 : vector<4xf32> to vector<1x4xf32>
      %23 = tpu.concatenate %19, %22 in 0 : vector<1x4xf32>, vector<1x4xf32> -> vector<2x4xf32>
      %24 = vector.shape_cast %23 : vector<2x4xf32> to vector<1x1x2x4xf32>
      %c0_18 = arith.constant 0 : index
      %c0_19 = arith.constant 0 : index
      %c0_20 = arith.constant 0 : index
      %c0_21 = arith.constant 0 : index
      %25 = vector.load %arg7[%c0_18, %c0_19, %c0_20, %c0_21] : memref<1x1x2x4xf32, #tpu.memory_space<vmem>>, vector<1x1x2x4xf32>
      tpu.vector_store %arg7[%c0_18, %c0_19, %c0_20, %c0_21], %24 {strides = array<i32>} : memref<1x1x2x4xf32, #tpu.memory_space<vmem>>, vector<1x1x2x4xf32>,
      %26 = math.tanh %17 : vector<512x4xf32>
      %27 = vector.shape_cast %26 : vector<512x4xf32> to vector<1x512x4xf32>
      %c0_22 = arith.constant 0 : index
      %c0_23 = arith.constant 0 : index
      %c0_24 = arith.constant 0 : index
      %28 = vector.load %arg6[%c0_22, %c0_23, %c0_24] : memref<1x512x4xf32, #tpu.memory_space<vmem>>, vector<1x512x4xf32>
      tpu.vector_store %arg6[%c0_22, %c0_23, %c0_24], %27 {strides = array<i32>} : memref<1x512x4xf32, #tpu.memory_space<vmem>>, vector<1x512x4xf32>,
    } else {
    }
    return
  }
  func.func @transform_0(%arg0: i32, %arg1: i32, %arg2: i32) -> (i32, i32, i32) {
    %c0_i32 = arith.constant 0 : i32
    return %arg0, %arg1, %arg2 : i32, i32, i32
  }
  func.func @transform_1(%arg0: i32, %arg1: i32, %arg2: i32) -> (i32, i32, i32) {
    %c0_i32 = arith.constant 0 : i32
    %c0_i32_0 = arith.constant 0 : i32
    return %arg0, %arg2, %c0_i32 : i32, i32, i32
  }
  func.func @transform_2(%arg0: i32, %arg1: i32, %arg2: i32) -> (i32, i32) {
    %c0_i32 = arith.constant 0 : i32
    %c0_i32_0 = arith.constant 0 : i32
    %c0_i32_1 = arith.constant 0 : i32
    return %c0_i32, %c0_i32_0 : i32, i32
  }
  func.func @transform_3(%arg0: i32, %arg1: i32, %arg2: i32) -> (i32, i32, i32) {
    %c0_i32 = arith.constant 0 : i32
    %c0_i32_0 = arith.constant 0 : i32
    return %arg0, %arg1, %c0_i32 : i32, i32, i32
  }
  func.func @transform_4(%arg0: i32, %arg1: i32, %arg2: i32) -> (i32, i32, i32, i32) {
    %c0_i32 = arith.constant 0 : i32
    %c0_i32_0 = arith.constant 0 : i32
    %c0_i32_1 = arith.constant 0 : i32
    return %arg0, %arg1, %c0_i32, %c0_i32_0 : i32, i32, i32, i32
  }
}

</mosaic_0001>

<bundles_post_ra>
// kernel: unet_forward.10
= control target key start
LH: loop header
LB: loop body
LE: loop exit
PB: predicated region body
PF: predicated region fallthrough
CT: control target
= control target key end

     0   :  { %vm22_vm0 = vcmask 64512   ;;  %vm407_vm1 = vcmask 523264   ;;  %v2107_v3 = vmov 0.0   ;;  %s3213_s0 = inlined_call_operand.vmem [shape: bf16[1,512,64], index: 0, kind: input, shape index: {}]   ;;  %s3214_s1 = inlined_call_operand.vmem [shape: bf16[1,64,8], index: 1, kind: input, shape index: {}]   ;;  %s3215_s2 = inlined_call_operand.vmem [shape: f32[1,8], index: 2, kind: input, shape index: {}]   ;;  %s3216_s3 = inlined_call_operand.vmem [shape: bf16[1,512,8], index: 3, kind: output, shape index: {0}]   ;;  %s3217_s4 = inlined_call_operand.hbm [shape: f32[1,1,2,8], index: 4, kind: output, shape index: {1}]  }
   0x1   :  { %v2048_v0 = vld [vmem:[%s3214_s1 + $0x18] sm:$0xff]   ;;  %v2140_v1 = vld [vmem:[%s3214_s1 + $0x10] sm:$0xff]   ;;  %v2145_v2 = vld [vmem:[%s3214_s1 + $0x8] sm:$0xff]   ;;  %25 = vst.msk [vmem:[#allocation2 + $0x10] sm:$0xff] %vm22_vm0, %v2107_v3 }
   0x2   :  { %1966 = vmatprep.subr.bf16.mxu0 %v2048_v0  ;;  %2038 = vmatprep.subr.bf16.mxu1 %v2048_v0  ;;  %23 = vst.msk [vmem:[#allocation2] sm:$0xff] %vm22_vm0, %v2107_v3  ;;  %24 = vst.msk [vmem:[#allocation2 + $0x8] sm:$0xff] %vm22_vm0, %v2107_v3  ;;  %v2052_v4 = vld [vmem:[%s3213_s0] sm:$0xff]   ;;  %v2053_v6 = vld [vmem:[%s3213_s0 + $0x8] sm:$0xff]  }
   0x3   :  { %1967 = vmatpush3.bf16.msra.mxu0 %v2048_v0  ;;  %2042 = vmatpush3.bf16.msra.mxu1 %v2048_v0  ;;  %26 = vst.msk [vmem:[#allocation2 + $0x18] sm:$0xff] %vm22_vm0, %v2107_v3  ;;  %27 = vst.msk [vmem:[#allocation2 + $0x20] sm:$0xff] %vm22_vm0, %v2107_v3  ;;  %v2051_v5 = vld [vmem:[%s3214_s1] sm:$0xff]   ;;  %v2054_v7 = vld [vmem:[%s3213_s0 + $0x10] sm:$0xff]  }
   0x4   :  { %28 = vst.msk [vmem:[#allocation2 + $0x28] sm:$0xff] %vm22_vm0, %v2107_v3  ;;  %29 = vst.msk [vmem:[#allocation2 + $0x30] sm:$0xff] %vm22_vm0, %v2107_v3  ;;  %1968 = vmatprep.subr.bf16.mxu0 %v2140_v1  ;;  %2039 = vmatprep.subr.bf16.mxu1 %v2140_v1  ;;  %v2055_v8 = vld [vmem:[%s3213_s0 + $0x18] sm:$0xff]   ;;  %v2068_v9 = vld [vmem:[%s3213_s0 + $0x80] sm:$0xff]  }
   0x5   :  { %30 = vst.msk [vmem:[#allocation2 + $0x38] sm:$0xff] %vm22_vm0, %v2107_v3  ;;  %31 = vst.msk [vmem:[#allocation2 + $0x40] sm:$0xff] %vm22_vm0, %v2107_v3  ;;  %1974 = vmatprep.mubr.msk.bf16.mxu0 %vm407_vm1, %v2052_v4  ;;  %v2069_v10 = vld [vmem:[%s3213_s0 + $0x88] sm:$0xff]   ;;  %2006 = vmatprep.mubr.msk.bf16.mxu1 %vm407_vm1, %v2068_v9  ;;  %v2070_v11 = vld [vmem:[%s3213_s0 + $0x90] sm:$0xff]  }
   0x6   :  { %32 = vst.msk [vmem:[#allocation2 + $0x48] sm:$0xff] %vm22_vm0, %v2107_v3  ;;  %33 = vst.msk [vmem:[#allocation2 + $0x50] sm:$0xff] %vm22_vm0, %v2107_v3  ;;  %v2056_v12 = vld [vmem:[%s3213_s0 + $0x20] sm:$0xff]   ;;  %v2071_v13 = vld [vmem:[%s3213_s0 + $0x98] sm:$0xff]  }
   0x7   :  { %34 = vst.msk [vmem:[#allocation2 + $0x58] sm:$0xff] %vm22_vm0, %v2107_v3  ;;  %35 = vst.msk [vmem:[#allocation2 + $0x60] sm:$0xff] %vm22_vm0, %v2107_v3  ;;  %1969 = vmatpush3.bf16.msra.mxu0 %v2140_v1  ;;  %2043 = vmatpush3.bf16.msra.mxu1 %v2140_v1  ;;  %v2072_v14 = vld [vmem:[%s3213_s0 + $0xa0] sm:$0xff]   ;;  %v2057_v15 = vld [vmem:[%s3213_s0 + $0x28] sm:$0xff]  }
   0x8   :  { %36 = vst.msk [vmem:[#allocation2 + $0x68] sm:$0xff] %vm22_vm0, %v2107_v3  ;;  %37 = vst.msk [vmem:[#allocation2 + $0x70] sm:$0xff] %vm22_vm0, %v2107_v3  ;;  %1970 = vmatprep.subr.bf16.mxu0 %v2145_v2  ;;  %2040 = vmatprep.subr.bf16.mxu1 %v2145_v2  ;;  %v2058_v16 = vld [vmem:[%s3213_s0 + $0x30] sm:$0xff]   ;;  %v2073_v17 = vld [vmem:[%s3213_s0 + $0xa8] sm:$0xff]  }
   0x9   :  { %38 = vst.msk [vmem:[#allocation2 + $0x78] sm:$0xff] %vm22_vm0, %v2107_v3  ;;  %39 = vst.msk [vmem:[#allocation2 + $0x80] sm:$0xff] %vm22_vm0, %v2107_v3  ;;  %v2074_v18 = vld [vmem:[%s3213_s0 + $0xb0] sm:$0xff]  }
   0xa   :  { %40 = vst.msk [vmem:[#allocation2 + $0x88] sm:$0xff] %vm22_vm0, %v2107_v3  ;;  %41 = vst.msk [vmem:[#allocation2 + $0x90] sm:$0xff] %vm22_vm0, %v2107_v3 }
   0xb   :  { %42 = vst.msk [vmem:[#allocation2 + $0x98] sm:$0xff] %vm22_vm0, %v2107_v3  ;;  %43 = vst.msk [vmem:[#allocation2 + $0xa0] sm:$0xff] %vm22_vm0, %v2107_v3  ;;  %1971 = vmatpush3.bf16.msra.mxu0 %v2145_v2  ;;  %2044 = vmatpush3.bf16.msra.mxu1 %v2145_v2 }
   0xc   :  { %44 = vst.msk [vmem:[#allocation2 + $0xa8] sm:$0xff] %vm22_vm0, %v2107_v3  ;;  %45 = vst.msk [vmem:[#allocation2 + $0xb0] sm:$0xff] %vm22_vm0, %v2107_v3  ;;  %1972 = vmatprep.subr.bf16.mxu0 %v2051_v5  ;;  %2041 = vmatprep.subr.bf16.mxu1 %v2051_v5 }
   0xd   :  { %46 = vst.msk [vmem:[#allocation2 + $0xb8] sm:$0xff] %vm22_vm0, %v2107_v3  ;;  %47 = vst.msk [vmem:[#allocation2 + $0xc0] sm:$0xff] %vm22_vm0, %v2107_v3 }
   0xe   :  { %48 = vst.msk [vmem:[#allocation2 + $0xc8] sm:$0xff] %vm22_vm0, %v2107_v3  ;;  %49 = vst.msk [vmem:[#allocation2 + $0xd0] sm:$0xff] %vm22_vm0, %v2107_v3 }
   0xf   :  { %50 = vst.msk [vmem:[#allocation2 + $0xd8] sm:$0xff] %vm22_vm0, %v2107_v3  ;;  %51 = vst.msk [vmem:[#allocation2 + $0xe0] sm:$0xff] %vm22_vm0, %v2107_v3  ;;  %1973 = vmatpush3.bf16.msra.mxu0 %v2051_v5  ;;  %2045 = vmatpush3.bf16.msra.mxu1 %v2051_v5 }
  0x10   :  { %52 = vst.msk [vmem:[#allocation2 + $0xe8] sm:$0xff] %vm22_vm0, %v2107_v3  ;;  %53 = vst.msk [vmem:[#allocation2 + $0xf0] sm:$0xff] %vm22_vm0, %v2107_v3 }
  0x11   :  { %54 = vst.msk [vmem:[#allocation2 + $0xf8] sm:$0xff] %vm22_vm0, %v2107_v3  ;;  %55 = vst.msk [vmem:[#allocation2 + $0x100] sm:$0xff] %vm22_vm0, %v2107_v3 }
  0x12   :  { %56 = vst.msk [vmem:[#allocation2 + $0x108] sm:$0xff] %vm22_vm0, %v2107_v3  ;;  %57 = vst.msk [vmem:[#allocation2 + $0x110] sm:$0xff] %vm22_vm0, %v2107_v3  ;;  %1975 = vmatmul.mubr.msk.bf16.vlgmr.msra.gmra.mxu0 %vm407_vm1, %v2053_v6  ;;  %2007 = vmatmul.mubr.msk.bf16.vlgmr.msra.gmra.mxu1 %vm407_vm1, %v2069_v10 }
  0x13   :  { %58 = vst.msk [vmem:[#allocation2 + $0x118] sm:$0xff] %vm22_vm0, %v2107_v3  ;;  %59 = vst.msk [vmem:[#allocation2 + $0x120] sm:$0xff] %vm22_vm0, %v2107_v3  ;;  %1978 = vmatprep.mubr.msk.bf16.mxu0 %vm407_vm1, %v2054_v7  ;;  %2010 = vmatprep.mubr.msk.bf16.mxu1 %vm407_vm1, %v2070_v11 }
  0x14   :  { %60 = vst.msk [vmem:[#allocation2 + $0x128] sm:$0xff] %vm22_vm0, %v2107_v3  ;;  %61 = vst.msk [vmem:[#allocation2 + $0x130] sm:$0xff] %vm22_vm0, %v2107_v3 }
  0x15   :  { %62 = vst.msk [vmem:[#allocation2 + $0x138] sm:$0xff] %vm22_vm0, %v2107_v3  ;;  %63 = vst.msk [vmem:[#allocation2 + $0x140] sm:$0xff] %vm22_vm0, %v2107_v3 }
  0x16   :  { %64 = vst.msk [vmem:[#allocation2 + $0x148] sm:$0xff] %vm22_vm0, %v2107_v3  ;;  %65 = vst.msk [vmem:[#allocation2 + $0x150] sm:$0xff] %vm22_vm0, %v2107_v3 }
  0x17   :  { %66 = vst.msk [vmem:[#allocation2 + $0x158] sm:$0xff] %vm22_vm0, %v2107_v3  ;;  %67 = vst.msk [vmem:[#allocation2 + $0x160] sm:$0xff] %vm22_vm0, %v2107_v3 }
  0x18   :  { %68 = vst.msk [vmem:[#allocation2 + $0x168] sm:$0xff] %vm22_vm0, %v2107_v3  ;;  %69 = vst.msk [vmem:[#allocation2 + $0x170] sm:$0xff] %vm22_vm0, %v2107_v3 }
  0x19   :  { %70 = vst.msk [vmem:[#allocation2 + $0x178] sm:$0xff] %vm22_vm0, %v2107_v3  ;;  %71 = vst.msk [vmem:[#allocation2 + $0x180] sm:$0xff] %vm22_vm0, %v2107_v3 }
  0x1a   :  { %72 = vst.msk [vmem:[#allocation2 + $0x188] sm:$0xff] %vm22_vm0, %v2107_v3  ;;  %73 = vst.msk [vmem:[#allocation2 + $0x190] sm:$0xff] %vm22_vm0, %v2107_v3  ;;  %1979 = vmatmul.mubr.msk.bf16.gmra.mxu0 %vm407_vm1, %v2055_v8  ;;  %2011 = vmatmul.mubr.msk.bf16.gmra.mxu1 %vm407_vm1, %v2071_v13 }
  0x1b   :  { %74 = vst.msk [vmem:[#allocation2 + $0x198] sm:$0xff] %vm22_vm0, %v2107_v3  ;;  %75 = vst.msk [vmem:[#allocation2 + $0x1a0] sm:$0xff] %vm22_vm0, %v2107_v3  ;;  %1982 = vmatprep.mubr.msk.bf16.mxu0 %vm407_vm1, %v2056_v12  ;;  %2014 = vmatprep.mubr.msk.bf16.mxu1 %vm407_vm1, %v2072_v14 }
  0x1c   :  { %76 = vst.msk [vmem:[#allocation2 + $0x1a8] sm:$0xff] %vm22_vm0, %v2107_v3  ;;  %77 = vst.msk [vmem:[#allocation2 + $0x1b0] sm:$0xff] %vm22_vm0, %v2107_v3 }
  0x1d   :  { %78 = vst.msk [vmem:[#allocation2 + $0x1b8] sm:$0xff] %vm22_vm0, %v2107_v3  ;;  %79 = vst.msk [vmem:[#allocation2 + $0x1c0] sm:$0xff] %vm22_vm0, %v2107_v3 }
  0x1e   :  { %80 = vst.msk [vmem:[#allocation2 + $0x1c8] sm:$0xff] %vm22_vm0, %v2107_v3  ;;  %81 = vst.msk [vmem:[#allocation2 + $0x1d0] sm:$0xff] %vm22_vm0, %v2107_v3 }
  0x1f   :  { %82 = vst.msk [vmem:[#allocation2 + $0x1d8] sm:$0xff] %vm22_vm0, %v2107_v3  ;;  %83 = vst.msk [vmem:[#allocation2 + $0x1e0] sm:$0xff] %vm22_vm0, %v2107_v3 }
  0x20   :  { %84 = vst.msk [vmem:[#allocation2 + $0x1e8] sm:$0xff] %vm22_vm0, %v2107_v3  ;;  %85 = vst.msk [vmem:[#allocation2 + $0x1f0] sm:$0xff] %vm22_vm0, %v2107_v3 }
  0x21   :  { %86 = vst.msk [vmem:[#allocation2 + $0x1f8] sm:$0xff] %vm22_vm0, %v2107_v3 }
  0x22   :  { %1983 = vmatmul.mubr.msk.bf16.gmra.mxu0 %vm407_vm1, %v2057_v15 }
  0x23   :  { %1986 = vmatprep.mubr.msk.bf16.mxu0 %vm407_vm1, %v2058_v16 }
  0x24   :  { %10 = vsyncpa [#allocation4], 0  ;;  %v2059_v19 = vld [vmem:[%s3213_s0 + $0x38] sm:$0xff]   ;;  %v2060_v20 = vld [vmem:[%s3213_s0 + $0x40] sm:$0xff]   ;;  %2015 = vmatmul.mubr.msk.bf16.gmra.mxu1 %vm407_vm1, %v2073_v17  ;;  %vm1650_vm2 = vcmask 60416   ;;  %vm1390_vm3 = vcmask 1040384  }
  0x25   :  { %2018 = vmatprep.mubr.msk.bf16.mxu1 %vm407_vm1, %v2074_v18  ;;  %v2075_v21 = vld [vmem:[%s3213_s0 + $0xb8] sm:$0xff]   ;;  %v2076_v22 = vld [vmem:[%s3213_s0 + $0xc0] sm:$0xff]   ;;  %v2061_v23 = vld [vmem:[%s3213_s0 + $0x48] sm:$0xff]   ;;  %vm1392_vm4 = vcmask 58368  }
  0x26   :  { %v2062_v24 = vld [vmem:[%s3213_s0 + $0x50] sm:$0xff]   ;;  %v2077_v25 = vld [vmem:[%s3213_s0 + $0xc8] sm:$0xff]   ;;  %v2063_v27 = vld [vmem:[%s3213_s0 + $0x58] sm:$0xff]  }
  0x27   :  { %v2078_v26 = vld [vmem:[%s3213_s0 + $0xd0] sm:$0xff]   ;;  %v2064_v28 = vld [vmem:[%s3213_s0 + $0x60] sm:$0xff]   ;;  %v2079_v29 = vld [vmem:[%s3213_s0 + $0xd8] sm:$0xff]  }
  0x28   :  { %v2080_v30 = vld [vmem:[%s3213_s0 + $0xe0] sm:$0xff]   ;;  %v2065_v31 = vld [vmem:[%s3213_s0 + $0x68] sm:$0xff]   ;;  %v2066_v32 = vld [vmem:[%s3213_s0 + $0x70] sm:$0xff]  }
  0x29   :  { %v2081_v33 = vld [vmem:[%s3213_s0 + $0xe8] sm:$0xff]   ;;  %v2082_v34 = vld [vmem:[%s3213_s0 + $0xf0] sm:$0xff]   ;;  %v2067_v35 = vld [vmem:[%s3213_s0 + $0x78] sm:$0xff]  }
  0x2a   :  { %1987 = vmatmul.mubr.msk.bf16.gmra.mxu0 %vm407_vm1, %v2059_v19  ;;  %v2083_v36 = vld [vmem:[%s3213_s0 + $0xf8] sm:$0xff]   ;;  %v89_v37 = vld [vmem:[#allocation2 + $0x10] sm:$0xff]  ;;  %v87_v39 = vld [vmem:[#allocation2] sm:$0xff] }
  0x2b   :  { %1990 = vmatprep.mubr.msk.bf16.mxu0 %vm407_vm1, %v2060_v20  ;;  %v90_v42 = vld [vmem:[#allocation2 + $0x18] sm:$0xff]  ;;  %v121_v44 = vld [vmem:[#allocation2 + $0x110] sm:$0xff]  ;;  %v88_v46 = vld [vmem:[#allocation2 + $0x8] sm:$0xff] }
  0x2c   :  { %2019 = vmatmul.mubr.msk.bf16.gmra.mxu1 %vm407_vm1, %v2075_v21  ;;  %v119_v49 = vld [vmem:[#allocation2 + $0x100] sm:$0xff]  ;;  %v93_v51 = vld [vmem:[#allocation2 + $0x30] sm:$0xff]  ;;  %v122_v55 = vld [vmem:[#allocation2 + $0x118] sm:$0xff] }
  0x2d   :  { %2022 = vmatprep.mubr.msk.bf16.mxu1 %vm407_vm1, %v2076_v22  ;;  %v2420_v56 = vld [vmem:[%s3215_s2] ss:$0 sm:$0xff]  ;;  %v120_v62 = vld [vmem:[#allocation2 + $0x108] sm:$0xff]  ;;  %v94_v4 = vld [vmem:[#allocation2 + $0x38] sm:$0xff] }
  0x2e   :  { %v91_v58 = vld [vmem:[#allocation2 + $0x20] sm:$0xff]  ;;  %v125_v6 = vld [vmem:[#allocation2 + $0x130] sm:$0xff]  ;;  %v92_v12 = vld [vmem:[#allocation2 + $0x28] sm:$0xff] }
  0x2f   :  { %v123_v14 = vld [vmem:[#allocation2 + $0x120] sm:$0xff]  ;;  %v97_v18 = vld [vmem:[#allocation2 + $0x50] sm:$0xff] }
  0x32   :  { %1991 = vmatmul.mubr.msk.bf16.gmra.mxu0 %vm407_vm1, %v2061_v23 }
  0x33   :  { %1994 = vmatprep.mubr.msk.bf16.mxu0 %vm407_vm1, %v2062_v24 }
  0x34   :  { %2023 = vmatmul.mubr.msk.bf16.gmra.mxu1 %vm407_vm1, %v2077_v25 }
  0x35   :  { %2026 = vmatprep.mubr.msk.bf16.mxu1 %vm407_vm1, %v2078_v26 }
  0x3a   :  { %1995 = vmatmul.mubr.msk.bf16.gmra.mxu0 %vm407_vm1, %v2063_v27 }
  0x3b   :  { %1998 = vmatprep.mubr.msk.bf16.mxu0 %vm407_vm1, %v2064_v28 }
  0x3c   :  { %2027 = vmatmul.mubr.msk.bf16.gmra.mxu1 %vm407_vm1, %v2079_v29 }
  0x3d   :  { %2030 = vmatprep.mubr.msk.bf16.mxu1 %vm407_vm1, %v2080_v30 }
  0x42   :  { %1999 = vmatmul.mubr.msk.bf16.gmra.mxu0 %vm407_vm1, %v2065_v31 }
  0x43   :  { %2002 = vmatprep.mubr.msk.bf16.mxu0 %vm407_vm1, %v2066_v32  ;;  %v95_v32 = vld [vmem:[#allocation2 + $0x40] sm:$0xff] }
  0x44   :  { %2031 = vmatmul.mubr.msk.bf16.gmra.mxu1 %vm407_vm1, %v2081_v33 }
  0x45   :  { %2034 = vmatprep.mubr.msk.bf16.mxu1 %vm407_vm1, %v2082_v34 }
  0x4a   :  { %2003 = vmatmul.mubr.msk.bf16.gmra.mxu0 %vm407_vm1, %v2067_v35 }
  0x4c   :  { %2035 = vmatmul.mubr.msk.bf16.gmra.mxu1 %vm407_vm1, %v2083_v36 }
  0xd2   :  { %v1976_v38 = vpop.f32.mrf.mxu0  ;;  %v2008_v48 = vpop.f32.mrf.mxu1 }
  0xd3   :  { %v795_v40 = vadd.f32 %v1976_v38, %v89_v37  ;;  %v827_v52 = vadd.f32 %v2008_v48, %v121_v44  ;;  %v98_v44 = vld [vmem:[#allocation2 + $0x58] sm:$0xff] }
  0xd4   :  { %v538_v41 = vpop.f32.mrf.mxu0  ;;  %v666_v54 = vpop.f32.mrf.mxu1 }
  0xd5   :  { %860 = vst.msk [vmem:[#allocation2 + $0x10] sm:$0xff] %vm22_vm0, %v795_v40  ;;  %v793_v43 = vadd.f32 %v538_v41, %v87_v39  ;;  %892 = vst.msk [vmem:[#allocation2 + $0x110] sm:$0xff] %vm22_vm0, %v827_v52  ;;  %v825_v59 = vadd.f32 %v666_v54, %v119_v49 }
  0xd6   :  { %v1977_v45 = vpop.f32.mrf.mxu0  ;;  %v2009_v61 = vpop.f32.mrf.mxu1 }
  0xd7   :  { %858 = vst.msk [vmem:[#allocation2] sm:$0xff] %vm22_vm0, %v793_v43  ;;  %v796_v47 = vadd.f32 %v1977_v45, %v90_v42  ;;  %890 = vst.msk [vmem:[#allocation2 + $0x100] sm:$0xff] %vm22_vm0, %v825_v59  ;;  %v828_v1 = vadd.f32 %v2009_v61, %v122_v55 }
  0xd8   :  { %v541_v50 = vpop.f32.mrf.mxu0  ;;  %v669_v5 = vpop.f32.mrf.mxu1 }
  0xd9   :  { %861 = vst.msk [vmem:[#allocation2 + $0x18] sm:$0xff] %vm22_vm0, %v796_v47  ;;  %v794_v53 = vadd.f32 %v541_v50, %v88_v46  ;;  %893 = vst.msk [vmem:[#allocation2 + $0x118] sm:$0xff] %vm22_vm0, %v828_v1  ;;  %v826_v9 = vadd.f32 %v669_v5, %v120_v62 }
  0xda   :  { %v1980_v57 = vpop.f32.mrf.mxu0  ;;  %v2012_v13 = vpop.f32.mrf.mxu1 }
  0xdb   :  { %859 = vst.msk [vmem:[#allocation2 + $0x8] sm:$0xff] %vm22_vm0, %v794_v53  ;;  %v799_v60 = vadd.f32 %v1980_v57, %v93_v51  ;;  %891 = vst.msk [vmem:[#allocation2 + $0x108] sm:$0xff] %vm22_vm0, %v826_v9  ;;  %v831_v19 = vadd.f32 %v2012_v13, %v125_v6  ;;  %v96_v51 = vld [vmem:[#allocation2 + $0x48] sm:$0xff] }
  0xdc   :  { %v927_v63 = vld [vmem:[#allocation2 + $0x10] sm:$0xff]  ;;  %v554_v0 = vpop.f32.mrf.mxu0  ;;  %v682_v22 = vpop.f32.mrf.mxu1 }
  0xdd   :  { %v998_v2 = vadd.f32 %v2420_v56, %v927_v63  ;;  %864 = vst.msk [vmem:[#allocation2 + $0x30] sm:$0xff] %vm22_vm0, %v799_v60  ;;  %v797_v3 = vadd.f32 %v554_v0, %v91_v58  ;;  %v959_v21 = vld [vmem:[#allocation2 + $0x110] sm:$0xff]  ;;  %896 = vst.msk [vmem:[#allocation2 + $0x130] sm:$0xff] %vm22_vm0, %v831_v19  ;;  %v829_v27 = vadd.f32 %v682_v22, %v123_v14 }
  0xde   :  { %v925_v7 = vld [vmem:[#allocation2] sm:$0xff]  ;;  %v1981_v8 = vpop.f32.mrf.mxu0  ;;  %v2443_v33 = vpop.f32.mrf.mxu1  ;;  %v2448_v39 = vadd.f32 %v2420_v56, %v959_v21  ;;  %v101_v63 = vld [vmem:[#allocation2 + $0x70] sm:$0xff] }
  0xdf   :  { %v1868_v10 = vpack.c.bf16 %v998_v2, %v998_v2  ;;  %v996_v11 = vadd.f32 %v2420_v56, %v925_v7  ;;  %862 = vst.msk [vmem:[#allocation2 + $0x20] sm:$0xff] %vm22_vm0, %v797_v3  ;;  %v800_v16 = vadd.f32 %v1981_v8, %v94_v4  ;;  %v1195_v28 = vmul.f32 %v998_v2, %v998_v2 }
  0xe0   :  { %v928_v15 = vld [vmem:[#allocation2 + $0x18] sm:$0xff]  ;;  %v557_v17 = vpop.f32.mrf.mxu0  ;;  %894 = vst.msk [vmem:[#allocation2 + $0x120] sm:$0xff] %vm22_vm0, %v829_v27  ;;  %v2456_v45 = vpop.f32.mrf.mxu1  ;;  %v1063_v46 = vsel %vm22_vm0, %v998_v2, 0.0  ;;  %v1900_v4 = vpack.c.bf16 %v2448_v39, %v2448_v39 }
  0xe1   :  { %1653 = vst.msk [vmem:[%s3216_s3 + $0x8] sm:$0xf] %vm1650_vm2, %v1868_v10  ;;  %v1866_v20 = vpack.c.bf16 %v996_v11, %v996_v11  ;;  %v999_v23 = vadd.f32 %v2420_v56, %v928_v15  ;;  %v798_v25 = vadd.f32 %v557_v17, %v92_v12  ;;  %v1193_v29 = vmul.f32 %v996_v11, %v996_v11 }
  0xe2   :  { %v926_v24 = vld [vmem:[#allocation2 + $0x8] sm:$0xff]  ;;  %865 = vst.msk [vmem:[#allocation2 + $0x38] sm:$0xff] %vm22_vm0, %v800_v16  ;;  %v1984_v26 = vpop.f32.mrf.mxu0  ;;  %v1060_v34 = vsel %vm22_vm0, %v996_v11, 0.0  ;;  %v1260_v52 = vsel %vm22_vm0, %v1195_v28, 0.0 }
  0xe3   :  { %1651 = vst.msk [vmem:[%s3216_s3] sm:$0xf] %vm1650_vm2, %v1866_v20  ;;  %v997_v30 = vadd.f32 %v2420_v56, %v926_v24  ;;  %v803_v31 = vadd.f32 %v1984_v26, %v97_v18  ;;  %v1196_v35 = vmul.f32 %v999_v23, %v999_v23  ;;  %v1869_v36 = vpack.c.bf16 %v999_v23, %v999_v23 }
  0xe4   :  { %v931_v37 = vld [vmem:[#allocation2 + $0x30] sm:$0xff]  ;;  %863 = vst.msk [vmem:[#allocation2 + $0x28] sm:$0xff] %vm22_vm0, %v798_v25  ;;  %v570_v38 = vpop.f32.mrf.mxu0  ;;  %v1257_v53 = vsel %vm22_vm0, %v1193_v29, 0.0  ;;  %v2472_v57 = vpop.f32.mrf.mxu1  ;;  %v1065_v0 = vsel %vm22_vm0, %v999_v23, 0.0  ;;  %v99_v25 = vld [vmem:[#allocation2 + $0x60] sm:$0xff] }
  0xe5   :  { %v1061_v40 = vsel %vm22_vm0, %v997_v30, 0.0  ;;  %v1194_v41 = vmul.f32 %v997_v30, %v997_v30  ;;  %v1867_v42 = vpack.c.bf16 %v997_v30, %v997_v30  ;;  %v2453_v43 = vadd.f32 %v2420_v56, %v931_v37  ;;  %868 = vst.msk [vmem:[#allocation2 + $0x50] sm:$0xff] %vm22_vm0, %v803_v31  ;;  %v102_v31 = vld [vmem:[#allocation2 + $0x78] sm:$0xff] }
  0xe6   :  { %1654 = vst.msk [vmem:[%s3216_s3 + $0xc] sm:$0xf] %vm1650_vm2, %v1869_v36  ;;  %v1062_v47 = vadd.f32 %v1061_v40, %v1060_v34  ;;  %v929_v48 = vld [vmem:[#allocation2 + $0x20] sm:$0xff]  ;;  %v801_v49 = vadd.f32 %v570_v38, %v95_v32  ;;  %v1985_v50 = vpop.f32.mrf.mxu0  ;;  %v1262_v1 = vsel %vm22_vm0, %v1196_v35, 0.0  ;;  %v2484_v5 = vpop.f32.mrf.mxu1  ;;  %1685 = vst.msk [vmem:[%s3216_s3 + $0x88] sm:$0xf] %vm1650_vm2, %v1900_v4 }
  0xe7   :  { %v1258_v54 = vsel %vm22_vm0, %v1194_v41, 0.0  ;;  %1652 = vst.msk [vmem:[%s3216_s3 + $0x4] sm:$0xf] %vm1650_vm2, %v1867_v42  ;;  %v1872_v55 = vpack.c.bf16 %v2453_v43, %v2453_v43  ;;  %v1000_v60 = vadd.f32 %v2420_v56, %v929_v48  ;;  %v804_v61 = vadd.f32 %v1985_v50, %v98_v44  ;;  %v957_v34 = vld [vmem:[#allocation2 + $0x100] sm:$0xff] }
  0xe8   :  { %v1064_v58 = vadd.f32 %v1063_v46, %v1062_v47  ;;  %v1259_v59 = vadd.f32 %v1258_v54, %v1257_v53  ;;  %866 = vst.msk [vmem:[#allocation2 + $0x40] sm:$0xff] %vm22_vm0, %v801_v49  ;;  %v573_v62 = vpop.f32.mrf.mxu0  ;;  %v1199_v7 = vmul.f32 %v2453_v43, %v2453_v43  ;;  %v2496_v16 = vpop.f32.mrf.mxu1  ;;  %v1071_v35 = vsel %vm22_vm0, %v2453_v43, 0.0  ;;  %v100_v47 = vld [vmem:[#allocation2 + $0x68] sm:$0xff] }
  0xe9   :  { %1657 = vst.msk [vmem:[%s3216_s3 + $0x18] sm:$0xf] %vm1650_vm2, %v1872_v55  ;;  %v932_v2 = vld [vmem:[#allocation2 + $0x38] sm:$0xff]  ;;  %v802_v3 = vadd.f32 %v573_v62, %v96_v51  ;;  %v1197_v9 = vmul.f32 %v1000_v60, %v1000_v60  ;;  %v1067_v11 = vsel %vm22_vm0, %v1000_v60, 0.0  ;;  %v1870_v12 = vpack.c.bf16 %v1000_v60, %v1000_v60 }
  0xea   :  { %v1261_v6 = vadd.f32 %v1260_v52, %v1259_v59  ;;  %v1066_v8 = vadd.f32 %v1065_v0, %v1064_v58  ;;  %869 = vst.msk [vmem:[#allocation2 + $0x58] sm:$0xff] %vm22_vm0, %v804_v61  ;;  %v1988_v10 = vpop.f32.mrf.mxu0  ;;  %v1003_v13 = vadd.f32 %v2420_v56, %v932_v2  ;;  %v2508_v26 = vpop.f32.mrf.mxu1  ;;  %v1268_v36 = vsel %vm22_vm0, %v1199_v7, 0.0 }
  0xeb   :  { %v930_v14 = vld [vmem:[#allocation2 + $0x28] sm:$0xff]  ;;  %867 = vst.msk [vmem:[#allocation2 + $0x48] sm:$0xff] %vm22_vm0, %v802_v3  ;;  %v807_v15 = vadd.f32 %v1988_v10, %v101_v63  ;;  %v1264_v22 = vsel %vm22_vm0, %v1197_v9, 0.0  ;;  %v2529_v53 = vadd.f32 %v2420_v56, %v957_v34  ;;  %v105_v3 = vld [vmem:[#allocation2 + $0x90] sm:$0xff] }
  0xec   :  { %v1068_v17 = vadd.f32 %v1067_v11, %v1066_v8  ;;  %v1263_v18 = vadd.f32 %v1262_v1, %v1261_v6  ;;  %v1001_v19 = vadd.f32 %v2420_v56, %v930_v14  ;;  %v935_v20 = vld [vmem:[#allocation2 + $0x50] sm:$0xff]  ;;  %v586_v21 = vpop.f32.mrf.mxu0  ;;  %1655 = vst.msk [vmem:[%s3216_s3 + $0x10] sm:$0xf] %vm1650_vm2, %v1870_v12  ;;  %v1873_v23 = vpack.c.bf16 %v1003_v13, %v1003_v13  ;;  %v2518_v41 = vpop.f32.mrf.mxu1  ;;  %v103_v11 = vld [vmem:[#allocation2 + $0x80] sm:$0xff] }
  0xed   :  { %v2505_v24 = vadd.f32 %v2420_v56, %v935_v20  ;;  %872 = vst.msk [vmem:[#allocation2 + $0x70] sm:$0xff] %vm22_vm0, %v807_v15  ;;  %v1200_v37 = vmul.f32 %v1003_v13, %v1003_v13  ;;  %v805_v46 = vadd.f32 %v586_v21, %v99_v25  ;;  %v1073_v55 = vsel %vm22_vm0, %v1003_v13, 0.0 }
  0xee   :  { %v1265_v27 = vadd.f32 %v1264_v22, %v1263_v18  ;;  %v1069_v28 = vsel %vm22_vm0, %v1001_v19, 0.0  ;;  %v1198_v29 = vmul.f32 %v1001_v19, %v1001_v19  ;;  %v1871_v30 = vpack.c.bf16 %v1001_v19, %v1001_v19  ;;  %v1989_v32 = vpop.f32.mrf.mxu0  ;;  %1658 = vst.msk [vmem:[%s3216_s3 + $0x1c] sm:$0xf] %vm1650_vm2, %v1873_v23  ;;  %v2531_v54 = vpop.f32.mrf.mxu1  ;;  %v106_v18 = vld [vmem:[#allocation2 + $0x98] sm:$0xff] }
  0xef   :  { %v1070_v38 = vadd.f32 %v1069_v28, %v1068_v17  ;;  %v933_v40 = vld [vmem:[#allocation2 + $0x40] sm:$0xff]  ;;  %v1876_v43 = vpack.c.bf16 %v2505_v24, %v2505_v24  ;;  %v808_v52 = vadd.f32 %v1989_v32, %v102_v31  ;;  %870 = vst.msk [vmem:[#allocation2 + $0x60] sm:$0xff] %vm22_vm0, %v805_v46  ;;  %v1270_v6 = vsel %vm22_vm0, %v1200_v37, 0.0 }
  0xf0   :  { %v1266_v42 = vsel %vm22_vm0, %v1198_v29, 0.0  ;;  %1656 = vst.msk [vmem:[%s3216_s3 + $0x14] sm:$0xf] %vm1650_vm2, %v1871_v30  ;;  %v1004_v44 = vadd.f32 %v2420_v56, %v933_v40  ;;  %v589_v48 = vpop.f32.mrf.mxu0  ;;  %v2542_v4 = vpop.f32.mrf.mxu1  ;;  %v1203_v7 = vmul.f32 %v2505_v24, %v2505_v24  ;;  %v1079_v34 = vsel %vm22_vm0, %v2505_v24, 0.0  ;;  %v109_v40 = vld [vmem:[#allocation2 + $0xb0] sm:$0xff] }
  0xf1   :  { %v1072_v49 = vadd.f32 %v1071_v35, %v1070_v38  ;;  %v1267_v50 = vadd.f32 %v1266_v42, %v1265_v27  ;;  %v936_v51 = vld [vmem:[#allocation2 + $0x58] sm:$0xff]  ;;  %1661 = vst.msk [vmem:[%s3216_s3 + $0x28] sm:$0xf] %vm1650_vm2, %v1876_v43  ;;  %v806_v2 = vadd.f32 %v589_v48, %v100_v47  ;;  %v104_v27 = vld [vmem:[#allocation2 + $0x88] sm:$0xff] }
  0xf2   :  { %v1201_v58 = vmul.f32 %v1004_v44, %v1004_v44  ;;  %v1874_v59 = vpack.c.bf16 %v1004_v44, %v1004_v44  ;;  %v1007_v60 = vadd.f32 %v2420_v56, %v936_v51  ;;  %v934_v61 = vld [vmem:[#allocation2 + $0x48] sm:$0xff]  ;;  %v1992_v62 = vpop.f32.mrf.mxu0  ;;  %873 = vst.msk [vmem:[#allocation2 + $0x78] sm:$0xff] %vm22_vm0, %v808_v52  ;;  %v1075_v8 = vsel %vm22_vm0, %v1004_v44, 0.0  ;;  %v2554_v19 = vpop.f32.mrf.mxu1 }
  0xf3   :  { %v1269_v63 = vadd.f32 %v1268_v36, %v1267_v50  ;;  %v1074_v0 = vadd.f32 %v1073_v55, %v1072_v49  ;;  %v1005_v1 = vadd.f32 %v2420_v56, %v934_v61  ;;  %871 = vst.msk [vmem:[#allocation2 + $0x68] sm:$0xff] %vm22_vm0, %v806_v2  ;;  %v811_v23 = vadd.f32 %v1992_v62, %v105_v3  ;;  %v107_v61 = vld [vmem:[#allocation2 + $0xa0] sm:$0xff] }
  0xf4   :  { %1659 = vst.msk [vmem:[%s3216_s3 + $0x20] sm:$0xf] %vm1650_vm2, %v1874_v59  ;;  %v1877_v9 = vpack.c.bf16 %v1007_v60, %v1007_v60  ;;  %v939_v10 = vld [vmem:[#allocation2 + $0x70] sm:$0xff]  ;;  %v602_v12 = vpop.f32.mrf.mxu0  ;;  %v1272_v20 = vsel %vm22_vm0, %v1201_v58, 0.0  ;;  %v2565_v32 = vpop.f32.mrf.mxu1  ;;  %v1204_v35 = vmul.f32 %v1007_v60, %v1007_v60  ;;  %v1276_v47 = vsel %vm22_vm0, %v1203_v7, 0.0  ;;  %v110_v7 = vld [vmem:[#allocation2 + $0xb8] sm:$0xff] }
  0xf5   :  { %v1076_v13 = vadd.f32 %v1075_v8, %v1074_v0  ;;  %v1271_v14 = vadd.f32 %v1270_v6, %v1269_v63  ;;  %v1077_v15 = vsel %vm22_vm0, %v1005_v1, 0.0  ;;  %v1202_v17 = vmul.f32 %v1005_v1, %v1005_v1  ;;  %876 = vst.msk [vmem:[#allocation2 + $0x90] sm:$0xff] %vm22_vm0, %v811_v23 }
  0xf6   :  { %1662 = vst.msk [vmem:[%s3216_s3 + $0x2c] sm:$0xf] %vm1650_vm2, %v1877_v9  ;;  %v1875_v21 = vpack.c.bf16 %v1005_v1, %v1005_v1  ;;  %v2562_v22 = vadd.f32 %v2420_v56, %v939_v10  ;;  %v1993_v25 = vpop.f32.mrf.mxu0  ;;  %v809_v31 = vadd.f32 %v602_v12, %v103_v11  ;;  %v937_v44 = vld [vmem:[#allocation2 + $0x60] sm:$0xff]  ;;  %v2577_v46 = vpop.f32.mrf.mxu1  ;;  %v1081_v48 = vsel %vm22_vm0, %v1007_v60, 0.0 }
  0xf7   :  { %v1273_v28 = vadd.f32 %v1272_v20, %v1271_v14  ;;  %v1078_v29 = vadd.f32 %v1077_v15, %v1076_v13  ;;  %v1274_v30 = vsel %vm22_vm0, %v1202_v17, 0.0  ;;  %v812_v37 = vadd.f32 %v1993_v25, %v106_v18  ;;  %v108_v18 = vld [vmem:[#allocation2 + $0xa8] sm:$0xff] }
  0xf8   :  { %1660 = vst.msk [vmem:[%s3216_s3 + $0x24] sm:$0xf] %vm1650_vm2, %v1875_v21  ;;  %v1880_v36 = vpack.c.bf16 %v2562_v22, %v2562_v22  ;;  %v605_v38 = vpop.f32.mrf.mxu0  ;;  %v1008_v49 = vadd.f32 %v2420_v56, %v937_v44  ;;  %v1898_v52 = vpack.c.bf16 %v2529_v53, %v2529_v53  ;;  %v2591_v62 = vpop.f32.mrf.mxu1  ;;  %v1278_v63 = vsel %vm22_vm0, %v1204_v35, 0.0 }
  0xf9   :  { %v1080_v42 = vadd.f32 %v1079_v34, %v1078_v29  ;;  %v1275_v43 = vadd.f32 %v1274_v30, %v1273_v28  ;;  %874 = vst.msk [vmem:[#allocation2 + $0x80] sm:$0xff] %vm22_vm0, %v809_v31  ;;  %v810_v24 = vadd.f32 %v605_v38, %v104_v27  ;;  %v940_v50 = vld [vmem:[#allocation2 + $0x78] sm:$0xff]  ;;  %877 = vst.msk [vmem:[#allocation2 + $0x98] sm:$0xff] %vm22_vm0, %v812_v37  ;;  %v2612_v25 = vsel %vm22_vm0, %v2448_v39, 0.0 }
  0xfa   :  { %1665 = vst.msk [vmem:[%s3216_s3 + $0x38] sm:$0xf] %vm1650_vm2, %v1880_v36  ;;  %v1996_v51 = vpop.f32.mrf.mxu0  ;;  %v1011_v59 = vadd.f32 %v2420_v56, %v940_v50  ;;  %v1083_v0 = vsel %vm22_vm0, %v1008_v49, 0.0  ;;  %v1205_v1 = vmul.f32 %v1008_v49, %v1008_v49  ;;  %v1878_v2 = vpack.c.bf16 %v1008_v49, %v1008_v49  ;;  %v938_v3 = vld [vmem:[#allocation2 + $0x68] sm:$0xff]  ;;  %1683 = vst.msk [vmem:[%s3216_s3 + $0x80] sm:$0xf] %vm1650_vm2, %v1898_v52  ;;  %v2602_v11 = vpop.f32.mrf.mxu1 }
  0xfb   :  { %v1277_v55 = vadd.f32 %v1276_v47, %v1275_v43  ;;  %v1082_v58 = vadd.f32 %v1081_v48, %v1080_v42  ;;  %875 = vst.msk [vmem:[#allocation2 + $0x88] sm:$0xff] %vm22_vm0, %v810_v24  ;;  %v815_v60 = vadd.f32 %v1996_v51, %v109_v40  ;;  %v1207_v8 = vmul.f32 %v2562_v22, %v2562_v22 }
  0xfc   :  { %v618_v6 = vpop.f32.mrf.mxu0  ;;  %v1280_v12 = vsel %vm22_vm0, %v1205_v1, 0.0  ;;  %1663 = vst.msk [vmem:[%s3216_s3 + $0x30] sm:$0xf] %vm1650_vm2, %v1878_v2  ;;  %v1881_v13 = vpack.c.bf16 %v1011_v59, %v1011_v59  ;;  %v1009_v14 = vadd.f32 %v2420_v56, %v938_v3  ;;  %v943_v21 = vld [vmem:[#allocation2 + $0x90] sm:$0xff]  ;;  %v2614_v27 = vpop.f32.mrf.mxu1  ;;  %v1208_v36 = vmul.f32 %v1011_v59, %v1011_v59 }
  0xfd   :  { %v1084_v9 = vadd.f32 %v1083_v0, %v1082_v58  ;;  %v1279_v10 = vadd.f32 %v1278_v63, %v1277_v55  ;;  %880 = vst.msk [vmem:[#allocation2 + $0xb0] sm:$0xff] %vm22_vm0, %v815_v60  ;;  %v813_v15 = vadd.f32 %v618_v6, %v107_v61  ;;  %v1014_v31 = vadd.f32 %v2420_v56, %v943_v21 }
  0xfe   :  { %v1997_v17 = vpop.f32.mrf.mxu0  ;;  %1666 = vst.msk [vmem:[%s3216_s3 + $0x3c] sm:$0xf] %vm1650_vm2, %v1881_v13  ;;  %v1085_v28 = vsel %vm22_vm0, %v1009_v14, 0.0  ;;  %v1206_v29 = vmul.f32 %v1009_v14, %v1009_v14  ;;  %v1879_v30 = vpack.c.bf16 %v1009_v14, %v1009_v14  ;;  %v1087_v43 = vsel %vm22_vm0, %v2562_v22, 0.0  ;;  %v2633_v50 = vpop.f32.mrf.mxu1 }
  0xff   :  { %v1281_v20 = vadd.f32 %v1280_v12, %v1279_v10  ;;  %v816_v23 = vadd.f32 %v1997_v17, %v110_v7  ;;  %878 = vst.msk [vmem:[#allocation2 + $0xa0] sm:$0xff] %vm22_vm0, %v813_v15  ;;  %v1086_v37 = vadd.f32 %v1085_v28, %v1084_v9  ;;  %v1284_v44 = vsel %vm22_vm0, %v1207_v8, 0.0  ;;  %v960_v7 = vld [vmem:[#allocation2 + $0x118] sm:$0xff]  ;;  %v111_v28 = vld [vmem:[#allocation2 + $0xc0] sm:$0xff] }
 0x100   :  { %v941_v34 = vld [vmem:[#allocation2 + $0x80] sm:$0xff]  ;;  %v621_v35 = vpop.f32.mrf.mxu0  ;;  %v944_v40 = vld [vmem:[#allocation2 + $0x98] sm:$0xff]  ;;  %v1282_v24 = vsel %vm22_vm0, %v1206_v29, 0.0  ;;  %1664 = vst.msk [vmem:[%s3216_s3 + $0x34] sm:$0xf] %vm1650_vm2, %v1879_v30  ;;  %v1884_v47 = vpack.c.bf16 %v1014_v31, %v1014_v31  ;;  %v1089_v51 = vsel %vm22_vm0, %v1011_v59, 0.0  ;;  %v2639_v22 = vmul.f32 %v2529_v53, %v2529_v53  ;;  %v2657_v14 = vpop.f32.mrf.mxu1 }
 0x101   :  { %v1012_v38 = vadd.f32 %v2420_v56, %v941_v34  ;;  %881 = vst.msk [vmem:[#allocation2 + $0xb8] sm:$0xff] %vm22_vm0, %v816_v23  ;;  %v814_v42 = vadd.f32 %v621_v35, %v108_v18  ;;  %v1088_v52 = vadd.f32 %v1087_v43, %v1086_v37  ;;  %v1283_v55 = vadd.f32 %v1282_v24, %v1281_v20  ;;  %v113_v23 = vld [vmem:[#allocation2 + $0xd0] sm:$0xff] }
 0x102   :  { %v942_v48 = vld [vmem:[#allocation2 + $0x88] sm:$0xff]  ;;  %v2000_v49 = vpop.f32.mrf.mxu0  ;;  %1669 = vst.msk [vmem:[%s3216_s3 + $0x48] sm:$0xf] %vm1650_vm2, %v1884_v47  ;;  %v1015_v61 = vadd.f32 %v2420_v56, %v944_v40  ;;  %v1286_v1 = vsel %vm22_vm0, %v1208_v36, 0.0  ;;  %v1211_v8 = vmul.f32 %v1014_v31, %v1014_v31  ;;  %v2667_v37 = vadd.f32 %v2420_v56, %v960_v7 }
 0x103   :  { %879 = vst.msk [vmem:[#allocation2 + $0xa8] sm:$0xff] %vm22_vm0, %v814_v42  ;;  %v1209_v58 = vmul.f32 %v1012_v38, %v1012_v38  ;;  %v1882_v60 = vpack.c.bf16 %v1012_v38, %v1012_v38  ;;  %v1013_v63 = vadd.f32 %v2420_v56, %v942_v48  ;;  %v1285_v2 = vadd.f32 %v1284_v44, %v1283_v55  ;;  %v2683_v55 = vpop.f32.mrf.mxu1 }
 0x104   :  { %v947_v59 = vld [vmem:[#allocation2 + $0xb0] sm:$0xff]  ;;  %v634_v0 = vpop.f32.mrf.mxu0  ;;  %v1090_v3 = vadd.f32 %v1089_v51, %v1088_v52  ;;  %v1091_v9 = vsel %vm22_vm0, %v1012_v38, 0.0  ;;  %v1885_v10 = vpack.c.bf16 %v1015_v61, %v1015_v61  ;;  %v1212_v30 = vmul.f32 %v1015_v61, %v1015_v61 }
 0x105   :  { %v2649_v6 = vadd.f32 %v2420_v56, %v947_v59  ;;  %1667 = vst.msk [vmem:[%s3216_s3 + $0x40] sm:$0xf] %vm1650_vm2, %v1882_v60  ;;  %v1093_v12 = vsel %vm22_vm0, %v1013_v63, 0.0  ;;  %v1287_v17 = vadd.f32 %v1286_v1, %v1285_v2  ;;  %v1210_v18 = vmul.f32 %v1013_v63, %v1013_v63  ;;  %v114_v59 = vld [vmem:[#allocation2 + $0xd8] sm:$0xff]  ;;  %v112_v1 = vld [vmem:[#allocation2 + $0xc8] sm:$0xff]  ;;  %v117_v2 = vld [vmem:[#allocation2 + $0xf0] sm:$0xff] }
 0x106   :  { %v2001_v13 = vpop.f32.mrf.mxu0  ;;  %v1092_v15 = vadd.f32 %v1091_v9, %v1090_v3  ;;  %v1883_v20 = vpack.c.bf16 %v1013_v63, %v1013_v63  ;;  %v945_v21 = vld [vmem:[#allocation2 + $0xa0] sm:$0xff]  ;;  %v1288_v29 = vsel %vm22_vm0, %v1209_v58, 0.0  ;;  %1670 = vst.msk [vmem:[%s3216_s3 + $0x4c] sm:$0xf] %vm1650_vm2, %v1885_v10  ;;  %v1095_v44 = vsel %vm22_vm0, %v1014_v31, 0.0 }
 0x107   :  { %v1888_v34 = vpack.c.bf16 %v2649_v6, %v2649_v6  ;;  %v1289_v38 = vadd.f32 %v1288_v29, %v1287_v17  ;;  %v1290_v42 = vsel %vm22_vm0, %v1210_v18, 0.0  ;;  %v1016_v43 = vadd.f32 %v2420_v56, %v945_v21  ;;  %v118_v17 = vld [vmem:[#allocation2 + $0xf8] sm:$0xff]  ;;  %v116_v29 = vld [vmem:[#allocation2 + $0xe8] sm:$0xff] }
 0x108   :  { %v948_v35 = vld [vmem:[#allocation2 + $0xb8] sm:$0xff]  ;;  %v637_v36 = vpop.f32.mrf.mxu0  ;;  %v1094_v40 = vadd.f32 %v1093_v12, %v1092_v15  ;;  %1668 = vst.msk [vmem:[%s3216_s3 + $0x44] sm:$0xf] %vm1650_vm2, %v1883_v20  ;;  %v819_v48 = vadd.f32 %v2000_v49, %v113_v23  ;;  %v817_v51 = vadd.f32 %v634_v0, %v111_v28  ;;  %v1292_v58 = vsel %vm22_vm0, %v1211_v8, 0.0  ;;  %v115_v15 = vld [vmem:[#allocation2 + $0xe0] sm:$0xff] }
 0x109   :  { %1673 = vst.msk [vmem:[%s3216_s3 + $0x58] sm:$0xf] %vm1650_vm2, %v1888_v34  ;;  %v2681_v24 = vadd.f32 %v2420_v56, %v948_v35  ;;  %v1097_v60 = vsel %vm22_vm0, %v1015_v61, 0.0  ;;  %v1291_v31 = vadd.f32 %v1290_v42, %v1289_v38  ;;  %v1294_v3 = vsel %vm22_vm0, %v1212_v30, 0.0  ;;  %v2704_v30 = vpop.f32.mrf.mxu1  ;;  %v958_v42 = vld [vmem:[#allocation2 + $0x108] sm:$0xff] }
 0x10a   :  { %v946_v47 = vld [vmem:[#allocation2 + $0xa8] sm:$0xff]  ;;  %v2004_v52 = vpop.f32.mrf.mxu0  ;;  %v1096_v63 = vadd.f32 %v1095_v44, %v1094_v40  ;;  %v1213_v7 = vmul.f32 %v1016_v43, %v1016_v43  ;;  %v1886_v9 = vpack.c.bf16 %v1016_v43, %v1016_v43  ;;  %884 = vst.msk [vmem:[#allocation2 + $0xd0] sm:$0xff] %vm22_vm0, %v819_v48  ;;  %882 = vst.msk [vmem:[#allocation2 + $0xc0] sm:$0xff] %vm22_vm0, %v817_v51  ;;  %v1099_v18 = vsel %vm22_vm0, %v1016_v43, 0.0  ;;  %v126_v48 = vld [vmem:[#allocation2 + $0x138] sm:$0xff] }
 0x10b   :  { %v1889_v49 = vpack.c.bf16 %v2681_v24, %v2681_v24  ;;  %v1293_v8 = vadd.f32 %v1292_v58, %v1291_v31  ;;  %v1215_v61 = vmul.f32 %v2649_v6, %v2649_v6  ;;  %v1017_v12 = vadd.f32 %v2420_v56, %v946_v47 }
 0x10c   :  { %v650_v0 = vpop.f32.mrf.mxu0  ;;  %v1098_v10 = vadd.f32 %v1097_v60, %v1096_v63  ;;  %1671 = vst.msk [vmem:[%s3216_s3 + $0x50] sm:$0xf] %vm1650_vm2, %v1886_v9  ;;  %v820_v20 = vadd.f32 %v2001_v13, %v114_v59  ;;  %v818_v21 = vadd.f32 %v637_v36, %v112_v1  ;;  %v823_v23 = vadd.f32 %v2004_v52, %v117_v2  ;;  %v963_v2 = vld [vmem:[#allocation2 + $0x130] sm:$0xff] }
 0x10d   :  { %1674 = vst.msk [vmem:[%s3216_s3 + $0x5c] sm:$0xf] %vm1650_vm2, %v1889_v49  ;;  %v1295_v35 = vadd.f32 %v1294_v3, %v1293_v8  ;;  %v1101_v38 = vsel %vm22_vm0, %v1017_v12, 0.0  ;;  %v1214_v40 = vmul.f32 %v1017_v12, %v1017_v12  ;;  %v1296_v43 = vsel %vm22_vm0, %v1213_v7, 0.0  ;;  %v2725_v3 = vpop.f32.mrf.mxu1 }
 0x10e   :  { %v2005_v28 = vpop.f32.mrf.mxu0  ;;  %v1100_v34 = vadd.f32 %v1099_v18, %v1098_v10  ;;  %v1887_v44 = vpack.c.bf16 %v1017_v12, %v1017_v12  ;;  %885 = vst.msk [vmem:[#allocation2 + $0xd8] sm:$0xff] %vm22_vm0, %v820_v20  ;;  %883 = vst.msk [vmem:[#allocation2 + $0xc8] sm:$0xff] %vm22_vm0, %v818_v21  ;;  %v821_v13 = vadd.f32 %v650_v0, %v115_v15  ;;  %v1103_v63 = vsel %vm22_vm0, %v2649_v6, 0.0 }
 0x10f   :  { %888 = vst.msk [vmem:[#allocation2 + $0xf0] sm:$0xff] %vm22_vm0, %v823_v23  ;;  %v824_v36 = vadd.f32 %v2005_v28, %v118_v17  ;;  %v1297_v51 = vadd.f32 %v1296_v43, %v1295_v35  ;;  %v1298_v58 = vsel %vm22_vm0, %v1214_v40, 0.0  ;;  %v1216_v31 = vmul.f32 %v2681_v24, %v2681_v24  ;;  %v961_v28 = vld [vmem:[#allocation2 + $0x120] sm:$0xff] }
 0x110   :  { %v653_v47 = vpop.f32.mrf.mxu0  ;;  %v1102_v52 = vadd.f32 %v1101_v38, %v1100_v34  ;;  %1672 = vst.msk [vmem:[%s3216_s3 + $0x54] sm:$0xf] %vm1650_vm2, %v1887_v44  ;;  %v1901_v59 = vpack.c.bf16 %v2667_v37, %v2667_v37  ;;  %v1029_v1 = vadd.f32 %v2420_v56, %v958_v42  ;;  %v2729_v0 = vmul.f32 %v2448_v39, %v2448_v39 }
 0x111   :  { %v822_v60 = vadd.f32 %v653_v47, %v116_v29  ;;  %886 = vst.msk [vmem:[#allocation2 + $0xe0] sm:$0xff] %vm22_vm0, %v821_v13  ;;  %889 = vst.msk [vmem:[#allocation2 + $0xf8] sm:$0xff] %vm22_vm0, %v824_v36  ;;  %v1299_v7 = vadd.f32 %v1298_v58, %v1297_v51  ;;  %v951_v9 = vld [vmem:[#allocation2 + $0xd0] sm:$0xff]  ;;  %v949_v49 = vld [vmem:[#allocation2 + $0xc0] sm:$0xff]  ;;  %v832_v8 = vadd.f32 %v2443_v33, %v126_v48  ;;  %v1300_v10 = vsel %vm22_vm0, %v1215_v61, 0.0  ;;  %v2755_v29 = vpop.f32.mrf.mxu1 }
 0x112   :  { %v1104_v6 = vadd.f32 %v1103_v63, %v1102_v52  ;;  %v1105_v12 = vsel %vm22_vm0, %v2681_v24, 0.0  ;;  %v1022_v15 = vadd.f32 %v2420_v56, %v951_v9  ;;  %v1020_v17 = vadd.f32 %v2420_v56, %v949_v49  ;;  %1686 = vst.msk [vmem:[%s3216_s3 + $0x8c] sm:$0xf] %vm1650_vm2, %v1901_v59 }
 0x113   :  { %887 = vst.msk [vmem:[#allocation2 + $0xe8] sm:$0xff] %vm22_vm0, %v822_v60  ;;  %v1301_v39 = vadd.f32 %v1300_v10, %v1299_v7  ;;  %v1899_v20 = vpack.c.bf16 %v1029_v1, %v1029_v1  ;;  %v2743_v21 = vadd.f32 %v2420_v56, %v963_v2  ;;  %897 = vst.msk [vmem:[#allocation2 + $0x138] sm:$0xff] %vm22_vm0, %v832_v8  ;;  %v1302_v33 = vsel %vm22_vm0, %v1216_v31, 0.0  ;;  %v2786_v7 = vpop.f32.mrf.mxu1 }
 0x114   :  { %v1106_v18 = vadd.f32 %v1105_v12, %v1104_v6  ;;  %v1892_v24 = vpack.c.bf16 %v1022_v15, %v1022_v15  ;;  %v2749_v61 = vsel %vm22_vm0, %v2529_v53, 0.0  ;;  %v2753_v23 = vsel %vm22_vm0, %v2639_v22, 0.0 }
 0x115   :  { %v1107_v34 = vsel %vm22_vm0, %v1020_v17, 0.0  ;;  %v1217_v35 = vmul.f32 %v1020_v17, %v1020_v17  ;;  %v1303_v38 = vadd.f32 %v1302_v33, %v1301_v39  ;;  %v1890_v40 = vpack.c.bf16 %v1020_v17, %v1020_v17  ;;  %v952_v42 = vld [vmem:[#allocation2 + $0xd8] sm:$0xff]  ;;  %v950_v43 = vld [vmem:[#allocation2 + $0xc8] sm:$0xff]  ;;  %1684 = vst.msk [vmem:[%s3216_s3 + $0x84] sm:$0xf] %vm1650_vm2, %v1899_v20 }
 0x116   :  { %v955_v44 = vld [vmem:[#allocation2 + $0xf0] sm:$0xff]  ;;  %1677 = vst.msk [vmem:[%s3216_s3 + $0x68] sm:$0xf] %vm1650_vm2, %v1892_v24  ;;  %v1108_v53 = vadd.f32 %v1107_v34, %v1106_v18  ;;  %v1023_v22 = vadd.f32 %v2420_v56, %v952_v42  ;;  %v1021_v13 = vadd.f32 %v2420_v56, %v950_v43  ;;  %v2776_v48 = vmul.f32 %v2667_v37, %v2667_v37 }
 0x117   :  { %v1026_v36 = vadd.f32 %v2420_v56, %v955_v44  ;;  %v1304_v47 = vsel %vm22_vm0, %v1217_v35, 0.0  ;;  %1675 = vst.msk [vmem:[%s3216_s3 + $0x60] sm:$0xf] %vm1650_vm2, %v1890_v40  ;;  %v1904_v51 = vpack.c.bf16 %v2743_v21, %v2743_v21  ;;  %v2781_v52 = vadd.f32 %v2420_v56, %v961_v28 }
 0x118   :  { %v1219_v58 = vmul.f32 %v1022_v15, %v1022_v15  ;;  %v1305_v60 = vadd.f32 %v1304_v47, %v1303_v38  ;;  %v1893_v63 = vpack.c.bf16 %v1023_v22, %v1023_v22  ;;  %v953_v31 = vld [vmem:[#allocation2 + $0xe0] sm:$0xff]  ;;  %v956_v59 = vld [vmem:[#allocation2 + $0xf8] sm:$0xff]  ;;  %v2784_v6 = vsel %vm22_vm0, %v1029_v1, 0.0 }
 0x119   :  { %v1220_v9 = vmul.f32 %v1023_v22, %v1023_v22  ;;  %v1109_v49 = vsel %vm22_vm0, %v1021_v13, 0.0  ;;  %v1218_v8 = vmul.f32 %v1021_v13, %v1021_v13  ;;  %v1891_v10 = vpack.c.bf16 %v1021_v13, %v1021_v13  ;;  %1689 = vst.msk [vmem:[%s3216_s3 + $0x98] sm:$0xf] %vm1650_vm2, %v1904_v51 }
 0x11a   :  { %v954_v2 = vld [vmem:[#allocation2 + $0xe8] sm:$0xff]  ;;  %v1111_v12 = vsel %vm22_vm0, %v1022_v15, 0.0  ;;  %1678 = vst.msk [vmem:[%s3216_s3 + $0x6c] sm:$0xf] %vm1650_vm2, %v1893_v63  ;;  %v1110_v17 = vadd.f32 %v1109_v49, %v1108_v53  ;;  %v1896_v39 = vpack.c.bf16 %v1026_v36, %v1026_v36  ;;  %v1226_v18 = vmul.f32 %v1029_v1, %v1029_v1  ;;  %v2812_v1 = vpop.f32.mrf.mxu1 }
 0x11b   :  { %v1306_v20 = vsel %vm22_vm0, %v1218_v8, 0.0  ;;  %1676 = vst.msk [vmem:[%s3216_s3 + $0x64] sm:$0xf] %vm1650_vm2, %v1891_v10  ;;  %v1024_v33 = vadd.f32 %v2420_v56, %v953_v31  ;;  %v1027_v24 = vadd.f32 %v2420_v56, %v956_v59  ;;  %v1025_v15 = vadd.f32 %v2420_v56, %v954_v2  ;;  %v124_v59 = vld [vmem:[#allocation2 + $0x128] sm:$0xff]  ;;  %v129_v2 = vld [vmem:[#allocation2 + $0x150] sm:$0xff] }
 0x11c   :  { %v1308_v28 = vsel %vm22_vm0, %v1219_v58, 0.0  ;;  %v1113_v34 = vsel %vm22_vm0, %v1023_v22, 0.0  ;;  %v1112_v35 = vadd.f32 %v1111_v12, %v1110_v17  ;;  %v1307_v38 = vadd.f32 %v1306_v20, %v1305_v60  ;;  %1681 = vst.msk [vmem:[%s3216_s3 + $0x78] sm:$0xf] %vm1650_vm2, %v1896_v39  ;;  %v964_v22 = vld [vmem:[#allocation2 + $0x138] sm:$0xff]  ;;  %v2829_v12 = vpop.f32.mrf.mxu1 }
 0x11d   :  { %v1310_v40 = vsel %vm22_vm0, %v1220_v9, 0.0  ;;  %v1223_v42 = vmul.f32 %v1026_v36, %v1026_v36  ;;  %v1221_v43 = vmul.f32 %v1024_v33, %v1024_v33  ;;  %v1894_v44 = vpack.c.bf16 %v1024_v33, %v1024_v33 }
 0x11e   :  { %v1309_v53 = vadd.f32 %v1308_v28, %v1307_v38  ;;  %v1114_v13 = vadd.f32 %v1113_v34, %v1112_v35  ;;  %v1115_v47 = vsel %vm22_vm0, %v1024_v33, 0.0  ;;  %v1897_v51 = vpack.c.bf16 %v1027_v24, %v1027_v24  ;;  %v127_v33 = vld [vmem:[#allocation2 + $0x140] sm:$0xff]  ;;  %v128_v38 = vld [vmem:[#allocation2 + $0x148] sm:$0xff] }
 0x11f   :  { %1679 = vst.msk [vmem:[%s3216_s3 + $0x70] sm:$0xf] %vm1650_vm2, %v1894_v44  ;;  %v1224_v58 = vmul.f32 %v1027_v24, %v1027_v24  ;;  %v1117_v60 = vsel %vm22_vm0, %v1025_v15, 0.0  ;;  %v1222_v63 = vmul.f32 %v1025_v15, %v1025_v15  ;;  %v1895_v31 = vpack.c.bf16 %v1025_v15, %v1025_v15 }
 0x120   :  { %v1119_v9 = vsel %vm22_vm0, %v1026_v36, 0.0  ;;  %v1116_v49 = vadd.f32 %v1115_v47, %v1114_v13  ;;  %v1311_v8 = vadd.f32 %v1310_v40, %v1309_v53  ;;  %1682 = vst.msk [vmem:[%s3216_s3 + $0x7c] sm:$0xf] %vm1650_vm2, %v1897_v51  ;;  %v2827_v10 = vsel %vm22_vm0, %v1226_v18, 0.0  ;;  %v130_v18 = vld [vmem:[#allocation2 + $0x158] sm:$0xff]  ;;  %v133_v40 = vld [vmem:[#allocation2 + $0x170] sm:$0xff] }
 0x121   :  { %v1312_v17 = vsel %vm22_vm0, %v1221_v43, 0.0  ;;  %v1314_v39 = vsel %vm22_vm0, %v1222_v63, 0.0  ;;  %1680 = vst.msk [vmem:[%s3216_s3 + $0x74] sm:$0xf] %vm1650_vm2, %v1895_v31  ;;  %v1902_v36 = vpack.c.bf16 %v2781_v52, %v2781_v52  ;;  %v2840_v20 = vadd.f32 %v2420_v56, %v964_v22  ;;  %v131_v43 = vld [vmem:[#allocation2 + $0x160] sm:$0xff]  ;;  %v132_v47 = vld [vmem:[#allocation2 + $0x168] sm:$0xff]  ;;  %v2037_v31 = vpop.f32.mrf.mxu1 }
 0x122   :  { %v1313_v15 = vadd.f32 %v1312_v17, %v1311_v8  ;;  %v1118_v28 = vadd.f32 %v1117_v60, %v1116_v49  ;;  %v830_v34 = vadd.f32 %v2456_v45, %v124_v59  ;;  %v835_v35 = vadd.f32 %v2472_v57, %v129_v2  ;;  %v134_v45 = vld [vmem:[#allocation2 + $0x178] sm:$0xff]  ;;  %v137_v57 = vld [vmem:[#allocation2 + $0x190] sm:$0xff]  ;;  %v136_v63 = vld [vmem:[#allocation2 + $0x188] sm:$0xff] }
 0x123   :  { %v1316_v44 = vsel %vm22_vm0, %v1223_v42, 0.0  ;;  %v1121_v53 = vsel %vm22_vm0, %v1027_v24, 0.0  ;;  %v1318_v13 = vsel %vm22_vm0, %v1224_v58, 0.0  ;;  %1687 = vst.msk [vmem:[%s3216_s3 + $0x90] sm:$0xf] %vm1650_vm2, %v1902_v36  ;;  %v1905_v56 = vpack.c.bf16 %v2840_v20, %v2840_v20  ;;  %v135_v58 = vld [vmem:[#allocation2 + $0x180] sm:$0xff] }
 0x124   :  { %v1120_v51 = vadd.f32 %v1119_v9, %v1118_v28  ;;  %v1315_v22 = vadd.f32 %v1314_v39, %v1313_v15  ;;  %895 = vst.msk [vmem:[#allocation2 + $0x128] sm:$0xff] %vm22_vm0, %v830_v34  ;;  %900 = vst.msk [vmem:[#allocation2 + $0x150] sm:$0xff] %vm22_vm0, %v835_v35  ;;  %v833_v24 = vadd.f32 %v2484_v5, %v127_v33  ;;  %v138_v60 = vld [vmem:[#allocation2 + $0x198] sm:$0xff]  ;;  %v139_v49 = vld [vmem:[#allocation2 + $0x1a0] sm:$0xff] }
 0x125   :  { %v836_v42 = vadd.f32 %v2496_v16, %v130_v18  ;;  %v2859_v59 = vmul.f32 %v2781_v52, %v2781_v52  ;;  %1690 = vst.msk [vmem:[%s3216_s3 + $0x9c] sm:$0xf] %vm1650_vm2, %v1905_v56  ;;  %v834_v2 = vadd.f32 %v2508_v26, %v128_v38  ;;  %v839_v9 = vadd.f32 %v2518_v41, %v133_v40  ;;  %v141_v16 = vld [vmem:[#allocation2 + $0x1b0] sm:$0xff]  ;;  %v142_v8 = vld [vmem:[#allocation2 + $0x1b8] sm:$0xff]  ;;  %v140_v18 = vld [vmem:[#allocation2 + $0x1a8] sm:$0xff] }
 0x126   :  { %v837_v5 = vadd.f32 %v2531_v54, %v131_v43  ;;  %v1317_v17 = vadd.f32 %v1316_v44, %v1315_v22  ;;  %v1122_v39 = vadd.f32 %v1121_v53, %v1120_v51  ;;  %898 = vst.msk [vmem:[#allocation2 + $0x140] sm:$0xff] %vm22_vm0, %v833_v24  ;;  %v840_v36 = vadd.f32 %v2542_v4, %v134_v45  ;;  %v145_v15 = vld [vmem:[#allocation2 + $0x1d0] sm:$0xff]  ;;  %v143_v26 = vld [vmem:[#allocation2 + $0x1c0] sm:$0xff]  ;;  %v146_v4 = vld [vmem:[#allocation2 + $0x1d8] sm:$0xff] }
 0x127   :  { %901 = vst.msk [vmem:[#allocation2 + $0x158] sm:$0xff] %vm22_vm0, %v836_v42  ;;  %v838_v33 = vadd.f32 %v2554_v19, %v132_v47  ;;  %899 = vst.msk [vmem:[#allocation2 + $0x148] sm:$0xff] %vm22_vm0, %v834_v2  ;;  %v843_v41 = vadd.f32 %v2565_v32, %v137_v57  ;;  %v841_v54 = vadd.f32 %v2577_v46, %v135_v58  ;;  %v144_v35 = vld [vmem:[#allocation2 + $0x1c8] sm:$0xff]  ;;  %v149_v19 = vld [vmem:[#allocation2 + $0x1f0] sm:$0xff] }
 0x128   :  { %904 = vst.msk [vmem:[#allocation2 + $0x170] sm:$0xff] %vm22_vm0, %v839_v9  ;;  %902 = vst.msk [vmem:[#allocation2 + $0x160] sm:$0xff] %vm22_vm0, %v837_v5  ;;  %v844_v28 = vadd.f32 %v2591_v62, %v138_v60  ;;  %v842_v34 = vadd.f32 %v2602_v11, %v136_v63  ;;  %v1124_v38 = vadd.f32 %v2749_v61, %v1122_v39  ;;  %v147_v44 = vld [vmem:[#allocation2 + $0x1e0] sm:$0xff]  ;;  %v150_v46 = vld [vmem:[#allocation2 + $0x1f8] sm:$0xff]  ;;  %v781_v62 = vpop.f32.mrf.mxu1 }
 0x129   :  { %v1319_v40 = vadd.f32 %v1318_v13, %v1317_v17  ;;  %905 = vst.msk [vmem:[#allocation2 + $0x178] sm:$0xff] %vm22_vm0, %v840_v36  ;;  %903 = vst.msk [vmem:[#allocation2 + $0x168] sm:$0xff] %vm22_vm0, %v838_v33  ;;  %v847_v43 = vadd.f32 %v2614_v27, %v141_v16  ;;  %v845_v32 = vadd.f32 %v2633_v50, %v139_v49  ;;  %v148_v53 = vld [vmem:[#allocation2 + $0x1e8] sm:$0xff] }
 0x12a   :  { %908 = vst.msk [vmem:[#allocation2 + $0x190] sm:$0xff] %vm22_vm0, %v843_v41  ;;  %906 = vst.msk [vmem:[#allocation2 + $0x180] sm:$0xff] %vm22_vm0, %v841_v54  ;;  %v848_v11 = vadd.f32 %v2657_v14, %v142_v8  ;;  %v846_v61 = vadd.f32 %v2683_v55, %v140_v18  ;;  %v851_v27 = vadd.f32 %v2704_v30, %v145_v15  ;;  %v1135_v18 = vsel %vm22_vm0, %v2743_v21, 0.0 }
 0x12b   :  { %909 = vst.msk [vmem:[#allocation2 + $0x198] sm:$0xff] %vm22_vm0, %v844_v28  ;;  %907 = vst.msk [vmem:[#allocation2 + $0x188] sm:$0xff] %vm22_vm0, %v842_v34  ;;  %v849_v50 = vadd.f32 %v2725_v3, %v143_v26  ;;  %v1126_v13 = vadd.f32 %v2784_v6, %v1124_v38  ;;  %v1321_v56 = vadd.f32 %v2753_v23, %v1319_v40  ;;  %v962_v57 = vld [vmem:[#allocation2 + $0x128] sm:$0xff]  ;;  %v967_v14 = vld [vmem:[#allocation2 + $0x150] sm:$0xff]  ;;  %v1137_v28 = vsel %vm22_vm0, %v2840_v20, 0.0 }
 0x12c   :  { %912 = vst.msk [vmem:[#allocation2 + $0x1b0] sm:$0xff] %vm22_vm0, %v847_v43  ;;  %910 = vst.msk [vmem:[#allocation2 + $0x1a0] sm:$0xff] %vm22_vm0, %v845_v32  ;;  %v852_v45 = vadd.f32 %v2755_v29, %v146_v4  ;;  %v850_v47 = vadd.f32 %v2786_v7, %v144_v35  ;;  %v855_v55 = vadd.f32 %v2812_v1, %v149_v19  ;;  %v2909_v7 = vld [vmem:[%s3215_s2] ss:$0 sm:$0xff]  ;;  %v1324_v1 = vsel %vm22_vm0, %v2729_v0, 0.0 }
 0x12d   :  { %913 = vst.msk [vmem:[#allocation2 + $0x1b8] sm:$0xff] %vm22_vm0, %v848_v11  ;;  %911 = vst.msk [vmem:[#allocation2 + $0x1a8] sm:$0xff] %vm22_vm0, %v846_v61  ;;  %v853_v30 = vadd.f32 %v2829_v12, %v147_v44  ;;  %v856_v3 = vadd.f32 %v2037_v31, %v150_v46  ;;  %v854_v23 = vadd.f32 %v781_v62, %v148_v53  ;;  %v1326_v12 = vsel %vm22_vm0, %v2776_v48, 0.0 }
 0x12e   :  { %916 = vst.msk [vmem:[#allocation2 + $0x1d0] sm:$0xff] %vm22_vm0, %v851_v27  ;;  %914 = vst.msk [vmem:[#allocation2 + $0x1c0] sm:$0xff] %vm22_vm0, %v849_v50  ;;  %v1128_v29 = vadd.f32 %v2612_v25, %v1126_v13  ;;  %v1323_v6 = vadd.f32 %v2827_v10, %v1321_v56  ;;  %v1033_v51 = vadd.f32 %v2909_v7, %v962_v57  ;;  %v1129_v25 = vsel %vm22_vm0, %v2667_v37, 0.0  ;;  %v965_v10 = vld [vmem:[#allocation2 + $0x140] sm:$0xff]  ;;  %v968_v58 = vld [vmem:[#allocation2 + $0x158] sm:$0xff] }
 0x12f   :  { %v2913_v22 = vadd.f32 %v2909_v7, %v967_v14  ;;  %917 = vst.msk [vmem:[#allocation2 + $0x1d8] sm:$0xff] %vm22_vm0, %v852_v45  ;;  %915 = vst.msk [vmem:[#allocation2 + $0x1c8] sm:$0xff] %vm22_vm0, %v850_v47  ;;  %v1231_v42 = vmul.f32 %v2743_v21, %v2743_v21  ;;  %v966_v60 = vld [vmem:[#allocation2 + $0x148] sm:$0xff]  ;;  %v1131_v37 = vsel %vm22_vm0, %v2781_v52, 0.0  ;;  %v971_v9 = vld [vmem:[#allocation2 + $0x170] sm:$0xff]  ;;  %v1328_v48 = vsel %vm22_vm0, %v2859_v59, 0.0 }
 0x130   :  { %920 = vst.msk [vmem:[#allocation2 + $0x1f0] sm:$0xff] %vm22_vm0, %v855_v55  ;;  %918 = vst.msk [vmem:[#allocation2 + $0x1e0] sm:$0xff] %vm22_vm0, %v853_v30  ;;  %v1325_v24 = vadd.f32 %v1324_v1, %v1323_v6  ;;  %v1130_v0 = vadd.f32 %v1129_v25, %v1128_v29  ;;  %v1230_v63 = vmul.f32 %v1033_v51, %v1033_v51  ;;  %v1133_v17 = vsel %vm22_vm0, %v1033_v51, 0.0  ;;  %v969_v35 = vld [vmem:[#allocation2 + $0x160] sm:$0xff]  ;;  %v972_v19 = vld [vmem:[#allocation2 + $0x178] sm:$0xff] }
 0x131   :  { %921 = vst.msk [vmem:[#allocation2 + $0x1f8] sm:$0xff] %vm22_vm0, %v856_v3  ;;  %919 = vst.msk [vmem:[#allocation2 + $0x1e8] sm:$0xff] %vm22_vm0, %v854_v23  ;;  %v1903_v31 = vpack.c.bf16 %v1033_v51, %v1033_v51  ;;  %v1908_v2 = vpack.c.bf16 %v2913_v22, %v2913_v22  ;;  %v1036_v49 = vadd.f32 %v2909_v7, %v965_v10  ;;  %v1332_v54 = vsel %vm22_vm0, %v1231_v42, 0.0  ;;  %v970_v38 = vld [vmem:[#allocation2 + $0x168] sm:$0xff]  ;;  %v975_v32 = vld [vmem:[#allocation2 + $0x190] sm:$0xff] }
 0x132   :  { %v1132_v5 = vadd.f32 %v1131_v37, %v1130_v0  ;;  %v1327_v16 = vadd.f32 %v1326_v12, %v1325_v24  ;;  %v1232_v8 = vmul.f32 %v2840_v20, %v2840_v20  ;;  %v1039_v52 = vadd.f32 %v2909_v7, %v968_v58  ;;  %v973_v23 = vld [vmem:[#allocation2 + $0x180] sm:$0xff]  ;;  %v976_v29 = vld [vmem:[#allocation2 + $0x198] sm:$0xff]  ;;  %v974_v6 = vld [vmem:[#allocation2 + $0x188] sm:$0xff] }
 0x133   :  { %1688 = vst.msk [vmem:[%s3216_s3 + $0x94] sm:$0xf] %vm1650_vm2, %v1903_v31  ;;  %1693 = vst.msk [vmem:[%s3216_s3 + $0xa8] sm:$0xf] %vm1650_vm2, %v1908_v2  ;;  %v1037_v59 = vadd.f32 %v2909_v7, %v966_v60  ;;  %v2950_v33 = vadd.f32 %v2909_v7, %v971_v9  ;;  %v1330_v15 = vsel %vm22_vm0, %v1230_v63, 0.0  ;;  %v1906_v26 = vpack.c.bf16 %v1036_v49, %v1036_v49  ;;  %v977_v12 = vld [vmem:[#allocation2 + $0x1a0] sm:$0xff] }
 0x134   :  { %v1329_v39 = vadd.f32 %v1328_v48, %v1327_v16  ;;  %v1134_v36 = vadd.f32 %v1133_v17, %v1132_v5  ;;  %v1909_v41 = vpack.c.bf16 %v1039_v52, %v1039_v52  ;;  %v1334_v40 = vsel %vm22_vm0, %v1232_v8, 0.0  ;;  %v978_v24 = vld [vmem:[#allocation2 + $0x1a8] sm:$0xff] }
 0x135   :  { %v1235_v43 = vmul.f32 %v2913_v22, %v2913_v22  ;;  %v1233_v21 = vmul.f32 %v1036_v49, %v1036_v49  ;;  %1691 = vst.msk [vmem:[%s3216_s3 + $0xa0] sm:$0xf] %vm1650_vm2, %v1906_v26  ;;  %v1907_v20 = vpack.c.bf16 %v1037_v59, %v1037_v59  ;;  %v1139_v53 = vsel %vm22_vm0, %v1036_v49, 0.0 }
 0x136   :  { %v1136_v34 = vadd.f32 %v1135_v18, %v1134_v36  ;;  %v1331_v4 = vadd.f32 %v1330_v15, %v1329_v39  ;;  %1694 = vst.msk [vmem:[%s3216_s3 + $0xac] sm:$0xf] %vm1650_vm2, %v1909_v41  ;;  %v1912_v62 = vpack.c.bf16 %v2950_v33, %v2950_v33  ;;  %v1234_v11 = vmul.f32 %v1037_v59, %v1037_v59 }
 0x137   :  { %1692 = vst.msk [vmem:[%s3216_s3 + $0xa4] sm:$0xf] %vm1650_vm2, %v1907_v20  ;;  %v1040_v61 = vadd.f32 %v2909_v7, %v969_v35  ;;  %v1043_v27 = vadd.f32 %v2909_v7, %v972_v19  ;;  %v1041_v50 = vadd.f32 %v2909_v7, %v970_v38  ;;  %v2984_v45 = vadd.f32 %v2909_v7, %v975_v32  ;;  %v979_v32 = vld [vmem:[#allocation2 + $0x1b0] sm:$0xff] }
 0x138   :  { %v1333_v44 = vadd.f32 %v1332_v54, %v1331_v4  ;;  %v1138_v46 = vadd.f32 %v1137_v28, %v1136_v34  ;;  %1697 = vst.msk [vmem:[%s3216_s3 + $0xb8] sm:$0xf] %vm1650_vm2, %v1912_v62  ;;  %v1336_v47 = vsel %vm22_vm0, %v1233_v21, 0.0  ;;  %v1141_v57 = vsel %vm22_vm0, %v1037_v59, 0.0  ;;  %v981_v62 = vld [vmem:[#allocation2 + $0x1c0] sm:$0xff] }
 0x139   :  { %v1910_v14 = vpack.c.bf16 %v1040_v61, %v1040_v61  ;;  %v1913_v3 = vpack.c.bf16 %v1043_v27, %v1043_v27  ;;  %v1143_v51 = vsel %vm22_vm0, %v2913_v22, 0.0  ;;  %v1340_v1 = vsel %vm22_vm0, %v1235_v43, 0.0 }
 0x13a   :  { %v1140_v13 = vadd.f32 %v1139_v53, %v1138_v46  ;;  %v1335_v56 = vadd.f32 %v1334_v40, %v1333_v44  ;;  %v1338_v25 = vsel %vm22_vm0, %v1234_v11, 0.0  ;;  %v1911_v10 = vpack.c.bf16 %v1041_v50, %v1041_v50  ;;  %v980_v53 = vld [vmem:[#allocation2 + $0x1b8] sm:$0xff]  ;;  %v982_v11 = vld [vmem:[#allocation2 + $0x1c8] sm:$0xff] }
 0x13b   :  { %1695 = vst.msk [vmem:[%s3216_s3 + $0xb0] sm:$0xf] %vm1650_vm2, %v1910_v14  ;;  %v1236_v42 = vmul.f32 %v1039_v52, %v1039_v52  ;;  %1698 = vst.msk [vmem:[%s3216_s3 + $0xbc] sm:$0xf] %vm1650_vm2, %v1913_v3  ;;  %v1916_v22 = vpack.c.bf16 %v2984_v45, %v2984_v45  ;;  %v1145_v60 = vsel %vm22_vm0, %v1039_v52, 0.0  ;;  %v1044_v37 = vadd.f32 %v2909_v7, %v973_v23  ;;  %v985_v14 = vld [vmem:[#allocation2 + $0x1e0] sm:$0xff] }
 0x13c   :  { %v1337_v55 = vadd.f32 %v1336_v47, %v1335_v56  ;;  %v1142_v30 = vadd.f32 %v1141_v57, %v1140_v13  ;;  %1696 = vst.msk [vmem:[%s3216_s3 + $0xb4] sm:$0xf] %vm1650_vm2, %v1911_v10  ;;  %v3009_v63 = vadd.f32 %v2909_v7, %v976_v29  ;;  %v1045_v31 = vadd.f32 %v2909_v7, %v974_v6  ;;  %v983_v56 = vld [vmem:[#allocation2 + $0x1d0] sm:$0xff]  ;;  %v988_v29 = vld [vmem:[#allocation2 + $0x1f8] sm:$0xff] }
 0x13d   :  { %1701 = vst.msk [vmem:[%s3216_s3 + $0xc8] sm:$0xf] %vm1650_vm2, %v1916_v22  ;;  %v3017_v5 = vadd.f32 %v2909_v7, %v977_v12  ;;  %v3020_v16 = vadd.f32 %v2909_v7, %v978_v24  ;;  %v1147_v48 = vsel %vm22_vm0, %v1040_v61, 0.0  ;;  %v1914_v49 = vpack.c.bf16 %v1044_v37, %v1044_v37  ;;  %v987_v23 = vld [vmem:[#allocation2 + $0x1f0] sm:$0xff] }
 0x13e   :  { %v1144_v0 = vadd.f32 %v1143_v51, %v1142_v30  ;;  %v1339_v58 = vadd.f32 %v1338_v25, %v1337_v55  ;;  %v1917_v8 = vpack.c.bf16 %v3009_v63, %v3009_v63  ;;  %v1342_v17 = vsel %vm22_vm0, %v1236_v42, 0.0  ;;  %v986_v55 = vld [vmem:[#allocation2 + $0x1e8] sm:$0xff] }
 0x13f   :  { %v1237_v59 = vmul.f32 %v1040_v61, %v1040_v61  ;;  %v1915_v39 = vpack.c.bf16 %v1045_v31, %v1045_v31  ;;  %v1149_v18 = vsel %vm22_vm0, %v1041_v50, 0.0  ;;  %1699 = vst.msk [vmem:[%s3216_s3 + $0xc0] sm:$0xf] %vm1650_vm2, %v1914_v49  ;;  %v1918_v15 = vpack.c.bf16 %v3017_v5, %v3017_v5 }
 0x140   :  { %v1341_v2 = vadd.f32 %v1340_v1, %v1339_v58  ;;  %v1146_v9 = vadd.f32 %v1145_v60, %v1144_v0  ;;  %1702 = vst.msk [vmem:[%s3216_s3 + $0xcc] sm:$0xf] %vm1650_vm2, %v1917_v8  ;;  %v1919_v26 = vpack.c.bf16 %v3020_v16, %v3020_v16  ;;  %v1151_v54 = vsel %vm22_vm0, %v2950_v33, 0.0 }
 0x141   :  { %1700 = vst.msk [vmem:[%s3216_s3 + $0xc4] sm:$0xf] %vm1650_vm2, %v1915_v39  ;;  %1703 = vst.msk [vmem:[%s3216_s3 + $0xd0] sm:$0xf] %vm1650_vm2, %v1918_v15  ;;  %v1344_v28 = vsel %vm22_vm0, %v1237_v59, 0.0  ;;  %v1238_v4 = vmul.f32 %v1041_v50, %v1041_v50  ;;  %v1153_v19 = vsel %vm22_vm0, %v1043_v27, 0.0  ;;  %v1239_v38 = vmul.f32 %v2950_v33, %v2950_v33 }
 0x142   :  { %v1148_v52 = vadd.f32 %v1147_v48, %v1146_v9  ;;  %v1343_v36 = vadd.f32 %v1342_v17, %v1341_v2  ;;  %1704 = vst.msk [vmem:[%s3216_s3 + $0xd4] sm:$0xf] %vm1650_vm2, %v1919_v26  ;;  %v1240_v40 = vmul.f32 %v1043_v27, %v1043_v27  ;;  %v1155_v21 = vsel %vm22_vm0, %v1044_v37, 0.0  ;;  %v984_v33 = vld [vmem:[#allocation2 + $0x1d8] sm:$0xff] }
 0x143   :  { %v1346_v20 = vsel %vm22_vm0, %v1238_v4, 0.0  ;;  %v1157_v61 = vsel %vm22_vm0, %v1045_v31, 0.0  ;;  %v1348_v50 = vsel %vm22_vm0, %v1239_v38, 0.0  ;;  %v1241_v47 = vmul.f32 %v1044_v37, %v1044_v37 }
 0x144   :  { %v1150_v41 = vadd.f32 %v1149_v18, %v1148_v52  ;;  %v1345_v35 = vadd.f32 %v1344_v28, %v1343_v36  ;;  %v1350_v13 = vsel %vm22_vm0, %v1240_v40, 0.0  ;;  %v1242_v57 = vmul.f32 %v1045_v31, %v1045_v31 }
 0x145   :  { %v1050_v30 = vadd.f32 %v2909_v7, %v979_v32  ;;  %v1159_v3 = vsel %vm22_vm0, %v2984_v45, 0.0  ;;  %v1051_v6 = vadd.f32 %v2909_v7, %v980_v53  ;;  %v3067_v51 = vadd.f32 %v2909_v7, %v981_v62 }
 0x146   :  { %v1152_v34 = vadd.f32 %v1151_v54, %v1150_v41  ;;  %v1347_v46 = vadd.f32 %v1346_v20, %v1345_v35  ;;  %v3070_v1 = vadd.f32 %v2909_v7, %v982_v11  ;;  %v3073_v10 = vadd.f32 %v2909_v7, %v983_v56 }
 0x147   :  { %v3076_v12 = vadd.f32 %v2909_v7, %v984_v33  ;;  %v1161_v24 = vsel %vm22_vm0, %v3009_v63, 0.0  ;;  %v3081_v0 = vadd.f32 %v2909_v7, %v985_v14  ;;  %v3084_v58 = vadd.f32 %v2909_v7, %v986_v55 }
 0x148   :  { %v1154_v43 = vadd.f32 %v1153_v19, %v1152_v34  ;;  %v1349_v42 = vadd.f32 %v1348_v50, %v1347_v46  ;;  %v1243_v60 = vmul.f32 %v2984_v45, %v2984_v45  ;;  %v3089_v37 = vadd.f32 %v2909_v7, %v987_v23 }
 0x149   :  { %v3092_v31 = vadd.f32 %v2909_v7, %v988_v29  ;;  %v1163_v2 = vsel %vm22_vm0, %v3017_v5, 0.0  ;;  %v1165_v49 = vsel %vm22_vm0, %v3020_v16, 0.0  ;;  %v1167_v8 = vsel %vm22_vm0, %v1050_v30, 0.0 }
 0x14a   :  { %v1156_v44 = vadd.f32 %v1155_v21, %v1154_v43  ;;  %v1351_v9 = vadd.f32 %v1350_v13, %v1349_v42  ;;  %v1352_v17 = vsel %vm22_vm0, %v1241_v47, 0.0  ;;  %v1169_v45 = vsel %vm22_vm0, %v1051_v6, 0.0 }
 0x14b   :  { %v1244_v52 = vmul.f32 %v3009_v63, %v3009_v63  ;;  %v1245_v7 = vmul.f32 %v3017_v5, %v3017_v5  ;;  %v1354_v36 = vsel %vm22_vm0, %v1242_v57, 0.0  ;;  %v1356_v18 = vsel %vm22_vm0, %v1243_v60, 0.0 }
 0x14c   :  { %v1158_v27 = vadd.f32 %v1157_v61, %v1156_v44  ;;  %v1353_v59 = vadd.f32 %v1352_v17, %v1351_v9  ;;  %v1920_v15 = vpack.c.bf16 %v1050_v30, %v1050_v30  ;;  %v1921_v41 = vpack.c.bf16 %v1051_v6, %v1051_v6 }
 0x14d   :  { %v1922_v54 = vpack.c.bf16 %v3067_v51, %v3067_v51  ;;  %v1923_v28 = vpack.c.bf16 %v3070_v1, %v3070_v1  ;;  %v1924_v63 = vpack.c.bf16 %v3073_v10, %v3073_v10  ;;  %v1925_v5 = vpack.c.bf16 %v3076_v12, %v3076_v12 }
 0x14e   :  { %v1160_v25 = vadd.f32 %v1159_v3, %v1158_v27  ;;  %v1355_v26 = vadd.f32 %v1354_v36, %v1353_v59  ;;  %v1926_v4 = vpack.c.bf16 %v3081_v0, %v3081_v0  ;;  %1705 = vst.msk [vmem:[%s3216_s3 + $0xd8] sm:$0xf] %vm1650_vm2, %v1920_v15  ;;  %v1927_v19 = vpack.c.bf16 %v3084_v58, %v3084_v58 }
 0x14f   :  { %v1928_v38 = vpack.c.bf16 %v3089_v37, %v3089_v37  ;;  %v1929_v40 = vpack.c.bf16 %v3092_v31, %v3092_v31  ;;  %1706 = vst.msk [vmem:[%s3216_s3 + $0xdc] sm:$0xf] %vm1650_vm2, %v1921_v41  ;;  %1707 = vst.msk [vmem:[%s3216_s3 + $0xe0] sm:$0xf] %vm1650_vm2, %v1922_v54  ;;  %v1246_v21 = vmul.f32 %v3020_v16, %v3020_v16  ;;  %v1358_v20 = vsel %vm22_vm0, %v1244_v52, 0.0 }
 0x150   :  { %v1162_v22 = vadd.f32 %v1161_v24, %v1160_v25  ;;  %v1357_v35 = vadd.f32 %v1356_v18, %v1355_v26  ;;  %1708 = vst.msk [vmem:[%s3216_s3 + $0xe4] sm:$0xf] %vm1650_vm2, %v1923_v28  ;;  %1709 = vst.msk [vmem:[%s3216_s3 + $0xe8] sm:$0xf] %vm1650_vm2, %v1924_v63  ;;  %v1171_v16 = vsel %vm22_vm0, %v3067_v51, 0.0  ;;  %v1247_v46 = vmul.f32 %v1050_v30, %v1050_v30 }
 0x151   :  { %1710 = vst.msk [vmem:[%s3216_s3 + $0xec] sm:$0xf] %vm1650_vm2, %v1925_v5  ;;  %1711 = vst.msk [vmem:[%s3216_s3 + $0xf0] sm:$0xf] %vm1650_vm2, %v1926_v4  ;;  %v1360_v53 = vsel %vm22_vm0, %v1245_v7, 0.0  ;;  %v1173_v62 = vsel %vm22_vm0, %v3070_v1, 0.0  ;;  %v1248_v50 = vmul.f32 %v1051_v6, %v1051_v6  ;;  %v1249_v47 = vmul.f32 %v3067_v51, %v3067_v51 }
 0x152   :  { %v1164_v48 = vadd.f32 %v1163_v2, %v1162_v22  ;;  %v1359_v32 = vadd.f32 %v1358_v20, %v1357_v35  ;;  %1712 = vst.msk [vmem:[%s3216_s3 + $0xf4] sm:$0xf] %vm1650_vm2, %v1927_v19  ;;  %1713 = vst.msk [vmem:[%s3216_s3 + $0xf8] sm:$0xf] %vm1650_vm2, %v1928_v38  ;;  %v1362_v13 = vsel %vm22_vm0, %v1246_v21, 0.0  ;;  %v1175_v56 = vsel %vm22_vm0, %v3073_v10, 0.0 }
 0x153   :  { %1714 = vst.msk [vmem:[%s3216_s3 + $0xfc] sm:$0xf] %vm1650_vm2, %v1929_v40  ;;  %v1364_v57 = vsel %vm22_vm0, %v1247_v46, 0.0  ;;  %v1177_v14 = vsel %vm22_vm0, %v3076_v12, 0.0  ;;  %v1250_v3 = vmul.f32 %v3070_v1, %v3070_v1  ;;  %v1366_v23 = vsel %vm22_vm0, %v1248_v50, 0.0  ;;  %s2108_s3 = smov [#allocation3]  }
 0x154   :  { %v1166_v39 = vadd.f32 %v1165_v49, %v1164_v48  ;;  %v1361_v11 = vadd.f32 %v1360_v53, %v1359_v32  ;;  %v1179_v29 = vsel %vm22_vm0, %v3081_v0, 0.0  ;;  %v1251_v51 = vmul.f32 %v3073_v10, %v3073_v10  ;;  %s1723_s23 = sshll.u32 %s2108_s3, 4  ;;  %s1724_s23 = int_to_ptr.vmem [resolvable:$true] %s1723_s23 }
 0x155   :  { %v1368_v24 = vsel %vm22_vm0, %v1249_v47, 0.0  ;;  %v1181_v42 = vsel %vm22_vm0, %v3084_v58, 0.0  ;;  %v1252_v1 = vmul.f32 %v3076_v12, %v3076_v12  ;;  %v1370_v2 = vsel %vm22_vm0, %v1250_v3, 0.0  ;;  %s2085_s24 = scalar_lea.vmem %s1724_s23, 32  ;;  %p2090_p1 = scmp.lt.s32.totalorder %s1724_s23, %s1724_s23 }
 0x156   :  { %v1168_v34 = vadd.f32 %v1167_v8, %v1166_v39  ;;  %v1363_v33 = vadd.f32 %v1362_v13, %v1361_v11  ;;  %v1183_v9 = vsel %vm22_vm0, %v3089_v37, 0.0  ;;  %v1253_v10 = vmul.f32 %v3081_v0, %v3081_v0  ;;  %p2086_p0 = scmp.ne.s32.totalorder %s1724_s23, %s2085_s24  ;;  %p2091_p2 = scmp.lt.s32.totalorder %s2085_s24, %s2085_s24 }
 0x157   :  { %v1372_v8 = vsel %vm22_vm0, %v1251_v51, 0.0  ;;  %v1185_v17 = vsel %vm22_vm0, %v3092_v31, 0.0  ;;  %v1254_v12 = vmul.f32 %v3084_v58, %v3084_v58  ;;  %v1374_v7 = vsel %vm22_vm0, %v1252_v1, 0.0 }
 0x158   :  { %v1170_v43 = vadd.f32 %v1169_v45, %v1168_v34  ;;  %v1365_v55 = vadd.f32 %v1364_v57, %v1363_v33  ;;  %v1255_v36 = vmul.f32 %v3089_v37, %v3089_v37  ;;  %v1376_v18 = vsel %vm22_vm0, %v1253_v10, 0.0  ;;  %p2092_p3 = por %p2091_p2, %p2090_p1 }
 0x159   :  { %v1256_v15 = vmul.f32 %v3092_v31, %v3092_v31  ;;  %v1378_v26 = vsel %vm22_vm0, %v1254_v12, 0.0 }
 0x15a   :  { %v1172_v44 = vadd.f32 %v1171_v16, %v1170_v43  ;;  %v1367_v6 = vadd.f32 %v1366_v23, %v1365_v55  ;;  %v1380_v28 = vsel %vm22_vm0, %v1255_v36, 0.0  ;;  %p2093_p4 = pnand %p2092_p3, %p2086_p0 }
 0x15b   :  { %v1382_v34 = vsel %vm22_vm0, %v1256_v15, 0.0 }
 0x15c   :  { %v1174_v61 = vadd.f32 %v1173_v62, %v1172_v44  ;;  %v1369_v22 = vadd.f32 %v1368_v24, %v1367_v6 }
 0x15e   :  { %v1176_v27 = vadd.f32 %v1175_v56, %v1174_v61  ;;  %v1371_v48 = vadd.f32 %v1370_v2, %v1369_v22 }
 0x160   :  { %v1178_v30 = vadd.f32 %v1177_v14, %v1176_v27  ;;  %v1373_v45 = vadd.f32 %v1372_v8, %v1371_v48 }
 0x162   :  { %v1180_v25 = vadd.f32 %v1179_v29, %v1178_v30  ;;  %v1375_v59 = vadd.f32 %v1374_v7, %v1373_v45 }
 0x164   :  { %v1182_v60 = vadd.f32 %v1181_v42, %v1180_v25  ;;  %v1377_v0 = vadd.f32 %v1376_v18, %v1375_v59 }
 0x166   :  { %v1184_v49 = vadd.f32 %v1183_v9, %v1182_v60  ;;  %v1379_v54 = vadd.f32 %v1378_v26, %v1377_v0 }
 0x168   :  { %v1186_v52 = vadd.f32 %v1185_v17, %v1184_v49  ;;  %v1381_v58 = vadd.f32 %v1380_v28, %v1379_v54 }
 0x16a   :  { %v1187_v39 = vrot.slane %v1186_v52, 4  ;;  %v1383_v5 = vadd.f32 %v1382_v34, %v1381_v58 }
 0x16c   :  { %v1188_v41 = vadd.f32 %v1187_v39, %v1186_v52  ;;  %v1384_v4 = vrot.slane %v1383_v5, 4 }
 0x16e   :  { %v1189_v63 = vrot.slane %v1188_v41, 2  ;;  %v1385_v37 = vadd.f32 %v1384_v4, %v1383_v5 }
 0x170   :  { %v1190_v35 = vadd.f32 %v1189_v63, %v1188_v41  ;;  %v1386_v19 = vrot.slane %v1385_v37, 2 }
 0x172   :  { %v1191_v38 = vrot.slane %v1190_v35, 1  ;;  %v1387_v40 = vadd.f32 %v1386_v19, %v1385_v37 }
 0x174   :  { %v1388_v43 = vrot.slane %v1387_v40, 1  ;;  %v1192_v31 = vadd.f32 %v1191_v38, %v1190_v35 }
 0x176   :  { %v1389_v21 = vadd.f32 %v1388_v43, %v1387_v40 }
 0x178   :  { %v1391_v20 = vsel %vm1390_vm3, %v1192_v31, %v1389_v21 }
 0x179   :  { %1393 = vst.msk [vmem:[#allocation3] sm:$0x3] %vm1392_vm4, %v1391_v20 }
 0x17a   :  { %2096 = shalt.err (!%p2093_p4)
}
 0x17b   :  { %1726 = dma.vmem_to_hbm [thread:$0]  %s1724_s23, 32, %s3217_s4, [#allocation4]  }
 0x17c   :  { %2105 = dma.done.wait [#allocation4], 32  }
 0x17d   :  { %2106 = vsyncadd [#allocation4], 4294967264 }
 0x17e   :  { %1732 = vsyncpa [#allocation4], 1 }

// kernel: unet_forward.11
= control target key start
LH: loop header
LB: loop body
LE: loop exit
PB: predicated region body
PF: predicated region fallthrough
CT: control target
= control target key end

     0   :  { %vm21_vm0 = vcmask 130048   ;;  %v667_v1 = vmov 0.0   ;;  %vm512_vm1 = vcmask 125952   ;;  %vm444_vm2 = vcmask 1040384   ;;  %s914_s1 = inlined_call_operand.vmem [shape: bf16[1,128,16], index: 1, kind: input, shape index: {}]   ;;  %s915_s0 = inlined_call_operand.vmem [shape: bf16[1,128,128], index: 0, kind: input, shape index: {}]   ;;  %s916_s2 = inlined_call_operand.vmem [shape: f32[1,16], index: 2, kind: input, shape index: {}]   ;;  %s917_s3 = inlined_call_operand.vmem [shape: bf16[1,128,16], index: 3, kind: output, shape index: {0}]   ;;  %s918_s4 = inlined_call_operand.vmem [shape: f32[1,1,2,16], index: 4, kind: output, shape index: {1}]  }
   0x1   :  { %v651_v0 = vld [vmem:[%s914_s1 + $0x38] sm:$0xff]   ;;  %24 = vst.msk [vmem:[#allocation2 + $0x10] sm:$0xff] %vm21_vm0, %v667_v1  ;;  %22 = vst.msk [vmem:[#allocation2] sm:$0xff] %vm21_vm0, %v667_v1  ;;  %v652_v2 = vld [vmem:[%s914_s1 + $0x30] sm:$0xff]   ;;  %vm446_vm3 = vcmask 123904  }
   0x2   :  { %23 = vst.msk [vmem:[#allocation2 + $0x8] sm:$0xff] %vm21_vm0, %v667_v1  ;;  %25 = vst.msk [vmem:[#allocation2 + $0x18] sm:$0xff] %vm21_vm0, %v667_v1  ;;  %602 = vmatprep.subr.bf16.mxu0 %v651_v0  ;;  %634 = vmatprep.subr.bf16.mxu1 %v651_v0  ;;  %v653_v3 = vld [vmem:[%s914_s1 + $0x28] sm:$0xff]   ;;  %v654_v4 = vld [vmem:[%s914_s1 + $0x20] sm:$0xff]  }
   0x3   :  { %26 = vst.msk [vmem:[#allocation2 + $0x20] sm:$0xff] %vm21_vm0, %v667_v1  ;;  %27 = vst.msk [vmem:[#allocation2 + $0x28] sm:$0xff] %vm21_vm0, %v667_v1  ;;  %603 = vmatpush3.bf16.msra.mxu0 %v651_v0  ;;  %642 = vmatpush3.bf16.msra.mxu1 %v651_v0  ;;  %v659_v5 = vld [vmem:[%s915_s0] sm:$0xff]   ;;  %v655_v6 = vld [vmem:[%s914_s1 + $0x18] sm:$0xff]  }
   0x4   :  { %28 = vst.msk [vmem:[#allocation2 + $0x30] sm:$0xff] %vm21_vm0, %v667_v1  ;;  %29 = vst.msk [vmem:[#allocation2 + $0x38] sm:$0xff] %vm21_vm0, %v667_v1  ;;  %604 = vmatprep.subr.bf16.mxu0 %v652_v2  ;;  %635 = vmatprep.subr.bf16.mxu1 %v652_v2  ;;  %v663_v7 = vld [vmem:[%s915_s0 + $0x20] sm:$0xff]   ;;  %v656_v8 = vld [vmem:[%s914_s1 + $0x10] sm:$0xff]  }
   0x5   :  { %30 = vst.msk [vmem:[#allocation2 + $0x40] sm:$0xff] %vm21_vm0, %v667_v1  ;;  %31 = vst.msk [vmem:[#allocation2 + $0x48] sm:$0xff] %vm21_vm0, %v667_v1  ;;  %618 = vmatprep.mubr.bf16.mxu0 %v659_v5  ;;  %626 = vmatprep.mubr.bf16.mxu1 %v663_v7  ;;  %v657_v9 = vld [vmem:[%s914_s1 + $0x8] sm:$0xff]   ;;  %v658_v10 = vld [vmem:[%s914_s1] sm:$0xff]  }
   0x6   :  { %32 = vst.msk [vmem:[#allocation2 + $0x50] sm:$0xff] %vm21_vm0, %v667_v1  ;;  %33 = vst.msk [vmem:[#allocation2 + $0x58] sm:$0xff] %vm21_vm0, %v667_v1  ;;  %v660_v11 = vld [vmem:[%s915_s0 + $0x8] sm:$0xff]   ;;  %v661_v13 = vld [vmem:[%s915_s0 + $0x10] sm:$0xff]  }
   0x7   :  { %34 = vst.msk [vmem:[#allocation2 + $0x60] sm:$0xff] %vm21_vm0, %v667_v1  ;;  %35 = vst.msk [vmem:[#allocation2 + $0x68] sm:$0xff] %vm21_vm0, %v667_v1  ;;  %605 = vmatpush3.bf16.msra.mxu0 %v652_v2  ;;  %643 = vmatpush3.bf16.msra.mxu1 %v652_v2  ;;  %v664_v12 = vld [vmem:[%s915_s0 + $0x28] sm:$0xff]   ;;  %v665_v14 = vld [vmem:[%s915_s0 + $0x30] sm:$0xff]  }
   0x8   :  { %36 = vst.msk [vmem:[#allocation2 + $0x70] sm:$0xff] %vm21_vm0, %v667_v1  ;;  %37 = vst.msk [vmem:[#allocation2 + $0x78] sm:$0xff] %vm21_vm0, %v667_v1  ;;  %606 = vmatprep.subr.bf16.mxu0 %v653_v3  ;;  %636 = vmatprep.subr.bf16.mxu1 %v653_v3  ;;  %v662_v15 = vld [vmem:[%s915_s0 + $0x18] sm:$0xff]   ;;  %v40_v17 = vld [vmem:[#allocation2 + $0x10] sm:$0xff] }
   0x9   :  { %v666_v16 = vld [vmem:[%s915_s0 + $0x38] sm:$0xff]   ;;  %v38_v20 = vld [vmem:[#allocation2] sm:$0xff]  ;;  %v39_v32 = vld [vmem:[#allocation2 + $0x8] sm:$0xff] }
   0xa   :  { %v41_v26 = vld [vmem:[#allocation2 + $0x18] sm:$0xff]  ;;  %v766_v43 = vld [vmem:[%s916_s2] ss:$0 sm:$0xff]  ;;  %v43_v0 = vld [vmem:[#allocation2 + $0x28] sm:$0xff] }
   0xb   :  { %607 = vmatpush3.bf16.msra.mxu0 %v653_v3  ;;  %644 = vmatpush3.bf16.msra.mxu1 %v653_v3  ;;  %v44_v38 = vld [vmem:[#allocation2 + $0x30] sm:$0xff]  ;;  %v42_v45 = vld [vmem:[#allocation2 + $0x20] sm:$0xff]  ;;  %v45_v57 = vld [vmem:[#allocation2 + $0x38] sm:$0xff] }
   0xc   :  { %608 = vmatprep.subr.bf16.mxu0 %v654_v4  ;;  %637 = vmatprep.subr.bf16.mxu1 %v654_v4  ;;  %v46_v22 = vld [vmem:[#allocation2 + $0x40] sm:$0xff]  ;;  %v47_v34 = vld [vmem:[#allocation2 + $0x48] sm:$0xff] }
   0xd   :  { %v48_v18 = vld [vmem:[#allocation2 + $0x50] sm:$0xff]  ;;  %v49_v28 = vld [vmem:[#allocation2 + $0x58] sm:$0xff] }
   0xe   :  { %v50_v47 = vld [vmem:[#allocation2 + $0x60] sm:$0xff] }
   0xf   :  { %609 = vmatpush3.bf16.msra.mxu0 %v654_v4  ;;  %645 = vmatpush3.bf16.msra.mxu1 %v654_v4  ;;  %v52_v40 = vld [vmem:[#allocation2 + $0x70] sm:$0xff] }
  0x10   :  { %610 = vmatprep.subr.bf16.mxu0 %v655_v6  ;;  %638 = vmatprep.subr.bf16.mxu1 %v655_v6 }
  0x13   :  { %611 = vmatpush3.bf16.msra.mxu0 %v655_v6  ;;  %646 = vmatpush3.bf16.msra.mxu1 %v655_v6 }
  0x14   :  { %612 = vmatprep.subr.bf16.mxu0 %v656_v8  ;;  %639 = vmatprep.subr.bf16.mxu1 %v656_v8 }
  0x17   :  { %613 = vmatpush3.bf16.msra.mxu0 %v656_v8  ;;  %647 = vmatpush3.bf16.msra.mxu1 %v656_v8 }
  0x18   :  { %614 = vmatprep.subr.bf16.mxu0 %v657_v9  ;;  %640 = vmatprep.subr.bf16.mxu1 %v657_v9 }
  0x1b   :  { %615 = vmatpush3.bf16.msra.mxu0 %v657_v9  ;;  %648 = vmatpush3.bf16.msra.mxu1 %v657_v9 }
  0x1c   :  { %616 = vmatprep.subr.bf16.mxu0 %v658_v10  ;;  %641 = vmatprep.subr.bf16.mxu1 %v658_v10 }
  0x1f   :  { %617 = vmatpush3.bf16.msra.mxu0 %v658_v10  ;;  %649 = vmatpush3.bf16.msra.mxu1 %v658_v10 }
  0x22   :  { %619 = vmatmul.mubr.bf16.vlgmr.msra.gmra.mxu0 %v660_v11  ;;  %627 = vmatmul.mubr.bf16.vlgmr.msra.gmra.mxu1 %v664_v12 }
  0x23   :  { %622 = vmatprep.mubr.bf16.mxu0 %v661_v13  ;;  %630 = vmatprep.mubr.bf16.mxu1 %v665_v14 }
  0x2a   :  { %623 = vmatmul.mubr.bf16.gmra.mxu0 %v662_v15  ;;  %631 = vmatmul.mubr.bf16.gmra.mxu1 %v666_v16 }
  0xe2   :  { %v620_v19 = vpop.f32.mrf.mxu0  ;;  %v628_v21 = vpop.f32.mrf.mxu1 }
  0xe3   :  { %v281_v23 = vadd.f32 %v620_v19, %v40_v17  ;;  %v289_v24 = vadd.f32 %v628_v21, %v48_v18 }
  0xe4   :  { %v216_v25 = vpop.f32.mrf.mxu0  ;;  %v248_v27 = vpop.f32.mrf.mxu1 }
  0xe5   :  { %298 = vst.msk [vmem:[#allocation2 + $0x10] sm:$0xff] %vm21_vm0, %v281_v23  ;;  %v279_v29 = vadd.f32 %v216_v25, %v38_v20  ;;  %306 = vst.msk [vmem:[#allocation2 + $0x50] sm:$0xff] %vm21_vm0, %v289_v24  ;;  %v287_v30 = vadd.f32 %v248_v27, %v46_v22 }
  0xe6   :  { %v621_v31 = vpop.f32.mrf.mxu0  ;;  %v629_v33 = vpop.f32.mrf.mxu1 }
  0xe7   :  { %296 = vst.msk [vmem:[#allocation2] sm:$0xff] %vm21_vm0, %v279_v29  ;;  %v282_v35 = vadd.f32 %v621_v31, %v41_v26  ;;  %304 = vst.msk [vmem:[#allocation2 + $0x40] sm:$0xff] %vm21_vm0, %v287_v30  ;;  %v290_v36 = vadd.f32 %v629_v33, %v49_v28 }
  0xe8   :  { %v219_v37 = vpop.f32.mrf.mxu0  ;;  %v251_v39 = vpop.f32.mrf.mxu1 }
  0xe9   :  { %299 = vst.msk [vmem:[#allocation2 + $0x18] sm:$0xff] %vm21_vm0, %v282_v35  ;;  %v280_v41 = vadd.f32 %v219_v37, %v39_v32  ;;  %307 = vst.msk [vmem:[#allocation2 + $0x58] sm:$0xff] %vm21_vm0, %v290_v36  ;;  %v288_v42 = vadd.f32 %v251_v39, %v47_v34 }
  0xea   :  { %v624_v44 = vpop.f32.mrf.mxu0  ;;  %v632_v46 = vpop.f32.mrf.mxu1 }
  0xeb   :  { %297 = vst.msk [vmem:[#allocation2 + $0x8] sm:$0xff] %vm21_vm0, %v280_v41  ;;  %v285_v48 = vadd.f32 %v624_v44, %v44_v38  ;;  %305 = vst.msk [vmem:[#allocation2 + $0x48] sm:$0xff] %vm21_vm0, %v288_v42  ;;  %v293_v49 = vadd.f32 %v632_v46, %v52_v40 }
  0xec   :  { %v317_v50 = vld [vmem:[#allocation2 + $0x10] sm:$0xff]  ;;  %v232_v51 = vpop.f32.mrf.mxu0  ;;  %v264_v53 = vpop.f32.mrf.mxu1 }
  0xed   :  { %v325_v52 = vld [vmem:[#allocation2 + $0x50] sm:$0xff]  ;;  %v340_v54 = vadd.f32 %v766_v43, %v317_v50  ;;  %302 = vst.msk [vmem:[#allocation2 + $0x30] sm:$0xff] %vm21_vm0, %v285_v48  ;;  %v283_v55 = vadd.f32 %v232_v51, %v42_v45  ;;  %310 = vst.msk [vmem:[#allocation2 + $0x70] sm:$0xff] %vm21_vm0, %v293_v49  ;;  %v291_v58 = vadd.f32 %v264_v53, %v50_v47 }
  0xee   :  { %v773_v56 = vadd.f32 %v766_v43, %v325_v52  ;;  %v315_v59 = vld [vmem:[#allocation2] sm:$0xff]  ;;  %v625_v60 = vpop.f32.mrf.mxu0  ;;  %v633_v42 = vpop.f32.mrf.mxu1 }
  0xef   :  { %v572_v61 = vpack.c.bf16 %v340_v54, %v340_v54  ;;  %v338_v62 = vadd.f32 %v766_v43, %v315_v59  ;;  %300 = vst.msk [vmem:[#allocation2 + $0x20] sm:$0xff] %vm21_vm0, %v283_v55  ;;  %v323_v63 = vld [vmem:[#allocation2 + $0x40] sm:$0xff]  ;;  %308 = vst.msk [vmem:[#allocation2 + $0x60] sm:$0xff] %vm21_vm0, %v291_v58  ;;  %v286_v3 = vadd.f32 %v625_v60, %v45_v57  ;;  %v357_v22 = vsel %vm21_vm0, %v340_v54, 0.0  ;;  %v53_v58 = vld [vmem:[#allocation2 + $0x78] sm:$0xff] }
  0xf0   :  { %v318_v1 = vld [vmem:[#allocation2 + $0x18] sm:$0xff]  ;;  %v580_v2 = vpack.c.bf16 %v773_v56, %v773_v56  ;;  %v235_v4 = vpop.f32.mrf.mxu0  ;;  %v792_v9 = vadd.f32 %v766_v43, %v323_v63  ;;  %v393_v13 = vmul.f32 %v340_v54, %v340_v54  ;;  %v51_v63 = vld [vmem:[#allocation2 + $0x68] sm:$0xff] }
  0xf1   :  { %515 = vst.msk [vmem:[%s917_s3 + $0x8] sm:$0xf] %vm512_vm1, %v572_v61  ;;  %v570_v5 = vpack.c.bf16 %v338_v62, %v338_v62  ;;  %v326_v6 = vld [vmem:[#allocation2 + $0x58] sm:$0xff]  ;;  %v341_v7 = vadd.f32 %v766_v43, %v318_v1  ;;  %v284_v10 = vadd.f32 %v235_v4, %v43_v0  ;;  %v391_v11 = vmul.f32 %v338_v62, %v338_v62  ;;  %v267_v0 = vpop.f32.mrf.mxu1 }
  0xf2   :  { %v316_v8 = vld [vmem:[#allocation2 + $0x8] sm:$0xff]  ;;  %523 = vst.msk [vmem:[%s917_s3 + $0x28] sm:$0xf] %vm512_vm1, %v580_v2  ;;  %v354_v14 = vsel %vm21_vm0, %v338_v62, 0.0  ;;  %v802_v17 = vadd.f32 %v766_v43, %v326_v6  ;;  %v578_v25 = vpack.c.bf16 %v792_v9, %v792_v9  ;;  %v410_v34 = vsel %vm21_vm0, %v393_v13, 0.0 }
  0xf3   :  { %303 = vst.msk [vmem:[#allocation2 + $0x38] sm:$0xff] %vm21_vm0, %v286_v3  ;;  %v339_v12 = vadd.f32 %v766_v43, %v316_v8  ;;  %v573_v15 = vpack.c.bf16 %v341_v7, %v341_v7  ;;  %301 = vst.msk [vmem:[#allocation2 + $0x28] sm:$0xff] %vm21_vm0, %v284_v10  ;;  %v407_v26 = vsel %vm21_vm0, %v391_v11, 0.0  ;;  %v394_v27 = vmul.f32 %v341_v7, %v341_v7  ;;  %v324_v30 = vld [vmem:[#allocation2 + $0x48] sm:$0xff] }
  0xf4   :  { %513 = vst.msk [vmem:[%s917_s3] sm:$0xf] %vm512_vm1, %v570_v5  ;;  %v321_v16 = vld [vmem:[#allocation2 + $0x30] sm:$0xff]  ;;  %521 = vst.msk [vmem:[%s917_s3 + $0x20] sm:$0xf] %vm512_vm1, %v578_v25  ;;  %v359_v35 = vsel %vm21_vm0, %v341_v7, 0.0  ;;  %v581_v37 = vpack.c.bf16 %v802_v17, %v802_v17  ;;  %v347_v41 = vadd.f32 %v766_v43, %v324_v30  ;;  %v294_v8 = vadd.f32 %v633_v42, %v53_v58 }
  0xf5   :  { %v355_v18 = vsel %vm21_vm0, %v339_v12, 0.0  ;;  %v392_v19 = vmul.f32 %v339_v12, %v339_v12  ;;  %v571_v20 = vpack.c.bf16 %v339_v12, %v339_v12  ;;  %v344_v21 = vadd.f32 %v766_v43, %v321_v16  ;;  %516 = vst.msk [vmem:[%s917_s3 + $0xc] sm:$0xf] %vm512_vm1, %v573_v15  ;;  %v329_v55 = vld [vmem:[#allocation2 + $0x70] sm:$0xff] }
  0xf6   :  { %v356_v23 = vadd.f32 %v355_v18, %v354_v14  ;;  %v319_v24 = vld [vmem:[#allocation2 + $0x20] sm:$0xff]  ;;  %v412_v44 = vsel %vm21_vm0, %v394_v27, 0.0  ;;  %524 = vst.msk [vmem:[%s917_s3 + $0x2c] sm:$0xf] %vm512_vm1, %v581_v37  ;;  %v579_v4 = vpack.c.bf16 %v347_v41, %v347_v41  ;;  %v352_v6 = vadd.f32 %v766_v43, %v329_v55 }
  0xf7   :  { %v408_v28 = vsel %vm21_vm0, %v392_v19, 0.0  ;;  %514 = vst.msk [vmem:[%s917_s3 + $0x4] sm:$0xf] %vm512_vm1, %v571_v20  ;;  %v576_v29 = vpack.c.bf16 %v344_v21, %v344_v21  ;;  %v342_v33 = vadd.f32 %v766_v43, %v319_v24  ;;  %v397_v52 = vmul.f32 %v344_v21, %v344_v21  ;;  %v327_v57 = vld [vmem:[#allocation2 + $0x60] sm:$0xff] }
  0xf8   :  { %v358_v31 = vadd.f32 %v357_v22, %v356_v23  ;;  %v409_v32 = vadd.f32 %v408_v28, %v407_v26  ;;  %v365_v1 = vsel %vm21_vm0, %v344_v21, 0.0  ;;  %v350_v7 = vadd.f32 %v766_v43, %v327_v57  ;;  %522 = vst.msk [vmem:[%s917_s3 + $0x24] sm:$0xf] %vm512_vm1, %v579_v4 }
  0xf9   :  { %519 = vst.msk [vmem:[%s917_s3 + $0x18] sm:$0xf] %vm512_vm1, %v576_v29  ;;  %v395_v40 = vmul.f32 %v342_v33, %v342_v33  ;;  %v361_v45 = vsel %vm21_vm0, %v342_v33, 0.0  ;;  %v574_v46 = vpack.c.bf16 %v342_v33, %v342_v33  ;;  %v292_v12 = vadd.f32 %v267_v0, %v51_v63 }
  0xfa   :  { %v322_v36 = vld [vmem:[#allocation2 + $0x38] sm:$0xff]  ;;  %v411_v38 = vadd.f32 %v410_v34, %v409_v32  ;;  %v360_v39 = vadd.f32 %v359_v35, %v358_v31  ;;  %v320_v48 = vld [vmem:[#allocation2 + $0x28] sm:$0xff]  ;;  %v418_v13 = vsel %vm21_vm0, %v397_v52, 0.0  ;;  %v399_v15 = vmul.f32 %v792_v9, %v792_v9  ;;  %311 = vst.msk [vmem:[#allocation2 + $0x78] sm:$0xff] %vm21_vm0, %v294_v8 }
  0xfb   :  { %v345_v47 = vadd.f32 %v766_v43, %v322_v36  ;;  %v343_v51 = vadd.f32 %v766_v43, %v320_v48  ;;  %v414_v53 = vsel %vm21_vm0, %v395_v40, 0.0  ;;  %517 = vst.msk [vmem:[%s917_s3 + $0x10] sm:$0xf] %vm512_vm1, %v574_v46  ;;  %v584_v16 = vpack.c.bf16 %v352_v6, %v352_v6 }
  0xfc   :  { %v362_v49 = vadd.f32 %v361_v45, %v360_v39  ;;  %v413_v50 = vadd.f32 %v412_v44, %v411_v38  ;;  %v582_v20 = vpack.c.bf16 %v350_v7, %v350_v7  ;;  %309 = vst.msk [vmem:[#allocation2 + $0x68] sm:$0xff] %vm21_vm0, %v292_v12  ;;  %v369_v22 = vsel %vm21_vm0, %v792_v9, 0.0 }
  0xfd   :  { %v577_v54 = vpack.c.bf16 %v345_v47, %v345_v47  ;;  %v363_v60 = vsel %vm21_vm0, %v343_v51, 0.0  ;;  %v396_v61 = vmul.f32 %v343_v51, %v343_v51  ;;  %v575_v62 = vpack.c.bf16 %v343_v51, %v343_v51  ;;  %527 = vst.msk [vmem:[%s917_s3 + $0x38] sm:$0xf] %vm512_vm1, %v584_v16 }
  0xfe   :  { %v415_v59 = vadd.f32 %v414_v53, %v413_v50  ;;  %v398_v2 = vmul.f32 %v345_v47, %v345_v47  ;;  %v364_v3 = vadd.f32 %v363_v60, %v362_v49  ;;  %v367_v14 = vsel %vm21_vm0, %v345_v47, 0.0  ;;  %525 = vst.msk [vmem:[%s917_s3 + $0x30] sm:$0xf] %vm512_vm1, %v582_v20 }
  0xff   :  { %520 = vst.msk [vmem:[%s917_s3 + $0x1c] sm:$0xf] %vm512_vm1, %v577_v54  ;;  %v416_v5 = vsel %vm21_vm0, %v396_v61, 0.0  ;;  %518 = vst.msk [vmem:[%s917_s3 + $0x14] sm:$0xf] %vm512_vm1, %v575_v62  ;;  %v400_v23 = vmul.f32 %v347_v41, %v347_v41  ;;  %v401_v26 = vmul.f32 %v773_v56, %v773_v56  ;;  %v422_v27 = vsel %vm21_vm0, %v399_v15, 0.0 }
 0x100   :  { %v366_v10 = vadd.f32 %v365_v1, %v364_v3  ;;  %v417_v11 = vadd.f32 %v416_v5, %v415_v59  ;;  %v420_v21 = vsel %vm21_vm0, %v398_v2, 0.0  ;;  %v371_v9 = vsel %vm21_vm0, %v347_v41, 0.0 }
 0x101   :  { %v373_v30 = vsel %vm21_vm0, %v773_v56, 0.0  ;;  %v402_v31 = vmul.f32 %v802_v17, %v802_v17  ;;  %v424_v32 = vsel %vm21_vm0, %v400_v23, 0.0  ;;  %v330_v35 = vld [vmem:[#allocation2 + $0x78] sm:$0xff]  ;;  %v426_v36 = vsel %vm21_vm0, %v401_v26, 0.0 }
 0x102   :  { %v419_v18 = vadd.f32 %v418_v13, %v417_v11  ;;  %v368_v19 = vadd.f32 %v367_v14, %v366_v10  ;;  %v375_v37 = vsel %vm21_vm0, %v802_v17, 0.0  ;;  %v403_v38 = vmul.f32 %v350_v7, %v350_v7 }
 0x103   :  { %v353_v39 = vadd.f32 %v766_v43, %v330_v35  ;;  %v328_v40 = vld [vmem:[#allocation2 + $0x68] sm:$0xff]  ;;  %v428_v44 = vsel %vm21_vm0, %v402_v31, 0.0  ;;  %v377_v45 = vsel %vm21_vm0, %v350_v7, 0.0  ;;  %v405_v50 = vmul.f32 %v352_v6, %v352_v6 }
 0x104   :  { %v370_v24 = vadd.f32 %v369_v22, %v368_v19  ;;  %v421_v25 = vadd.f32 %v420_v21, %v419_v18  ;;  %v351_v56 = vadd.f32 %v766_v43, %v328_v40  ;;  %v430_v51 = vsel %vm21_vm0, %v403_v38, 0.0 }
 0x105   :  { %v585_v46 = vpack.c.bf16 %v353_v39, %v353_v39  ;;  %v381_v54 = vsel %vm21_vm0, %v352_v6, 0.0  ;;  %v406_v55 = vmul.f32 %v353_v39, %v353_v39  ;;  %v434_v60 = vsel %vm21_vm0, %v405_v50, 0.0 }
 0x106   :  { %v372_v28 = vadd.f32 %v371_v9, %v370_v24  ;;  %v423_v29 = vadd.f32 %v422_v27, %v421_v25  ;;  %v404_v49 = vmul.f32 %v351_v56, %v351_v56  ;;  %v379_v17 = vsel %vm21_vm0, %v351_v56, 0.0 }
 0x107   :  { %528 = vst.msk [vmem:[%s917_s3 + $0x3c] sm:$0xf] %vm512_vm1, %v585_v46  ;;  %v583_v52 = vpack.c.bf16 %v351_v56, %v351_v56  ;;  %v383_v61 = vsel %vm21_vm0, %v353_v39, 0.0  ;;  %v436_v0 = vsel %vm21_vm0, %v406_v55, 0.0 }
 0x108   :  { %v374_v33 = vadd.f32 %v373_v30, %v372_v28  ;;  %v425_v34 = vadd.f32 %v424_v32, %v423_v29  ;;  %v432_v57 = vsel %vm21_vm0, %v404_v49, 0.0 }
 0x109   :  { %526 = vst.msk [vmem:[%s917_s3 + $0x34] sm:$0xf] %vm512_vm1, %v583_v52 }
 0x10a   :  { %v427_v41 = vadd.f32 %v426_v36, %v425_v34  ;;  %v376_v42 = vadd.f32 %v375_v37, %v374_v33 }
 0x10c   :  { %v378_v47 = vadd.f32 %v377_v45, %v376_v42  ;;  %v429_v48 = vadd.f32 %v428_v44, %v427_v41 }
 0x10e   :  { %v431_v43 = vadd.f32 %v430_v51, %v429_v48  ;;  %v380_v53 = vadd.f32 %v379_v17, %v378_v47 }
 0x110   :  { %v382_v58 = vadd.f32 %v381_v54, %v380_v53  ;;  %v433_v59 = vadd.f32 %v432_v57, %v431_v43 }
 0x112   :  { %v384_v62 = vadd.f32 %v383_v61, %v382_v58  ;;  %v435_v63 = vadd.f32 %v434_v60, %v433_v59 }
 0x114   :  { %v385_v1 = vrot.slane %v384_v62, 4  ;;  %v437_v2 = vadd.f32 %v436_v0, %v435_v63 }
 0x116   :  { %v386_v3 = vadd.f32 %v385_v1, %v384_v62  ;;  %v438_v4 = vrot.slane %v437_v2, 4 }
 0x118   :  { %v387_v5 = vrot.slane %v386_v3, 2  ;;  %v439_v6 = vadd.f32 %v438_v4, %v437_v2 }
 0x11a   :  { %v388_v7 = vadd.f32 %v387_v5, %v386_v3  ;;  %v440_v8 = vrot.slane %v439_v6, 2 }
 0x11c   :  { %v389_v10 = vrot.slane %v388_v7, 1  ;;  %v441_v11 = vadd.f32 %v440_v8, %v439_v6 }
 0x11e   :  { %v442_v12 = vrot.slane %v441_v11, 1  ;;  %v390_v13 = vadd.f32 %v389_v10, %v388_v7 }
 0x120   :  { %v443_v14 = vadd.f32 %v442_v12, %v441_v11 }
 0x122   :  { %v445_v15 = vsel %vm444_vm2, %v390_v13, %v443_v14 }
 0x123   :  { %447 = vst.msk [vmem:[%s918_s4] sm:$0x3] %vm446_vm3, %v445_v15 }

// kernel: unet_forward.12
= control target key start
LH: loop header
LB: loop body
LE: loop exit
PB: predicated region body
PF: predicated region fallthrough
CT: control target
= control target key end

     0   :  { %vm21_vm0 = vcmask 261120   ;;  %v417_v20 = vmov 0.0   ;;  %vm308_vm1 = vcmask 257024   ;;  %vm288_vm2 = vcmask 1040384   ;;  %s541_s1 = inlined_call_operand.vmem [shape: bf16[1,256,32], index: 1, kind: input, shape index: {}]   ;;  %s542_s0 = inlined_call_operand.vmem [shape: bf16[1,32,256], index: 0, kind: input, shape index: {}]   ;;  %s543_s2 = inlined_call_operand.vmem [shape: f32[1,32], index: 2, kind: input, shape index: {}]   ;;  %s544_s3 = inlined_call_operand.vmem [shape: bf16[1,32,32], index: 3, kind: output, shape index: {0}]   ;;  %s545_s4 = inlined_call_operand.vmem [shape: f32[1,1,2,32], index: 4, kind: output, shape index: {1}]  }
   0x1   :  { %v395_v0 = vld [vmem:[%s541_s1 + $0x78] sm:$0xff]   ;;  %v397_v2 = vld [vmem:[%s541_s1 + $0x70] sm:$0xff]   ;;  %v399_v4 = vld [vmem:[%s541_s1 + $0x68] sm:$0xff]   ;;  %22 = vst.msk [vmem:[#allocation2] sm:$0xff] %vm21_vm0, %v417_v20  ;;  %vm290_vm3 = vcmask 254976  }
   0x2   :  { %v396_v1 = vld [vmem:[%s541_s1 + $0x38] sm:$0xff]   ;;  %350 = vmatprep.subr.bf16.mxu0 %v395_v0  ;;  %378 = vmatprep.subr.bf16.mxu1 %v395_v0  ;;  %v398_v3 = vld [vmem:[%s541_s1 + $0x30] sm:$0xff]   ;;  %v400_v5 = vld [vmem:[%s541_s1 + $0x28] sm:$0xff]   ;;  %23 = vst.msk [vmem:[#allocation2 + $0x8] sm:$0xff] %vm21_vm0, %v417_v20 }
   0x3   :  { %351 = vmatpush3.bf16.msra.mxu0 %v396_v1  ;;  %386 = vmatpush3.bf16.msra.mxu1 %v396_v1  ;;  %v401_v6 = vld [vmem:[%s541_s1 + $0x60] sm:$0xff]   ;;  %v403_v8 = vld [vmem:[%s541_s1 + $0x58] sm:$0xff]   ;;  %v405_v10 = vld [vmem:[%s541_s1 + $0x50] sm:$0xff]   ;;  %24 = vst.msk [vmem:[#allocation2 + $0x10] sm:$0xff] %vm21_vm0, %v417_v20 }
   0x4   :  { %352 = vmatprep.subr.bf16.mxu0 %v397_v2  ;;  %379 = vmatprep.subr.bf16.mxu1 %v397_v2  ;;  %v402_v7 = vld [vmem:[%s541_s1 + $0x20] sm:$0xff]   ;;  %v404_v9 = vld [vmem:[%s541_s1 + $0x18] sm:$0xff]   ;;  %v406_v13 = vld [vmem:[%s541_s1 + $0x10] sm:$0xff]   ;;  %25 = vst.msk [vmem:[#allocation2 + $0x18] sm:$0xff] %vm21_vm0, %v417_v20 }
   0x5   :  { %v413_v11 = vld [vmem:[%s542_s0 + $0x4] ss:$8 sps:$4 sm:$0xff]   ;;  %v416_v12 = vld [vmem:[%s542_s0 + $0x14] ss:$8 sps:$4 sm:$0xff]   ;;  %v411_v18 = vld [vmem:[%s542_s0] ss:$8 sps:$4 sm:$0xff]  }
   0x6   :  { %v407_v14 = vld [vmem:[%s541_s1 + $0x48] sm:$0xff]   ;;  %214 = vmatprep.mubr.bf16.mxu0 %v413_v11  ;;  %222 = vmatprep.mubr.bf16.mxu1 %v416_v12  ;;  %v409_v16 = vld [vmem:[%s541_s1 + $0x40] sm:$0xff]   ;;  %v414_v19 = vld [vmem:[%s542_s0 + $0x10] ss:$8 sps:$4 sm:$0xff]  }
   0x7   :  { %353 = vmatpush3.bf16.msra.mxu0 %v398_v3  ;;  %387 = vmatpush3.bf16.msra.mxu1 %v398_v3  ;;  %v408_v15 = vld [vmem:[%s541_s1 + $0x8] sm:$0xff]   ;;  %v410_v17 = vld [vmem:[%s541_s1] sm:$0xff]  }
   0x8   :  { %354 = vmatprep.subr.bf16.mxu0 %v399_v4  ;;  %380 = vmatprep.subr.bf16.mxu1 %v399_v4  ;;  %v26_v23 = vld [vmem:[#allocation2] sm:$0xff] }
   0x9   :  { %v27_v33 = vld [vmem:[#allocation2 + $0x8] sm:$0xff]  ;;  %v341_v41 = vld [vmem:[%s543_s2] ss:$0 sm:$0xff] }
   0xa   :  { %v28_v25 = vld [vmem:[#allocation2 + $0x10] sm:$0xff] }
   0xb   :  { %355 = vmatpush3.bf16.msra.mxu0 %v400_v5  ;;  %388 = vmatpush3.bf16.msra.mxu1 %v400_v5  ;;  %v29_v35 = vld [vmem:[#allocation2 + $0x18] sm:$0xff] }
   0xc   :  { %356 = vmatprep.subr.bf16.mxu0 %v401_v6  ;;  %381 = vmatprep.subr.bf16.mxu1 %v401_v6 }
   0xf   :  { %357 = vmatpush3.bf16.msra.mxu0 %v402_v7  ;;  %389 = vmatpush3.bf16.msra.mxu1 %v402_v7 }
  0x10   :  { %358 = vmatprep.subr.bf16.mxu0 %v403_v8  ;;  %382 = vmatprep.subr.bf16.mxu1 %v403_v8 }
  0x13   :  { %359 = vmatpush3.bf16.msra.mxu0 %v404_v9  ;;  %390 = vmatpush3.bf16.msra.mxu1 %v404_v9 }
  0x14   :  { %360 = vmatprep.subr.bf16.mxu0 %v405_v10  ;;  %383 = vmatprep.subr.bf16.mxu1 %v405_v10 }
  0x17   :  { %361 = vmatpush3.bf16.msra.mxu0 %v406_v13  ;;  %391 = vmatpush3.bf16.msra.mxu1 %v406_v13 }
  0x18   :  { %362 = vmatprep.subr.bf16.mxu0 %v407_v14  ;;  %384 = vmatprep.subr.bf16.mxu1 %v407_v14 }
  0x1b   :  { %363 = vmatpush3.bf16.msra.mxu0 %v408_v15  ;;  %392 = vmatpush3.bf16.msra.mxu1 %v408_v15 }
  0x1c   :  { %364 = vmatprep.subr.bf16.mxu0 %v409_v16  ;;  %385 = vmatprep.subr.bf16.mxu1 %v409_v16 }
  0x1f   :  { %365 = vmatpush3.bf16.msra.mxu0 %v410_v17  ;;  %393 = vmatpush3.bf16.msra.mxu1 %v410_v17 }
  0x22   :  { %215 = vmatmul.mubr.bf16.vlgmr.msra.gmra.mxu0 %v411_v18  ;;  %223 = vmatmul.mubr.bf16.vlgmr.msra.gmra.mxu1 %v414_v19 }
  0xe2   :  { %v366_v21 = vpop.f32.mrf.mxu0  ;;  %v372_v22 = vpop.f32.mrf.mxu1 }
  0xe4   :  { %v367_v24 = vpop.f32.mrf.mxu0  ;;  %v373_v26 = vpop.f32.mrf.mxu1 }
  0xe5   :  { %v368_v27 = vadd.f32 %v367_v24, %v366_v21  ;;  %v374_v28 = vadd.f32 %v373_v26, %v372_v22 }
  0xe6   :  { %v369_v29 = vpop.f32.mrf.mxu0  ;;  %v375_v30 = vpop.f32.mrf.mxu1 }
  0xe7   :  { %v231_v31 = vadd.f32 %v368_v27, %v26_v23  ;;  %v233_v32 = vadd.f32 %v374_v28, %v28_v25 }
  0xe8   :  { %v370_v34 = vpop.f32.mrf.mxu0  ;;  %v376_v36 = vpop.f32.mrf.mxu1 }
  0xe9   :  { %236 = vst.msk [vmem:[#allocation2] sm:$0xff] %vm21_vm0, %v231_v31  ;;  %238 = vst.msk [vmem:[#allocation2 + $0x10] sm:$0xff] %vm21_vm0, %v233_v32  ;;  %v371_v37 = vadd.f32 %v370_v34, %v369_v29  ;;  %v377_v38 = vadd.f32 %v376_v36, %v375_v30 }
  0xeb   :  { %v232_v39 = vadd.f32 %v371_v37, %v27_v33  ;;  %v234_v40 = vadd.f32 %v377_v38, %v29_v35 }
  0xed   :  { %237 = vst.msk [vmem:[#allocation2 + $0x8] sm:$0xff] %vm21_vm0, %v232_v39  ;;  %239 = vst.msk [vmem:[#allocation2 + $0x18] sm:$0xff] %vm21_vm0, %v234_v40 }
  0xf0   :  { %v243_v42 = vld [vmem:[#allocation2] sm:$0xff]  ;;  %v245_v43 = vld [vmem:[#allocation2 + $0x10] sm:$0xff] }
  0xf1   :  { %v254_v44 = vadd.f32 %v341_v41, %v243_v42  ;;  %v256_v45 = vadd.f32 %v341_v41, %v245_v43 }
  0xf3   :  { %v346_v46 = vpack.c.bf16 %v254_v44, %v254_v44  ;;  %v348_v47 = vpack.c.bf16 %v256_v45, %v256_v45  ;;  %v271_v50 = vmul.f32 %v254_v44, %v254_v44  ;;  %v258_v53 = vsel %vm21_vm0, %v254_v44, 0.0 }
  0xf4   :  { %v244_v48 = vld [vmem:[#allocation2 + $0x8] sm:$0xff]  ;;  %v246_v49 = vld [vmem:[#allocation2 + $0x18] sm:$0xff]  ;;  %v273_v54 = vmul.f32 %v256_v45, %v256_v45  ;;  %v261_v61 = vsel %vm21_vm0, %v256_v45, 0.0 }
  0xf5   :  { %309 = vst.msk [vmem:[%s544_s3] sm:$0xf] %vm308_vm1, %v346_v46  ;;  %v255_v51 = vadd.f32 %v341_v41, %v244_v48  ;;  %v257_v52 = vadd.f32 %v341_v41, %v246_v49  ;;  %311 = vst.msk [vmem:[%s544_s3 + $0x8] sm:$0xf] %vm308_vm1, %v348_v47  ;;  %v275_v60 = vsel %vm21_vm0, %v271_v50, 0.0 }
  0xf6   :  { %v278_v2 = vsel %vm21_vm0, %v273_v54, 0.0 }
  0xf7   :  { %v259_v55 = vsel %vm21_vm0, %v255_v51, 0.0  ;;  %v272_v56 = vmul.f32 %v255_v51, %v255_v51  ;;  %v347_v57 = vpack.c.bf16 %v255_v51, %v255_v51  ;;  %v349_v59 = vpack.c.bf16 %v257_v52, %v257_v52 }
  0xf8   :  { %v260_v58 = vadd.f32 %v259_v55, %v258_v53  ;;  %v274_v63 = vmul.f32 %v257_v52, %v257_v52  ;;  %v263_v3 = vsel %vm21_vm0, %v257_v52, 0.0 }
  0xf9   :  { %v276_v62 = vsel %vm21_vm0, %v272_v56, 0.0  ;;  %310 = vst.msk [vmem:[%s544_s3 + $0x4] sm:$0xf] %vm308_vm1, %v347_v57  ;;  %312 = vst.msk [vmem:[%s544_s3 + $0xc] sm:$0xf] %vm308_vm1, %v349_v59 }
  0xfa   :  { %v277_v0 = vadd.f32 %v276_v62, %v275_v60  ;;  %v262_v1 = vadd.f32 %v261_v61, %v260_v58  ;;  %v280_v6 = vsel %vm21_vm0, %v274_v63, 0.0 }
  0xfc   :  { %v264_v4 = vadd.f32 %v263_v3, %v262_v1  ;;  %v279_v5 = vadd.f32 %v278_v2, %v277_v0 }
  0xfe   :  { %v265_v7 = vrot.slane %v264_v4, 4  ;;  %v281_v8 = vadd.f32 %v280_v6, %v279_v5 }
 0x100   :  { %v266_v9 = vadd.f32 %v265_v7, %v264_v4  ;;  %v282_v10 = vrot.slane %v281_v8, 4 }
 0x102   :  { %v267_v11 = vrot.slane %v266_v9, 2  ;;  %v283_v12 = vadd.f32 %v282_v10, %v281_v8 }
 0x104   :  { %v268_v13 = vadd.f32 %v267_v11, %v266_v9  ;;  %v284_v14 = vrot.slane %v283_v12, 2 }
 0x106   :  { %v269_v15 = vrot.slane %v268_v13, 1  ;;  %v285_v16 = vadd.f32 %v284_v14, %v283_v12 }
 0x108   :  { %v286_v17 = vrot.slane %v285_v16, 1  ;;  %v270_v18 = vadd.f32 %v269_v15, %v268_v13 }
 0x10a   :  { %v287_v19 = vadd.f32 %v286_v17, %v285_v16 }
 0x10c   :  { %v289_v20 = vsel %vm288_vm2, %v270_v18, %v287_v19 }
 0x10d   :  { %291 = vst.msk [vmem:[%s545_s4] sm:$0x3] %vm290_vm3, %v289_v20 }

// kernel: unet_forward.13
= control target key start
LH: loop header
LB: loop body
LE: loop exit
PB: predicated region body
PF: predicated region fallthrough
CT: control target
= control target key end

     0   :  { %vm21_vm0 = vcmask 523264   ;;  %v539_v38 = vmov 0.0   ;;  %vm411_vm1 = vcmask 519168   ;;  %vm406_vm2 = vcmask 1040384   ;;  %s680_s1 = inlined_call_operand.vmem [shape: bf16[1,512,64], index: 1, kind: input, shape index: {}]   ;;  %s681_s0 = inlined_call_operand.vmem [shape: bf16[1,8,512], index: 0, kind: input, shape index: {}]   ;;  %s682_s2 = inlined_call_operand.vmem [shape: f32[1,64], index: 2, kind: input, shape index: {}]   ;;  %s683_s3 = inlined_call_operand.vmem [shape: bf16[1,8,64], index: 3, kind: output, shape index: {0}]   ;;  %s684_s4 = inlined_call_operand.vmem [shape: f32[1,1,2,64], index: 4, kind: output, shape index: {1}]  }
   0x1   :  { %v503_v0 = vld [vmem:[%s680_s1 + $0x78] sm:$0xff]   ;;  %v507_v4 = vld [vmem:[%s680_s1 + $0x70] sm:$0xff]   ;;  %v511_v8 = vld [vmem:[%s680_s1 + $0x68] sm:$0xff]   ;;  %22 = vst.msk [vmem:[#allocation2] sm:$0xff] %vm21_vm0, %v539_v38  ;;  %vm408_vm3 = vcmask 517120  }
   0x2   :  { %v504_v1 = vld [vmem:[%s680_s1 + $0xf8] sm:$0xff]   ;;  %458 = vmatprep.subr.bf16.mxu0 %v503_v0  ;;  %v508_v5 = vld [vmem:[%s680_s1 + $0xf0] sm:$0xff]   ;;  %v512_v9 = vld [vmem:[%s680_s1 + $0xe8] sm:$0xff]  }
   0x3   :  { %v505_v2 = vld [vmem:[%s680_s1 + $0x38] sm:$0xff]   ;;  %480 = vmatprep.subr.bf16.mxu1 %v504_v1  ;;  %v509_v6 = vld [vmem:[%s680_s1 + $0x30] sm:$0xff]   ;;  %v513_v10 = vld [vmem:[%s680_s1 + $0x28] sm:$0xff]  }
   0x4   :  { %v506_v3 = vld [vmem:[%s680_s1 + $0xb8] sm:$0xff]   ;;  %459 = vmatpush3.bf16.msra.mxu0 %v505_v2  ;;  %v510_v7 = vld [vmem:[%s680_s1 + $0xb0] sm:$0xff]   ;;  %v514_v11 = vld [vmem:[%s680_s1 + $0xa8] sm:$0xff]  }
   0x5   :  { %481 = vmatpush3.bf16.msra.mxu1 %v506_v3  ;;  %460 = vmatprep.subr.bf16.mxu0 %v507_v4  ;;  %v515_v12 = vld [vmem:[%s680_s1 + $0x60] sm:$0xff]   ;;  %v519_v16 = vld [vmem:[%s680_s1 + $0x58] sm:$0xff]   ;;  %v523_v20 = vld [vmem:[%s680_s1 + $0x50] sm:$0xff]  }
   0x6   :  { %482 = vmatprep.subr.bf16.mxu1 %v508_v5  ;;  %v516_v13 = vld [vmem:[%s680_s1 + $0xe0] sm:$0xff]   ;;  %v520_v17 = vld [vmem:[%s680_s1 + $0xd8] sm:$0xff]   ;;  %v524_v21 = vld [vmem:[%s680_s1 + $0xd0] sm:$0xff]  }
   0x7   :  { %v517_v14 = vld [vmem:[%s680_s1 + $0x20] sm:$0xff]   ;;  %v521_v18 = vld [vmem:[%s680_s1 + $0x18] sm:$0xff]   ;;  %v525_v22 = vld [vmem:[%s680_s1 + $0x10] sm:$0xff]  }
   0x8   :  { %461 = vmatpush3.bf16.msra.mxu0 %v509_v6  ;;  %v518_v15 = vld [vmem:[%s680_s1 + $0xa0] sm:$0xff]   ;;  %v522_v19 = vld [vmem:[%s680_s1 + $0x98] sm:$0xff]   ;;  %v526_v23 = vld [vmem:[%s680_s1 + $0x90] sm:$0xff]  }
   0x9   :  { %483 = vmatpush3.bf16.msra.mxu1 %v510_v7  ;;  %462 = vmatprep.subr.bf16.mxu0 %v511_v8  ;;  %v527_v24 = vld [vmem:[%s680_s1 + $0x48] sm:$0xff]   ;;  %v531_v28 = vld [vmem:[%s680_s1 + $0x40] sm:$0xff]  }
   0xa   :  { %484 = vmatprep.subr.bf16.mxu1 %v512_v9  ;;  %v528_v25 = vld [vmem:[%s680_s1 + $0xc8] sm:$0xff]   ;;  %v532_v29 = vld [vmem:[%s680_s1 + $0xc0] sm:$0xff]  }
   0xb   :  { %v529_v26 = vld [vmem:[%s680_s1 + $0x8] sm:$0xff]   ;;  %v533_v30 = vld [vmem:[%s680_s1] sm:$0xff]  }
   0xc   :  { %463 = vmatpush3.bf16.msra.mxu0 %v513_v10  ;;  %v530_v27 = vld [vmem:[%s680_s1 + $0x88] sm:$0xff]   ;;  %v534_v31 = vld [vmem:[%s680_s1 + $0x80] sm:$0xff]  }
   0xd   :  { %485 = vmatpush3.bf16.msra.mxu1 %v514_v11  ;;  %464 = vmatprep.subr.bf16.mxu0 %v515_v12  ;;  %v24_v32 = vld [vmem:[%s681_s0] sm:$0xff]  ;;  %v25_v33 = vld [vmem:[%s681_s0 + $0x8] sm:$0xff] }
   0xe   :  { %486 = vmatprep.subr.bf16.mxu1 %v516_v13  ;;  %v421_v34 = vcombine.low %v24_v32, %v24_v32  ;;  %v422_v35 = vcombine.high %v24_v32, %v24_v32  ;;  %v423_v36 = vcombine.low %v25_v33, %v25_v33  ;;  %v424_v37 = vcombine.high %v25_v33, %v25_v33  ;;  %v23_v45 = vld [vmem:[#allocation2] sm:$0xff] }
   0xf   :  { %v457_v52 = vld [vmem:[%s682_s2] ss:$0 sm:$0xff] }
  0x10   :  { %465 = vmatpush3.bf16.msra.mxu0 %v517_v14  ;;  %328 = vmatprep.mubr.bf16.mxu0 %v422_v35 }
  0x11   :  { %487 = vmatpush3.bf16.msra.mxu1 %v518_v15  ;;  %466 = vmatprep.subr.bf16.mxu0 %v519_v16 }
  0x12   :  { %488 = vmatprep.subr.bf16.mxu1 %v520_v17  ;;  %368 = vmatprep.mubr.bf16.mxu1 %v424_v37 }
  0x14   :  { %467 = vmatpush3.bf16.msra.mxu0 %v521_v18 }
  0x15   :  { %489 = vmatpush3.bf16.msra.mxu1 %v522_v19  ;;  %468 = vmatprep.subr.bf16.mxu0 %v523_v20 }
  0x16   :  { %490 = vmatprep.subr.bf16.mxu1 %v524_v21 }
  0x18   :  { %469 = vmatpush3.bf16.msra.mxu0 %v525_v22 }
  0x19   :  { %491 = vmatpush3.bf16.msra.mxu1 %v526_v23  ;;  %470 = vmatprep.subr.bf16.mxu0 %v527_v24 }
  0x1a   :  { %492 = vmatprep.subr.bf16.mxu1 %v528_v25 }
  0x1c   :  { %471 = vmatpush3.bf16.msra.mxu0 %v529_v26 }
  0x1d   :  { %493 = vmatpush3.bf16.msra.mxu1 %v530_v27  ;;  %472 = vmatprep.subr.bf16.mxu0 %v531_v28 }
  0x1e   :  { %494 = vmatprep.subr.bf16.mxu1 %v532_v29 }
  0x20   :  { %473 = vmatpush3.bf16.msra.mxu0 %v533_v30 }
  0x21   :  { %495 = vmatpush3.bf16.msra.mxu1 %v534_v31 }
  0x23   :  { %329 = vmatmul.mubr.bf16.vlgmr.msra.gmra.mxu0 %v421_v34 }
  0x24   :  { %369 = vmatmul.mubr.bf16.vlgmr.msra.gmra.mxu1 %v423_v36 }
  0xe3   :  { %v474_v39 = vpop.f32.mrf.mxu0 }
  0xe4   :  { %v496_v40 = vpop.f32.mrf.mxu1 }
  0xe5   :  { %v475_v41 = vpop.f32.mrf.mxu0 }
  0xe6   :  { %v497_v42 = vpop.f32.mrf.mxu1  ;;  %v476_v43 = vadd.f32 %v475_v41, %v474_v39 }
  0xe7   :  { %v498_v44 = vadd.f32 %v497_v42, %v496_v40  ;;  %v477_v46 = vpop.f32.mrf.mxu0 }
  0xe8   :  { %v499_v47 = vpop.f32.mrf.mxu1 }
  0xe9   :  { %v371_v48 = vadd.f32 %v498_v44, %v476_v43  ;;  %v478_v49 = vpop.f32.mrf.mxu0 }
  0xea   :  { %v500_v50 = vpop.f32.mrf.mxu1 }
  0xeb   :  { %v376_v51 = vadd.f32 %v371_v48, %v23_v45 }
  0xed   :  { %378 = vst.msk [vmem:[#allocation2] sm:$0xff] %vm21_vm0, %v376_v51 }
  0xf4   :  { %v382_v53 = vld [vmem:[#allocation2] sm:$0xff] }
  0xf5   :  { %v390_v54 = vadd.f32 %v457_v52, %v382_v53 }
  0xf7   :  { %v391_v55 = vsel %vm21_vm0, %v390_v54, 0.0  ;;  %v398_v56 = vmul.f32 %v390_v54, %v390_v54  ;;  %v410_v57 = vpack.c.bf16 %v390_v54, %v390_v54 }
  0xf8   :  { %v392_v58 = vrot.slane %v391_v55, 4 }
  0xf9   :  { %v399_v59 = vsel %vm21_vm0, %v398_v56, 0.0  ;;  %412 = vst.msk [vmem:[%s683_s3] sm:$0xf] %vm411_vm1, %v410_v57 }
  0xfa   :  { %v393_v60 = vadd.f32 %v392_v58, %v391_v55  ;;  %v400_v61 = vrot.slane %v399_v59, 4 }
  0xfc   :  { %v394_v62 = vrot.slane %v393_v60, 2  ;;  %v401_v63 = vadd.f32 %v400_v61, %v399_v59 }
  0xfe   :  { %v395_v0 = vadd.f32 %v394_v62, %v393_v60  ;;  %v402_v1 = vrot.slane %v401_v63, 2 }
 0x100   :  { %v396_v2 = vrot.slane %v395_v0, 1  ;;  %v403_v3 = vadd.f32 %v402_v1, %v401_v63 }
 0x102   :  { %v404_v4 = vrot.slane %v403_v3, 1  ;;  %v397_v5 = vadd.f32 %v396_v2, %v395_v0 }
 0x104   :  { %v405_v6 = vadd.f32 %v404_v4, %v403_v3 }
 0x106   :  { %v407_v7 = vsel %vm406_vm2, %v397_v5, %v405_v6 }
 0x107   :  { %409 = vst.msk [vmem:[%s684_s4] sm:$0x3] %vm408_vm3, %v407_v7 }

// kernel: unet_forward.14
= control target key start
LH: loop header
LB: loop body
LE: loop exit
PB: predicated region body
PF: predicated region fallthrough
CT: control target
= control target key end

     0   :  { %v159_v28 = vlaneseq  ;;  %v1053_v36 = vmov 1966171168   ;;  %s1303_s0 = inlined_call_operand.vmem [shape: bf16[1,2,1024], index: 0, kind: input, shape index: {}]   ;;  %s1304_s1 = inlined_call_operand.vmem [shape: bf16[1,1024,64], index: 1, kind: input, shape index: {}]   ;;  %s1305_s2 = inlined_call_operand.vmem [shape: f32[1,64], index: 2, kind: input, shape index: {}]   ;;  %s1306_s3 = inlined_call_operand.vmem [shape: bf16[1,2,64], index: 3, kind: output, shape index: {0}]   ;;  %s1307_s4 = inlined_call_operand.hbm [shape: f32[1,1,2,64], index: 4, kind: output, shape index: {1}]  }
   0x1   :  { %v966_v0 = vld [vmem:[%s1304_s1 + $0x78] sm:$0xff]   ;;  %v970_v4 = vld [vmem:[%s1304_s1 + $0x70] sm:$0xff]   ;;  %v974_v8 = vld [vmem:[%s1304_s1 + $0x68] sm:$0xff]   ;;  %v157_v37 = vunpack.c.l.s4 %v1053_v36 }
   0x2   :  { %v967_v1 = vld [vmem:[%s1304_s1 + $0xf8] sm:$0xff]   ;;  %875 = vmatprep.subr.bf16.mxu0 %v966_v0  ;;  %v971_v5 = vld [vmem:[%s1304_s1 + $0xf0] sm:$0xff]   ;;  %v975_v9 = vld [vmem:[%s1304_s1 + $0xe8] sm:$0xff]   ;;  %v160_v33 = vshrl.u32 %v159_v28, 7 }
   0x3   :  { %v968_v2 = vld [vmem:[%s1304_s1 + $0x38] sm:$0xff]   ;;  %897 = vmatprep.subr.bf16.mxu1 %v967_v1  ;;  %v972_v6 = vld [vmem:[%s1304_s1 + $0x30] sm:$0xff]   ;;  %v976_v10 = vld [vmem:[%s1304_s1 + $0x28] sm:$0xff]   ;;  %v158_v40 = vunpack.c.0.s8 %v157_v37 }
   0x4   :  { %v969_v3 = vld [vmem:[%s1304_s1 + $0xb8] sm:$0xff]   ;;  %876 = vmatpush3.bf16.msra.mxu0 %v968_v2  ;;  %v973_v7 = vld [vmem:[%s1304_s1 + $0xb0] sm:$0xff]   ;;  %v977_v11 = vld [vmem:[%s1304_s1 + $0xa8] sm:$0xff]  }
   0x5   :  { %898 = vmatpush3.bf16.msra.mxu1 %v969_v3  ;;  %877 = vmatprep.subr.bf16.mxu0 %v970_v4  ;;  %v978_v12 = vld [vmem:[%s1304_s1 + $0x60] sm:$0xff]   ;;  %v982_v16 = vld [vmem:[%s1304_s1 + $0x58] sm:$0xff]   ;;  %v986_v20 = vld [vmem:[%s1304_s1 + $0x50] sm:$0xff]   ;;  %v1186_v41 = vsub.s32 %v158_v40, %v160_v33 }
   0x6   :  { %899 = vmatprep.subr.bf16.mxu1 %v971_v5  ;;  %v979_v13 = vld [vmem:[%s1304_s1 + $0xe0] sm:$0xff]   ;;  %v983_v17 = vld [vmem:[%s1304_s1 + $0xd8] sm:$0xff]   ;;  %v987_v21 = vld [vmem:[%s1304_s1 + $0xd0] sm:$0xff]  }
   0x7   :  { %v980_v14 = vld [vmem:[%s1304_s1 + $0x20] sm:$0xff]   ;;  %v984_v18 = vld [vmem:[%s1304_s1 + $0x18] sm:$0xff]   ;;  %v988_v22 = vld [vmem:[%s1304_s1 + $0x10] sm:$0xff]  }
   0x8   :  { %878 = vmatpush3.bf16.msra.mxu0 %v972_v6  ;;  %v981_v15 = vld [vmem:[%s1304_s1 + $0xa0] sm:$0xff]   ;;  %v985_v19 = vld [vmem:[%s1304_s1 + $0x98] sm:$0xff]   ;;  %v989_v23 = vld [vmem:[%s1304_s1 + $0x90] sm:$0xff]  }
   0x9   :  { %900 = vmatpush3.bf16.msra.mxu1 %v973_v7  ;;  %879 = vmatprep.subr.bf16.mxu0 %v974_v8  ;;  %v990_v24 = vld [vmem:[%s1304_s1 + $0x48] sm:$0xff]   ;;  %v994_v29 = vld [vmem:[%s1304_s1 + $0x40] sm:$0xff]   ;;  %v999_v35 = vld [vmem:[%s1304_s1 + $0x178] sm:$0xff]  }
   0xa   :  { %901 = vmatprep.subr.bf16.mxu1 %v975_v9  ;;  %v991_v25 = vld [vmem:[%s1304_s1 + $0xc8] sm:$0xff]   ;;  %v995_v30 = vld [vmem:[%s1304_s1 + $0xc0] sm:$0xff]   ;;  %v1000_v38 = vld [vmem:[%s1304_s1 + $0x1f8] sm:$0xff]  }
   0xb   :  { %v992_v26 = vld [vmem:[%s1304_s1 + $0x8] sm:$0xff]   ;;  %v996_v31 = vld [vmem:[%s1304_s1] sm:$0xff]   ;;  %v1001_v48 = vld [vmem:[%s1304_s1 + $0x138] sm:$0xff]  }
   0xc   :  { %880 = vmatpush3.bf16.msra.mxu0 %v976_v10  ;;  %v993_v27 = vld [vmem:[%s1304_s1 + $0x88] sm:$0xff]   ;;  %v997_v32 = vld [vmem:[%s1304_s1 + $0x80] sm:$0xff]   ;;  %v1003_v51 = vld [vmem:[%s1304_s1 + $0x170] sm:$0xff]  }
   0xd   :  { %902 = vmatpush3.bf16.msra.mxu1 %v977_v11  ;;  %881 = vmatprep.subr.bf16.mxu0 %v978_v12  ;;  %v25_v34 = vld [vmem:[%s1303_s0] sm:$0xff]  ;;  %v1002_v53 = vld [vmem:[%s1304_s1 + $0x1b8] sm:$0xff]   ;;  %v1004_v54 = vld [vmem:[%s1304_s1 + $0x1f0] sm:$0xff]  }
   0xe   :  { %903 = vmatprep.subr.bf16.mxu1 %v979_v13  ;;  %v155_v39 = vcombine.high %v25_v34, %v25_v34  ;;  %v162_v42 = vrot.slane %v25_v34, %v1186_v41  ;;  %v1005_v56 = vld [vmem:[%s1304_s1 + $0x130] sm:$0xff]   ;;  %v1007_v57 = vld [vmem:[%s1304_s1 + $0x168] sm:$0xff]   ;;  %v1011_v61 = vld [vmem:[%s1304_s1 + $0x160] sm:$0xff]  }
   0xf   :  { %v1006_v58 = vld [vmem:[%s1304_s1 + $0x1b0] sm:$0xff]   ;;  %v1008_v59 = vld [vmem:[%s1304_s1 + $0x1e8] sm:$0xff]   ;;  %v1012_v63 = vld [vmem:[%s1304_s1 + $0x1e0] sm:$0xff]  }
  0x10   :  { %882 = vmatpush3.bf16.msra.mxu0 %v980_v14  ;;  %v1190_v43 = vrot.slane %v155_v39, %v1186_v41  ;;  %v170_v44 = vcombine.high %v162_v42, %v162_v42  ;;  %v178_v45 = vrot.slane %v162_v42, %v1186_v41  ;;  %v1009_v60 = vld [vmem:[%s1304_s1 + $0x128] sm:$0xff]   ;;  %v1013_v0 = vld [vmem:[%s1304_s1 + $0x120] sm:$0xff]   ;;  %v1015_v1 = vld [vmem:[%s1304_s1 + $0x158] sm:$0xff]  }
  0x11   :  { %904 = vmatpush3.bf16.msra.mxu1 %v981_v15  ;;  %883 = vmatprep.subr.bf16.mxu0 %v982_v16  ;;  %v1010_v62 = vld [vmem:[%s1304_s1 + $0x1a8] sm:$0xff]   ;;  %v1014_v2 = vld [vmem:[%s1304_s1 + $0x1a0] sm:$0xff]   ;;  %v1016_v3 = vld [vmem:[%s1304_s1 + $0x1d8] sm:$0xff]  }
  0x12   :  { %905 = vmatprep.subr.bf16.mxu1 %v983_v17  ;;  %v171_v46 = vcombine.high %v1190_v43, %v1190_v43  ;;  %v192_v47 = vrot.slane %v170_v44, %v1186_v41  ;;  %v200_v50 = vcombine.high %v178_v45, %v178_v45  ;;  %v1017_v4 = vld [vmem:[%s1304_s1 + $0x118] sm:$0xff]   ;;  %v1019_v5 = vld [vmem:[%s1304_s1 + $0x150] sm:$0xff]   ;;  %v1023_v9 = vld [vmem:[%s1304_s1 + $0x148] sm:$0xff]  }
  0x13   :  { %v1018_v6 = vld [vmem:[%s1304_s1 + $0x198] sm:$0xff]   ;;  %v1020_v7 = vld [vmem:[%s1304_s1 + $0x1d0] sm:$0xff]  }
  0x14   :  { %884 = vmatpush3.bf16.msra.mxu0 %v984_v18  ;;  %v199_v49 = vrot.slane %v171_v46, %v1186_v41  ;;  %628 = vmatprep.mubr.bf16.mxu0 %v192_v47  ;;  %v202_v52 = vcombine.high %v192_v47, %v192_v47  ;;  %v1021_v8 = vld [vmem:[%s1304_s1 + $0x110] sm:$0xff]  }
  0x15   :  { %906 = vmatpush3.bf16.msra.mxu1 %v985_v19  ;;  %885 = vmatprep.subr.bf16.mxu0 %v986_v20 }
  0x16   :  { %907 = vmatprep.subr.bf16.mxu1 %v987_v21  ;;  %v203_v55 = vcombine.high %v199_v49, %v199_v49  ;;  %668 = vmatprep.mubr.bf16.mxu1 %v202_v52 }
  0x18   :  { %886 = vmatpush3.bf16.msra.mxu0 %v988_v22 }
  0x19   :  { %908 = vmatpush3.bf16.msra.mxu1 %v989_v23  ;;  %887 = vmatprep.subr.bf16.mxu0 %v990_v24 }
  0x1a   :  { %909 = vmatprep.subr.bf16.mxu1 %v991_v25 }
  0x1c   :  { %888 = vmatpush3.bf16.msra.mxu0 %v992_v26 }
  0x1d   :  { %910 = vmatpush3.bf16.msra.mxu1 %v993_v27  ;;  %889 = vmatprep.subr.bf16.mxu0 %v994_v29 }
  0x1e   :  { %911 = vmatprep.subr.bf16.mxu1 %v995_v30 }
  0x20   :  { %890 = vmatpush3.bf16.msra.mxu0 %v996_v31 }
  0x21   :  { %912 = vmatpush3.bf16.msra.mxu1 %v997_v32  ;;  %919 = vmatprep.subr.bf16.mxu0 %v999_v35 }
  0x22   :  { %941 = vmatprep.subr.bf16.mxu1 %v1000_v38 }
  0x23   :  { %629 = vmatmul.mubr.bf16.vlgmr.msra.gmra.mxu0 %v178_v45 }
  0x24   :  { %920 = vmatpush3.bf16.msra.mxu0 %v1001_v48  ;;  %669 = vmatmul.mubr.bf16.vlgmr.msra.gmra.mxu1 %v200_v50 }
  0x25   :  { %921 = vmatprep.subr.bf16.mxu0 %v1003_v51  ;;  %942 = vmatpush3.bf16.msra.mxu1 %v1002_v53 }
  0x26   :  { %708 = vmatprep.mubr.bf16.mxu0 %v199_v49  ;;  %943 = vmatprep.subr.bf16.mxu1 %v1004_v54 }
  0x27   :  { %748 = vmatprep.mubr.bf16.mxu1 %v203_v55 }
  0x28   :  { %922 = vmatpush3.bf16.msra.mxu0 %v1005_v56 }
  0x29   :  { %923 = vmatprep.subr.bf16.mxu0 %v1007_v57  ;;  %944 = vmatpush3.bf16.msra.mxu1 %v1006_v58 }
  0x2a   :  { %945 = vmatprep.subr.bf16.mxu1 %v1008_v59 }
  0x2c   :  { %924 = vmatpush3.bf16.msra.mxu0 %v1009_v60 }
  0x2d   :  { %925 = vmatprep.subr.bf16.mxu0 %v1011_v61  ;;  %946 = vmatpush3.bf16.msra.mxu1 %v1010_v62 }
  0x2e   :  { %947 = vmatprep.subr.bf16.mxu1 %v1012_v63 }
  0x30   :  { %926 = vmatpush3.bf16.msra.mxu0 %v1013_v0 }
  0x31   :  { %927 = vmatprep.subr.bf16.mxu0 %v1015_v1  ;;  %948 = vmatpush3.bf16.msra.mxu1 %v1014_v2 }
  0x32   :  { %949 = vmatprep.subr.bf16.mxu1 %v1016_v3 }
  0x34   :  { %928 = vmatpush3.bf16.msra.mxu0 %v1017_v4 }
  0x35   :  { %929 = vmatprep.subr.bf16.mxu0 %v1019_v5 }
  0x36   :  { %10 = vsyncpa [#allocation4], 0  ;;  %950 = vmatpush3.bf16.msra.mxu1 %v1018_v6  ;;  %v1022_v10 = vld [vmem:[%s1304_s1 + $0x190] sm:$0xff]   ;;  %v1024_v11 = vld [vmem:[%s1304_s1 + $0x1c8] sm:$0xff]   ;;  %v185_v17 = vrot.slane %v1190_v43, %v1186_v41  ;;  %vm22_vm0 = vcmask 517120   ;;  %v1054_v20 = vmov 0.0  }
  0x37   :  { %951 = vmatprep.subr.bf16.mxu1 %v1020_v7  ;;  %v1025_v12 = vld [vmem:[%s1304_s1 + $0x108] sm:$0xff]   ;;  %v1027_v13 = vld [vmem:[%s1304_s1 + $0x140] sm:$0xff]   ;;  %23 = vst.msk [vmem:[#allocation2] sm:$0x3] %vm22_vm0, %v1054_v20  ;;  %vm790_vm1 = vcmask 516096   ;;  %vm786_vm2 = vcmask 1040384  }
  0x38   :  { %930 = vmatpush3.bf16.msra.mxu0 %v1021_v8  ;;  %v1026_v14 = vld [vmem:[%s1304_s1 + $0x188] sm:$0xff]   ;;  %v1028_v15 = vld [vmem:[%s1304_s1 + $0x1c0] sm:$0xff]   ;;  %v201_v19 = vcombine.high %v185_v17, %v185_v17 }
  0x39   :  { %931 = vmatprep.subr.bf16.mxu0 %v1023_v9  ;;  %v1029_v16 = vld [vmem:[%s1304_s1 + $0x100] sm:$0xff]  }
  0x3a   :  { %952 = vmatpush3.bf16.msra.mxu1 %v1022_v10  ;;  %v1030_v18 = vld [vmem:[%s1304_s1 + $0x180] sm:$0xff]  }
  0x3b   :  { %953 = vmatprep.subr.bf16.mxu1 %v1024_v11  ;;  %v874_v46 = vld [vmem:[%s1305_s2] ss:$0 sm:$0xff]  ;;  %s1055_s2 = smov [#allocation3]  }
  0x3c   :  { %932 = vmatpush3.bf16.msra.mxu0 %v1025_v12  ;;  %s800_s15 = sshll.u32 %s1055_s2, 4  ;;  %s801_s15 = int_to_ptr.vmem [resolvable:$true] %s800_s15 }
  0x3d   :  { %933 = vmatprep.subr.bf16.mxu0 %v1027_v13  ;;  %s1031_s16 = scalar_lea.vmem %s801_s15, 32  ;;  %p1036_p1 = scmp.lt.s32.totalorder %s801_s15, %s801_s15 }
  0x3e   :  { %954 = vmatpush3.bf16.msra.mxu1 %v1026_v14  ;;  %v24_v40 = vld [vmem:[#allocation2] sm:$0x3]  ;;  %p1032_p0 = scmp.ne.s32.totalorder %s801_s15, %s1031_s16  ;;  %p1037_p2 = scmp.lt.s32.totalorder %s1031_s16, %s1031_s16 }
  0x3f   :  { %955 = vmatprep.subr.bf16.mxu1 %v1028_v15 }
  0x40   :  { %934 = vmatpush3.bf16.msra.mxu0 %v1029_v16  ;;  %p1038_p3 = por %p1037_p2, %p1036_p1 }
  0x42   :  { %956 = vmatpush3.bf16.msra.mxu1 %v1030_v18  ;;  %p1039_p4 = pnand %p1038_p3, %p1032_p0 }
  0x43   :  { %709 = vmatmul.mubr.bf16.vlgmr.msra.gmra.mxu0 %v185_v17 }
  0x45   :  { %749 = vmatmul.mubr.bf16.vlgmr.msra.gmra.mxu1 %v201_v19 }
  0xe3   :  { %v891_v21 = vpop.f32.mrf.mxu0 }
  0xe4   :  { %v913_v22 = vpop.f32.mrf.mxu1 }
  0xe5   :  { %v892_v23 = vpop.f32.mrf.mxu0 }
  0xe6   :  { %v914_v24 = vpop.f32.mrf.mxu1  ;;  %v893_v29 = vadd.f32 %v892_v23, %v891_v21 }
  0xe7   :  { %v894_v25 = vpop.f32.mrf.mxu0  ;;  %v915_v30 = vadd.f32 %v914_v24, %v913_v22 }
  0xe8   :  { %v916_v26 = vpop.f32.mrf.mxu1 }
  0xe9   :  { %v895_v27 = vpop.f32.mrf.mxu0  ;;  %v671_v34 = vadd.f32 %v915_v30, %v893_v29 }
  0xea   :  { %v917_v28 = vpop.f32.mrf.mxu1 }
 0x103   :  { %v935_v31 = vpop.f32.mrf.mxu0 }
 0x105   :  { %v957_v32 = vpop.f32.mrf.mxu1  ;;  %v936_v33 = vpop.f32.mrf.mxu0 }
 0x106   :  { %v937_v35 = vadd.f32 %v936_v33, %v935_v31 }
 0x107   :  { %v958_v36 = vpop.f32.mrf.mxu1  ;;  %v938_v37 = vpop.f32.mrf.mxu0 }
 0x108   :  { %v711_v38 = vadd.f32 %v937_v35, %v671_v34  ;;  %v959_v39 = vadd.f32 %v958_v36, %v957_v32 }
 0x109   :  { %v960_v41 = vpop.f32.mrf.mxu1  ;;  %v939_v42 = vpop.f32.mrf.mxu0 }
 0x10a   :  { %v751_v43 = vadd.f32 %v959_v39, %v711_v38 }
 0x10b   :  { %v961_v44 = vpop.f32.mrf.mxu1 }
 0x10c   :  { %v756_v45 = vadd.f32 %v751_v43, %v24_v40 }
 0x10e   :  { %758 = vst.msk [vmem:[#allocation2] sm:$0x3] %vm22_vm0, %v756_v45 }
 0x115   :  { %v762_v47 = vld [vmem:[#allocation2] sm:$0x3] }
 0x116   :  { %v770_v48 = vadd.f32 %v874_v46, %v762_v47 }
 0x118   :  { %v771_v49 = vsel %vm22_vm0, %v770_v48, 0.0  ;;  %v778_v50 = vmul.f32 %v770_v48, %v770_v48  ;;  %v789_v51 = vpack.c.bf16 %v770_v48, %v770_v48 }
 0x119   :  { %v772_v52 = vrot.slane %v771_v49, 4 }
 0x11a   :  { %v779_v53 = vsel %vm22_vm0, %v778_v50, 0.0  ;;  %791 = vst.msk [vmem:[%s1306_s3] sm:$0x1] %vm790_vm1, %v789_v51 }
 0x11b   :  { %v773_v54 = vadd.f32 %v772_v52, %v771_v49  ;;  %v780_v55 = vrot.slane %v779_v53, 4 }
 0x11d   :  { %v774_v56 = vrot.slane %v773_v54, 2  ;;  %v781_v57 = vadd.f32 %v780_v55, %v779_v53 }
 0x11f   :  { %v775_v58 = vadd.f32 %v774_v56, %v773_v54  ;;  %v782_v59 = vrot.slane %v781_v57, 2 }
 0x121   :  { %v776_v60 = vrot.slane %v775_v58, 1  ;;  %v783_v61 = vadd.f32 %v782_v59, %v781_v57 }
 0x123   :  { %v784_v62 = vrot.slane %v783_v61, 1  ;;  %v777_v63 = vadd.f32 %v776_v60, %v775_v58 }
 0x125   :  { %v785_v0 = vadd.f32 %v784_v62, %v783_v61 }
 0x127   :  { %v787_v1 = vsel %vm786_vm2, %v777_v63, %v785_v0 }
 0x128   :  { %788 = vst.msk [vmem:[#allocation3] sm:$0x3] %vm22_vm0, %v787_v1 }
 0x129   :  { %1042 = shalt.err (!%p1039_p4)
}
 0x12a   :  { %803 = dma.vmem_to_hbm [thread:$0]  %s801_s15, 32, %s1307_s4, [#allocation4]  }
 0x12b   :  { %1051 = dma.done.wait [#allocation4], 32  }
 0x12c   :  { %1052 = vsyncadd [#allocation4], 4294967264 }
 0x12d   :  { %809 = vsyncpa [#allocation4], 1 }

// kernel: unet_forward.15
= control target key start
LH: loop header
LB: loop body
LE: loop exit
PB: predicated region body
PF: predicated region fallthrough
CT: control target
= control target key end

     0   :  { %s822_s15 = smov 0   ;;  %s824_s16 = smov 0   ;;  %s896_s0 = inlined_call_operand.vmem [shape: bf16[4,2,256], index: 0, kind: input, shape index: {}]   ;;  %s897_s1 = inlined_call_operand.vmem [shape: bf16[4,256,64], index: 1, kind: input, shape index: {}]   ;;  %s898_s2 = inlined_call_operand.vmem [shape: f32[1,64], index: 2, kind: input, shape index: {}]   ;;  %s899_s3 = inlined_call_operand.vmem [shape: bf16[4,2,64], index: 3, kind: output, shape index: {0}]   ;;  %s900_s4 = inlined_call_operand.vmem [shape: f32[4,1,2,64], index: 4, kind: output, shape index: {1}]  }
   0x1   :  { %s826_s17 = smov 0  }
   0x2 LB: > { %s34_s18 = sadd.s32 1, %s789_s16  ;;  %p681_p0 = scmp.ge.s32.totalorder %s793_s17, 1  ;;  %s793_s17 = sphi %s826_s17, %s15_s17   ;;  %s789_s16 = sphi %s824_s16, %s902_s16   ;;  %s785_s15 = sphi %s822_s15, %s901_s15  }
   0x3   : > { %p36_p1 = scmp.ge.s32.totalorder %s34_s18, 4  ;;  %p217_p2 = scmp.lt.s32.totalorder %s793_s17, 5 }
   0x5   : > { %s904_s18 = smov (%p36_p1, %s34_s18), 0  ;;  %p218_p3 = pnand %p681_p0, %p217_p2 }
   0x6   : > { %p268_p4 = scmp.lt.s32.totalorder (!%p218_p3), %s785_s15, 3 }
   0x7   : > { %221 = sbr.rel (%p218_p3) target bundleno = 274 (0x112), region = 32 }
   0xc   : > { %s906_s15 = smov (!%p268_p4, %s785_s15), 3  ;;  %v795_v6 = vmov 1966171168   ;;  %v356_v8 = vlaneseq  ;;  %vm308_vm0 = vcmask 517120   ;;  %v796_v26 = vmov 0.0  }
   0xd   : > { %s706_s19 = sshll.u32 %s906_s15, 7  ;;  %v354_v7 = vunpack.c.l.s4 %v795_v6  ;;  %s682_s23 = sshll.u32 %s906_s15, 1  ;;  %309 = vst.msk [vmem:[#allocation2] sm:$0x3] %vm308_vm0, %v796_v26  ;;  %v703_v34 = vld [vmem:[%s898_s2] ss:$0 sm:$0xff] }
   0xe   : > { %s846_s22 = scalar_lea.vmem %s897_s1, %s706_s19  ;;  %v357_v12 = vshrl.u32 %v356_v8, 7  ;;  %s278_s26 = scalar_lea.vmem %s896_s0, %s682_s23  ;;  %vm539_vm1 = vcmask 516096   ;;  %vm535_vm2 = vcmask 1040384  }
   0xf   : > { %v755_v0 = vld [vmem:[%s846_s22 + $0x78] sm:$0xff]   ;;  %v757_v2 = vld [vmem:[%s846_s22 + $0x70] sm:$0xff]   ;;  %v759_v4 = vld [vmem:[%s846_s22 + $0x68] sm:$0xff]   ;;  %v355_v11 = vunpack.c.0.s8 %v354_v7  ;;  %s295_s5 = scalar_lea.vmem %s899_s3, %s906_s15  ;;  %s302_s8 = scalar_lea.vmem %s900_s4, %s682_s23 }
  0x10   : > { %v756_v1 = vld [vmem:[%s846_s22 + $0x38] sm:$0xff]   ;;  %707 = vmatprep.subr.bf16.mxu0 %v755_v0  ;;  %v758_v3 = vld [vmem:[%s846_s22 + $0x30] sm:$0xff]   ;;  %v760_v5 = vld [vmem:[%s846_s22 + $0x28] sm:$0xff]  }
  0x11   : > { %708 = vmatpush3.bf16.msra.mxu0 %v756_v1  ;;  %v761_v9 = vld [vmem:[%s846_s22 + $0x60] sm:$0xff]   ;;  %v763_v13 = vld [vmem:[%s846_s22 + $0x58] sm:$0xff]   ;;  %v358_v15 = vsub.s32 %v355_v11, %v357_v12  ;;  %v765_v16 = vld [vmem:[%s846_s22 + $0x50] sm:$0xff]  }
  0x12   : > { %709 = vmatprep.subr.bf16.mxu0 %v757_v2  ;;  %v762_v10 = vld [vmem:[%s846_s22 + $0x20] sm:$0xff]   ;;  %v764_v14 = vld [vmem:[%s846_s22 + $0x18] sm:$0xff]   ;;  %v766_v19 = vld [vmem:[%s846_s22 + $0x10] sm:$0xff]  }
  0x13   : > { %v686_v17 = vld.sshfl [vmem:[%s278_s26] sm:$0x11 pattern:$0x75316420]  ;;  %v767_v21 = vld [vmem:[%s846_s22 + $0x48] sm:$0xff]  }
  0x14   : > { %v352_v18 = vcombine.high %v686_v17, %v686_v17  ;;  %v768_v22 = vld [vmem:[%s846_s22 + $0x8] sm:$0xff]   ;;  %v769_v23 = vld [vmem:[%s846_s22 + $0x40] sm:$0xff]   ;;  %v359_v25 = vrot.slane %v686_v17, %v358_v15 }
  0x15   : > { %710 = vmatpush3.bf16.msra.mxu0 %v758_v3  ;;  %v770_v24 = vld [vmem:[%s846_s22] sm:$0xff]  }
  0x16   : > { %711 = vmatprep.subr.bf16.mxu0 %v759_v4  ;;  %v366_v20 = vrot.slane %v352_v18, %v358_v15  ;;  %v310_v28 = vld [vmem:[#allocation2] sm:$0x3] }
  0x18   : > { %497 = vmatprep.mubr.bf16.mxu0 %v366_v20 }
  0x19   : > { %712 = vmatpush3.bf16.msra.mxu0 %v760_v5 }
  0x1a   : > { %713 = vmatprep.subr.bf16.mxu0 %v761_v9 }
  0x1d   : > { %714 = vmatpush3.bf16.msra.mxu0 %v762_v10 }
  0x1e   : > { %715 = vmatprep.subr.bf16.mxu0 %v763_v13 }
  0x21   : > { %716 = vmatpush3.bf16.msra.mxu0 %v764_v14 }
  0x22   : > { %717 = vmatprep.subr.bf16.mxu0 %v765_v16 }
  0x25   : > { %718 = vmatpush3.bf16.msra.mxu0 %v766_v19 }
  0x26   : > { %719 = vmatprep.subr.bf16.mxu0 %v767_v21 }
  0x29   : > { %720 = vmatpush3.bf16.msra.mxu0 %v768_v22 }
  0x2a   : > { %721 = vmatprep.subr.bf16.mxu0 %v769_v23 }
  0x2d   : > { %722 = vmatpush3.bf16.msra.mxu0 %v770_v24 }
  0x30   : > { %498 = vmatmul.mubr.bf16.vlgmr.msra.gmra.mxu0 %v359_v25 }
  0xf0   : > { %v723_v27 = vpop.f32.mrf.mxu0 }
  0xf2   : > { %v724_v29 = vpop.f32.mrf.mxu0 }
  0xf3   : > { %v725_v30 = vadd.f32 %v724_v29, %v723_v27 }
  0xf4   : > { %v726_v31 = vpop.f32.mrf.mxu0 }
  0xf5   : > { %v505_v32 = vadd.f32 %v725_v30, %v310_v28 }
  0xf6   : > { %v727_v33 = vpop.f32.mrf.mxu0 }
  0xf7   : > { %507 = vst.msk [vmem:[#allocation2] sm:$0x3] %vm308_vm0, %v505_v32 }
  0xfe   : > { %v511_v35 = vld [vmem:[#allocation2] sm:$0x3] }
  0xff   : > { %v519_v36 = vadd.f32 %v703_v34, %v511_v35 }
 0x101   : > { %v520_v37 = vsel %vm308_vm0, %v519_v36, 0.0  ;;  %v527_v38 = vmul.f32 %v519_v36, %v519_v36  ;;  %v538_v39 = vpack.c.bf16 %v519_v36, %v519_v36 }
 0x102   : > { %v521_v40 = vrot.slane %v520_v37, 4 }
 0x103   : > { %v528_v41 = vsel %vm308_vm0, %v527_v38, 0.0  ;;  %540 = vst.msk [vmem:[%s295_s5] sm:$0x1] %vm539_vm1, %v538_v39 }
 0x104   : > { %v522_v42 = vadd.f32 %v521_v40, %v520_v37  ;;  %v529_v43 = vrot.slane %v528_v41, 4 }
 0x106   : > { %v523_v44 = vrot.slane %v522_v42, 2  ;;  %v530_v45 = vadd.f32 %v529_v43, %v528_v41 }
 0x108   : > { %v524_v46 = vadd.f32 %v523_v44, %v522_v42  ;;  %v531_v47 = vrot.slane %v530_v45, 2 }
 0x10a   : > { %v525_v48 = vrot.slane %v524_v46, 1  ;;  %v532_v49 = vadd.f32 %v531_v47, %v530_v45 }
 0x10c   : > { %v533_v50 = vrot.slane %v532_v49, 1  ;;  %v526_v51 = vadd.f32 %v525_v48, %v524_v46 }
 0x10e   : > { %v534_v52 = vadd.f32 %v533_v50, %v532_v49 }
 0x110   : > { %v536_v53 = vsel %vm535_vm2, %v526_v51, %v534_v52 }
 0x111   : > { %537 = vst.msk [vmem:[%s302_s8] sm:$0x3] %vm308_vm0, %v536_v53 }
 0x112 PF: > { %s15_s17 = sadd.s32 1, %s793_s17   ;;  %s901_s15 = smov %s789_s16 }
 0x113   : > { %p12_p5 = scmp.ge.s32.totalorder %s15_s17, 6   ;;  %s902_s16 = smov %s904_s18 }
 0x115   :  { %14 = sbr.rel (!%p12_p5) target bundleno = 2 (0x2), region = 85 }

// kernel: unet_forward.16
= control target key start
LH: loop header
LB: loop body
LE: loop exit
PB: predicated region body
PF: predicated region fallthrough
CT: control target
= control target key end

     0   :  { %s1057_s15 = smov 0   ;;  %s1059_s16 = smov 0   ;;  %s1143_s0 = inlined_call_operand.vmem [shape: bf16[4,8,512], index: 0, kind: input, shape index: {}]   ;;  %s1144_s1 = inlined_call_operand.vmem [shape: bf16[4,512,32], index: 1, kind: input, shape index: {}]   ;;  %s1145_s2 = inlined_call_operand.vmem [shape: f32[1,32], index: 2, kind: input, shape index: {}]   ;;  %s1146_s3 = inlined_call_operand.vmem [shape: bf16[4,8,32], index: 3, kind: output, shape index: {0}]   ;;  %s1147_s4 = inlined_call_operand.vmem [shape: f32[4,1,2,32], index: 4, kind: output, shape index: {1}]  }
   0x1   :  { %s1061_s17 = smov 0  }
   0x2 LB: > { %s34_s18 = sadd.s32 1, %s1025_s16  ;;  %p854_p0 = scmp.ge.s32.totalorder %s1029_s17, 1  ;;  %s1029_s17 = sphi %s1061_s17, %s15_s17   ;;  %s1025_s16 = sphi %s1059_s16, %s1149_s16   ;;  %s1021_s15 = sphi %s1057_s15, %s1148_s15  }
   0x3   : > { %p36_p1 = scmp.ge.s32.totalorder %s34_s18, 4  ;;  %p218_p2 = scmp.lt.s32.totalorder %s1029_s17, 5 }
   0x5   : > { %s1151_s18 = smov (%p36_p1, %s34_s18), 0  ;;  %p219_p3 = pnand %p854_p0, %p218_p2 }
   0x6   : > { %p271_p4 = scmp.lt.s32.totalorder (!%p219_p3), %s1021_s15, 3 }
   0x7   : > { %222 = sbr.rel (%p219_p3) target bundleno = 278 (0x116), region = 32 }
   0xc   : > { %s1153_s15 = smov (!%p271_p4, %s1021_s15), 3  ;;  %vm313_vm0 = vcmask 261120   ;;  %v1031_v38 = vmov 0.0   ;;  %v897_v52 = vld [vmem:[%s1145_s2] ss:$0 sm:$0xff]  ;;  %vm703_vm1 = vcmask 257024  }
   0xd   : > { %s901_s19 = sshll.u32 %s1153_s15, 8  ;;  %s900_s23 = sshll.u32 %s1153_s15, 4  ;;  %314 = vst.msk [vmem:[#allocation2] sm:$0xff] %vm313_vm0, %v1031_v38  ;;  %vm698_vm2 = vcmask 1040384   ;;  %vm700_vm3 = vcmask 254976  }
   0xe   : > { %s1081_s22 = scalar_lea.vmem %s1144_s1, %s901_s19  ;;  %s282_s26 = scalar_lea.vmem %s1143_s0, %s900_s23 }
   0xf   : > { %v971_v0 = vld [vmem:[%s1081_s22 + $0x78] sm:$0xff]   ;;  %v975_v4 = vld [vmem:[%s1081_s22 + $0x70] sm:$0xff]   ;;  %v979_v8 = vld [vmem:[%s1081_s22 + $0x68] sm:$0xff]   ;;  %s859_s29 = sshll.u32 %s1153_s15, 2  ;;  %s860_s7 = sshll.u32 %s1153_s15, 1 }
  0x10   : > { %v972_v1 = vld [vmem:[%s1081_s22 + $0xf8] sm:$0xff]   ;;  %902 = vmatprep.subr.bf16.mxu0 %v971_v0  ;;  %v976_v5 = vld [vmem:[%s1081_s22 + $0xf0] sm:$0xff]   ;;  %v980_v9 = vld [vmem:[%s1081_s22 + $0xe8] sm:$0xff]   ;;  %s300_s6 = scalar_lea.vmem %s1146_s3, %s859_s29  ;;  %s307_s10 = scalar_lea.vmem %s1147_s4, %s860_s7 }
  0x11   : > { %v973_v2 = vld [vmem:[%s1081_s22 + $0x38] sm:$0xff]   ;;  %924 = vmatprep.subr.bf16.mxu1 %v972_v1  ;;  %v977_v6 = vld [vmem:[%s1081_s22 + $0x30] sm:$0xff]   ;;  %v981_v10 = vld [vmem:[%s1081_s22 + $0x28] sm:$0xff]  }
  0x12   : > { %v974_v3 = vld [vmem:[%s1081_s22 + $0xb8] sm:$0xff]   ;;  %903 = vmatpush3.bf16.msra.mxu0 %v973_v2  ;;  %v978_v7 = vld [vmem:[%s1081_s22 + $0xb0] sm:$0xff]   ;;  %v982_v11 = vld [vmem:[%s1081_s22 + $0xa8] sm:$0xff]  }
  0x13   : > { %925 = vmatpush3.bf16.msra.mxu1 %v974_v3  ;;  %904 = vmatprep.subr.bf16.mxu0 %v975_v4  ;;  %v983_v12 = vld [vmem:[%s1081_s22 + $0x60] sm:$0xff]   ;;  %v987_v16 = vld [vmem:[%s1081_s22 + $0x58] sm:$0xff]   ;;  %v991_v20 = vld [vmem:[%s1081_s22 + $0x50] sm:$0xff]  }
  0x14   : > { %926 = vmatprep.subr.bf16.mxu1 %v976_v5  ;;  %v984_v13 = vld [vmem:[%s1081_s22 + $0xe0] sm:$0xff]   ;;  %v988_v17 = vld [vmem:[%s1081_s22 + $0xd8] sm:$0xff]   ;;  %v992_v21 = vld [vmem:[%s1081_s22 + $0xd0] sm:$0xff]  }
  0x15   : > { %v985_v14 = vld [vmem:[%s1081_s22 + $0x20] sm:$0xff]   ;;  %v989_v18 = vld [vmem:[%s1081_s22 + $0x18] sm:$0xff]   ;;  %v993_v22 = vld [vmem:[%s1081_s22 + $0x10] sm:$0xff]  }
  0x16   : > { %905 = vmatpush3.bf16.msra.mxu0 %v977_v6  ;;  %v986_v15 = vld [vmem:[%s1081_s22 + $0xa0] sm:$0xff]   ;;  %v990_v19 = vld [vmem:[%s1081_s22 + $0x98] sm:$0xff]   ;;  %v994_v23 = vld [vmem:[%s1081_s22 + $0x90] sm:$0xff]  }
  0x17   : > { %927 = vmatpush3.bf16.msra.mxu1 %v978_v7  ;;  %906 = vmatprep.subr.bf16.mxu0 %v979_v8  ;;  %v995_v24 = vld [vmem:[%s1081_s22 + $0x48] sm:$0xff]   ;;  %v999_v28 = vld [vmem:[%s1081_s22 + $0x40] sm:$0xff]  }
  0x18   : > { %928 = vmatprep.subr.bf16.mxu1 %v980_v9  ;;  %v996_v25 = vld [vmem:[%s1081_s22 + $0xc8] sm:$0xff]   ;;  %v1000_v29 = vld [vmem:[%s1081_s22 + $0xc0] sm:$0xff]  }
  0x19   : > { %v997_v26 = vld [vmem:[%s1081_s22 + $0x8] sm:$0xff]   ;;  %v1001_v30 = vld [vmem:[%s1081_s22] sm:$0xff]  }
  0x1a   : > { %907 = vmatpush3.bf16.msra.mxu0 %v981_v10  ;;  %v998_v27 = vld [vmem:[%s1081_s22 + $0x88] sm:$0xff]   ;;  %v1002_v31 = vld [vmem:[%s1081_s22 + $0x80] sm:$0xff]  }
  0x1b   : > { %929 = vmatpush3.bf16.msra.mxu1 %v982_v11  ;;  %908 = vmatprep.subr.bf16.mxu0 %v983_v12  ;;  %v316_v32 = vld [vmem:[%s282_s26] sm:$0xff]  ;;  %v317_v33 = vld [vmem:[%s282_s26 + $0x8] sm:$0xff] }
  0x1c   : > { %930 = vmatprep.subr.bf16.mxu1 %v984_v13  ;;  %v861_v34 = vcombine.low %v316_v32, %v316_v32  ;;  %v862_v35 = vcombine.high %v316_v32, %v316_v32  ;;  %v863_v36 = vcombine.low %v317_v33, %v317_v33  ;;  %v864_v37 = vcombine.high %v317_v33, %v317_v33  ;;  %v315_v45 = vld [vmem:[#allocation2] sm:$0xff] }
  0x1e   : > { %909 = vmatpush3.bf16.msra.mxu0 %v985_v14  ;;  %620 = vmatprep.mubr.bf16.mxu0 %v862_v35 }
  0x1f   : > { %931 = vmatpush3.bf16.msra.mxu1 %v986_v15  ;;  %910 = vmatprep.subr.bf16.mxu0 %v987_v16 }
  0x20   : > { %932 = vmatprep.subr.bf16.mxu1 %v988_v17  ;;  %660 = vmatprep.mubr.bf16.mxu1 %v864_v37 }
  0x22   : > { %911 = vmatpush3.bf16.msra.mxu0 %v989_v18 }
  0x23   : > { %933 = vmatpush3.bf16.msra.mxu1 %v990_v19  ;;  %912 = vmatprep.subr.bf16.mxu0 %v991_v20 }
  0x24   : > { %934 = vmatprep.subr.bf16.mxu1 %v992_v21 }
  0x26   : > { %913 = vmatpush3.bf16.msra.mxu0 %v993_v22 }
  0x27   : > { %935 = vmatpush3.bf16.msra.mxu1 %v994_v23  ;;  %914 = vmatprep.subr.bf16.mxu0 %v995_v24 }
  0x28   : > { %936 = vmatprep.subr.bf16.mxu1 %v996_v25 }
  0x2a   : > { %915 = vmatpush3.bf16.msra.mxu0 %v997_v26 }
  0x2b   : > { %937 = vmatpush3.bf16.msra.mxu1 %v998_v27  ;;  %916 = vmatprep.subr.bf16.mxu0 %v999_v28 }
  0x2c   : > { %938 = vmatprep.subr.bf16.mxu1 %v1000_v29 }
  0x2e   : > { %917 = vmatpush3.bf16.msra.mxu0 %v1001_v30 }
  0x2f   : > { %939 = vmatpush3.bf16.msra.mxu1 %v1002_v31 }
  0x31   : > { %621 = vmatmul.mubr.bf16.vlgmr.msra.gmra.mxu0 %v861_v34 }
  0x32   : > { %661 = vmatmul.mubr.bf16.vlgmr.msra.gmra.mxu1 %v863_v36 }
  0xf1   : > { %v918_v39 = vpop.f32.mrf.mxu0 }
  0xf2   : > { %v940_v40 = vpop.f32.mrf.mxu1 }
  0xf3   : > { %v919_v41 = vpop.f32.mrf.mxu0 }
  0xf4   : > { %v941_v42 = vpop.f32.mrf.mxu1  ;;  %v920_v43 = vadd.f32 %v919_v41, %v918_v39 }
  0xf5   : > { %v942_v44 = vadd.f32 %v941_v42, %v940_v40  ;;  %v921_v46 = vpop.f32.mrf.mxu0 }
  0xf6   : > { %v943_v47 = vpop.f32.mrf.mxu1 }
  0xf7   : > { %v663_v48 = vadd.f32 %v942_v44, %v920_v43  ;;  %v922_v49 = vpop.f32.mrf.mxu0 }
  0xf8   : > { %v944_v50 = vpop.f32.mrf.mxu1 }
  0xf9   : > { %v668_v51 = vadd.f32 %v663_v48, %v315_v45 }
  0xfb   : > { %670 = vst.msk [vmem:[#allocation2] sm:$0xff] %vm313_vm0, %v668_v51 }
 0x102   : > { %v674_v53 = vld [vmem:[#allocation2] sm:$0xff] }
 0x103   : > { %v682_v54 = vadd.f32 %v897_v52, %v674_v53 }
 0x105   : > { %v683_v55 = vsel %vm313_vm0, %v682_v54, 0.0  ;;  %v690_v56 = vmul.f32 %v682_v54, %v682_v54  ;;  %v702_v57 = vpack.c.bf16 %v682_v54, %v682_v54 }
 0x106   : > { %v684_v58 = vrot.slane %v683_v55, 4 }
 0x107   : > { %v691_v59 = vsel %vm313_vm0, %v690_v56, 0.0  ;;  %704 = vst.msk [vmem:[%s300_s6] sm:$0xf] %vm703_vm1, %v702_v57 }
 0x108   : > { %v685_v60 = vadd.f32 %v684_v58, %v683_v55  ;;  %v692_v61 = vrot.slane %v691_v59, 4 }
 0x10a   : > { %v686_v62 = vrot.slane %v685_v60, 2  ;;  %v693_v63 = vadd.f32 %v692_v61, %v691_v59 }
 0x10c   : > { %v687_v0 = vadd.f32 %v686_v62, %v685_v60  ;;  %v694_v1 = vrot.slane %v693_v63, 2 }
 0x10e   : > { %v688_v2 = vrot.slane %v687_v0, 1  ;;  %v695_v3 = vadd.f32 %v694_v1, %v693_v63 }
 0x110   : > { %v696_v4 = vrot.slane %v695_v3, 1  ;;  %v689_v5 = vadd.f32 %v688_v2, %v687_v0 }
 0x112   : > { %v697_v6 = vadd.f32 %v696_v4, %v695_v3 }
 0x114   : > { %v699_v7 = vsel %vm698_vm2, %v689_v5, %v697_v6 }
 0x115   : > { %701 = vst.msk [vmem:[%s307_s10] sm:$0x3] %vm700_vm3, %v699_v7 }
 0x116 PF: > { %s15_s17 = sadd.s32 1, %s1029_s17   ;;  %s1148_s15 = smov %s1025_s16 }
 0x117   : > { %p12_p5 = scmp.ge.s32.totalorder %s15_s17, 6   ;;  %s1149_s16 = smov %s1151_s18 }
 0x119   :  { %14 = sbr.rel (!%p12_p5) target bundleno = 2 (0x2), region = 85 }

// kernel: unet_forward.17
= control target key start
LH: loop header
LB: loop body
LE: loop exit
PB: predicated region body
PF: predicated region fallthrough
CT: control target
= control target key end

     0   :  { %s957_s15 = smov 0   ;;  %s959_s16 = smov 0   ;;  %s1043_s0 = inlined_call_operand.vmem [shape: bf16[4,32,256], index: 0, kind: input, shape index: {}]   ;;  %s1044_s1 = inlined_call_operand.vmem [shape: bf16[4,256,16], index: 1, kind: input, shape index: {}]   ;;  %s1045_s2 = inlined_call_operand.vmem [shape: f32[1,16], index: 2, kind: input, shape index: {}]   ;;  %s1046_s3 = inlined_call_operand.vmem [shape: bf16[4,32,16], index: 3, kind: output, shape index: {0}]   ;;  %s1047_s4 = inlined_call_operand.vmem [shape: f32[4,1,2,16], index: 4, kind: output, shape index: {1}]  }
   0x1   :  { %s961_s17 = smov 0  }
   0x2 LB: > { %s34_s18 = sadd.s32 1, %s925_s16  ;;  %p774_p0 = scmp.ge.s32.totalorder %s929_s17, 1  ;;  %s929_s17 = sphi %s961_s17, %s15_s17   ;;  %s925_s16 = sphi %s959_s16, %s1049_s16   ;;  %s921_s15 = sphi %s957_s15, %s1048_s15  }
   0x3   : > { %p36_p1 = scmp.ge.s32.totalorder %s34_s18, 4  ;;  %p220_p2 = scmp.lt.s32.totalorder %s929_s17, 5 }
   0x5   : > { %s1051_s18 = smov (%p36_p1, %s34_s18), 0  ;;  %p221_p3 = pnand %p774_p0, %p220_p2 }
   0x6   : > { %p277_p4 = scmp.lt.s32.totalorder (!%p221_p3), %s921_s15, 3 }
   0x7   : > { %224 = sbr.rel (%p221_p3) target bundleno = 284 (0x11c), region = 32 }
   0xc   : > { %s1053_s15 = smov (!%p277_p4, %s921_s15), 3  ;;  %vm323_vm0 = vcmask 130048   ;;  %v931_v20 = vmov 0.0   ;;  %v802_v41 = vld [vmem:[%s1045_s2] ss:$0 sm:$0xff]  ;;  %vm610_vm1 = vcmask 125952  }
   0xd   : > { %s810_s19 = sshll.u32 %s1053_s15, 7  ;;  %s809_s23 = sshll.u32 %s1053_s15, 5  ;;  %324 = vst.msk [vmem:[#allocation2] sm:$0xff] %vm323_vm0, %v931_v20  ;;  %325 = vst.msk [vmem:[#allocation2 + $0x8] sm:$0xff] %vm323_vm0, %v931_v20  ;;  %vm590_vm2 = vcmask 1040384   ;;  %vm592_vm3 = vcmask 123904  }
   0xe   : > { %s981_s22 = scalar_lea.vmem %s1044_s1, %s810_s19  ;;  %s288_s26 = scalar_lea.vmem %s1043_s0, %s809_s23  ;;  %326 = vst.msk [vmem:[#allocation2 + $0x10] sm:$0xff] %vm323_vm0, %v931_v20  ;;  %327 = vst.msk [vmem:[#allocation2 + $0x18] sm:$0xff] %vm323_vm0, %v931_v20 }
   0xf   : > { %v885_v0 = vld [vmem:[%s981_s22 + $0x78] sm:$0xff]   ;;  %v887_v2 = vld [vmem:[%s981_s22 + $0x70] sm:$0xff]   ;;  %v889_v4 = vld [vmem:[%s981_s22 + $0x68] sm:$0xff]   ;;  %s811_s29 = sshll.u32 %s1053_s15, 4  ;;  %s781_s7 = sshll.u32 %s1053_s15, 1 }
  0x10   : > { %v886_v1 = vld [vmem:[%s981_s22 + $0x38] sm:$0xff]   ;;  %816 = vmatprep.subr.bf16.mxu0 %v885_v0  ;;  %844 = vmatprep.subr.bf16.mxu1 %v885_v0  ;;  %v888_v3 = vld [vmem:[%s981_s22 + $0x30] sm:$0xff]   ;;  %v890_v5 = vld [vmem:[%s981_s22 + $0x28] sm:$0xff]   ;;  %s309_s6 = scalar_lea.vmem %s1046_s3, %s811_s29  ;;  %s317_s10 = scalar_lea.vmem %s1047_s4, %s781_s7 }
  0x11   : > { %817 = vmatpush3.bf16.msra.mxu0 %v886_v1  ;;  %852 = vmatpush3.bf16.msra.mxu1 %v886_v1  ;;  %v891_v6 = vld [vmem:[%s981_s22 + $0x60] sm:$0xff]   ;;  %v893_v8 = vld [vmem:[%s981_s22 + $0x58] sm:$0xff]   ;;  %v895_v10 = vld [vmem:[%s981_s22 + $0x50] sm:$0xff]  }
  0x12   : > { %818 = vmatprep.subr.bf16.mxu0 %v887_v2  ;;  %845 = vmatprep.subr.bf16.mxu1 %v887_v2  ;;  %v892_v7 = vld [vmem:[%s981_s22 + $0x20] sm:$0xff]   ;;  %v894_v9 = vld [vmem:[%s981_s22 + $0x18] sm:$0xff]   ;;  %v896_v13 = vld [vmem:[%s981_s22 + $0x10] sm:$0xff]  }
  0x13   : > { %v903_v11 = vld [vmem:[%s288_s26 + $0x4] ss:$8 sps:$4 sm:$0xff]   ;;  %v906_v12 = vld [vmem:[%s288_s26 + $0x14] ss:$8 sps:$4 sm:$0xff]   ;;  %v901_v18 = vld [vmem:[%s288_s26] ss:$8 sps:$4 sm:$0xff]  }
  0x14   : > { %v897_v14 = vld [vmem:[%s981_s22 + $0x48] sm:$0xff]   ;;  %516 = vmatprep.mubr.bf16.mxu0 %v903_v11  ;;  %524 = vmatprep.mubr.bf16.mxu1 %v906_v12  ;;  %v899_v16 = vld [vmem:[%s981_s22 + $0x40] sm:$0xff]   ;;  %v904_v19 = vld [vmem:[%s288_s26 + $0x10] ss:$8 sps:$4 sm:$0xff]  }
  0x15   : > { %819 = vmatpush3.bf16.msra.mxu0 %v888_v3  ;;  %853 = vmatpush3.bf16.msra.mxu1 %v888_v3  ;;  %v898_v15 = vld [vmem:[%s981_s22 + $0x8] sm:$0xff]   ;;  %v900_v17 = vld [vmem:[%s981_s22] sm:$0xff]   ;;  %v330_v25 = vld [vmem:[#allocation2 + $0x10] sm:$0xff] }
  0x16   : > { %820 = vmatprep.subr.bf16.mxu0 %v889_v4  ;;  %846 = vmatprep.subr.bf16.mxu1 %v889_v4  ;;  %v328_v23 = vld [vmem:[#allocation2] sm:$0xff]  ;;  %v329_v33 = vld [vmem:[#allocation2 + $0x8] sm:$0xff]  ;;  %v331_v35 = vld [vmem:[#allocation2 + $0x18] sm:$0xff] }
  0x19   : > { %821 = vmatpush3.bf16.msra.mxu0 %v890_v5  ;;  %854 = vmatpush3.bf16.msra.mxu1 %v890_v5 }
  0x1a   : > { %822 = vmatprep.subr.bf16.mxu0 %v891_v6  ;;  %847 = vmatprep.subr.bf16.mxu1 %v891_v6 }
  0x1d   : > { %823 = vmatpush3.bf16.msra.mxu0 %v892_v7  ;;  %855 = vmatpush3.bf16.msra.mxu1 %v892_v7 }
  0x1e   : > { %824 = vmatprep.subr.bf16.mxu0 %v893_v8  ;;  %848 = vmatprep.subr.bf16.mxu1 %v893_v8 }
  0x21   : > { %825 = vmatpush3.bf16.msra.mxu0 %v894_v9  ;;  %856 = vmatpush3.bf16.msra.mxu1 %v894_v9 }
  0x22   : > { %826 = vmatprep.subr.bf16.mxu0 %v895_v10  ;;  %849 = vmatprep.subr.bf16.mxu1 %v895_v10 }
  0x25   : > { %827 = vmatpush3.bf16.msra.mxu0 %v896_v13  ;;  %857 = vmatpush3.bf16.msra.mxu1 %v896_v13 }
  0x26   : > { %828 = vmatprep.subr.bf16.mxu0 %v897_v14  ;;  %850 = vmatprep.subr.bf16.mxu1 %v897_v14 }
  0x29   : > { %829 = vmatpush3.bf16.msra.mxu0 %v898_v15  ;;  %858 = vmatpush3.bf16.msra.mxu1 %v898_v15 }
  0x2a   : > { %830 = vmatprep.subr.bf16.mxu0 %v899_v16  ;;  %851 = vmatprep.subr.bf16.mxu1 %v899_v16 }
  0x2d   : > { %831 = vmatpush3.bf16.msra.mxu0 %v900_v17  ;;  %859 = vmatpush3.bf16.msra.mxu1 %v900_v17 }
  0x30   : > { %517 = vmatmul.mubr.bf16.vlgmr.msra.gmra.mxu0 %v901_v18  ;;  %525 = vmatmul.mubr.bf16.vlgmr.msra.gmra.mxu1 %v904_v19 }
  0xf0   : > { %v832_v21 = vpop.f32.mrf.mxu0  ;;  %v838_v22 = vpop.f32.mrf.mxu1 }
  0xf2   : > { %v833_v24 = vpop.f32.mrf.mxu0  ;;  %v839_v26 = vpop.f32.mrf.mxu1 }
  0xf3   : > { %v834_v27 = vadd.f32 %v833_v24, %v832_v21  ;;  %v840_v28 = vadd.f32 %v839_v26, %v838_v22 }
  0xf4   : > { %v835_v29 = vpop.f32.mrf.mxu0  ;;  %v841_v30 = vpop.f32.mrf.mxu1 }
  0xf5   : > { %v533_v31 = vadd.f32 %v834_v27, %v328_v23  ;;  %v535_v32 = vadd.f32 %v840_v28, %v330_v25 }
  0xf6   : > { %v836_v34 = vpop.f32.mrf.mxu0  ;;  %v842_v36 = vpop.f32.mrf.mxu1 }
  0xf7   : > { %538 = vst.msk [vmem:[#allocation2] sm:$0xff] %vm323_vm0, %v533_v31  ;;  %540 = vst.msk [vmem:[#allocation2 + $0x10] sm:$0xff] %vm323_vm0, %v535_v32  ;;  %v837_v37 = vadd.f32 %v836_v34, %v835_v29  ;;  %v843_v38 = vadd.f32 %v842_v36, %v841_v30 }
  0xf9   : > { %v534_v39 = vadd.f32 %v837_v37, %v329_v33  ;;  %v536_v40 = vadd.f32 %v843_v38, %v331_v35 }
  0xfb   : > { %539 = vst.msk [vmem:[#allocation2 + $0x8] sm:$0xff] %vm323_vm0, %v534_v39  ;;  %541 = vst.msk [vmem:[#allocation2 + $0x18] sm:$0xff] %vm323_vm0, %v536_v40 }
  0xfe   : > { %v545_v42 = vld [vmem:[#allocation2] sm:$0xff]  ;;  %v547_v43 = vld [vmem:[#allocation2 + $0x10] sm:$0xff] }
  0xff   : > { %v556_v44 = vadd.f32 %v802_v41, %v545_v42  ;;  %v558_v45 = vadd.f32 %v802_v41, %v547_v43 }
 0x101   : > { %v812_v46 = vpack.c.bf16 %v556_v44, %v556_v44  ;;  %v814_v47 = vpack.c.bf16 %v558_v45, %v558_v45  ;;  %v573_v50 = vmul.f32 %v556_v44, %v556_v44  ;;  %v560_v53 = vsel %vm323_vm0, %v556_v44, 0.0 }
 0x102   : > { %v546_v48 = vld [vmem:[#allocation2 + $0x8] sm:$0xff]  ;;  %v548_v49 = vld [vmem:[#allocation2 + $0x18] sm:$0xff]  ;;  %v575_v54 = vmul.f32 %v558_v45, %v558_v45  ;;  %v563_v61 = vsel %vm323_vm0, %v558_v45, 0.0 }
 0x103   : > { %611 = vst.msk [vmem:[%s309_s6] sm:$0xf] %vm610_vm1, %v812_v46  ;;  %v557_v51 = vadd.f32 %v802_v41, %v546_v48  ;;  %v559_v52 = vadd.f32 %v802_v41, %v548_v49  ;;  %613 = vst.msk [vmem:[%s309_s6 + $0x8] sm:$0xf] %vm610_vm1, %v814_v47  ;;  %v577_v60 = vsel %vm323_vm0, %v573_v50, 0.0 }
 0x104   : > { %v580_v2 = vsel %vm323_vm0, %v575_v54, 0.0 }
 0x105   : > { %v561_v55 = vsel %vm323_vm0, %v557_v51, 0.0  ;;  %v574_v56 = vmul.f32 %v557_v51, %v557_v51  ;;  %v813_v57 = vpack.c.bf16 %v557_v51, %v557_v51  ;;  %v815_v59 = vpack.c.bf16 %v559_v52, %v559_v52 }
 0x106   : > { %v562_v58 = vadd.f32 %v561_v55, %v560_v53  ;;  %v576_v63 = vmul.f32 %v559_v52, %v559_v52  ;;  %v565_v3 = vsel %vm323_vm0, %v559_v52, 0.0 }
 0x107   : > { %v578_v62 = vsel %vm323_vm0, %v574_v56, 0.0  ;;  %612 = vst.msk [vmem:[%s309_s6 + $0x4] sm:$0xf] %vm610_vm1, %v813_v57  ;;  %614 = vst.msk [vmem:[%s309_s6 + $0xc] sm:$0xf] %vm610_vm1, %v815_v59 }
 0x108   : > { %v579_v0 = vadd.f32 %v578_v62, %v577_v60  ;;  %v564_v1 = vadd.f32 %v563_v61, %v562_v58  ;;  %v582_v6 = vsel %vm323_vm0, %v576_v63, 0.0 }
 0x10a   : > { %v566_v4 = vadd.f32 %v565_v3, %v564_v1  ;;  %v581_v5 = vadd.f32 %v580_v2, %v579_v0 }
 0x10c   : > { %v567_v7 = vrot.slane %v566_v4, 4  ;;  %v583_v8 = vadd.f32 %v582_v6, %v581_v5 }
 0x10e   : > { %v568_v9 = vadd.f32 %v567_v7, %v566_v4  ;;  %v584_v10 = vrot.slane %v583_v8, 4 }
 0x110   : > { %v569_v11 = vrot.slane %v568_v9, 2  ;;  %v585_v12 = vadd.f32 %v584_v10, %v583_v8 }
 0x112   : > { %v570_v13 = vadd.f32 %v569_v11, %v568_v9  ;;  %v586_v14 = vrot.slane %v585_v12, 2 }
 0x114   : > { %v571_v15 = vrot.slane %v570_v13, 1  ;;  %v587_v16 = vadd.f32 %v586_v14, %v585_v12 }
 0x116   : > { %v588_v17 = vrot.slane %v587_v16, 1  ;;  %v572_v18 = vadd.f32 %v571_v15, %v570_v13 }
 0x118   : > { %v589_v19 = vadd.f32 %v588_v17, %v587_v16 }
 0x11a   : > { %v591_v20 = vsel %vm590_vm2, %v572_v18, %v589_v19 }
 0x11b   : > { %593 = vst.msk [vmem:[%s317_s10] sm:$0x3] %vm592_vm3, %v591_v20 }
 0x11c PF: > { %s15_s17 = sadd.s32 1, %s929_s17   ;;  %s1048_s15 = smov %s925_s16 }
 0x11d   : > { %p12_p5 = scmp.ge.s32.totalorder %s15_s17, 6   ;;  %s1049_s16 = smov %s1051_s18 }
 0x11f   :  { %14 = sbr.rel (!%p12_p5) target bundleno = 2 (0x2), region = 85 }

// kernel: unet_forward.18
= control target key start
LH: loop header
LB: loop body
LE: loop exit
PB: predicated region body
PF: predicated region fallthrough
CT: control target
= control target key end

     0   :  { %s1196_s15 = smov 0   ;;  %s1198_s16 = smov 0   ;;  %s1405_s0 = inlined_call_operand.vmem [shape: bf16[4,128,128], index: 0, kind: input, shape index: {}]   ;;  %s1406_s1 = inlined_call_operand.vmem [shape: bf16[4,128,8], index: 1, kind: input, shape index: {}]   ;;  %s1407_s2 = inlined_call_operand.vmem [shape: f32[1,8], index: 2, kind: input, shape index: {}]   ;;  %s1408_s3 = inlined_call_operand.vmem [shape: bf16[4,128,8], index: 3, kind: output, shape index: {0}]   ;;  %s1409_s4 = inlined_call_operand.vmem [shape: f32[4,1,2,8], index: 4, kind: output, shape index: {1}]  }
   0x1   :  { %s1200_s17 = smov 0  }
   0x2 LB: > { %s34_s18 = sadd.s32 1, %s1164_s16  ;;  %p979_p0 = scmp.ge.s32.totalorder %s1168_s17, 1  ;;  %s1168_s17 = sphi %s1200_s17, %s15_s17   ;;  %s1164_s16 = sphi %s1198_s16, %s1411_s16   ;;  %s1160_s15 = sphi %s1196_s15, %s1410_s15  }
   0x3   : > { %p36_p1 = scmp.ge.s32.totalorder %s34_s18, 4  ;;  %p217_p2 = scmp.lt.s32.totalorder %s1168_s17, 5 }
   0x5   : > { %s1413_s18 = smov (%p36_p1, %s34_s18), 0  ;;  %p218_p3 = pnand %p979_p0, %p217_p2 }
   0x6   : > { %p271_p4 = scmp.lt.s32.totalorder (!%p218_p3), %s1160_s15, 3 }
   0x7   : > { %221 = sbr.rel (%p218_p3) target bundleno = 306 (0x132), region = 32 }
   0xc   : > { %vm315_vm0 = vcmask 64512   ;;  %v1170_v0 = vmov 0.0   ;;  %s1415_s15 = smov (!%p271_p4, %s1160_s15), 3  ;;  %v1273_v43 = vld [vmem:[%s1407_s2] ss:$0 sm:$0xff]  ;;  %vm806_vm1 = vcmask 60416  }
   0xd   : > { %318 = vst.msk [vmem:[#allocation2 + $0x10] sm:$0xff] %vm315_vm0, %v1170_v0  ;;  %316 = vst.msk [vmem:[#allocation2] sm:$0xff] %vm315_vm0, %v1170_v0  ;;  %s1234_s19 = sshll.u32 %s1415_s15, 6  ;;  %s986_s5 = sshll.u32 %s1415_s15, 1  ;;  %vm738_vm2 = vcmask 1040384   ;;  %vm740_vm3 = vcmask 58368  }
   0xe   : > { %317 = vst.msk [vmem:[#allocation2 + $0x8] sm:$0xff] %vm315_vm0, %v1170_v0  ;;  %319 = vst.msk [vmem:[#allocation2 + $0x18] sm:$0xff] %vm315_vm0, %v1170_v0  ;;  %s1240_s22 = scalar_lea.vmem %s1406_s1, %s1234_s19  ;;  %s1249_s25 = scalar_lea.vmem %s1405_s0, %s1234_s19 }
   0xf   : > { %320 = vst.msk [vmem:[#allocation2 + $0x20] sm:$0xff] %vm315_vm0, %v1170_v0  ;;  %321 = vst.msk [vmem:[#allocation2 + $0x28] sm:$0xff] %vm315_vm0, %v1170_v0  ;;  %v1130_v1 = vld [vmem:[%s1240_s22 + $0x38] sm:$0xff]   ;;  %v1131_v2 = vld [vmem:[%s1240_s22 + $0x30] sm:$0xff]   ;;  %s1287_s30 = scalar_lea.vmem %s1408_s3, %s1234_s19  ;;  %s309_s8 = scalar_lea.vmem %s1409_s4, %s986_s5 }
  0x10   : > { %322 = vst.msk [vmem:[#allocation2 + $0x30] sm:$0xff] %vm315_vm0, %v1170_v0  ;;  %323 = vst.msk [vmem:[#allocation2 + $0x38] sm:$0xff] %vm315_vm0, %v1170_v0  ;;  %1057 = vmatprep.subr.bf16.mxu0 %v1130_v1  ;;  %1089 = vmatprep.subr.bf16.mxu1 %v1130_v1  ;;  %v1132_v3 = vld [vmem:[%s1240_s22 + $0x28] sm:$0xff]   ;;  %v1133_v4 = vld [vmem:[%s1240_s22 + $0x20] sm:$0xff]  }
  0x11   : > { %324 = vst.msk [vmem:[#allocation2 + $0x40] sm:$0xff] %vm315_vm0, %v1170_v0  ;;  %325 = vst.msk [vmem:[#allocation2 + $0x48] sm:$0xff] %vm315_vm0, %v1170_v0  ;;  %1058 = vmatpush3.bf16.msra.mxu0 %v1130_v1  ;;  %1097 = vmatpush3.bf16.msra.mxu1 %v1130_v1  ;;  %v1138_v5 = vld [vmem:[%s1249_s25] sm:$0xff]   ;;  %v1134_v6 = vld [vmem:[%s1240_s22 + $0x18] sm:$0xff]  }
  0x12   : > { %326 = vst.msk [vmem:[#allocation2 + $0x50] sm:$0xff] %vm315_vm0, %v1170_v0  ;;  %327 = vst.msk [vmem:[#allocation2 + $0x58] sm:$0xff] %vm315_vm0, %v1170_v0  ;;  %1059 = vmatprep.subr.bf16.mxu0 %v1131_v2  ;;  %1090 = vmatprep.subr.bf16.mxu1 %v1131_v2  ;;  %v1142_v7 = vld [vmem:[%s1249_s25 + $0x20] sm:$0xff]   ;;  %v1135_v8 = vld [vmem:[%s1240_s22 + $0x10] sm:$0xff]  }
  0x13   : > { %328 = vst.msk [vmem:[#allocation2 + $0x60] sm:$0xff] %vm315_vm0, %v1170_v0  ;;  %329 = vst.msk [vmem:[#allocation2 + $0x68] sm:$0xff] %vm315_vm0, %v1170_v0  ;;  %1073 = vmatprep.mubr.bf16.mxu0 %v1138_v5  ;;  %1081 = vmatprep.mubr.bf16.mxu1 %v1142_v7  ;;  %v1136_v9 = vld [vmem:[%s1240_s22 + $0x8] sm:$0xff]   ;;  %v1137_v10 = vld [vmem:[%s1240_s22] sm:$0xff]  }
  0x14   : > { %330 = vst.msk [vmem:[#allocation2 + $0x70] sm:$0xff] %vm315_vm0, %v1170_v0  ;;  %331 = vst.msk [vmem:[#allocation2 + $0x78] sm:$0xff] %vm315_vm0, %v1170_v0  ;;  %v1139_v11 = vld [vmem:[%s1249_s25 + $0x8] sm:$0xff]   ;;  %v1140_v13 = vld [vmem:[%s1249_s25 + $0x10] sm:$0xff]  }
  0x15   : > { %1060 = vmatpush3.bf16.msra.mxu0 %v1131_v2  ;;  %1098 = vmatpush3.bf16.msra.mxu1 %v1131_v2  ;;  %v1143_v12 = vld [vmem:[%s1249_s25 + $0x28] sm:$0xff]   ;;  %v1144_v14 = vld [vmem:[%s1249_s25 + $0x30] sm:$0xff]   ;;  %v1141_v15 = vld [vmem:[%s1249_s25 + $0x18] sm:$0xff]  }
  0x16   : > { %1061 = vmatprep.subr.bf16.mxu0 %v1132_v3  ;;  %1091 = vmatprep.subr.bf16.mxu1 %v1132_v3  ;;  %v1145_v16 = vld [vmem:[%s1249_s25 + $0x38] sm:$0xff]   ;;  %v334_v17 = vld [vmem:[#allocation2 + $0x10] sm:$0xff]  ;;  %v332_v20 = vld [vmem:[#allocation2] sm:$0xff] }
  0x17   : > { %v335_v26 = vld [vmem:[#allocation2 + $0x18] sm:$0xff]  ;;  %v333_v32 = vld [vmem:[#allocation2 + $0x8] sm:$0xff]  ;;  %v338_v38 = vld [vmem:[#allocation2 + $0x30] sm:$0xff] }
  0x18   : > { %v340_v22 = vld [vmem:[#allocation2 + $0x40] sm:$0xff]  ;;  %v341_v34 = vld [vmem:[#allocation2 + $0x48] sm:$0xff]  ;;  %v339_v57 = vld [vmem:[#allocation2 + $0x38] sm:$0xff] }
  0x19   : > { %1062 = vmatpush3.bf16.msra.mxu0 %v1132_v3  ;;  %1099 = vmatpush3.bf16.msra.mxu1 %v1132_v3  ;;  %v342_v18 = vld [vmem:[#allocation2 + $0x50] sm:$0xff]  ;;  %v343_v28 = vld [vmem:[#allocation2 + $0x58] sm:$0xff]  ;;  %v336_v45 = vld [vmem:[#allocation2 + $0x20] sm:$0xff] }
  0x1a   : > { %1063 = vmatprep.subr.bf16.mxu0 %v1133_v4  ;;  %1092 = vmatprep.subr.bf16.mxu1 %v1133_v4  ;;  %v344_v47 = vld [vmem:[#allocation2 + $0x60] sm:$0xff]  ;;  %v337_v0 = vld [vmem:[#allocation2 + $0x28] sm:$0xff] }
  0x1b   : > { %v346_v40 = vld [vmem:[#allocation2 + $0x70] sm:$0xff] }
  0x1d   : > { %1064 = vmatpush3.bf16.msra.mxu0 %v1133_v4  ;;  %1100 = vmatpush3.bf16.msra.mxu1 %v1133_v4 }
  0x1e   : > { %1065 = vmatprep.subr.bf16.mxu0 %v1134_v6  ;;  %1093 = vmatprep.subr.bf16.mxu1 %v1134_v6 }
  0x21   : > { %1066 = vmatpush3.bf16.msra.mxu0 %v1134_v6  ;;  %1101 = vmatpush3.bf16.msra.mxu1 %v1134_v6 }
  0x22   : > { %1067 = vmatprep.subr.bf16.mxu0 %v1135_v8  ;;  %1094 = vmatprep.subr.bf16.mxu1 %v1135_v8 }
  0x25   : > { %1068 = vmatpush3.bf16.msra.mxu0 %v1135_v8  ;;  %1102 = vmatpush3.bf16.msra.mxu1 %v1135_v8 }
  0x26   : > { %1069 = vmatprep.subr.bf16.mxu0 %v1136_v9  ;;  %1095 = vmatprep.subr.bf16.mxu1 %v1136_v9 }
  0x29   : > { %1070 = vmatpush3.bf16.msra.mxu0 %v1136_v9  ;;  %1103 = vmatpush3.bf16.msra.mxu1 %v1136_v9 }
  0x2a   : > { %1071 = vmatprep.subr.bf16.mxu0 %v1137_v10  ;;  %1096 = vmatprep.subr.bf16.mxu1 %v1137_v10 }
  0x2d   : > { %1072 = vmatpush3.bf16.msra.mxu0 %v1137_v10  ;;  %1104 = vmatpush3.bf16.msra.mxu1 %v1137_v10 }
  0x30   : > { %1074 = vmatmul.mubr.bf16.vlgmr.msra.gmra.mxu0 %v1139_v11  ;;  %1082 = vmatmul.mubr.bf16.vlgmr.msra.gmra.mxu1 %v1143_v12 }
  0x31   : > { %1077 = vmatprep.mubr.bf16.mxu0 %v1140_v13  ;;  %1085 = vmatprep.mubr.bf16.mxu1 %v1144_v14 }
  0x38   : > { %1078 = vmatmul.mubr.bf16.gmra.mxu0 %v1141_v15  ;;  %1086 = vmatmul.mubr.bf16.gmra.mxu1 %v1145_v16 }
  0xf0   : > { %v1075_v19 = vpop.f32.mrf.mxu0  ;;  %v1083_v21 = vpop.f32.mrf.mxu1 }
  0xf1   : > { %v575_v23 = vadd.f32 %v1075_v19, %v334_v17  ;;  %v583_v24 = vadd.f32 %v1083_v21, %v342_v18 }
  0xf2   : > { %v510_v25 = vpop.f32.mrf.mxu0  ;;  %v542_v27 = vpop.f32.mrf.mxu1 }
  0xf3   : > { %592 = vst.msk [vmem:[#allocation2 + $0x10] sm:$0xff] %vm315_vm0, %v575_v23  ;;  %v573_v29 = vadd.f32 %v510_v25, %v332_v20  ;;  %600 = vst.msk [vmem:[#allocation2 + $0x50] sm:$0xff] %vm315_vm0, %v583_v24  ;;  %v581_v30 = vadd.f32 %v542_v27, %v340_v22 }
  0xf4   : > { %v1076_v31 = vpop.f32.mrf.mxu0  ;;  %v1084_v33 = vpop.f32.mrf.mxu1 }
  0xf5   : > { %590 = vst.msk [vmem:[#allocation2] sm:$0xff] %vm315_vm0, %v573_v29  ;;  %v576_v35 = vadd.f32 %v1076_v31, %v335_v26  ;;  %598 = vst.msk [vmem:[#allocation2 + $0x40] sm:$0xff] %vm315_vm0, %v581_v30  ;;  %v584_v36 = vadd.f32 %v1084_v33, %v343_v28 }
  0xf6   : > { %v513_v37 = vpop.f32.mrf.mxu0  ;;  %v545_v39 = vpop.f32.mrf.mxu1 }
  0xf7   : > { %593 = vst.msk [vmem:[#allocation2 + $0x18] sm:$0xff] %vm315_vm0, %v576_v35  ;;  %v574_v41 = vadd.f32 %v513_v37, %v333_v32  ;;  %601 = vst.msk [vmem:[#allocation2 + $0x58] sm:$0xff] %vm315_vm0, %v584_v36  ;;  %v582_v42 = vadd.f32 %v545_v39, %v341_v34 }
  0xf8   : > { %v1079_v44 = vpop.f32.mrf.mxu0  ;;  %v1087_v46 = vpop.f32.mrf.mxu1 }
  0xf9   : > { %591 = vst.msk [vmem:[#allocation2 + $0x8] sm:$0xff] %vm315_vm0, %v574_v41  ;;  %v579_v48 = vadd.f32 %v1079_v44, %v338_v38  ;;  %599 = vst.msk [vmem:[#allocation2 + $0x48] sm:$0xff] %vm315_vm0, %v582_v42  ;;  %v587_v49 = vadd.f32 %v1087_v46, %v346_v40 }
  0xfa   : > { %v611_v50 = vld [vmem:[#allocation2 + $0x10] sm:$0xff]  ;;  %v526_v51 = vpop.f32.mrf.mxu0  ;;  %v558_v53 = vpop.f32.mrf.mxu1 }
  0xfb   : > { %v619_v52 = vld [vmem:[#allocation2 + $0x50] sm:$0xff]  ;;  %v634_v54 = vadd.f32 %v1273_v43, %v611_v50  ;;  %596 = vst.msk [vmem:[#allocation2 + $0x30] sm:$0xff] %vm315_vm0, %v579_v48  ;;  %v577_v55 = vadd.f32 %v526_v51, %v336_v45  ;;  %604 = vst.msk [vmem:[#allocation2 + $0x70] sm:$0xff] %vm315_vm0, %v587_v49  ;;  %v585_v58 = vadd.f32 %v558_v53, %v344_v47 }
  0xfc   : > { %v1280_v56 = vadd.f32 %v1273_v43, %v619_v52  ;;  %v609_v59 = vld [vmem:[#allocation2] sm:$0xff]  ;;  %v1080_v60 = vpop.f32.mrf.mxu0  ;;  %v1088_v42 = vpop.f32.mrf.mxu1 }
  0xfd   : > { %v1027_v61 = vpack.c.bf16 %v634_v54, %v634_v54  ;;  %v632_v62 = vadd.f32 %v1273_v43, %v609_v59  ;;  %594 = vst.msk [vmem:[#allocation2 + $0x20] sm:$0xff] %vm315_vm0, %v577_v55  ;;  %v617_v63 = vld [vmem:[#allocation2 + $0x40] sm:$0xff]  ;;  %602 = vst.msk [vmem:[#allocation2 + $0x60] sm:$0xff] %vm315_vm0, %v585_v58  ;;  %v580_v3 = vadd.f32 %v1080_v60, %v339_v57  ;;  %v651_v22 = vsel %vm315_vm0, %v634_v54, 0.0  ;;  %v347_v58 = vld [vmem:[#allocation2 + $0x78] sm:$0xff] }
  0xfe   : > { %v612_v1 = vld [vmem:[#allocation2 + $0x18] sm:$0xff]  ;;  %v1035_v2 = vpack.c.bf16 %v1280_v56, %v1280_v56  ;;  %v529_v4 = vpop.f32.mrf.mxu0  ;;  %v1301_v9 = vadd.f32 %v1273_v43, %v617_v63  ;;  %v687_v13 = vmul.f32 %v634_v54, %v634_v54  ;;  %v345_v63 = vld [vmem:[#allocation2 + $0x68] sm:$0xff] }
  0xff   : > { %809 = vst.msk [vmem:[%s1287_s30 + $0x8] sm:$0xf] %vm806_vm1, %v1027_v61  ;;  %v1025_v5 = vpack.c.bf16 %v632_v62, %v632_v62  ;;  %v620_v6 = vld [vmem:[#allocation2 + $0x58] sm:$0xff]  ;;  %v635_v7 = vadd.f32 %v1273_v43, %v612_v1  ;;  %v578_v10 = vadd.f32 %v529_v4, %v337_v0  ;;  %v685_v11 = vmul.f32 %v632_v62, %v632_v62  ;;  %v561_v0 = vpop.f32.mrf.mxu1 }
 0x100   : > { %v610_v8 = vld [vmem:[#allocation2 + $0x8] sm:$0xff]  ;;  %817 = vst.msk [vmem:[%s1287_s30 + $0x28] sm:$0xf] %vm806_vm1, %v1035_v2  ;;  %v648_v14 = vsel %vm315_vm0, %v632_v62, 0.0  ;;  %v1309_v17 = vadd.f32 %v1273_v43, %v620_v6  ;;  %v1033_v25 = vpack.c.bf16 %v1301_v9, %v1301_v9  ;;  %v704_v34 = vsel %vm315_vm0, %v687_v13, 0.0 }
 0x101   : > { %597 = vst.msk [vmem:[#allocation2 + $0x38] sm:$0xff] %vm315_vm0, %v580_v3  ;;  %v633_v12 = vadd.f32 %v1273_v43, %v610_v8  ;;  %v1028_v15 = vpack.c.bf16 %v635_v7, %v635_v7  ;;  %595 = vst.msk [vmem:[#allocation2 + $0x28] sm:$0xff] %vm315_vm0, %v578_v10  ;;  %v701_v26 = vsel %vm315_vm0, %v685_v11, 0.0  ;;  %v688_v27 = vmul.f32 %v635_v7, %v635_v7  ;;  %v618_v30 = vld [vmem:[#allocation2 + $0x48] sm:$0xff] }
 0x102   : > { %807 = vst.msk [vmem:[%s1287_s30] sm:$0xf] %vm806_vm1, %v1025_v5  ;;  %v615_v16 = vld [vmem:[#allocation2 + $0x30] sm:$0xff]  ;;  %815 = vst.msk [vmem:[%s1287_s30 + $0x20] sm:$0xf] %vm806_vm1, %v1033_v25  ;;  %v653_v35 = vsel %vm315_vm0, %v635_v7, 0.0  ;;  %v1036_v37 = vpack.c.bf16 %v1309_v17, %v1309_v17  ;;  %v641_v41 = vadd.f32 %v1273_v43, %v618_v30  ;;  %v588_v8 = vadd.f32 %v1088_v42, %v347_v58 }
 0x103   : > { %v649_v18 = vsel %vm315_vm0, %v633_v12, 0.0  ;;  %v686_v19 = vmul.f32 %v633_v12, %v633_v12  ;;  %v1026_v20 = vpack.c.bf16 %v633_v12, %v633_v12  ;;  %v638_v21 = vadd.f32 %v1273_v43, %v615_v16  ;;  %810 = vst.msk [vmem:[%s1287_s30 + $0xc] sm:$0xf] %vm806_vm1, %v1028_v15  ;;  %v623_v55 = vld [vmem:[#allocation2 + $0x70] sm:$0xff] }
 0x104   : > { %v650_v23 = vadd.f32 %v649_v18, %v648_v14  ;;  %v613_v24 = vld [vmem:[#allocation2 + $0x20] sm:$0xff]  ;;  %v706_v44 = vsel %vm315_vm0, %v688_v27, 0.0  ;;  %818 = vst.msk [vmem:[%s1287_s30 + $0x2c] sm:$0xf] %vm806_vm1, %v1036_v37  ;;  %v1034_v4 = vpack.c.bf16 %v641_v41, %v641_v41  ;;  %v646_v6 = vadd.f32 %v1273_v43, %v623_v55 }
 0x105   : > { %v702_v28 = vsel %vm315_vm0, %v686_v19, 0.0  ;;  %808 = vst.msk [vmem:[%s1287_s30 + $0x4] sm:$0xf] %vm806_vm1, %v1026_v20  ;;  %v1031_v29 = vpack.c.bf16 %v638_v21, %v638_v21  ;;  %v636_v33 = vadd.f32 %v1273_v43, %v613_v24  ;;  %v691_v52 = vmul.f32 %v638_v21, %v638_v21  ;;  %v621_v57 = vld [vmem:[#allocation2 + $0x60] sm:$0xff] }
 0x106   : > { %v652_v31 = vadd.f32 %v651_v22, %v650_v23  ;;  %v703_v32 = vadd.f32 %v702_v28, %v701_v26  ;;  %v659_v1 = vsel %vm315_vm0, %v638_v21, 0.0  ;;  %v644_v7 = vadd.f32 %v1273_v43, %v621_v57  ;;  %816 = vst.msk [vmem:[%s1287_s30 + $0x24] sm:$0xf] %vm806_vm1, %v1034_v4 }
 0x107   : > { %813 = vst.msk [vmem:[%s1287_s30 + $0x18] sm:$0xf] %vm806_vm1, %v1031_v29  ;;  %v689_v40 = vmul.f32 %v636_v33, %v636_v33  ;;  %v655_v45 = vsel %vm315_vm0, %v636_v33, 0.0  ;;  %v1029_v46 = vpack.c.bf16 %v636_v33, %v636_v33  ;;  %v586_v12 = vadd.f32 %v561_v0, %v345_v63 }
 0x108   : > { %v616_v36 = vld [vmem:[#allocation2 + $0x38] sm:$0xff]  ;;  %v705_v38 = vadd.f32 %v704_v34, %v703_v32  ;;  %v654_v39 = vadd.f32 %v653_v35, %v652_v31  ;;  %v614_v48 = vld [vmem:[#allocation2 + $0x28] sm:$0xff]  ;;  %v712_v13 = vsel %vm315_vm0, %v691_v52, 0.0  ;;  %v693_v15 = vmul.f32 %v1301_v9, %v1301_v9  ;;  %605 = vst.msk [vmem:[#allocation2 + $0x78] sm:$0xff] %vm315_vm0, %v588_v8 }
 0x109   : > { %v639_v47 = vadd.f32 %v1273_v43, %v616_v36  ;;  %v637_v51 = vadd.f32 %v1273_v43, %v614_v48  ;;  %v708_v53 = vsel %vm315_vm0, %v689_v40, 0.0  ;;  %811 = vst.msk [vmem:[%s1287_s30 + $0x10] sm:$0xf] %vm806_vm1, %v1029_v46  ;;  %v1039_v16 = vpack.c.bf16 %v646_v6, %v646_v6 }
 0x10a   : > { %v656_v49 = vadd.f32 %v655_v45, %v654_v39  ;;  %v707_v50 = vadd.f32 %v706_v44, %v705_v38  ;;  %v1037_v20 = vpack.c.bf16 %v644_v7, %v644_v7  ;;  %603 = vst.msk [vmem:[#allocation2 + $0x68] sm:$0xff] %vm315_vm0, %v586_v12  ;;  %v663_v22 = vsel %vm315_vm0, %v1301_v9, 0.0 }
 0x10b   : > { %v1032_v54 = vpack.c.bf16 %v639_v47, %v639_v47  ;;  %v657_v60 = vsel %vm315_vm0, %v637_v51, 0.0  ;;  %v690_v61 = vmul.f32 %v637_v51, %v637_v51  ;;  %v1030_v62 = vpack.c.bf16 %v637_v51, %v637_v51  ;;  %821 = vst.msk [vmem:[%s1287_s30 + $0x38] sm:$0xf] %vm806_vm1, %v1039_v16 }
 0x10c   : > { %v709_v59 = vadd.f32 %v708_v53, %v707_v50  ;;  %v692_v2 = vmul.f32 %v639_v47, %v639_v47  ;;  %v658_v3 = vadd.f32 %v657_v60, %v656_v49  ;;  %v661_v14 = vsel %vm315_vm0, %v639_v47, 0.0  ;;  %819 = vst.msk [vmem:[%s1287_s30 + $0x30] sm:$0xf] %vm806_vm1, %v1037_v20 }
 0x10d   : > { %814 = vst.msk [vmem:[%s1287_s30 + $0x1c] sm:$0xf] %vm806_vm1, %v1032_v54  ;;  %v710_v5 = vsel %vm315_vm0, %v690_v61, 0.0  ;;  %812 = vst.msk [vmem:[%s1287_s30 + $0x14] sm:$0xf] %vm806_vm1, %v1030_v62  ;;  %v694_v23 = vmul.f32 %v641_v41, %v641_v41  ;;  %v695_v26 = vmul.f32 %v1280_v56, %v1280_v56  ;;  %v716_v27 = vsel %vm315_vm0, %v693_v15, 0.0 }
 0x10e   : > { %v660_v10 = vadd.f32 %v659_v1, %v658_v3  ;;  %v711_v11 = vadd.f32 %v710_v5, %v709_v59  ;;  %v714_v21 = vsel %vm315_vm0, %v692_v2, 0.0  ;;  %v665_v28 = vsel %vm315_vm0, %v641_v41, 0.0 }
 0x10f   : > { %v667_v31 = vsel %vm315_vm0, %v1280_v56, 0.0  ;;  %v696_v9 = vmul.f32 %v1309_v17, %v1309_v17  ;;  %v718_v32 = vsel %vm315_vm0, %v694_v23, 0.0  ;;  %v624_v35 = vld [vmem:[#allocation2 + $0x78] sm:$0xff]  ;;  %v720_v36 = vsel %vm315_vm0, %v695_v26, 0.0 }
 0x110   : > { %v713_v18 = vadd.f32 %v712_v13, %v711_v11  ;;  %v662_v19 = vadd.f32 %v661_v14, %v660_v10  ;;  %v669_v37 = vsel %vm315_vm0, %v1309_v17, 0.0  ;;  %v697_v38 = vmul.f32 %v644_v7, %v644_v7 }
 0x111   : > { %v647_v39 = vadd.f32 %v1273_v43, %v624_v35  ;;  %v622_v40 = vld [vmem:[#allocation2 + $0x68] sm:$0xff]  ;;  %v722_v44 = vsel %vm315_vm0, %v696_v9, 0.0  ;;  %v671_v45 = vsel %vm315_vm0, %v644_v7, 0.0  ;;  %v699_v50 = vmul.f32 %v646_v6, %v646_v6 }
 0x112   : > { %v664_v24 = vadd.f32 %v663_v22, %v662_v19  ;;  %v715_v25 = vadd.f32 %v714_v21, %v713_v18  ;;  %v645_v42 = vadd.f32 %v1273_v43, %v622_v40  ;;  %v724_v17 = vsel %vm315_vm0, %v697_v38, 0.0 }
 0x113   : > { %v1040_v46 = vpack.c.bf16 %v647_v39, %v647_v39  ;;  %v675_v43 = vsel %vm315_vm0, %v646_v6, 0.0  ;;  %v700_v55 = vmul.f32 %v647_v39, %v647_v39  ;;  %v728_v60 = vsel %vm315_vm0, %v699_v50, 0.0 }
 0x114   : > { %v666_v29 = vadd.f32 %v665_v28, %v664_v24  ;;  %v717_v30 = vadd.f32 %v716_v27, %v715_v25  ;;  %v698_v49 = vmul.f32 %v645_v42, %v645_v42  ;;  %v673_v51 = vsel %vm315_vm0, %v645_v42, 0.0 }
 0x115   : > { %822 = vst.msk [vmem:[%s1287_s30 + $0x3c] sm:$0xf] %vm806_vm1, %v1040_v46  ;;  %v1038_v52 = vpack.c.bf16 %v645_v42, %v645_v42  ;;  %v677_v61 = vsel %vm315_vm0, %v647_v39, 0.0  ;;  %v730_v0 = vsel %vm315_vm0, %v700_v55, 0.0 }
 0x116   : > { %v668_v33 = vadd.f32 %v667_v31, %v666_v29  ;;  %v719_v34 = vadd.f32 %v718_v32, %v717_v30  ;;  %v726_v57 = vsel %vm315_vm0, %v698_v49, 0.0 }
 0x117   : > { %820 = vst.msk [vmem:[%s1287_s30 + $0x34] sm:$0xf] %vm806_vm1, %v1038_v52 }
 0x118   : > { %v721_v41 = vadd.f32 %v720_v36, %v719_v34  ;;  %v670_v56 = vadd.f32 %v669_v37, %v668_v33 }
 0x11a   : > { %v672_v47 = vadd.f32 %v671_v45, %v670_v56  ;;  %v723_v48 = vadd.f32 %v722_v44, %v721_v41 }
 0x11c   : > { %v725_v53 = vadd.f32 %v724_v17, %v723_v48  ;;  %v674_v54 = vadd.f32 %v673_v51, %v672_v47 }
 0x11e   : > { %v676_v58 = vadd.f32 %v675_v43, %v674_v54  ;;  %v727_v59 = vadd.f32 %v726_v57, %v725_v53 }
 0x120   : > { %v678_v62 = vadd.f32 %v677_v61, %v676_v58  ;;  %v729_v63 = vadd.f32 %v728_v60, %v727_v59 }
 0x122   : > { %v679_v1 = vrot.slane %v678_v62, 4  ;;  %v731_v2 = vadd.f32 %v730_v0, %v729_v63 }
 0x124   : > { %v680_v3 = vadd.f32 %v679_v1, %v678_v62  ;;  %v732_v4 = vrot.slane %v731_v2, 4 }
 0x126   : > { %v681_v5 = vrot.slane %v680_v3, 2  ;;  %v733_v6 = vadd.f32 %v732_v4, %v731_v2 }
 0x128   : > { %v682_v7 = vadd.f32 %v681_v5, %v680_v3  ;;  %v734_v8 = vrot.slane %v733_v6, 2 }
 0x12a   : > { %v683_v10 = vrot.slane %v682_v7, 1  ;;  %v735_v11 = vadd.f32 %v734_v8, %v733_v6 }
 0x12c   : > { %v736_v12 = vrot.slane %v735_v11, 1  ;;  %v684_v13 = vadd.f32 %v683_v10, %v682_v7 }
 0x12e   : > { %v737_v14 = vadd.f32 %v736_v12, %v735_v11 }
 0x130   : > { %v739_v15 = vsel %vm738_vm2, %v684_v13, %v737_v14 }
 0x131   : > { %741 = vst.msk [vmem:[%s309_s8] sm:$0x3] %vm740_vm3, %v739_v15 }
 0x132 PF: > { %s15_s17 = sadd.s32 1, %s1168_s17   ;;  %s1410_s15 = smov %s1164_s16 }
 0x133   : > { %p12_p5 = scmp.ge.s32.totalorder %s15_s17, 6   ;;  %s1411_s16 = smov %s1413_s18 }
 0x135   :  { %14 = sbr.rel (!%p12_p5) target bundleno = 2 (0x2), region = 85 }

// kernel: unet_forward.19
= control target key start
LH: loop header
LB: loop body
LE: loop exit
PB: predicated region body
PF: predicated region fallthrough
CT: control target
= control target key end

     0   :  { %10 = vsyncpa [#allocation4], 0  ;;  %s3429_s0 = inlined_call_operand.vmem [shape: bf16[4,512,64], index: 0, kind: input, shape index: {}]   ;;  %s3430_s1 = inlined_call_operand.vmem [shape: bf16[4,64,4], index: 1, kind: input, shape index: {}]   ;;  %s3431_s2 = inlined_call_operand.vmem [shape: f32[1,4], index: 2, kind: input, shape index: {}]   ;;  %s3432_s3 = inlined_call_operand.vmem [shape: f32[4,512,4], index: 3, kind: output, shape index: {0}]   ;;  %s3433_s4 = inlined_call_operand.hbm [shape: f32[4,1,2,4], index: 4, kind: output, shape index: {1}]  }
   0x1   :  { %12 = vsyncpa [#allocation4 + $0x1], 0  ;;  %s2502_s15 = smov 0   ;;  %s2504_s16 = smov 0  }
   0x2   :  { %s2506_s17 = smov 0   ;;  %s2508_s18 = smov 0  }
   0x3   :  { %s2510_s19 = smov 0   ;;  %s2512_s20 = smov 0  }
   0x4 LB: > { %s1972_s21 = sadd.s32 4294967295, %s2473_s20   ;;  %s1973_s22 = sadd.s32 4294967294, %s2473_s20   ;;  %s2473_s20 = sphi %s2512_s20, %s18_s20   ;;  %s2469_s19 = sphi %s2510_s19, %s3440_s19   ;;  %s2465_s18 = sphi %s2508_s18, %s3439_s18   ;;  %s2461_s17 = sphi %s2506_s17, %s3438_s17   ;;  %s2457_s16 = sphi %s2504_s16, %s3437_s16   ;;  %s2453_s15 = sphi %s2502_s15, %s3436_s15  }
   0x5   : > { %s37_s23 = sadd.s32 1, %s2469_s19  ;;  %s153_s24 = sadd.s32 1, %s2461_s17 }
   0x6   : > { %p39_p0 = scmp.ge.s32.totalorder %s37_s23, 4  ;;  %p163_p1 = scmp.ne.s32.totalorder %s2461_s17, %s2457_s16 }
   0x7   : > { %p164_p2 = scmp.eq.s32.totalorder %s1972_s21, 3  ;;  %p169_p3 = scmp.ne.s32.totalorder %s2457_s16, %s2453_s15 }
   0x8   : > { %s3442_s23 = smov (%p39_p0, %s37_s23), 0  ;;  %p170_p5 = scmp.eq.s32.totalorder %s1973_s22, 3 }
   0x9   : > { %p2542_p4 = por %p164_p2, %p163_p1  ;;  %s148_s26 = ssub.s32 %s2469_s19, %s3442_s23 }
   0xa   : > { %p1976_p6 = scmp.ge.s32.totalorder %s2473_s20, 1  ;;  %p151_p7 = scmp.eq.s32.totalorder %s148_s26, 0 }
   0xb   : > { %p2549_p8 = por %p170_p5, %p169_p3  ;;  %p220_p9 = scmp.lt.s32.totalorder %s2473_s20, 5 }
   0xc   : > { %s2555_s28 = scalar_select %p151_p7, %s2461_s17, %s153_s24  }
   0xd   : > { %p221_p10 = pnand %p1976_p6, %p220_p9 }
   0xe   : > { %p272_p11 = scmp.lt.s32.totalorder (!%p221_p10), %s2465_s18, 3  ;;  %s2054_s6 = sshll.u32 (!%p221_p10), %s2465_s18, 5 }
   0xf   : > { %224 = sbr.rel (%p221_p10) target bundleno = 413 (0x19d), region = 32 }
  0x14   : > { %vm309_vm0 = vcmask 31744   ;;  %v2475_v0 = vmov 0.0   ;;  %s2689_s29 = scalar_select %p272_p11, %s2465_s18, 3  ;;  %vm694_vm1 = vcmask 523264   ;;  %v2771_v56 = vld [vmem:[%s3431_s2] ss:$0 sm:$0xff] }
  0x15   : > { %312 = vst.msk [vmem:[#allocation2 + $0x10] sm:$0xff] %vm309_vm0, %v2475_v0  ;;  %310 = vst.msk [vmem:[#allocation2] sm:$0xff] %vm309_vm0, %v2475_v0  ;;  %vm1677_vm2 = vcmask 1040384   ;;  %vm1679_vm3 = vcmask 25600   ;;  %s2476_s18 = smov [#allocation3]  }
  0x16   : > { %311 = vst.msk [vmem:[#allocation2 + $0x8] sm:$0xff] %vm309_vm0, %v2475_v0  ;;  %313 = vst.msk [vmem:[#allocation2 + $0x18] sm:$0xff] %vm309_vm0, %v2475_v0  ;;  %s2057_s30 = sshll.u32 %s2689_s29, 8  ;;  %s2058_s5 = sshll.u32 %s2689_s29, 5 }
  0x17   : > { %314 = vst.msk [vmem:[#allocation2 + $0x20] sm:$0xff] %vm309_vm0, %v2475_v0  ;;  %315 = vst.msk [vmem:[#allocation2 + $0x28] sm:$0xff] %vm309_vm0, %v2475_v0  ;;  %s292_s8 = scalar_lea.vmem %s3430_s1, %s2058_s5  ;;  %s2699_s11 = scalar_lea.vmem %s3429_s0, %s2057_s30 }
  0x18   : > { %316 = vst.msk [vmem:[#allocation2 + $0x30] sm:$0xff] %vm309_vm0, %v2475_v0  ;;  %317 = vst.msk [vmem:[#allocation2 + $0x38] sm:$0xff] %vm309_vm0, %v2475_v0  ;;  %v2232_v1 = vld [vmem:[%s292_s8 + $0x18] sm:$0xff]   ;;  %v2233_v2 = vld [vmem:[%s292_s8 + $0x10] sm:$0xff]   ;;  %s2059_s14 = sshll.u32 %s2689_s29, 9  ;;  %s268_s30 = sand.u32 1, %s2457_s16  }
  0x19   : > { %318 = vst.msk [vmem:[#allocation2 + $0x40] sm:$0xff] %vm309_vm0, %v2475_v0  ;;  %319 = vst.msk [vmem:[#allocation2 + $0x48] sm:$0xff] %vm309_vm0, %v2475_v0  ;;  %2096 = vmatprep.subr.bf16.mxu0 %v2232_v1  ;;  %2168 = vmatprep.subr.bf16.mxu1 %v2232_v1  ;;  %v2234_v3 = vld [vmem:[%s292_s8 + $0x8] sm:$0xff]   ;;  %v2236_v4 = vld [vmem:[%s2699_s11] sm:$0xff]   ;;  %s2819_s24 = scalar_lea.vmem %s3432_s3, %s2059_s14  ;;  %s1977_s5 = sshll.u32 %s268_s30, 1 }
  0x1a   : > { %320 = vst.msk [vmem:[#allocation2 + $0x50] sm:$0xff] %vm309_vm0, %v2475_v0  ;;  %321 = vst.msk [vmem:[#allocation2 + $0x58] sm:$0xff] %vm309_vm0, %v2475_v0  ;;  %2097 = vmatpush3.bf16.msra.mxu0 %v2232_v1  ;;  %2172 = vmatpush3.bf16.msra.mxu1 %v2232_v1  ;;  %v2235_v5 = vld [vmem:[%s292_s8] sm:$0xff]   ;;  %v2237_v6 = vld [vmem:[%s2699_s11 + $0x8] sm:$0xff]   ;;  %s270_s7 = scalar_lea.vmem [#allocation3], %s1977_s5  ;;  %s1819_s12 = scalar_lea.sflag [#allocation4], %s268_s30 }
  0x1b   : > { %322 = vst.msk [vmem:[#allocation2 + $0x60] sm:$0xff] %vm309_vm0, %v2475_v0  ;;  %323 = vst.msk [vmem:[#allocation2 + $0x68] sm:$0xff] %vm309_vm0, %v2475_v0  ;;  %2098 = vmatprep.subr.bf16.mxu0 %v2233_v2  ;;  %2169 = vmatprep.subr.bf16.mxu1 %v2233_v2  ;;  %v2238_v7 = vld [vmem:[%s2699_s11 + $0x10] sm:$0xff]   ;;  %v2239_v8 = vld [vmem:[%s2699_s11 + $0x18] sm:$0xff]   ;;  %s1837_s8 = sshll.u32 %s270_s7, 4  ;;  %s2401_s14 = sshll.u32 %s2476_s18, 4  ;;  %s1838_s8 = int_to_ptr.vmem [resolvable:$true] %s1837_s8  ;;  %s2402_s14 = int_to_ptr.vmem [resolvable:$false] %s2401_s14 }
  0x1c   : > { %324 = vst.msk [vmem:[#allocation2 + $0x70] sm:$0xff] %vm309_vm0, %v2475_v0  ;;  %325 = vst.msk [vmem:[#allocation2 + $0x78] sm:$0xff] %vm309_vm0, %v2475_v0  ;;  %2104 = vmatprep.mubr.msk.bf16.mxu0 %vm694_vm1, %v2236_v4  ;;  %v2252_v9 = vld [vmem:[%s2699_s11 + $0x80] sm:$0xff]   ;;  %v2253_v10 = vld [vmem:[%s2699_s11 + $0x88] sm:$0xff]   ;;  %s2397_s13 = scalar_lea.vmem %s1838_s8, 32  ;;  %s2403_s21 = scalar_lea.vmem %s2402_s14, 64 }
  0x1d   : > { %326 = vst.msk [vmem:[#allocation2 + $0x80] sm:$0xff] %vm309_vm0, %v2475_v0  ;;  %327 = vst.msk [vmem:[#allocation2 + $0x88] sm:$0xff] %vm309_vm0, %v2475_v0  ;;  %2136 = vmatprep.mubr.msk.bf16.mxu1 %vm694_vm1, %v2252_v9  ;;  %v2254_v11 = vld [vmem:[%s2699_s11 + $0x90] sm:$0xff]   ;;  %v2240_v12 = vld [vmem:[%s2699_s11 + $0x20] sm:$0xff]   ;;  %p2398_p12 = scmp.ne.s32.totalorder %s1838_s8, %s2397_s13  ;;  %p2404_p1 = scmp.lt.s32.totalorder %s1838_s8, %s2402_s14 }
  0x1e   : > { %328 = vst.msk [vmem:[#allocation2 + $0x90] sm:$0xff] %vm309_vm0, %v2475_v0  ;;  %329 = vst.msk [vmem:[#allocation2 + $0x98] sm:$0xff] %vm309_vm0, %v2475_v0  ;;  %2099 = vmatpush3.bf16.msra.mxu0 %v2233_v2  ;;  %2173 = vmatpush3.bf16.msra.mxu1 %v2233_v2  ;;  %v2255_v13 = vld [vmem:[%s2699_s11 + $0x98] sm:$0xff]   ;;  %v2256_v14 = vld [vmem:[%s2699_s11 + $0xa0] sm:$0xff]   ;;  %p2405_p2 = scmp.lt.s32.totalorder %s2403_s21, %s2397_s13 }
  0x1f   : > { %330 = vst.msk [vmem:[#allocation2 + $0xa0] sm:$0xff] %vm309_vm0, %v2475_v0  ;;  %331 = vst.msk [vmem:[#allocation2 + $0xa8] sm:$0xff] %vm309_vm0, %v2475_v0  ;;  %2100 = vmatprep.subr.bf16.mxu0 %v2234_v3  ;;  %2170 = vmatprep.subr.bf16.mxu1 %v2234_v3  ;;  %v2241_v15 = vld [vmem:[%s2699_s11 + $0x28] sm:$0xff]   ;;  %v2242_v16 = vld [vmem:[%s2699_s11 + $0x30] sm:$0xff]   ;;  %p2399_p13 = pnand %p2398_p12, %p2542_p4 }
  0x20   : > { %332 = vst.msk [vmem:[#allocation2 + $0xb0] sm:$0xff] %vm309_vm0, %v2475_v0  ;;  %333 = vst.msk [vmem:[#allocation2 + $0xb8] sm:$0xff] %vm309_vm0, %v2475_v0  ;;  %v2257_v17 = vld [vmem:[%s2699_s11 + $0xa8] sm:$0xff]   ;;  %v2258_v18 = vld [vmem:[%s2699_s11 + $0xb0] sm:$0xff]   ;;  %p2406_p3 = por %p2405_p2, %p2404_p1 }
  0x21   : > { %334 = vst.msk [vmem:[#allocation2 + $0xc0] sm:$0xff] %vm309_vm0, %v2475_v0  ;;  %335 = vst.msk [vmem:[#allocation2 + $0xc8] sm:$0xff] %vm309_vm0, %v2475_v0  ;;  %v2243_v19 = vld [vmem:[%s2699_s11 + $0x38] sm:$0xff]   ;;  %v2244_v20 = vld [vmem:[%s2699_s11 + $0x40] sm:$0xff]   ;;  %p2400_p0 = pneg %p2399_p13 }
  0x22   : > { %336 = vst.msk [vmem:[#allocation2 + $0xd0] sm:$0xff] %vm309_vm0, %v2475_v0  ;;  %337 = vst.msk [vmem:[#allocation2 + $0xd8] sm:$0xff] %vm309_vm0, %v2475_v0  ;;  %2101 = vmatpush3.bf16.msra.mxu0 %v2234_v3  ;;  %2174 = vmatpush3.bf16.msra.mxu1 %v2234_v3  ;;  %v2259_v21 = vld [vmem:[%s2699_s11 + $0xb8] sm:$0xff]   ;;  %v2260_v22 = vld [vmem:[%s2699_s11 + $0xc0] sm:$0xff]  }
  0x23   : > { %338 = vst.msk [vmem:[#allocation2 + $0xe0] sm:$0xff] %vm309_vm0, %v2475_v0  ;;  %339 = vst.msk [vmem:[#allocation2 + $0xe8] sm:$0xff] %vm309_vm0, %v2475_v0  ;;  %2102 = vmatprep.subr.bf16.mxu0 %v2235_v5  ;;  %2171 = vmatprep.subr.bf16.mxu1 %v2235_v5  ;;  %v2245_v23 = vld [vmem:[%s2699_s11 + $0x48] sm:$0xff]   ;;  %v2246_v24 = vld [vmem:[%s2699_s11 + $0x50] sm:$0xff]   ;;  %p2407_p5 = pnand %p2406_p3, %p2400_p0 }
  0x24   : > { %340 = vst.msk [vmem:[#allocation2 + $0xf0] sm:$0xff] %vm309_vm0, %v2475_v0  ;;  %341 = vst.msk [vmem:[#allocation2 + $0xf8] sm:$0xff] %vm309_vm0, %v2475_v0  ;;  %v2261_v25 = vld [vmem:[%s2699_s11 + $0xc8] sm:$0xff]   ;;  %v2262_v26 = vld [vmem:[%s2699_s11 + $0xd0] sm:$0xff]  }
  0x25   : > { %342 = vst.msk [vmem:[#allocation2 + $0x100] sm:$0xff] %vm309_vm0, %v2475_v0  ;;  %343 = vst.msk [vmem:[#allocation2 + $0x108] sm:$0xff] %vm309_vm0, %v2475_v0  ;;  %v2247_v27 = vld [vmem:[%s2699_s11 + $0x58] sm:$0xff]   ;;  %v2248_v28 = vld [vmem:[%s2699_s11 + $0x60] sm:$0xff]  }
  0x26   : > { %344 = vst.msk [vmem:[#allocation2 + $0x110] sm:$0xff] %vm309_vm0, %v2475_v0  ;;  %345 = vst.msk [vmem:[#allocation2 + $0x118] sm:$0xff] %vm309_vm0, %v2475_v0  ;;  %2103 = vmatpush3.bf16.msra.mxu0 %v2235_v5  ;;  %2175 = vmatpush3.bf16.msra.mxu1 %v2235_v5  ;;  %v2263_v29 = vld [vmem:[%s2699_s11 + $0xd8] sm:$0xff]   ;;  %v2264_v30 = vld [vmem:[%s2699_s11 + $0xe0] sm:$0xff]  }
  0x27   : > { %346 = vst.msk [vmem:[#allocation2 + $0x120] sm:$0xff] %vm309_vm0, %v2475_v0  ;;  %347 = vst.msk [vmem:[#allocation2 + $0x128] sm:$0xff] %vm309_vm0, %v2475_v0  ;;  %v2249_v31 = vld [vmem:[%s2699_s11 + $0x68] sm:$0xff]   ;;  %v2250_v32 = vld [vmem:[%s2699_s11 + $0x70] sm:$0xff]  }
  0x28   : > { %348 = vst.msk [vmem:[#allocation2 + $0x130] sm:$0xff] %vm309_vm0, %v2475_v0  ;;  %349 = vst.msk [vmem:[#allocation2 + $0x138] sm:$0xff] %vm309_vm0, %v2475_v0  ;;  %v2265_v33 = vld [vmem:[%s2699_s11 + $0xe8] sm:$0xff]   ;;  %v2266_v34 = vld [vmem:[%s2699_s11 + $0xf0] sm:$0xff]  }
  0x29   : > { %350 = vst.msk [vmem:[#allocation2 + $0x140] sm:$0xff] %vm309_vm0, %v2475_v0  ;;  %351 = vst.msk [vmem:[#allocation2 + $0x148] sm:$0xff] %vm309_vm0, %v2475_v0  ;;  %2105 = vmatmul.mubr.msk.bf16.vlgmr.msra.gmra.mxu0 %vm694_vm1, %v2237_v6  ;;  %2137 = vmatmul.mubr.msk.bf16.vlgmr.msra.gmra.mxu1 %vm694_vm1, %v2253_v10  ;;  %v2251_v35 = vld [vmem:[%s2699_s11 + $0x78] sm:$0xff]   ;;  %v376_v37 = vld [vmem:[#allocation2 + $0x10] sm:$0xff] }
  0x2a   : > { %352 = vst.msk [vmem:[#allocation2 + $0x150] sm:$0xff] %vm309_vm0, %v2475_v0  ;;  %353 = vst.msk [vmem:[#allocation2 + $0x158] sm:$0xff] %vm309_vm0, %v2475_v0  ;;  %2108 = vmatprep.mubr.msk.bf16.mxu0 %vm694_vm1, %v2238_v7  ;;  %2140 = vmatprep.mubr.msk.bf16.mxu1 %vm694_vm1, %v2254_v11  ;;  %v2267_v36 = vld [vmem:[%s2699_s11 + $0xf8] sm:$0xff]   ;;  %v374_v39 = vld [vmem:[#allocation2] sm:$0xff]  ;;  %s3389_s11 = scalar_lea.hbm %s3433_s4, %s2054_s6 }
  0x2b   : > { %354 = vst.msk [vmem:[#allocation2 + $0x160] sm:$0xff] %vm309_vm0, %v2475_v0  ;;  %355 = vst.msk [vmem:[#allocation2 + $0x168] sm:$0xff] %vm309_vm0, %v2475_v0  ;;  %v377_v42 = vld [vmem:[#allocation2 + $0x18] sm:$0xff]  ;;  %v375_v46 = vld [vmem:[#allocation2 + $0x8] sm:$0xff] }
  0x2c   : > { %356 = vst.msk [vmem:[#allocation2 + $0x170] sm:$0xff] %vm309_vm0, %v2475_v0  ;;  %357 = vst.msk [vmem:[#allocation2 + $0x178] sm:$0xff] %vm309_vm0, %v2475_v0  ;;  %v406_v49 = vld [vmem:[#allocation2 + $0x100] sm:$0xff]  ;;  %v380_v51 = vld [vmem:[#allocation2 + $0x30] sm:$0xff] }
  0x2d   : > { %358 = vst.msk [vmem:[#allocation2 + $0x180] sm:$0xff] %vm309_vm0, %v2475_v0  ;;  %359 = vst.msk [vmem:[#allocation2 + $0x188] sm:$0xff] %vm309_vm0, %v2475_v0  ;;  %v408_v44 = vld [vmem:[#allocation2 + $0x110] sm:$0xff]  ;;  %v409_v55 = vld [vmem:[#allocation2 + $0x118] sm:$0xff] }
  0x2e   : > { %360 = vst.msk [vmem:[#allocation2 + $0x190] sm:$0xff] %vm309_vm0, %v2475_v0  ;;  %361 = vst.msk [vmem:[#allocation2 + $0x198] sm:$0xff] %vm309_vm0, %v2475_v0  ;;  %v378_v58 = vld [vmem:[#allocation2 + $0x20] sm:$0xff]  ;;  %v407_v62 = vld [vmem:[#allocation2 + $0x108] sm:$0xff] }
  0x2f   : > { %362 = vst.msk [vmem:[#allocation2 + $0x1a0] sm:$0xff] %vm309_vm0, %v2475_v0  ;;  %363 = vst.msk [vmem:[#allocation2 + $0x1a8] sm:$0xff] %vm309_vm0, %v2475_v0  ;;  %v381_v4 = vld [vmem:[#allocation2 + $0x38] sm:$0xff]  ;;  %v412_v6 = vld [vmem:[#allocation2 + $0x130] sm:$0xff] }
  0x30   : > { %364 = vst.msk [vmem:[#allocation2 + $0x1b0] sm:$0xff] %vm309_vm0, %v2475_v0  ;;  %365 = vst.msk [vmem:[#allocation2 + $0x1b8] sm:$0xff] %vm309_vm0, %v2475_v0  ;;  %v379_v11 = vld [vmem:[#allocation2 + $0x28] sm:$0xff] }
  0x31   : > { %366 = vst.msk [vmem:[#allocation2 + $0x1c0] sm:$0xff] %vm309_vm0, %v2475_v0  ;;  %367 = vst.msk [vmem:[#allocation2 + $0x1c8] sm:$0xff] %vm309_vm0, %v2475_v0  ;;  %2109 = vmatmul.mubr.msk.bf16.gmra.mxu0 %vm694_vm1, %v2239_v8  ;;  %2141 = vmatmul.mubr.msk.bf16.gmra.mxu1 %vm694_vm1, %v2255_v13  ;;  %v410_v13 = vld [vmem:[#allocation2 + $0x120] sm:$0xff] }
  0x32   : > { %368 = vst.msk [vmem:[#allocation2 + $0x1d0] sm:$0xff] %vm309_vm0, %v2475_v0  ;;  %369 = vst.msk [vmem:[#allocation2 + $0x1d8] sm:$0xff] %vm309_vm0, %v2475_v0  ;;  %2112 = vmatprep.mubr.msk.bf16.mxu0 %vm694_vm1, %v2240_v12  ;;  %2144 = vmatprep.mubr.msk.bf16.mxu1 %vm694_vm1, %v2256_v14 }
  0x33   : > { %370 = vst.msk [vmem:[#allocation2 + $0x1e0] sm:$0xff] %vm309_vm0, %v2475_v0  ;;  %371 = vst.msk [vmem:[#allocation2 + $0x1e8] sm:$0xff] %vm309_vm0, %v2475_v0 }
  0x34   : > { %372 = vst.msk [vmem:[#allocation2 + $0x1f0] sm:$0xff] %vm309_vm0, %v2475_v0  ;;  %373 = vst.msk [vmem:[#allocation2 + $0x1f8] sm:$0xff] %vm309_vm0, %v2475_v0 }
  0x39   : > { %2113 = vmatmul.mubr.msk.bf16.gmra.mxu0 %vm694_vm1, %v2241_v15  ;;  %2145 = vmatmul.mubr.msk.bf16.gmra.mxu1 %vm694_vm1, %v2257_v17  ;;  %v384_v17 = vld [vmem:[#allocation2 + $0x50] sm:$0xff] }
  0x3a   : > { %2116 = vmatprep.mubr.msk.bf16.mxu0 %vm694_vm1, %v2242_v16  ;;  %2148 = vmatprep.mubr.msk.bf16.mxu1 %vm694_vm1, %v2258_v18 }
  0x41   : > { %2117 = vmatmul.mubr.msk.bf16.gmra.mxu0 %vm694_vm1, %v2243_v19  ;;  %2149 = vmatmul.mubr.msk.bf16.gmra.mxu1 %vm694_vm1, %v2259_v21 }
  0x42   : > { %2120 = vmatprep.mubr.msk.bf16.mxu0 %vm694_vm1, %v2244_v20  ;;  %2152 = vmatprep.mubr.msk.bf16.mxu1 %vm694_vm1, %v2260_v22 }
  0x49   : > { %2121 = vmatmul.mubr.msk.bf16.gmra.mxu0 %vm694_vm1, %v2245_v23  ;;  %2153 = vmatmul.mubr.msk.bf16.gmra.mxu1 %vm694_vm1, %v2261_v25 }
  0x4a   : > { %2124 = vmatprep.mubr.msk.bf16.mxu0 %vm694_vm1, %v2246_v24  ;;  %2156 = vmatprep.mubr.msk.bf16.mxu1 %vm694_vm1, %v2262_v26 }
  0x51   : > { %2125 = vmatmul.mubr.msk.bf16.gmra.mxu0 %vm694_vm1, %v2247_v27  ;;  %2157 = vmatmul.mubr.msk.bf16.gmra.mxu1 %vm694_vm1, %v2263_v29 }
  0x52   : > { %2128 = vmatprep.mubr.msk.bf16.mxu0 %vm694_vm1, %v2248_v28  ;;  %2160 = vmatprep.mubr.msk.bf16.mxu1 %vm694_vm1, %v2264_v30  ;;  %v382_v30 = vld [vmem:[#allocation2 + $0x40] sm:$0xff] }
  0x59   : > { %2129 = vmatmul.mubr.msk.bf16.gmra.mxu0 %vm694_vm1, %v2249_v31  ;;  %2161 = vmatmul.mubr.msk.bf16.gmra.mxu1 %vm694_vm1, %v2265_v33 }
  0x5a   : > { %2132 = vmatprep.mubr.msk.bf16.mxu0 %vm694_vm1, %v2250_v32  ;;  %2164 = vmatprep.mubr.msk.bf16.mxu1 %vm694_vm1, %v2266_v34 }
  0x61   : > { %2133 = vmatmul.mubr.msk.bf16.gmra.mxu0 %vm694_vm1, %v2251_v35  ;;  %2165 = vmatmul.mubr.msk.bf16.gmra.mxu1 %vm694_vm1, %v2267_v36 }
  0xe9   : > { %v2106_v38 = vpop.f32.mrf.mxu0  ;;  %v2138_v48 = vpop.f32.mrf.mxu1 }
  0xea   : > { %v1082_v40 = vadd.f32 %v2106_v38, %v376_v37  ;;  %v1114_v52 = vadd.f32 %v2138_v48, %v408_v44 }
  0xeb   : > { %v825_v41 = vpop.f32.mrf.mxu0  ;;  %v953_v54 = vpop.f32.mrf.mxu1 }
  0xec   : > { %1147 = vst.msk [vmem:[#allocation2 + $0x10] sm:$0xff] %vm309_vm0, %v1082_v40  ;;  %v1080_v43 = vadd.f32 %v825_v41, %v374_v39  ;;  %1179 = vst.msk [vmem:[#allocation2 + $0x110] sm:$0xff] %vm309_vm0, %v1114_v52  ;;  %v1112_v59 = vadd.f32 %v953_v54, %v406_v49  ;;  %v385_v40 = vld [vmem:[#allocation2 + $0x58] sm:$0xff] }
  0xed   : > { %v2107_v45 = vpop.f32.mrf.mxu0  ;;  %v2139_v61 = vpop.f32.mrf.mxu1 }
  0xee   : > { %1145 = vst.msk [vmem:[#allocation2] sm:$0xff] %vm309_vm0, %v1080_v43  ;;  %v1083_v47 = vadd.f32 %v2107_v45, %v377_v42  ;;  %1177 = vst.msk [vmem:[#allocation2 + $0x100] sm:$0xff] %vm309_vm0, %v1112_v59  ;;  %v1115_v1 = vadd.f32 %v2139_v61, %v409_v55 }
  0xef   : > { %v828_v50 = vpop.f32.mrf.mxu0  ;;  %v956_v5 = vpop.f32.mrf.mxu1 }
  0xf0   : > { %1148 = vst.msk [vmem:[#allocation2 + $0x18] sm:$0xff] %vm309_vm0, %v1083_v47  ;;  %v1081_v53 = vadd.f32 %v828_v50, %v375_v46  ;;  %1180 = vst.msk [vmem:[#allocation2 + $0x118] sm:$0xff] %vm309_vm0, %v1115_v1  ;;  %v1113_v9 = vadd.f32 %v956_v5, %v407_v62  ;;  %v383_v47 = vld [vmem:[#allocation2 + $0x48] sm:$0xff] }
  0xf1   : > { %v2110_v57 = vpop.f32.mrf.mxu0  ;;  %v2142_v12 = vpop.f32.mrf.mxu1 }
  0xf2   : > { %1146 = vst.msk [vmem:[#allocation2 + $0x8] sm:$0xff] %vm309_vm0, %v1081_v53  ;;  %v1086_v60 = vadd.f32 %v2110_v57, %v380_v51  ;;  %1178 = vst.msk [vmem:[#allocation2 + $0x108] sm:$0xff] %vm309_vm0, %v1113_v9  ;;  %v1118_v18 = vadd.f32 %v2142_v12, %v412_v6 }
  0xf3   : > { %v1214_v63 = vld [vmem:[#allocation2 + $0x10] sm:$0xff]  ;;  %v841_v0 = vpop.f32.mrf.mxu0  ;;  %v969_v20 = vpop.f32.mrf.mxu1 }
  0xf4   : > { %v1285_v2 = vadd.f32 %v2771_v56, %v1214_v63  ;;  %1151 = vst.msk [vmem:[#allocation2 + $0x30] sm:$0xff] %vm309_vm0, %v1086_v60  ;;  %v1084_v3 = vadd.f32 %v841_v0, %v378_v58  ;;  %v1246_v19 = vld [vmem:[#allocation2 + $0x110] sm:$0xff]  ;;  %1183 = vst.msk [vmem:[#allocation2 + $0x130] sm:$0xff] %vm309_vm0, %v1118_v18  ;;  %v1116_v25 = vadd.f32 %v969_v20, %v410_v13  ;;  %v386_v18 = vld [vmem:[#allocation2 + $0x60] sm:$0xff] }
  0xf5   : > { %v1212_v7 = vld [vmem:[#allocation2] sm:$0xff]  ;;  %v2111_v8 = vpop.f32.mrf.mxu0  ;;  %v2786_v31 = vpop.f32.mrf.mxu1  ;;  %v2791_v36 = vadd.f32 %v2771_v56, %v1246_v19  ;;  %v388_v58 = vld [vmem:[#allocation2 + $0x70] sm:$0xff] }
  0xf6   : > { %2268 = vtanh.f32 %v1285_v2  ;;  %v1283_v10 = vadd.f32 %v2771_v56, %v1212_v7  ;;  %1149 = vst.msk [vmem:[#allocation2 + $0x20] sm:$0xff] %vm309_vm0, %v1084_v3  ;;  %v1087_v15 = vadd.f32 %v2111_v8, %v381_v4  ;;  %v1482_v26 = vmul.f32 %v1285_v2, %v1285_v2  ;;  %1181 = vst.msk [vmem:[#allocation2 + $0x120] sm:$0xff] %vm309_vm0, %v1116_v25 }
  0xf7   : > { %v1215_v14 = vld [vmem:[#allocation2 + $0x18] sm:$0xff]  ;;  %v844_v16 = vpop.f32.mrf.mxu0  ;;  %v2799_v41 = vpop.f32.mrf.mxu1  ;;  %v1350_v42 = vsel %vm309_vm0, %v1285_v2, 0.0 }
  0xf8   : > { %2270 = vtanh.f32 %v1283_v10  ;;  %v1286_v21 = vadd.f32 %v2771_v56, %v1215_v14  ;;  %1152 = vst.msk [vmem:[#allocation2 + $0x38] sm:$0xff] %vm309_vm0, %v1087_v15  ;;  %v1085_v23 = vadd.f32 %v844_v16, %v379_v11  ;;  %v1480_v27 = vmul.f32 %v1283_v10, %v1283_v10 }
  0xf9   : > { %v1213_v22 = vld [vmem:[#allocation2 + $0x8] sm:$0xff]  ;;  %v2114_v24 = vpop.f32.mrf.mxu0  ;;  %v1347_v32 = vsel %vm309_vm0, %v1283_v10, 0.0  ;;  %v1547_v48 = vsel %vm309_vm0, %v1482_v26, 0.0  ;;  %v2807_v51 = vpop.f32.mrf.mxu1  ;;  %v1244_v26 = vld [vmem:[#allocation2 + $0x100] sm:$0xff] }
  0xfa   : > { %v1284_v28 = vadd.f32 %v2771_v56, %v1213_v22  ;;  %v1090_v29 = vadd.f32 %v2114_v24, %v384_v17  ;;  %v1483_v33 = vmul.f32 %v1286_v21, %v1286_v21  ;;  %2272 = vtanh.f32 %v1286_v21  ;;  %1150 = vst.msk [vmem:[#allocation2 + $0x28] sm:$0xff] %vm309_vm0, %v1085_v23  ;;  %v389_v24 = vld [vmem:[#allocation2 + $0x78] sm:$0xff] }
  0xfb   : > { %v1218_v34 = vld [vmem:[#allocation2 + $0x30] sm:$0xff]  ;;  %v857_v35 = vpop.f32.mrf.mxu0  ;;  %v1544_v49 = vsel %vm309_vm0, %v1480_v27, 0.0  ;;  %v1352_v59 = vsel %vm309_vm0, %v1286_v21, 0.0  ;;  %v2814_v63 = vpop.f32.mrf.mxu1 }
  0xfc   : > { %v1348_v37 = vsel %vm309_vm0, %v1284_v28, 0.0  ;;  %v1481_v38 = vmul.f32 %v1284_v28, %v1284_v28  ;;  %2274 = vtanh.f32 %v1284_v28  ;;  %v2796_v39 = vadd.f32 %v2771_v56, %v1218_v34  ;;  %1155 = vst.msk [vmem:[#allocation2 + $0x50] sm:$0xff] %vm309_vm0, %v1090_v29 }
  0xfd   : > { %v1349_v43 = vadd.f32 %v1348_v37, %v1347_v32  ;;  %v1216_v44 = vld [vmem:[#allocation2 + $0x20] sm:$0xff]  ;;  %v1088_v45 = vadd.f32 %v857_v35, %v382_v30  ;;  %v2115_v46 = vpop.f32.mrf.mxu0  ;;  %v1549_v60 = vsel %vm309_vm0, %v1483_v33, 0.0  ;;  %v2827_v9 = vpop.f32.mrf.mxu1 }
  0xfe   : > { %v1545_v50 = vsel %vm309_vm0, %v1481_v38, 0.0  ;;  %2276 = vtanh.f32 %v2796_v39  ;;  %v1287_v54 = vadd.f32 %v2771_v56, %v1216_v44  ;;  %v1091_v55 = vadd.f32 %v2115_v46, %v385_v40  ;;  %v387_v38 = vld [vmem:[#allocation2 + $0x68] sm:$0xff] }
  0xff   : > { %v1351_v52 = vadd.f32 %v1350_v42, %v1349_v43  ;;  %v1546_v53 = vadd.f32 %v1545_v50, %v1544_v49  ;;  %1153 = vst.msk [vmem:[#allocation2 + $0x40] sm:$0xff] %vm309_vm0, %v1088_v45  ;;  %v860_v57 = vpop.f32.mrf.mxu0  ;;  %v1219_v61 = vld [vmem:[#allocation2 + $0x38] sm:$0xff]  ;;  %2278 = vtanh.f32 %v2791_v36  ;;  %v1486_v1 = vmul.f32 %v2796_v39, %v2796_v39  ;;  %v2837_v19 = vpop.f32.mrf.mxu1 }
 0x100   : > { %v1089_v62 = vadd.f32 %v860_v57, %v383_v47  ;;  %v1484_v3 = vmul.f32 %v1287_v54, %v1287_v54  ;;  %1156 = vst.msk [vmem:[#allocation2 + $0x58] sm:$0xff] %vm309_vm0, %v1091_v55  ;;  %v1354_v5 = vsel %vm309_vm0, %v1287_v54, 0.0  ;;  %2280 = vtanh.f32 %v1287_v54 }
 0x101   : > { %v1548_v0 = vadd.f32 %v1547_v48, %v1546_v53  ;;  %v1353_v2 = vadd.f32 %v1352_v59, %v1351_v52  ;;  %v2118_v4 = vpop.f32.mrf.mxu0  ;;  %v1290_v6 = vadd.f32 %v2771_v56, %v1219_v61  ;;  %v1217_v7 = vld [vmem:[#allocation2 + $0x28] sm:$0xff]  ;;  %v1358_v27 = vsel %vm309_vm0, %v2796_v39, 0.0  ;;  %v2845_v33 = vpop.f32.mrf.mxu1 }
 0x102   : > { %1154 = vst.msk [vmem:[#allocation2 + $0x48] sm:$0xff] %vm309_vm0, %v1089_v62  ;;  %v1094_v8 = vadd.f32 %v2118_v4, %v388_v58  ;;  %v1288_v13 = vadd.f32 %v2771_v56, %v1217_v7  ;;  %v1551_v16 = vsel %vm309_vm0, %v1484_v3, 0.0  ;;  %v1555_v28 = vsel %vm309_vm0, %v1486_v1, 0.0  ;;  %v390_v4 = vld [vmem:[#allocation2 + $0x80] sm:$0xff] }
 0x103   : > { %v2269_v10 = vpop.eup %2268  ;;  %v1355_v11 = vadd.f32 %v1354_v5, %v1353_v2  ;;  %v1550_v12 = vadd.f32 %v1549_v60, %v1548_v0  ;;  %v1222_v14 = vld [vmem:[#allocation2 + $0x50] sm:$0xff]  ;;  %v873_v15 = vpop.f32.mrf.mxu0  ;;  %2282 = vtanh.f32 %v1290_v6  ;;  %v1487_v29 = vmul.f32 %v1290_v6, %v1290_v6 }
 0x104   : > { %1747 = vst.msk [vmem:[%s2819_s24 + $0x10] sm:$0xff] %vm309_vm0, %v2269_v10  ;;  %v2834_v17 = vadd.f32 %v2771_v56, %v1222_v14  ;;  %1159 = vst.msk [vmem:[#allocation2 + $0x70] sm:$0xff] %vm309_vm0, %v1094_v8  ;;  %v1356_v22 = vsel %vm309_vm0, %v1288_v13, 0.0  ;;  %v1485_v23 = vmul.f32 %v1288_v13, %v1288_v13  ;;  %2284 = vtanh.f32 %v1288_v13  ;;  %v2853_v47 = vpop.f32.mrf.mxu1  ;;  %v392_v60 = vld [vmem:[#allocation2 + $0x90] sm:$0xff] }
 0x105   : > { %v2271_v20 = vpop.eup %2270  ;;  %v1552_v21 = vadd.f32 %v1551_v16, %v1550_v12  ;;  %v2119_v25 = vpop.f32.mrf.mxu0  ;;  %v1357_v30 = vadd.f32 %v1356_v22, %v1355_v11  ;;  %v1092_v37 = vadd.f32 %v873_v15, %v386_v18  ;;  %v2851_v46 = vadd.f32 %v2771_v56, %v1244_v26  ;;  %v393_v11 = vld [vmem:[#allocation2 + $0x98] sm:$0xff] }
 0x106   : > { %1745 = vst.msk [vmem:[%s2819_s24] sm:$0xff] %vm309_vm0, %v2271_v20  ;;  %v1220_v32 = vld [vmem:[#allocation2 + $0x40] sm:$0xff]  ;;  %v1553_v34 = vsel %vm309_vm0, %v1485_v23, 0.0  ;;  %2286 = vtanh.f32 %v2834_v17  ;;  %v1095_v45 = vadd.f32 %v2119_v25, %v389_v24  ;;  %v1360_v49 = vsel %vm309_vm0, %v1290_v6, 0.0  ;;  %v2864_v61 = vpop.f32.mrf.mxu1  ;;  %v391_v20 = vld [vmem:[#allocation2 + $0x88] sm:$0xff] }
 0x107   : > { %v1291_v35 = vadd.f32 %v2771_v56, %v1220_v32  ;;  %v876_v40 = vpop.f32.mrf.mxu0  ;;  %v2273_v42 = vpop.eup %2272  ;;  %v1359_v39 = vadd.f32 %v1358_v27, %v1357_v30  ;;  %v1554_v43 = vadd.f32 %v1553_v34, %v1552_v21  ;;  %v1223_v44 = vld [vmem:[#allocation2 + $0x58] sm:$0xff]  ;;  %1157 = vst.msk [vmem:[#allocation2 + $0x60] sm:$0xff] %vm309_vm0, %v1092_v37  ;;  %v1557_v0 = vsel %vm309_vm0, %v1487_v29, 0.0  ;;  %v396_v32 = vld [vmem:[#allocation2 + $0xb0] sm:$0xff] }
 0x108   : > { %1748 = vst.msk [vmem:[%s2819_s24 + $0x18] sm:$0xff] %vm309_vm0, %v2273_v42  ;;  %v1294_v52 = vadd.f32 %v2771_v56, %v1223_v44  ;;  %1160 = vst.msk [vmem:[#allocation2 + $0x78] sm:$0xff] %vm309_vm0, %v1095_v45  ;;  %v1093_v59 = vadd.f32 %v876_v40, %v387_v38  ;;  %v1490_v1 = vmul.f32 %v2834_v17, %v2834_v17  ;;  %v2874_v12 = vpop.f32.mrf.mxu1  ;;  %v1366_v27 = vsel %vm309_vm0, %v2834_v17, 0.0 }
 0x109   : > { %v2275_v48 = vpop.eup %2274  ;;  %v1488_v50 = vmul.f32 %v1291_v35, %v1291_v35  ;;  %2288 = vtanh.f32 %v1291_v35  ;;  %v1221_v53 = vld [vmem:[#allocation2 + $0x48] sm:$0xff]  ;;  %v2122_v54 = vpop.f32.mrf.mxu0  ;;  %v1556_v55 = vadd.f32 %v1555_v28, %v1554_v43  ;;  %v1361_v57 = vadd.f32 %v1360_v49, %v1359_v39 }
 0x10a   : > { %1746 = vst.msk [vmem:[%s2819_s24 + $0x8] sm:$0xff] %vm309_vm0, %v2275_v48  ;;  %v1292_v58 = vadd.f32 %v2771_v56, %v1221_v53  ;;  %v1362_v2 = vsel %vm309_vm0, %v1291_v35, 0.0  ;;  %2290 = vtanh.f32 %v1294_v52  ;;  %1158 = vst.msk [vmem:[#allocation2 + $0x68] sm:$0xff] %vm309_vm0, %v1093_v59  ;;  %v1098_v16 = vadd.f32 %v2122_v54, %v392_v60  ;;  %v2883_v25 = vpop.f32.mrf.mxu1 }
 0x10b   : > { %v2277_v62 = vpop.eup %2276  ;;  %v1226_v3 = vld [vmem:[#allocation2 + $0x70] sm:$0xff]  ;;  %v889_v5 = vpop.f32.mrf.mxu0  ;;  %v1363_v6 = vadd.f32 %v1362_v2, %v1361_v57  ;;  %v1558_v7 = vadd.f32 %v1557_v0, %v1556_v55  ;;  %v1559_v14 = vsel %vm309_vm0, %v1488_v50, 0.0  ;;  %v1491_v28 = vmul.f32 %v1294_v52, %v1294_v52  ;;  %v394_v55 = vld [vmem:[#allocation2 + $0xa0] sm:$0xff]  ;;  %v397_v0 = vld [vmem:[#allocation2 + $0xb8] sm:$0xff] }
 0x10c   : > { %1751 = vst.msk [vmem:[%s2819_s24 + $0x30] sm:$0xff] %vm309_vm0, %v2277_v62  ;;  %v1364_v8 = vsel %vm309_vm0, %v1292_v58, 0.0  ;;  %v1489_v10 = vmul.f32 %v1292_v58, %v1292_v58  ;;  %v2279_v13 = vpop.eup %2278  ;;  %2292 = vtanh.f32 %v1292_v58  ;;  %v2878_v15 = vadd.f32 %v2771_v56, %v1226_v3  ;;  %1163 = vst.msk [vmem:[#allocation2 + $0x90] sm:$0xff] %vm309_vm0, %v1098_v16  ;;  %v2892_v40 = vpop.f32.mrf.mxu1 }
 0x10d   : > { %v2123_v18 = vpop.f32.mrf.mxu0  ;;  %v1560_v21 = vadd.f32 %v1559_v14, %v1558_v7  ;;  %v1365_v22 = vadd.f32 %v1364_v8, %v1363_v6  ;;  %v1096_v24 = vadd.f32 %v889_v5, %v390_v4  ;;  %1779 = vst.msk [vmem:[%s2819_s24 + $0x110] sm:$0xff] %vm309_vm0, %v2279_v13  ;;  %v2281_v26 = vpop.eup %2280  ;;  %v1563_v42 = vsel %vm309_vm0, %v1490_v1, 0.0 }
 0x10e   : > { %v1561_v23 = vsel %vm309_vm0, %v1489_v10, 0.0  ;;  %2294 = vtanh.f32 %v2878_v15  ;;  %v1099_v29 = vadd.f32 %v2123_v18, %v393_v11  ;;  %1749 = vst.msk [vmem:[%s2819_s24 + $0x20] sm:$0xff] %vm309_vm0, %v2281_v26  ;;  %v1224_v37 = vld [vmem:[#allocation2 + $0x60] sm:$0xff]  ;;  %v1368_v39 = vsel %vm309_vm0, %v1294_v52, 0.0  ;;  %v2903_v52 = vpop.f32.mrf.mxu1  ;;  %v395_v11 = vld [vmem:[#allocation2 + $0xa8] sm:$0xff] }
 0x10f   : > { %v892_v30 = vpop.f32.mrf.mxu0  ;;  %v1367_v34 = vadd.f32 %v1366_v27, %v1365_v22  ;;  %v1562_v35 = vadd.f32 %v1561_v23, %v1560_v21  ;;  %1161 = vst.msk [vmem:[#allocation2 + $0x80] sm:$0xff] %vm309_vm0, %v1096_v24  ;;  %v1295_v43 = vadd.f32 %v2771_v56, %v1224_v37  ;;  %v1227_v44 = vld [vmem:[#allocation2 + $0x78] sm:$0xff]  ;;  %2296 = vtanh.f32 %v2851_v46 }
 0x110   : > { %v1097_v38 = vadd.f32 %v892_v30, %v391_v20  ;;  %v2283_v17 = vpop.eup %2282  ;;  %1164 = vst.msk [vmem:[#allocation2 + $0x98] sm:$0xff] %vm309_vm0, %v1099_v29  ;;  %v1298_v53 = vadd.f32 %v2771_v56, %v1227_v44  ;;  %v1565_v57 = vsel %vm309_vm0, %v1491_v28, 0.0  ;;  %v1494_v2 = vmul.f32 %v2878_v15, %v2878_v15  ;;  %v2912_v5 = vpop.f32.mrf.mxu1 }
 0x111   : > { %v2126_v45 = vpop.f32.mrf.mxu0  ;;  %v2285_v48 = vpop.eup %2284  ;;  %1752 = vst.msk [vmem:[%s2819_s24 + $0x38] sm:$0xff] %vm309_vm0, %v2283_v17  ;;  %v1564_v49 = vadd.f32 %v1563_v42, %v1562_v35  ;;  %v1369_v50 = vadd.f32 %v1368_v39, %v1367_v34  ;;  %v1370_v58 = vsel %vm309_vm0, %v1295_v43, 0.0  ;;  %v1492_v59 = vmul.f32 %v1295_v43, %v1295_v43  ;;  %v1225_v60 = vld [vmem:[#allocation2 + $0x68] sm:$0xff]  ;;  %v1247_v39 = vld [vmem:[#allocation2 + $0x118] sm:$0xff] }
 0x112   : > { %1162 = vst.msk [vmem:[#allocation2 + $0x88] sm:$0xff] %vm309_vm0, %v1097_v38  ;;  %v1102_v54 = vadd.f32 %v2126_v45, %v396_v32  ;;  %1750 = vst.msk [vmem:[%s2819_s24 + $0x28] sm:$0xff] %vm309_vm0, %v2285_v48  ;;  %2298 = vtanh.f32 %v1295_v43  ;;  %v1296_v7 = vadd.f32 %v2771_v56, %v1225_v60  ;;  %v1495_v16 = vmul.f32 %v1298_v53, %v1298_v53  ;;  %v2918_v21 = vpop.f32.mrf.mxu1 }
 0x113   : > { %v905_v62 = vpop.f32.mrf.mxu0  ;;  %v2287_v1 = vpop.eup %2286  ;;  %v1371_v3 = vadd.f32 %v1370_v58, %v1369_v50  ;;  %v1566_v4 = vadd.f32 %v1565_v57, %v1564_v49  ;;  %v1567_v6 = vsel %vm309_vm0, %v1492_v59, 0.0  ;;  %2300 = vtanh.f32 %v1298_v53  ;;  %v1230_v18 = vld [vmem:[#allocation2 + $0x90] sm:$0xff] }
 0x114   : > { %1167 = vst.msk [vmem:[#allocation2 + $0xb0] sm:$0xff] %vm309_vm0, %v1102_v54  ;;  %1755 = vst.msk [vmem:[%s2819_s24 + $0x50] sm:$0xff] %vm309_vm0, %v2287_v1  ;;  %v1100_v8 = vadd.f32 %v905_v62, %v394_v55  ;;  %v1372_v22 = vsel %vm309_vm0, %v1296_v7, 0.0  ;;  %v1493_v23 = vmul.f32 %v1296_v7, %v1296_v7  ;;  %2302 = vtanh.f32 %v1296_v7  ;;  %v2933_v43 = vpop.f32.mrf.mxu1 }
 0x115   : > { %v2127_v10 = vpop.f32.mrf.mxu0  ;;  %v1568_v14 = vadd.f32 %v1567_v6, %v1566_v4  ;;  %v1301_v24 = vadd.f32 %v2771_v56, %v1230_v18  ;;  %v1373_v29 = vadd.f32 %v1372_v22, %v1371_v3  ;;  %v1374_v35 = vsel %vm309_vm0, %v2878_v15, 0.0 }
 0x116   : > { %v2289_v13 = vpop.eup %2288  ;;  %v1103_v20 = vadd.f32 %v2127_v10, %v397_v0  ;;  %v1228_v26 = vld [vmem:[#allocation2 + $0x80] sm:$0xff]  ;;  %1165 = vst.msk [vmem:[#allocation2 + $0xa0] sm:$0xff] %vm309_vm0, %v1100_v8  ;;  %v1571_v37 = vsel %vm309_vm0, %v1494_v2, 0.0  ;;  %v1569_v38 = vsel %vm309_vm0, %v1493_v23, 0.0  ;;  %v1376_v45 = vsel %vm309_vm0, %v1298_v53, 0.0  ;;  %v2954_v6 = vpop.f32.mrf.mxu1 }
 0x117   : > { %1753 = vst.msk [vmem:[%s2819_s24 + $0x40] sm:$0xff] %vm309_vm0, %v2289_v13  ;;  %v908_v27 = vpop.f32.mrf.mxu0  ;;  %v2291_v28 = vpop.eup %2290  ;;  %v1299_v30 = vadd.f32 %v2771_v56, %v1228_v26  ;;  %v1231_v32 = vld [vmem:[#allocation2 + $0x98] sm:$0xff]  ;;  %2304 = vtanh.f32 %v1301_v24  ;;  %v1573_v48 = vsel %vm309_vm0, %v1495_v16, 0.0  ;;  %v1375_v49 = vadd.f32 %v1374_v35, %v1373_v29  ;;  %v398_v16 = vld [vmem:[#allocation2 + $0xc0] sm:$0xff] }
 0x118   : > { %1168 = vst.msk [vmem:[#allocation2 + $0xb8] sm:$0xff] %vm309_vm0, %v1103_v20  ;;  %v1101_v34 = vadd.f32 %v908_v27, %v395_v11  ;;  %1756 = vst.msk [vmem:[%s2819_s24 + $0x58] sm:$0xff] %vm309_vm0, %v2291_v28  ;;  %v1570_v50 = vadd.f32 %v1569_v38, %v1568_v14  ;;  %v1302_v54 = vadd.f32 %v2771_v56, %v1231_v32  ;;  %v400_v14 = vld [vmem:[#allocation2 + $0xd0] sm:$0xff]  ;;  %v1382_v18 = vsel %vm309_vm0, %v1301_v24, 0.0 }
 0x119   : > { %v1229_v17 = vld [vmem:[#allocation2 + $0x88] sm:$0xff]  ;;  %v2130_v42 = vpop.f32.mrf.mxu0  ;;  %v2293_v44 = vpop.eup %2292  ;;  %v1496_v15 = vmul.f32 %v1299_v30, %v1299_v30  ;;  %2306 = vtanh.f32 %v1299_v30  ;;  %v1377_v53 = vadd.f32 %v1376_v45, %v1375_v49  ;;  %v2946_v0 = vadd.f32 %v2771_v56, %v1247_v39 }
 0x11a   : > { %1166 = vst.msk [vmem:[#allocation2 + $0xa8] sm:$0xff] %vm309_vm0, %v1101_v34  ;;  %1754 = vst.msk [vmem:[%s2819_s24 + $0x48] sm:$0xff] %vm309_vm0, %v2293_v44  ;;  %v1300_v55 = vadd.f32 %v2771_v56, %v1229_v17  ;;  %v1572_v60 = vadd.f32 %v1571_v37, %v1570_v50  ;;  %v1498_v1 = vmul.f32 %v1301_v24, %v1301_v24  ;;  %v1378_v2 = vsel %vm309_vm0, %v1299_v30, 0.0  ;;  %v2969_v39 = vpop.f32.mrf.mxu1 }
 0x11b   : > { %v1234_v57 = vld [vmem:[#allocation2 + $0xb0] sm:$0xff]  ;;  %v921_v58 = vpop.f32.mrf.mxu0  ;;  %v2295_v59 = vpop.eup %2294  ;;  %2308 = vtanh.f32 %v1302_v54  ;;  %v1379_v8 = vadd.f32 %v1378_v2, %v1377_v53  ;;  %v1575_v20 = vsel %vm309_vm0, %v1496_v15, 0.0  ;;  %v1499_v22 = vmul.f32 %v1302_v54, %v1302_v54 }
 0x11c   : > { %v2943_v62 = vadd.f32 %v2771_v56, %v1234_v57  ;;  %1759 = vst.msk [vmem:[%s2819_s24 + $0x70] sm:$0xff] %vm309_vm0, %v2295_v59  ;;  %v1380_v3 = vsel %vm309_vm0, %v1300_v55, 0.0  ;;  %v2297_v7 = vpop.eup %2296  ;;  %v1574_v10 = vadd.f32 %v1573_v48, %v1572_v60  ;;  %v1497_v11 = vmul.f32 %v1300_v55, %v1300_v55  ;;  %v401_v57 = vld [vmem:[#allocation2 + $0xd8] sm:$0xff]  ;;  %v404_v2 = vld [vmem:[#allocation2 + $0xf0] sm:$0xff] }
 0x11d   : > { %v2952_v4 = vpop.f32.mrf.mxu0  ;;  %2310 = vtanh.f32 %v1300_v55  ;;  %v1232_v13 = vld [vmem:[#allocation2 + $0xa0] sm:$0xff]  ;;  %1777 = vst.msk [vmem:[%s2819_s24 + $0x100] sm:$0xff] %vm309_vm0, %v2297_v7  ;;  %v1381_v29 = vadd.f32 %v1380_v3, %v1379_v8  ;;  %v1579_v24 = vsel %vm309_vm0, %v1498_v1, 0.0  ;;  %v1106_v37 = vadd.f32 %v2130_v42, %v400_v14  ;;  %v405_v7 = vld [vmem:[#allocation2 + $0xf8] sm:$0xff]  ;;  %v403_v14 = vld [vmem:[#allocation2 + $0xe8] sm:$0xff] }
 0x11e   : > { %2312 = vtanh.f32 %v2943_v62  ;;  %v1576_v28 = vadd.f32 %v1575_v20, %v1574_v10  ;;  %v1577_v30 = vsel %vm309_vm0, %v1497_v11, 0.0  ;;  %v1303_v32 = vadd.f32 %v2771_v56, %v1232_v13  ;;  %v402_v3 = vld [vmem:[#allocation2 + $0xe0] sm:$0xff] }
 0x11f   : > { %v1235_v23 = vld [vmem:[#allocation2 + $0xb8] sm:$0xff]  ;;  %v924_v26 = vpop.f32.mrf.mxu0  ;;  %v2299_v27 = vpop.eup %2298  ;;  %v1104_v38 = vadd.f32 %v921_v58, %v398_v16  ;;  %v1384_v45 = vsel %vm309_vm0, %v1302_v54, 0.0  ;;  %v1383_v48 = vadd.f32 %v1382_v18, %v1381_v29  ;;  %v1581_v15 = vsel %vm309_vm0, %v1499_v22, 0.0  ;;  %1171 = vst.msk [vmem:[#allocation2 + $0xd0] sm:$0xff] %vm309_vm0, %v1106_v37  ;;  %v399_v54 = vld [vmem:[#allocation2 + $0xc8] sm:$0xff] }
 0x120   : > { %1757 = vst.msk [vmem:[%s2819_s24 + $0x60] sm:$0xff] %vm309_vm0, %v2299_v27  ;;  %v2967_v34 = vadd.f32 %v2771_v56, %v1235_v23  ;;  %v2301_v44 = vpop.eup %2300  ;;  %v1578_v49 = vadd.f32 %v1577_v30, %v1576_v28  ;;  %v1500_v50 = vmul.f32 %v1303_v32, %v1303_v32  ;;  %v1502_v55 = vmul.f32 %v2943_v62, %v2943_v62  ;;  %v2986_v16 = vpop.f32.mrf.mxu1  ;;  %v1245_v28 = vld [vmem:[#allocation2 + $0x108] sm:$0xff]  ;;  %v413_v37 = vld [vmem:[#allocation2 + $0x138] sm:$0xff] }
 0x121   : > { %v1233_v35 = vld [vmem:[#allocation2 + $0xa8] sm:$0xff]  ;;  %v2134_v17 = vpop.f32.mrf.mxu0  ;;  %1760 = vst.msk [vmem:[%s2819_s24 + $0x78] sm:$0xff] %vm309_vm0, %v2301_v44  ;;  %2314 = vtanh.f32 %v1303_v32  ;;  %1169 = vst.msk [vmem:[#allocation2 + $0xc0] sm:$0xff] %vm309_vm0, %v1104_v38  ;;  %v2303_v59 = vpop.eup %2302  ;;  %v1385_v53 = vadd.f32 %v1384_v45, %v1383_v48  ;;  %v1386_v1 = vsel %vm309_vm0, %v1303_v32, 0.0  ;;  %v1107_v23 = vadd.f32 %v2952_v4, %v401_v57  ;;  %v1250_v48 = vld [vmem:[#allocation2 + $0x130] sm:$0xff] }
 0x122   : > { %v1304_v42 = vadd.f32 %v2771_v56, %v1233_v35  ;;  %v1580_v60 = vadd.f32 %v1579_v24, %v1578_v49  ;;  %2316 = vtanh.f32 %v2967_v34  ;;  %1758 = vst.msk [vmem:[%s2819_s24 + $0x68] sm:$0xff] %vm309_vm0, %v2303_v59  ;;  %v1583_v8 = vsel %vm309_vm0, %v1500_v50, 0.0 }
 0x123   : > { %v937_v58 = vpop.f32.mrf.mxu0  ;;  %v1387_v20 = vadd.f32 %v1386_v1, %v1385_v53  ;;  %v1105_v27 = vadd.f32 %v924_v26, %v399_v54  ;;  %v1110_v30 = vadd.f32 %v2134_v17, %v404_v2  ;;  %1172 = vst.msk [vmem:[#allocation2 + $0xd8] sm:$0xff] %vm309_vm0, %v1107_v23  ;;  %v1512_v4 = vmul.f32 %v2851_v46, %v2851_v46 }
 0x124   : > { %v1388_v10 = vsel %vm309_vm0, %v1304_v42, 0.0  ;;  %v1501_v11 = vmul.f32 %v1304_v42, %v1304_v42  ;;  %2318 = vtanh.f32 %v1304_v42  ;;  %v2305_v18 = vpop.eup %2304  ;;  %v1582_v22 = vadd.f32 %v1581_v15, %v1580_v60  ;;  %v3009_v15 = vpop.f32.mrf.mxu1 }
 0x125   : > { %v2135_v13 = vpop.f32.mrf.mxu0  ;;  %1763 = vst.msk [vmem:[%s2819_s24 + $0x90] sm:$0xff] %vm309_vm0, %v2305_v18  ;;  %v1108_v32 = vadd.f32 %v937_v58, %v402_v3  ;;  %v1389_v45 = vadd.f32 %v1388_v10, %v1387_v20  ;;  %1170 = vst.msk [vmem:[#allocation2 + $0xc8] sm:$0xff] %vm309_vm0, %v1105_v27  ;;  %v1390_v17 = vsel %vm309_vm0, %v2943_v62, 0.0  ;;  %v1503_v49 = vmul.f32 %v2967_v34, %v2967_v34 }
 0x126   : > { %v1585_v29 = vsel %vm309_vm0, %v1501_v11, 0.0  ;;  %v1111_v24 = vadd.f32 %v2135_v13, %v405_v7  ;;  %v2307_v38 = vpop.eup %2306  ;;  %v1584_v44 = vadd.f32 %v1583_v8, %v1582_v22  ;;  %1175 = vst.msk [vmem:[#allocation2 + $0xf0] sm:$0xff] %vm309_vm0, %v1110_v30  ;;  %2320 = vtanh.f32 %v2946_v0  ;;  %v1238_v58 = vld [vmem:[#allocation2 + $0xd0] sm:$0xff]  ;;  %v1248_v13 = vld [vmem:[#allocation2 + $0x120] sm:$0xff] }
 0x127   : > { %v940_v35 = vpop.f32.mrf.mxu0  ;;  %1761 = vst.msk [vmem:[%s2819_s24 + $0x80] sm:$0xff] %vm309_vm0, %v2307_v38  ;;  %1173 = vst.msk [vmem:[#allocation2 + $0xe0] sm:$0xff] %vm309_vm0, %v1108_v32  ;;  %v3007_v50 = vadd.f32 %v2771_v56, %v1245_v28  ;;  %v1587_v62 = vsel %vm309_vm0, %v1502_v55, 0.0  ;;  %v1391_v57 = vadd.f32 %v1390_v17, %v1389_v45  ;;  %v1119_v60 = vadd.f32 %v2786_v31, %v413_v37 }
 0x128   : > { %v1109_v26 = vadd.f32 %v940_v35, %v403_v14  ;;  %1176 = vst.msk [vmem:[#allocation2 + $0xf8] sm:$0xff] %vm309_vm0, %v1111_v24  ;;  %v2309_v42 = vpop.eup %2308  ;;  %v1586_v54 = vadd.f32 %v1585_v29, %v1584_v44  ;;  %v1236_v59 = vld [vmem:[#allocation2 + $0xc0] sm:$0xff]  ;;  %v1392_v1 = vsel %vm309_vm0, %v2967_v34, 0.0  ;;  %v1309_v2 = vadd.f32 %v2771_v56, %v1238_v58  ;;  %v3038_v14 = vpop.f32.mrf.mxu1 }
 0x129   : > { %1764 = vst.msk [vmem:[%s2819_s24 + $0x98] sm:$0xff] %vm309_vm0, %v2309_v42  ;;  %v1307_v3 = vadd.f32 %v2771_v56, %v1236_v59  ;;  %v3021_v55 = vadd.f32 %v2771_v56, %v1250_v48  ;;  %v1393_v10 = vadd.f32 %v1392_v1, %v1391_v57  ;;  %2322 = vtanh.f32 %v3007_v50  ;;  %1184 = vst.msk [vmem:[#allocation2 + $0x138] sm:$0xff] %vm309_vm0, %v1119_v60 }
 0x12a   : > { %1174 = vst.msk [vmem:[#allocation2 + $0xe8] sm:$0xff] %vm309_vm0, %v1109_v26  ;;  %v2311_v53 = vpop.eup %2310  ;;  %v1588_v8 = vadd.f32 %v1587_v62, %v1586_v54  ;;  %v1589_v31 = vsel %vm309_vm0, %v1503_v49, 0.0  ;;  %2324 = vtanh.f32 %v1309_v2  ;;  %v3032_v34 = vsel %vm309_vm0, %v2791_v36, 0.0  ;;  %v1239_v27 = vld [vmem:[#allocation2 + $0xd8] sm:$0xff]  ;;  %v3063_v49 = vpop.f32.mrf.mxu1 }
 0x12b   : > { %v2313_v7 = vpop.eup %2312  ;;  %1762 = vst.msk [vmem:[%s2819_s24 + $0x88] sm:$0xff] %vm309_vm0, %v2311_v53  ;;  %v3036_v11 = vmul.f32 %v2791_v36, %v2791_v36  ;;  %v1394_v18 = vsel %vm309_vm0, %v1307_v3, 0.0  ;;  %v1504_v20 = vmul.f32 %v1307_v3, %v1307_v3  ;;  %2326 = vtanh.f32 %v1307_v3 }
 0x12c   : > { %1767 = vst.msk [vmem:[%s2819_s24 + $0xb0] sm:$0xff] %vm309_vm0, %v2313_v7  ;;  %v1590_v22 = vadd.f32 %v1589_v31, %v1588_v8  ;;  %v1395_v23 = vadd.f32 %v1394_v18, %v1393_v10  ;;  %v1237_v28 = vld [vmem:[#allocation2 + $0xc8] sm:$0xff]  ;;  %v3043_v29 = vsel %vm309_vm0, %v2851_v46, 0.0  ;;  %v3046_v30 = vsel %vm309_vm0, %v1512_v4, 0.0 }
 0x12d   : > { %2328 = vtanh.f32 %v3021_v55  ;;  %v1310_v32 = vadd.f32 %v2771_v56, %v1239_v27  ;;  %v1308_v24 = vadd.f32 %v2771_v56, %v1237_v28  ;;  %v1242_v35 = vld [vmem:[#allocation2 + $0xf0] sm:$0xff]  ;;  %v3053_v44 = vmul.f32 %v2946_v0, %v2946_v0 }
 0x12e   : > { %v2315_v36 = vpop.eup %2314  ;;  %v1240_v37 = vld [vmem:[#allocation2 + $0xe0] sm:$0xff]  ;;  %v3056_v46 = vadd.f32 %v2771_v56, %v1248_v13  ;;  %v1506_v4 = vmul.f32 %v1309_v2, %v1309_v2  ;;  %v1591_v26 = vsel %vm309_vm0, %v1504_v20, 0.0  ;;  %v1313_v48 = vadd.f32 %v2771_v56, %v1242_v35  ;;  %v3082_v13 = vpop.f32.mrf.mxu1 }
 0x12f   : > { %v1243_v38 = vld [vmem:[#allocation2 + $0xf8] sm:$0xff]  ;;  %v2317_v45 = vpop.eup %2316  ;;  %1765 = vst.msk [vmem:[%s2819_s24 + $0xa0] sm:$0xff] %vm309_vm0, %v2315_v36  ;;  %v1311_v17 = vadd.f32 %v2771_v56, %v1240_v37  ;;  %v1592_v62 = vadd.f32 %v1591_v26, %v1590_v22  ;;  %2330 = vtanh.f32 %v1310_v32  ;;  %v1396_v57 = vsel %vm309_vm0, %v1308_v24, 0.0 }
 0x130   : > { %1768 = vst.msk [vmem:[%s2819_s24 + $0xb8] sm:$0xff] %vm309_vm0, %v2317_v45  ;;  %v1314_v54 = vadd.f32 %v2771_v56, %v1243_v38  ;;  %v1507_v58 = vmul.f32 %v1310_v32, %v1310_v32  ;;  %v1397_v59 = vadd.f32 %v1396_v57, %v1395_v23  ;;  %v1505_v60 = vmul.f32 %v1308_v24, %v1308_v24  ;;  %v1251_v36 = vld [vmem:[#allocation2 + $0x138] sm:$0xff]  ;;  %v416_v45 = vld [vmem:[#allocation2 + $0x150] sm:$0xff]  ;;  %v3092_v57 = vpop.f32.mrf.mxu1 }
 0x131   : > { %v2319_v42 = vpop.eup %2318  ;;  %2332 = vtanh.f32 %v1308_v24  ;;  %v1398_v53 = vsel %vm309_vm0, %v1309_v2, 0.0  ;;  %v1241_v1 = vld [vmem:[#allocation2 + $0xe8] sm:$0xff]  ;;  %v3074_v3 = vsel %vm309_vm0, %v3007_v50, 0.0  ;;  %v3078_v7 = vmul.f32 %v3007_v50, %v3007_v50 }
 0x132   : > { %1766 = vst.msk [vmem:[%s2819_s24 + $0xa8] sm:$0xff] %vm309_vm0, %v2319_v42  ;;  %2334 = vtanh.f32 %v1313_v48  ;;  %v1595_v8 = vsel %vm309_vm0, %v1506_v4, 0.0  ;;  %v1399_v10 = vadd.f32 %v1398_v53, %v1397_v59  ;;  %v1593_v31 = vsel %vm309_vm0, %v1505_v60, 0.0  ;;  %v417_v53 = vld [vmem:[#allocation2 + $0x158] sm:$0xff] }
 0x133   : > { %2336 = vtanh.f32 %v1311_v17  ;;  %v2321_v2 = vpop.eup %2320  ;;  %v1400_v18 = vsel %vm309_vm0, %v1310_v32, 0.0  ;;  %v1594_v20 = vadd.f32 %v1593_v31, %v1592_v62  ;;  %v1406_v22 = vsel %vm309_vm0, %v1313_v48, 0.0  ;;  %v411_v32 = vld [vmem:[#allocation2 + $0x128] sm:$0xff] }
 0x134   : > { %v1508_v23 = vmul.f32 %v1311_v17, %v1311_v17  ;;  %v1597_v27 = vsel %vm309_vm0, %v1507_v58, 0.0  ;;  %v1401_v28 = vadd.f32 %v1400_v18, %v1399_v10  ;;  %2338 = vtanh.f32 %v1314_v54  ;;  %1780 = vst.msk [vmem:[%s2819_s24 + $0x118] sm:$0xff] %vm309_vm0, %v2321_v2 }
 0x135   : > { %v1312_v50 = vadd.f32 %v2771_v56, %v1241_v1  ;;  %v1596_v24 = vadd.f32 %v1595_v8, %v1594_v20  ;;  %v1510_v35 = vmul.f32 %v1313_v48, %v1313_v48  ;;  %v1402_v37 = vsel %vm309_vm0, %v1311_v17, 0.0  ;;  %v414_v17 = vld [vmem:[#allocation2 + $0x140] sm:$0xff]  ;;  %v415_v1 = vld [vmem:[#allocation2 + $0x148] sm:$0xff]  ;;  %v420_v20 = vld [vmem:[#allocation2 + $0x170] sm:$0xff] }
 0x136   : > { %v1511_v38 = vmul.f32 %v1314_v54, %v1314_v54  ;;  %v2323_v4 = vpop.eup %2322  ;;  %v1403_v26 = vadd.f32 %v1402_v37, %v1401_v28  ;;  %v1599_v60 = vsel %vm309_vm0, %v1508_v23, 0.0  ;;  %v3099_v48 = vadd.f32 %v2771_v56, %v1251_v36  ;;  %v418_v23 = vld [vmem:[#allocation2 + $0x160] sm:$0xff]  ;;  %v421_v36 = vld [vmem:[#allocation2 + $0x178] sm:$0xff]  ;;  %v424_v37 = vld [vmem:[#allocation2 + $0x190] sm:$0xff] }
 0x137   : > { %v1404_v42 = vsel %vm309_vm0, %v1312_v50, 0.0  ;;  %v1509_v62 = vmul.f32 %v1312_v50, %v1312_v50  ;;  %2340 = vtanh.f32 %v1312_v50  ;;  %v2325_v58 = vpop.eup %2324  ;;  %v1598_v59 = vadd.f32 %v1597_v27, %v1596_v24  ;;  %1778 = vst.msk [vmem:[%s2819_s24 + $0x108] sm:$0xff] %vm309_vm0, %v2323_v4  ;;  %v419_v24 = vld [vmem:[#allocation2 + $0x168] sm:$0xff] }
 0x138   : > { %2342 = vtanh.f32 %v3056_v46  ;;  %v2327_v8 = vpop.eup %2326  ;;  %1771 = vst.msk [vmem:[%s2819_s24 + $0xd0] sm:$0xff] %vm309_vm0, %v2325_v58  ;;  %v1405_v10 = vadd.f32 %v1404_v42, %v1403_v26  ;;  %v1117_v2 = vadd.f32 %v2799_v41, %v411_v32  ;;  %v1122_v18 = vadd.f32 %v2807_v51, %v416_v45  ;;  %v422_v32 = vld [vmem:[#allocation2 + $0x180] sm:$0xff]  ;;  %v423_v45 = vld [vmem:[#allocation2 + $0x188] sm:$0xff]  ;;  %v3118_v26 = vpop.f32.mrf.mxu1 }
 0x139   : > { %v1601_v31 = vsel %vm309_vm0, %v1509_v62, 0.0  ;;  %1769 = vst.msk [vmem:[%s2819_s24 + $0xc0] sm:$0xff] %vm309_vm0, %v2327_v8  ;;  %v1603_v56 = vsel %vm309_vm0, %v1510_v35, 0.0  ;;  %v1600_v28 = vadd.f32 %v1599_v60, %v1598_v59  ;;  %v1408_v50 = vsel %vm309_vm0, %v1314_v54, 0.0  ;;  %v425_v54 = vld [vmem:[#allocation2 + $0x198] sm:$0xff]  ;;  %v428_v59 = vld [vmem:[#allocation2 + $0x1b0] sm:$0xff] }
 0x13a   : > { %v2329_v27 = vpop.eup %2328  ;;  %2344 = vtanh.f32 %v3099_v48  ;;  %v1407_v4 = vadd.f32 %v1406_v22, %v1405_v10  ;;  %1182 = vst.msk [vmem:[#allocation2 + $0x128] sm:$0xff] %vm309_vm0, %v1117_v2  ;;  %1187 = vst.msk [vmem:[#allocation2 + $0x150] sm:$0xff] %vm309_vm0, %v1122_v18  ;;  %v1120_v41 = vadd.f32 %v2814_v63, %v414_v17  ;;  %v1123_v51 = vadd.f32 %v2827_v9, %v417_v53  ;;  %v426_v60 = vld [vmem:[#allocation2 + $0x1a0] sm:$0xff]  ;;  %v429_v63 = vld [vmem:[#allocation2 + $0x1b8] sm:$0xff] }
 0x13b   : > { %1783 = vst.msk [vmem:[%s2819_s24 + $0x130] sm:$0xff] %vm309_vm0, %v2329_v27  ;;  %v1121_v35 = vadd.f32 %v2837_v19, %v415_v1  ;;  %v1605_v42 = vsel %vm309_vm0, %v1511_v38, 0.0  ;;  %v1602_v22 = vadd.f32 %v1601_v31, %v1600_v28  ;;  %v1126_v62 = vadd.f32 %v2845_v33, %v420_v20  ;;  %v432_v53 = vld [vmem:[#allocation2 + $0x1d0] sm:$0xff]  ;;  %v430_v1 = vld [vmem:[#allocation2 + $0x1c0] sm:$0xff]  ;;  %v433_v2 = vld [vmem:[#allocation2 + $0x1d8] sm:$0xff] }
 0x13c   : > { %v1124_v58 = vadd.f32 %v2853_v47, %v418_v23  ;;  %v2331_v17 = vpop.eup %2330  ;;  %v1409_v9 = vadd.f32 %v1408_v50, %v1407_v4  ;;  %1185 = vst.msk [vmem:[#allocation2 + $0x140] sm:$0xff] %vm309_vm0, %v1120_v41  ;;  %1188 = vst.msk [vmem:[#allocation2 + $0x158] sm:$0xff] %vm309_vm0, %v1123_v51  ;;  %v1127_v19 = vadd.f32 %v2864_v61, %v421_v36  ;;  %v427_v47 = vld [vmem:[#allocation2 + $0x1a8] sm:$0xff]  ;;  %v436_v18 = vld [vmem:[#allocation2 + $0x1f0] sm:$0xff]  ;;  %v1068_v50 = vpop.f32.mrf.mxu1 }
 0x13d   : > { %1186 = vst.msk [vmem:[#allocation2 + $0x148] sm:$0xff] %vm309_vm0, %v1121_v35  ;;  %v1125_v38 = vadd.f32 %v2874_v12, %v419_v24  ;;  %v1130_v33 = vadd.f32 %v2883_v25, %v424_v37  ;;  %1772 = vst.msk [vmem:[%s2819_s24 + $0xd8] sm:$0xff] %vm309_vm0, %v2331_v17  ;;  %v1604_v10 = vadd.f32 %v1603_v56, %v1602_v22  ;;  %v431_v25 = vld [vmem:[#allocation2 + $0x1c8] sm:$0xff]  ;;  %v434_v27 = vld [vmem:[#allocation2 + $0x1e0] sm:$0xff]  ;;  %v1418_v17 = vsel %vm309_vm0, %v3056_v46, 0.0 }
 0x13e   : > { %v2333_v8 = vpop.eup %2332  ;;  %1191 = vst.msk [vmem:[#allocation2 + $0x170] sm:$0xff] %vm309_vm0, %v1126_v62  ;;  %1189 = vst.msk [vmem:[#allocation2 + $0x160] sm:$0xff] %vm309_vm0, %v1124_v58  ;;  %v1128_v31 = vadd.f32 %v2892_v40, %v422_v32  ;;  %v1131_v61 = vadd.f32 %v2903_v52, %v425_v54  ;;  %v1129_v12 = vadd.f32 %v2912_v5, %v423_v45  ;;  %v437_v56 = vld [vmem:[#allocation2 + $0x1f8] sm:$0xff]  ;;  %v435_v28 = vld [vmem:[#allocation2 + $0x1e8] sm:$0xff]  ;;  %v1611_v62 = vsel %vm309_vm0, %v3036_v11, 0.0 }
 0x13f   : > { %v2335_v20 = vpop.eup %2334  ;;  %1770 = vst.msk [vmem:[%s2819_s24 + $0xc8] sm:$0xff] %vm309_vm0, %v2333_v8  ;;  %v1411_v23 = vadd.f32 %v3043_v29, %v1409_v9  ;;  %1192 = vst.msk [vmem:[#allocation2 + $0x178] sm:$0xff] %vm309_vm0, %v1127_v19  ;;  %v1134_v40 = vadd.f32 %v2918_v21, %v428_v59  ;;  %v1132_v52 = vadd.f32 %v2933_v43, %v426_v60 }
 0x140   : > { %1190 = vst.msk [vmem:[#allocation2 + $0x168] sm:$0xff] %vm309_vm0, %v1125_v38  ;;  %1195 = vst.msk [vmem:[#allocation2 + $0x190] sm:$0xff] %vm309_vm0, %v1130_v33  ;;  %v1135_v5 = vadd.f32 %v2954_v6, %v429_v63  ;;  %v2337_v36 = vpop.eup %2336  ;;  %v1606_v29 = vadd.f32 %v1605_v42, %v1604_v10  ;;  %v1133_v21 = vadd.f32 %v2969_v39, %v427_v47 }
 0x141   : > { %1775 = vst.msk [vmem:[%s2819_s24 + $0xf0] sm:$0xff] %vm309_vm0, %v2335_v20  ;;  %1193 = vst.msk [vmem:[#allocation2 + $0x180] sm:$0xff] %vm309_vm0, %v1128_v31  ;;  %v1138_v43 = vadd.f32 %v2986_v16, %v432_v53  ;;  %v1136_v6 = vadd.f32 %v3009_v15, %v430_v1  ;;  %v1413_v24 = vadd.f32 %v3074_v3, %v1411_v23  ;;  %v2339_v16 = vpop.eup %2338  ;;  %v1249_v41 = vld [vmem:[#allocation2 + $0x128] sm:$0xff]  ;;  %v1254_v51 = vld [vmem:[#allocation2 + $0x150] sm:$0xff] }
 0x142   : > { %1196 = vst.msk [vmem:[#allocation2 + $0x198] sm:$0xff] %vm309_vm0, %v1131_v61  ;;  %1194 = vst.msk [vmem:[#allocation2 + $0x188] sm:$0xff] %vm309_vm0, %v1129_v12  ;;  %v1139_v37 = vadd.f32 %v3038_v14, %v433_v2  ;;  %v1137_v4 = vadd.f32 %v3063_v49, %v431_v25  ;;  %v1142_v39 = vadd.f32 %v3082_v13, %v436_v18  ;;  %v3176_v13 = vld [vmem:[%s3431_s2] ss:$0 sm:$0xff]  ;;  %v1422_v61 = vsel %vm309_vm0, %v3021_v55, 0.0 }
 0x143   : > { %1773 = vst.msk [vmem:[%s2819_s24 + $0xe0] sm:$0xff] %vm309_vm0, %v2337_v36  ;;  %1199 = vst.msk [vmem:[#allocation2 + $0x1b0] sm:$0xff] %vm309_vm0, %v1134_v40  ;;  %v1608_v15 = vadd.f32 %v3046_v30, %v1606_v29  ;;  %v1140_v3 = vadd.f32 %v3092_v57, %v434_v27  ;;  %v1143_v35 = vadd.f32 %v3118_v26, %v437_v56  ;;  %v1609_v30 = vsel %vm309_vm0, %v3078_v7, 0.0  ;;  %v1252_v26 = vld [vmem:[#allocation2 + $0x140] sm:$0xff]  ;;  %v1255_v42 = vld [vmem:[#allocation2 + $0x158] sm:$0xff] }
 0x144   : > { %1197 = vst.msk [vmem:[#allocation2 + $0x1a0] sm:$0xff] %vm309_vm0, %v1132_v52  ;;  %1200 = vst.msk [vmem:[#allocation2 + $0x1b8] sm:$0xff] %vm309_vm0, %v1135_v5  ;;  %v1141_v14 = vadd.f32 %v1068_v50, %v435_v28  ;;  %v1415_v49 = vadd.f32 %v3032_v34, %v1413_v24  ;;  %v1320_v32 = vadd.f32 %v3176_v13, %v1249_v41  ;;  %v2341_v34 = vpop.eup %2340  ;;  %v1416_v7 = vsel %vm309_vm0, %v2946_v0, 0.0  ;;  %v1253_v59 = vld [vmem:[#allocation2 + $0x148] sm:$0xff] }
 0x145   : > { %1198 = vst.msk [vmem:[#allocation2 + $0x1a8] sm:$0xff] %vm309_vm0, %v1133_v21  ;;  %1203 = vst.msk [vmem:[#allocation2 + $0x1d0] sm:$0xff] %vm309_vm0, %v1138_v43  ;;  %v3180_v57 = vadd.f32 %v3176_v13, %v1254_v51  ;;  %v1610_v54 = vadd.f32 %v1609_v30, %v1608_v15  ;;  %v1516_v45 = vmul.f32 %v3056_v46, %v3056_v46  ;;  %v2343_v22 = vpop.eup %2342  ;;  %v1613_v0 = vsel %vm309_vm0, %v3053_v44, 0.0  ;;  %v1258_v11 = vld [vmem:[#allocation2 + $0x170] sm:$0xff]  ;;  %v1256_v18 = vld [vmem:[#allocation2 + $0x160] sm:$0xff] }
 0x146   : > { %1201 = vst.msk [vmem:[#allocation2 + $0x1c0] sm:$0xff] %vm309_vm0, %v1136_v6  ;;  %1776 = vst.msk [vmem:[%s2819_s24 + $0xf8] sm:$0xff] %vm309_vm0, %v2339_v16  ;;  %v1417_v58 = vadd.f32 %v1416_v7, %v1415_v49  ;;  %2346 = vtanh.f32 %v1320_v32  ;;  %v1518_v63 = vmul.f32 %v3021_v55, %v3021_v55  ;;  %v1517_v38 = vmul.f32 %v1320_v32, %v1320_v32  ;;  %v1259_v20 = vld [vmem:[#allocation2 + $0x178] sm:$0xff] }
 0x147   : > { %1204 = vst.msk [vmem:[#allocation2 + $0x1d8] sm:$0xff] %vm309_vm0, %v1139_v37  ;;  %1202 = vst.msk [vmem:[#allocation2 + $0x1c8] sm:$0xff] %vm309_vm0, %v1137_v4  ;;  %v1612_v60 = vadd.f32 %v1611_v62, %v1610_v54  ;;  %2348 = vtanh.f32 %v3180_v57  ;;  %v2345_v9 = vpop.eup %2344  ;;  %v1323_v44 = vadd.f32 %v3176_v13, %v1252_v26  ;;  %v1326_v33 = vadd.f32 %v3176_v13, %v1255_v42  ;;  %v1257_v5 = vld [vmem:[#allocation2 + $0x168] sm:$0xff]  ;;  %v1262_v55 = vld [vmem:[#allocation2 + $0x190] sm:$0xff] }
 0x148   : > { %1207 = vst.msk [vmem:[#allocation2 + $0x1f0] sm:$0xff] %vm309_vm0, %v1142_v39  ;;  %1205 = vst.msk [vmem:[#allocation2 + $0x1e0] sm:$0xff] %vm309_vm0, %v1140_v3  ;;  %v1419_v19 = vadd.f32 %v1418_v17, %v1417_v58  ;;  %v1615_v53 = vsel %vm309_vm0, %v1516_v45, 0.0  ;;  %v1420_v1 = vsel %vm309_vm0, %v1320_v32, 0.0  ;;  %v1324_v46 = vadd.f32 %v3176_v13, %v1253_v59  ;;  %v1260_v43 = vld [vmem:[#allocation2 + $0x180] sm:$0xff] }
 0x149   : > { %1208 = vst.msk [vmem:[#allocation2 + $0x1f8] sm:$0xff] %vm309_vm0, %v1143_v35  ;;  %1206 = vst.msk [vmem:[#allocation2 + $0x1e8] sm:$0xff] %vm309_vm0, %v1141_v14  ;;  %v1614_v47 = vadd.f32 %v1613_v0, %v1612_v60  ;;  %v1519_v8 = vmul.f32 %v3099_v48, %v3099_v48  ;;  %2350 = vtanh.f32 %v1323_v44  ;;  %v3215_v31 = vadd.f32 %v3176_v13, %v1258_v11  ;;  %v1263_v7 = vld [vmem:[#allocation2 + $0x198] sm:$0xff]  ;;  %v1261_v54 = vld [vmem:[#allocation2 + $0x188] sm:$0xff] }
 0x14a   : > { %1774 = vst.msk [vmem:[%s2819_s24 + $0xe8] sm:$0xff] %vm309_vm0, %v2341_v34  ;;  %1781 = vst.msk [vmem:[%s2819_s24 + $0x120] sm:$0xff] %vm309_vm0, %v2343_v22  ;;  %v1421_v10 = vadd.f32 %v1420_v1, %v1419_v19  ;;  %2352 = vtanh.f32 %v1326_v33  ;;  %v1617_v25 = vsel %vm309_vm0, %v1517_v38, 0.0  ;;  %v1619_v23 = vsel %vm309_vm0, %v1518_v63, 0.0  ;;  %v1266_v45 = vld [vmem:[#allocation2 + $0x1b0] sm:$0xff] }
 0x14b   : > { %1784 = vst.msk [vmem:[%s2819_s24 + $0x138] sm:$0xff] %vm309_vm0, %v2345_v9  ;;  %v1616_v12 = vadd.f32 %v1615_v53, %v1614_v47  ;;  %v1424_v40 = vsel %vm309_vm0, %v3099_v48, 0.0  ;;  %2354 = vtanh.f32 %v1324_v46  ;;  %v1621_v27 = vsel %vm309_vm0, %v1519_v8, 0.0  ;;  %v1264_v22 = vld [vmem:[#allocation2 + $0x1a0] sm:$0xff] }
 0x14c   : > { %v1423_v2 = vadd.f32 %v1422_v61, %v1421_v10  ;;  %v1520_v28 = vmul.f32 %v1323_v44, %v1323_v44  ;;  %2356 = vtanh.f32 %v3215_v31  ;;  %v1426_v36 = vsel %vm309_vm0, %v1323_v44, 0.0  ;;  %v1265_v59 = vld [vmem:[#allocation2 + $0x1a8] sm:$0xff] }
 0x14d   : > { %v1618_v52 = vadd.f32 %v1617_v25, %v1616_v12  ;;  %v1327_v29 = vadd.f32 %v3176_v13, %v1256_v18  ;;  %v3228_v21 = vadd.f32 %v3176_v13, %v1259_v20  ;;  %v1522_v48 = vmul.f32 %v3180_v57, %v3180_v57 }
 0x14e   : > { %v1425_v56 = vadd.f32 %v1424_v40, %v1423_v2  ;;  %v1521_v24 = vmul.f32 %v1324_v46, %v1324_v46  ;;  %v1328_v37 = vadd.f32 %v3176_v13, %v1257_v5  ;;  %v1428_v39 = vsel %vm309_vm0, %v1324_v46, 0.0 }
 0x14f   : > { %v1620_v50 = vadd.f32 %v1619_v23, %v1618_v52  ;;  %2358 = vtanh.f32 %v1327_v29  ;;  %v3235_v16 = vadd.f32 %v3176_v13, %v1262_v55  ;;  %v1623_v15 = vsel %vm309_vm0, %v1520_v28, 0.0 }
 0x150   : > { %v1427_v6 = vadd.f32 %v1426_v36, %v1425_v56  ;;  %2360 = vtanh.f32 %v3228_v21  ;;  %v3240_v51 = vadd.f32 %v3176_v13, %v1260_v43  ;;  %v1430_v35 = vsel %vm309_vm0, %v3180_v57, 0.0 }
 0x151   : > { %v1622_v4 = vadd.f32 %v1621_v27, %v1620_v50  ;;  %v1523_v30 = vmul.f32 %v1326_v33, %v1326_v33  ;;  %v1625_v34 = vsel %vm309_vm0, %v1521_v24, 0.0  ;;  %2362 = vtanh.f32 %v1328_v37 }
 0x152   : > { %v1429_v41 = vadd.f32 %v1428_v39, %v1427_v6  ;;  %v1627_v26 = vsel %vm309_vm0, %v1522_v48, 0.0  ;;  %v1432_v42 = vsel %vm309_vm0, %v1326_v33, 0.0  ;;  %2364 = vtanh.f32 %v3235_v16 }
 0x153   : > { %v2347_v3 = vpop.eup %2346  ;;  %v1624_v14 = vadd.f32 %v1623_v15, %v1622_v4  ;;  %v1434_v0 = vsel %vm309_vm0, %v1327_v29, 0.0  ;;  %v1524_v58 = vmul.f32 %v1327_v29, %v1327_v29  ;;  %2366 = vtanh.f32 %v3240_v51 }
 0x154   : > { %v2349_v49 = vpop.eup %2348  ;;  %1782 = vst.msk [vmem:[%s2819_s24 + $0x128] sm:$0xff] %vm309_vm0, %v2347_v3  ;;  %v1431_v32 = vadd.f32 %v1430_v35, %v1429_v41  ;;  %v1334_v17 = vadd.f32 %v3176_v13, %v1263_v7  ;;  %v1332_v11 = vadd.f32 %v3176_v13, %v1261_v54  ;;  %v3257_v9 = vadd.f32 %v3176_v13, %v1266_v45  ;;  %v1267_v35 = vld [vmem:[#allocation2 + $0x1b8] sm:$0xff]  ;;  %v1270_v45 = vld [vmem:[#allocation2 + $0x1d0] sm:$0xff] }
 0x155   : > { %1787 = vst.msk [vmem:[%s2819_s24 + $0x150] sm:$0xff] %vm309_vm0, %v2349_v49  ;;  %v1626_v57 = vadd.f32 %v1625_v34, %v1624_v14  ;;  %v1629_v38 = vsel %vm309_vm0, %v1523_v30, 0.0  ;;  %v1525_v33 = vmul.f32 %v1328_v37, %v1328_v37  ;;  %v3263_v47 = vadd.f32 %v3176_v13, %v1264_v22  ;;  %v1268_v14 = vld [vmem:[#allocation2 + $0x1c0] sm:$0xff]  ;;  %v1269_v30 = vld [vmem:[#allocation2 + $0x1c8] sm:$0xff] }
 0x156   : > { %v1433_v62 = vadd.f32 %v1432_v42, %v1431_v32  ;;  %v2351_v60 = vpop.eup %2350  ;;  %v1436_v1 = vsel %vm309_vm0, %v1328_v37, 0.0  ;;  %2368 = vtanh.f32 %v1334_v17  ;;  %v3269_v46 = vadd.f32 %v3176_v13, %v1265_v59 }
 0x157   : > { %v1628_v63 = vadd.f32 %v1627_v26, %v1626_v57  ;;  %v2353_v19 = vpop.eup %2352  ;;  %1785 = vst.msk [vmem:[%s2819_s24 + $0x140] sm:$0xff] %vm309_vm0, %v2351_v60  ;;  %v1526_v10 = vmul.f32 %v3215_v31, %v3215_v31  ;;  %v1631_v61 = vsel %vm309_vm0, %v1524_v58, 0.0  ;;  %2370 = vtanh.f32 %v1332_v11  ;;  %v1271_v26 = vld [vmem:[#allocation2 + $0x1d8] sm:$0xff]  ;;  %v1273_v60 = vld [vmem:[#allocation2 + $0x1e8] sm:$0xff] }
 0x158   : > { %v1435_v44 = vadd.f32 %v1434_v0, %v1433_v62  ;;  %1788 = vst.msk [vmem:[%s2819_s24 + $0x158] sm:$0xff] %vm309_vm0, %v2353_v19  ;;  %v2355_v8 = vpop.eup %2354  ;;  %v1438_v25 = vsel %vm309_vm0, %v3215_v31, 0.0  ;;  %2372 = vtanh.f32 %v3257_v9  ;;  %v1527_v20 = vmul.f32 %v3228_v21, %v3228_v21 }
 0x159   : > { %v1630_v53 = vadd.f32 %v1629_v38, %v1628_v63  ;;  %v2357_v2 = vpop.eup %2356  ;;  %1786 = vst.msk [vmem:[%s2819_s24 + $0x148] sm:$0xff] %vm309_vm0, %v2355_v8  ;;  %v1633_v40 = vsel %vm309_vm0, %v1525_v33, 0.0  ;;  %2374 = vtanh.f32 %v3263_v47  ;;  %v1440_v52 = vsel %vm309_vm0, %v3228_v21, 0.0 }
 0x15a   : > { %v1437_v12 = vadd.f32 %v1436_v1, %v1435_v44  ;;  %1791 = vst.msk [vmem:[%s2819_s24 + $0x170] sm:$0xff] %vm309_vm0, %v2357_v2  ;;  %2376 = vtanh.f32 %v3269_v46  ;;  %v1635_v27 = vsel %vm309_vm0, %v1526_v10, 0.0  ;;  %v1528_v28 = vmul.f32 %v3240_v51, %v3240_v51  ;;  %v1274_v10 = vld [vmem:[#allocation2 + $0x1f0] sm:$0xff] }
 0x15b   : > { %v1632_v18 = vadd.f32 %v1631_v61, %v1630_v53  ;;  %v1442_v36 = vsel %vm309_vm0, %v3240_v51, 0.0  ;;  %v1637_v29 = vsel %vm309_vm0, %v1527_v20, 0.0  ;;  %v1444_v6 = vsel %vm309_vm0, %v1332_v11, 0.0 }
 0x15c   : > { %v1439_v23 = vadd.f32 %v1438_v25, %v1437_v12  ;;  %v2359_v31 = vpop.eup %2358  ;;  %v1639_v37 = vsel %vm309_vm0, %v1528_v28, 0.0  ;;  %v1529_v39 = vmul.f32 %v1332_v11, %v1332_v11  ;;  %v1446_v41 = vsel %vm309_vm0, %v3235_v16, 0.0 }
 0x15d   : > { %v1634_v5 = vadd.f32 %v1633_v40, %v1632_v18  ;;  %v2361_v55 = vpop.eup %2360  ;;  %1789 = vst.msk [vmem:[%s2819_s24 + $0x160] sm:$0xff] %vm309_vm0, %v2359_v31  ;;  %v1530_v3 = vmul.f32 %v3235_v16, %v3235_v16  ;;  %v1448_v32 = vsel %vm309_vm0, %v1334_v17, 0.0  ;;  %v1531_v7 = vmul.f32 %v1334_v17, %v1334_v17  ;;  %v1272_v16 = vld [vmem:[#allocation2 + $0x1e0] sm:$0xff] }
 0x15e   : > { %v1441_v56 = vadd.f32 %v1440_v52, %v1439_v23  ;;  %1792 = vst.msk [vmem:[%s2819_s24 + $0x178] sm:$0xff] %vm309_vm0, %v2361_v55  ;;  %v2363_v43 = vpop.eup %2362  ;;  %v1641_v54 = vsel %vm309_vm0, %v1529_v39, 0.0  ;;  %v1338_v22 = vadd.f32 %v3176_v13, %v1267_v35  ;;  %v1339_v62 = vadd.f32 %v3176_v13, %v1268_v14  ;;  %v1275_v23 = vld [vmem:[#allocation2 + $0x1f8] sm:$0xff] }
 0x15f   : > { %v1636_v50 = vadd.f32 %v1635_v27, %v1634_v5  ;;  %v2365_v24 = vpop.eup %2364  ;;  %1790 = vst.msk [vmem:[%s2819_s24 + $0x168] sm:$0xff] %vm309_vm0, %v2363_v43  ;;  %v1450_v0 = vsel %vm309_vm0, %v3263_v47, 0.0  ;;  %v1340_v63 = vadd.f32 %v3176_v13, %v1269_v30  ;;  %v1532_v11 = vmul.f32 %v3263_v47, %v3263_v47 }
 0x160   : > { %v1443_v21 = vadd.f32 %v1442_v36, %v1441_v56  ;;  %v2367_v15 = vpop.eup %2366  ;;  %1795 = vst.msk [vmem:[%s2819_s24 + $0x190] sm:$0xff] %vm309_vm0, %v2365_v24  ;;  %v1643_v19 = vsel %vm309_vm0, %v1530_v3, 0.0  ;;  %v1341_v44 = vadd.f32 %v3176_v13, %v1270_v45  ;;  %v1342_v33 = vadd.f32 %v3176_v13, %v1271_v26 }
 0x161   : > { %v1638_v48 = vadd.f32 %v1637_v29, %v1636_v50  ;;  %1793 = vst.msk [vmem:[%s2819_s24 + $0x180] sm:$0xff] %vm309_vm0, %v2367_v15  ;;  %v1452_v53 = vsel %vm309_vm0, %v3269_v46, 0.0  ;;  %v1343_v61 = vadd.f32 %v3176_v13, %v1272_v16  ;;  %v1533_v12 = vmul.f32 %v3269_v46, %v3269_v46 }
 0x162   : > { %v1445_v4 = vadd.f32 %v1444_v6, %v1443_v21  ;;  %v1645_v2 = vsel %vm309_vm0, %v1531_v7, 0.0  ;;  %v1344_v25 = vadd.f32 %v3176_v13, %v1273_v60  ;;  %v1454_v18 = vsel %vm309_vm0, %v3257_v9, 0.0 }
 0x163   : > { %v1640_v51 = vadd.f32 %v1639_v37, %v1638_v48  ;;  %v2369_v34 = vpop.eup %2368  ;;  %2378 = vtanh.f32 %v1338_v22  ;;  %v1534_v52 = vmul.f32 %v3257_v9, %v3257_v9  ;;  %v1647_v5 = vsel %vm309_vm0, %v1532_v11, 0.0 }
 0x164   : > { %v1447_v49 = vadd.f32 %v1446_v41, %v1445_v4  ;;  %v2371_v57 = vpop.eup %2370  ;;  %1796 = vst.msk [vmem:[%s2819_s24 + $0x198] sm:$0xff] %vm309_vm0, %v2369_v34  ;;  %2380 = vtanh.f32 %v1339_v62  ;;  %v1345_v46 = vadd.f32 %v3176_v13, %v1274_v10  ;;  %v1456_v31 = vsel %vm309_vm0, %v1338_v22, 0.0 }
 0x165   : > { %v1642_v58 = vadd.f32 %v1641_v54, %v1640_v51  ;;  %v2373_v59 = vpop.eup %2372  ;;  %1794 = vst.msk [vmem:[%s2819_s24 + $0x188] sm:$0xff] %vm309_vm0, %v2371_v57  ;;  %2382 = vtanh.f32 %v1340_v63  ;;  %v1535_v28 = vmul.f32 %v1338_v22, %v1338_v22  ;;  %v1649_v55 = vsel %vm309_vm0, %v1533_v12, 0.0 }
 0x166   : > { %v1449_v42 = vadd.f32 %v1448_v32, %v1447_v49  ;;  %v2375_v38 = vpop.eup %2374  ;;  %1799 = vst.msk [vmem:[%s2819_s24 + $0x1b0] sm:$0xff] %vm309_vm0, %v2373_v59  ;;  %2384 = vtanh.f32 %v1341_v44  ;;  %v1346_v50 = vadd.f32 %v3176_v13, %v1275_v23  ;;  %v1458_v36 = vsel %vm309_vm0, %v1339_v62, 0.0 }
 0x167   : > { %v1644_v1 = vadd.f32 %v1643_v19, %v1642_v58  ;;  %v2377_v8 = vpop.eup %2376  ;;  %1797 = vst.msk [vmem:[%s2819_s24 + $0x1a0] sm:$0xff] %vm309_vm0, %v2375_v38  ;;  %2386 = vtanh.f32 %v1342_v33  ;;  %v1536_v21 = vmul.f32 %v1339_v62, %v1339_v62  ;;  %v1651_v43 = vsel %vm309_vm0, %v1534_v52, 0.0 }
 0x168   : > { %v1451_v17 = vadd.f32 %v1450_v0, %v1449_v42  ;;  %1798 = vst.msk [vmem:[%s2819_s24 + $0x1a8] sm:$0xff] %vm309_vm0, %v2377_v8  ;;  %2388 = vtanh.f32 %v1343_v61  ;;  %v1460_v48 = vsel %vm309_vm0, %v1340_v63, 0.0  ;;  %v1537_v37 = vmul.f32 %v1340_v63, %v1340_v63 }
 0x169   : > { %v1646_v20 = vadd.f32 %v1645_v2, %v1644_v1  ;;  %2390 = vtanh.f32 %v1344_v25  ;;  %v1653_v4 = vsel %vm309_vm0, %v1535_v28, 0.0  ;;  %v1462_v13 = vsel %vm309_vm0, %v1341_v44, 0.0 }
 0x16a   : > { %v1453_v47 = vadd.f32 %v1452_v53, %v1451_v17  ;;  %2392 = vtanh.f32 %v1345_v46  ;;  %v1538_v41 = vmul.f32 %v1341_v44, %v1341_v44  ;;  %v1655_v51 = vsel %vm309_vm0, %v1536_v21, 0.0 }
 0x16b   : > { %v1648_v27 = vadd.f32 %v1647_v5, %v1646_v20  ;;  %2394 = vtanh.f32 %v1346_v50  ;;  %v1464_v3 = vsel %vm309_vm0, %v1342_v33, 0.0  ;;  %v1539_v49 = vmul.f32 %v1342_v33, %v1342_v33 }
 0x16c   : > { %v1455_v40 = vadd.f32 %v1454_v18, %v1453_v47  ;;  %v1657_v30 = vsel %vm309_vm0, %v1537_v37, 0.0  ;;  %v1466_v32 = vsel %vm309_vm0, %v1343_v61, 0.0  ;;  %v1540_v45 = vmul.f32 %v1343_v61, %v1343_v61 }
 0x16d   : > { %v1650_v29 = vadd.f32 %v1649_v55, %v1648_v27  ;;  %v1659_v26 = vsel %vm309_vm0, %v1538_v41, 0.0  ;;  %v1468_v57 = vsel %vm309_vm0, %v1344_v25, 0.0  ;;  %v1541_v0 = vmul.f32 %v1344_v25, %v1344_v25 }
 0x16e   : > { %v1457_v56 = vadd.f32 %v1456_v31, %v1455_v40  ;;  %v1661_v58 = vsel %vm309_vm0, %v1539_v49, 0.0  ;;  %v1470_v60 = vsel %vm309_vm0, %v1345_v46, 0.0  ;;  %v1542_v19 = vmul.f32 %v1345_v46, %v1345_v46 }
 0x16f   : > { %v1652_v6 = vadd.f32 %v1651_v43, %v1650_v29  ;;  %v1663_v38 = vsel %vm309_vm0, %v1540_v45, 0.0  ;;  %v1472_v33 = vsel %vm309_vm0, %v1346_v50, 0.0  ;;  %v1543_v10 = vmul.f32 %v1346_v50, %v1346_v50 }
 0x170   : > { %v1459_v9 = vadd.f32 %v1458_v36, %v1457_v56  ;;  %v2379_v7 = vpop.eup %2378  ;;  %v1665_v61 = vsel %vm309_vm0, %v1541_v0, 0.0  ;;  %v1667_v18 = vsel %vm309_vm0, %v1542_v19, 0.0 }
 0x171   : > { %v1654_v39 = vadd.f32 %v1653_v4, %v1652_v6  ;;  %v2381_v42 = vpop.eup %2380  ;;  %1800 = vst.msk [vmem:[%s2819_s24 + $0x1b8] sm:$0xff] %vm309_vm0, %v2379_v7  ;;  %v1669_v40 = vsel %vm309_vm0, %v1543_v10, 0.0 }
 0x172   : > { %v1461_v24 = vadd.f32 %v1460_v48, %v1459_v9  ;;  %v2383_v22 = vpop.eup %2382  ;;  %1801 = vst.msk [vmem:[%s2819_s24 + $0x1c0] sm:$0xff] %vm309_vm0, %v2381_v42 }
 0x173   : > { %v1656_v35 = vadd.f32 %v1655_v51, %v1654_v39  ;;  %v2385_v59 = vpop.eup %2384  ;;  %1802 = vst.msk [vmem:[%s2819_s24 + $0x1c8] sm:$0xff] %vm309_vm0, %v2383_v22 }
 0x174   : > { %v1463_v15 = vadd.f32 %v1462_v13, %v1461_v24  ;;  %v2387_v17 = vpop.eup %2386  ;;  %1803 = vst.msk [vmem:[%s2819_s24 + $0x1d0] sm:$0xff] %vm309_vm0, %v2385_v59 }
 0x175   : > { %v1658_v34 = vadd.f32 %v1657_v30, %v1656_v35  ;;  %v2389_v44 = vpop.eup %2388  ;;  %1804 = vst.msk [vmem:[%s2819_s24 + $0x1d8] sm:$0xff] %vm309_vm0, %v2387_v17 }
 0x176   : > { %v1465_v14 = vadd.f32 %v1464_v3, %v1463_v15  ;;  %v2391_v1 = vpop.eup %2390  ;;  %1805 = vst.msk [vmem:[%s2819_s24 + $0x1e0] sm:$0xff] %vm309_vm0, %v2389_v44 }
 0x177   : > { %v1660_v16 = vadd.f32 %v1659_v26, %v1658_v34  ;;  %v2393_v47 = vpop.eup %2392  ;;  %1806 = vst.msk [vmem:[%s2819_s24 + $0x1e8] sm:$0xff] %vm309_vm0, %v2391_v1 }
 0x178   : > { %v1467_v54 = vadd.f32 %v1466_v32, %v1465_v14  ;;  %v2395_v2 = vpop.eup %2394  ;;  %1807 = vst.msk [vmem:[%s2819_s24 + $0x1f0] sm:$0xff] %vm309_vm0, %v2393_v47 }
 0x179   : > { %v1662_v63 = vadd.f32 %v1661_v58, %v1660_v16  ;;  %1808 = vst.msk [vmem:[%s2819_s24 + $0x1f8] sm:$0xff] %vm309_vm0, %v2395_v2 }
 0x17a   : > { %v1469_v62 = vadd.f32 %v1468_v57, %v1467_v54 }
 0x17b   : > { %v1664_v53 = vadd.f32 %v1663_v38, %v1662_v63 }
 0x17c   : > { %v1471_v11 = vadd.f32 %v1470_v60, %v1469_v62 }
 0x17d   : > { %v1666_v12 = vadd.f32 %v1665_v61, %v1664_v53 }
 0x17e   : > { %v1473_v8 = vadd.f32 %v1472_v33, %v1471_v11 }
 0x17f   : > { %v1668_v20 = vadd.f32 %v1667_v18, %v1666_v12 }
 0x180   : > { %v1474_v25 = vrot.slane %v1473_v8, 4 }
 0x181   : > { %v1670_v52 = vadd.f32 %v1669_v40, %v1668_v20 }
 0x182   : > { %v1475_v23 = vadd.f32 %v1474_v25, %v1473_v8 }
 0x183   : > { %v1671_v46 = vrot.slane %v1670_v52, 4 }
 0x184   : > { %v1476_v5 = vrot.slane %v1475_v23, 2 }
 0x185   : > { %v1672_v27 = vadd.f32 %v1671_v46, %v1670_v52 }
 0x186   : > { %v1477_v31 = vadd.f32 %v1476_v5, %v1475_v23 }
 0x187   : > { %v1673_v56 = vrot.slane %v1672_v27, 2 }
 0x188   : > { %v1478_v28 = vrot.slane %v1477_v31, 1 }
 0x189   : > { %v1674_v55 = vadd.f32 %v1673_v56, %v1672_v27 }
 0x18a   : > { %v1479_v36 = vadd.f32 %v1478_v28, %v1477_v31 }
 0x18b   : > { %v1675_v50 = vrot.slane %v1674_v55, 1 }
 0x18d   : > { %v1676_v29 = vadd.f32 %v1675_v50, %v1674_v55 }
 0x18f   : > { %v1678_v9 = vsel %vm1677_vm2, %v1479_v36, %v1676_v29 }
 0x190   : > { %1680 = vst.msk [vmem:[%s270_s7] sm:$0x3] %vm1679_vm3, %v1678_v9 }
 0x191   : > { %2410 = shalt.err (!%p2407_p5)
}
 0x192   : > { %s2411_s22 = scalar_lea.hbm %s3389_s11, 32  ;;  %s2415_s29 = scalar_lea.hbm %s3433_s4, 128 }
 0x193   : > { %p2412_p6 = scmp.ne.s32.totalorder %s3389_s11, %s2411_s22  ;;  %p2416_p10 = scmp.lt.s32.totalorder %s3389_s11, %s3433_s4 }
 0x194   : > { %p2417_p11 = scmp.lt.s32.totalorder %s2415_s29, %s2411_s22 }
 0x195   : > { %p2413_p7 = pnand %p2412_p6, %p2542_p4 }
 0x196   : > { %p2418_p12 = por %p2417_p11, %p2416_p10 }
 0x197   : > { %p2414_p9 = pneg %p2413_p7 }
 0x199   : > { %p2419_p13 = pnand %p2418_p12, %p2414_p9 }
 0x19b   : > { %2422 = shalt.err (!%p2419_p13)
}
 0x19c   : > { %2176 = dma.vmem_to_hbm [thread:$0]  (%p2542_p4), %s1838_s8, 32, %s3389_s11, %s1819_s12  }
 0x19d PF: > { %p2182_p0 = scmp.ge.s32.totalorder %s2473_s20, 2  ;;  %s1861_s6 = sand.u32 1, %s2453_s15  }
 0x19e   : > { %s1862_s7 = scalar_lea.sflag [#allocation4], %s1861_s6 }
 0x19f   : > { %p2179_p1 = pnand %p2182_p0, %p2549_p8 }
 0x1a1   : > { %p2180_p2 = pneg %p2179_p1 }
 0x1a3   : > { %2448 = dma.done.wait (%p2180_p2), %s1862_s7, 32  }
 0x1a4   : > { %2450 = vsyncadd (%p2180_p2), %s1862_s7, 4294967264  ;;  %s18_s20 = sadd.s32 1, %s2473_s20   ;;  %s3436_s15 = smov %s2457_s16 }
 0x1a5   : > { %p15_p3 = scmp.ge.s32.totalorder %s18_s20, 6   ;;  %s3437_s16 = smov %s2461_s17 }
 0x1a6   : > { %s3438_s17 = smov %s2555_s28  ;;  %s3439_s18 = smov %s2469_s19 }
 0x1a7   : > { %s3440_s19 = smov %s3442_s23  ;;  %17 = sbr.rel (!%p15_p3) target bundleno = 4 (0x4), region = 90 }
 0x1ac   :  { %1867 = vsyncpa [#allocation4], 1 }
 0x1ad   :  { %1869 = vsyncpa [#allocation4 + $0x1], 1 }

</bundles_post_ra>
